<compile_context>
chip_gen: v5e
topology: v5e:2x2
jax: 0.10.0
libtpu: 0.0.40
codegen_flags: <defaults>
</compile_context>

<pallas_src>
import functools

import jax
import jax.numpy as jnp
import numpy as np
from jax import lax
from jax.experimental import pallas as pl
from jax.experimental.pallas import tpu as pltpu


def _make_divisible(v, divisor, min_value=None):
    if min_value is None:
        min_value = divisor
    new_v = max(min_value, int(v + divisor / 2) // divisor * divisor)
    if new_v < 0.9 * v:
        new_v += divisor
    return new_v


# ----------------------------------------------------------------------------
# Pallas kernel: one MBConv block for Bb batch elements, (C, H*W) layout.
# ----------------------------------------------------------------------------
def _mbconv_kernel(x_ref, w1_ref, b1_ref, wdw_ref, b2_ref,
                   sew1_ref, seb1_ref, sew2_ref, seb2_ref,
                   w3_ref, b3_ref, o_ref,
                   *, H, W, Ho, Wo, Cin, Cexp, Cout, Bb, stride,
                   use_se, identity, bf16_silu):
    del H, Cin, Cout  # implied by the ref shapes
    HW = x_ref.shape[-1]

    # ---- hoisted spatial masks: one (1, HW) iota, four booleans, reused ----
    s = lax.broadcasted_iota(jnp.int32, (1, HW), 1)
    if (W & (W - 1)) == 0:
        xi = jnp.bitwise_and(s, W - 1)          # column index x = s % W
    else:
        xi = jnp.remainder(s, W)
    m_xm1 = xi >= 1                              # a[y, x-1] valid
    m_xp1 = xi <= W - 2                          # a[y, x+1] valid
    m_ym1 = s >= W                               # row y-1 exists
    m_yp1 = s < HW - W                           # row y+1 exists

    def silu(v):
        if bf16_silu:
            # v6e/v7x: sigmoid on the bf16 EUP path, multiply/accumulate in f32.
            return v * jax.nn.sigmoid(v.astype(jnp.bfloat16)).astype(jnp.float32)
        return v * jax.nn.sigmoid(v)

    # ---- hoisted weight loads / tap slices (loop-invariant across Bb) ----
    w1 = w1_ref[...]                             # (Cexp, Cin) bf16, BN folded
    b1 = b1_ref[...]                             # (Cexp, 1)
    wdw = wdw_ref[...]                           # (Cexp, 9)  f32, BN folded
    taps = tuple(wdw[:, k:k + 1] for k in range(9))
    b2 = b2_ref[...]                             # (Cexp, 1)
    w3 = w3_ref[...]                             # (Cout, Cexp) bf16, BN folded
    b3 = b3_ref[...]                             # (Cout, 1)

    for bi in range(Bb):
        x2d = x_ref[bi]                          # (Cin, HW) f32

        # ---- 1x1 expand conv + bias + SiLU (MXU, lane-dense N=HW) ----
        a = jnp.dot(w1, x2d.astype(jnp.bfloat16),
                    preferred_element_type=jnp.float32) + b1
        a = silu(a)                              # (Cexp, HW) f32

        # ---- depthwise 3x3, padding=1: lane rolls (XLU) + hoisted masks ----
        a_m1 = jnp.where(m_xm1, pltpu.roll(a, 1, axis=1), 0.0)        # a[y,x-1]
        a_p1 = jnp.where(m_xp1, pltpu.roll(a, HW - 1, axis=1), 0.0)   # a[y,x+1]
        cols = (a_m1, a, a_p1)                                        # kw=0,1,2

        # kh = 1 (center row) needs no vertical shift.
        dwacc = cols[0] * taps[3] + cols[1] * taps[4] + cols[2] * taps[5]
        # kh = 0: contribution is inner[y-1]  -> roll down by W.
        inner = cols[0] * taps[0] + cols[1] * taps[1] + cols[2] * taps[2]
        dwacc = dwacc + jnp.where(m_ym1, pltpu.roll(inner, W, axis=1), 0.0)
        # kh = 2: contribution is inner[y+1]  -> roll up by W.
        inner = cols[0] * taps[6] + cols[1] * taps[7] + cols[2] * taps[8]
        dwacc = dwacc + jnp.where(m_yp1, pltpu.roll(inner, HW - W, axis=1), 0.0)

        if stride != 1:
            # TODO(synk): untested stride-2 path; even/odd lane selection would
            # avoid the relayout cost of this strided slice and the wasted
            # full-resolution compute for discarded rows/cols.
            d3 = dwacc.reshape(Cexp, Ho * stride if stride * (Ho - 1) + 1 > Ho else Ho, -1) \
                if False else dwacc.reshape(Cexp, HW // W, W)
            d3 = lax.slice(d3, (0, 0, 0),
                           (Cexp, stride * (Ho - 1) + 1, stride * (Wo - 1) + 1),
                           (1, stride, stride))
            dwacc = d3.reshape(Cexp, Ho * Wo)

        dw = silu(dwacc + b2)                    # (Cexp, Ho*Wo) f32

        # ---- squeeze-and-excitation ----
        if use_se:
            pooled = jnp.mean(dw, axis=1, keepdims=True)              # (Cexp, 1)
            h = jnp.dot(sew1_ref[...], pooled.astype(jnp.bfloat16),
                        preferred_element_type=jnp.float32) + seb1_ref[...]
            h = silu(h)
            g = jax.nn.sigmoid(
                jnp.dot(sew2_ref[...], h.astype(jnp.bfloat16),
                        preferred_element_type=jnp.float32) + seb2_ref[...])
            dw = dw * g                                               # lane bcast

        # ---- 1x1 project conv + bias (+ residual) ----
        out = jnp.dot(w3, dw.astype(jnp.bfloat16),
                      preferred_element_type=jnp.float32) + b3
        if identity:
            out = out + x2d

        # Lane-dense store: (Cout, Ho*Wo) is already NCHW order, no reshape.
        o_ref[bi] = out.astype(o_ref.dtype)


# ----------------------------------------------------------------------------
# Parameter folding: BN scale -> conv weights (per output channel / row).
# ----------------------------------------------------------------------------
def fold_params(p):
    return dict(
        w1=(p['w1'] * p['s1']).astype(jnp.bfloat16),     # (Cexp, Cin)
        b1=p['b1'].astype(jnp.float32),                  # (Cexp, 1)
        wdw=(p['wdw'] * p['s2']).astype(jnp.float32),    # (Cexp, 9) [kh*3+kw]
        b2=p['b2'].astype(jnp.float32),                  # (Cexp, 1)
        w3=(p['w3'] * p['s3']).astype(jnp.bfloat16),     # (Cout, Cexp)
        b3=p['b3'].astype(jnp.float32),                  # (Cout, 1)
        sew1=p['sew1'].astype(jnp.bfloat16),             # (Chid, Cexp)
        seb1=p['seb1'].astype(jnp.float32),              # (Chid, 1)
        sew2=p['sew2'].astype(jnp.bfloat16),             # (Cexp, Chid)
        seb2=p['seb2'].astype(jnp.float32),              # (Cexp, 1)
    )


# ----------------------------------------------------------------------------
# Wrapper
# ----------------------------------------------------------------------------
def mbconv_pallas(x_nchw, fp, *, stride, use_se, identity,
                  bf16_silu=False, out_dtype=jnp.float32, block_b=None):
    x_nchw = x_nchw.astype(jnp.float32)
    B, Cin, H, W = x_nchw.shape
    Cexp = fp['w1'].shape[0]
    Cout = fp['w3'].shape[0]
    Ho = (H - 1) // stride + 1
    Wo = (W - 1) // stride + 1
    HW, HWo = H * W, Ho * Wo

    # NCHW -> (B, C, H*W) and back are free reshapes (no transpose): channels on
    # sublanes, flat spatial axis on lanes (lane-dense, HW is a multiple of 128).
    x3 = x_nchw.reshape(B, Cin, HW)

    # Pick Bb so the parallel grid keeps >= 2 steps (both v7x TensorCores busy)
    # while amortizing per-grid-step overhead when B is large.
    if block_b is None:
        block_b = 1
        for cand in range(min(8, B), 0, -1):
            if B % cand == 0 and (B // cand) >= min(2, B):
                block_b = cand
                break
    # TODO(synk): for B == 1 or very large feature maps, add an H row-strip grid
    # axis (1-row halo, two-pass SE) so v7x's 64 MiB VMEM is never exceeded.

    kernel = functools.partial(
        _mbconv_kernel, H=H, W=W, Ho=Ho, Wo=Wo, Cin=Cin, Cexp=Cexp, Cout=Cout,
        Bb=block_b, stride=stride, use_se=use_se, identity=identity,
        bf16_silu=bf16_silu)

    weights = (fp['w1'], fp['b1'], fp['wdw'], fp['b2'],
               fp['sew1'], fp['seb1'], fp['sew2'], fp['seb2'],
               fp['w3'], fp['b3'])

    # VMEM budget: double-buffered activation blocks + weights + live temporaries
    # (a, two rolled copies, inner, dwacc, dw, out, masks), with 4x headroom,
    # capped well below v7x's 64 MiB physical VMEM.
    w_bytes = sum(int(np.prod(w.shape)) * w.dtype.itemsize for w in weights)
    act_bytes = 4 * block_b * (Cin * HW + Cout * HWo)
    live_bytes = 4 * block_b * (8 * Cexp * HW + 6 * HW)
    vmem_limit = int(min(48 << 20,
                         max(16 << 20, 4 * (2 * act_bytes + 2 * w_bytes + live_bytes))))

    def weight_spec(arr, mode):
        n = arr.ndim
        if mode is None:
            return pl.BlockSpec(arr.shape, lambda b, n=n: (0,) * n)
        return pl.BlockSpec(arr.shape, lambda b, n=n: (0,) * n, pipeline_mode=mode)

    def run(weight_mode):
        in_specs = ([pl.BlockSpec((block_b, Cin, HW), lambda b: (b, 0, 0))]
                    + [weight_spec(w, weight_mode) for w in weights])
        return pl.pallas_call(
            kernel,
            out_shape=jax.ShapeDtypeStruct((B, Cout, HWo), out_dtype),
            grid_spec=pltpu.PrefetchScalarGridSpec(
                num_scalar_prefetch=0,
                grid=(B // block_b,),
                in_specs=in_specs,
                out_specs=pl.BlockSpec((block_b, Cout, HWo),
                                       lambda b: (b, 0, 0))),
            compiler_params=pltpu.CompilerParams(
                dimension_semantics=("parallel",),
                vmem_limit_bytes=vmem_limit),
        )(x3, *weights)

    try:
        # Grid-invariant weights only need a single VMEM buffer (review item).
        out3 = jax.block_until_ready(run(pl.Buffered(1)))
    except Exception:
        # TODO(synk): pl.Buffered(1) pipeline_mode rejected by this JAX/Mosaic
        # build; fall back to default double-buffered weight specs (negligible
        # VMEM cost at these weight sizes).
        out3 = run(None)

    return out3.reshape(B, Cout, Ho, Wo)        # free reshape back to NCHW


# ----------------------------------------------------------------------------
# Deterministic parameter construction (shapes follow the PyTorch __init__;
# weight layouts match PyTorch storage: Conv2d (out,in), Linear (out,in)).
# ----------------------------------------------------------------------------
def init_params(key, inp, oup, expansion):
    Cexp = round(inp * expansion)
    Chid = _make_divisible(inp // 4, 8)
    keys = jax.random.split(key, 20)

    def bn_fold(k0, k1, k2, k3, c, eps=1e-5):
        gamma = jax.random.uniform(k0, (c, 1), jnp.float32, 0.5, 1.5)
        beta = 0.1 * jax.random.normal(k1, (c, 1), jnp.float32)
        mean = 0.1 * jax.random.normal(k2, (c, 1), jnp.float32)
        var = jax.random.uniform(k3, (c, 1), jnp.float32, 0.5, 1.5)
        scale = gamma / jnp.sqrt(var + eps)
        bias = beta - mean * scale
        return scale, bias

    s1, b1 = bn_fold(keys[3], keys[4], keys[5], keys[6], Cexp)
    s2, b2 = bn_fold(keys[7], keys[8], keys[9], keys[10], Cexp)
    s3, b3 = bn_fold(keys[11], keys[12], keys[13], keys[14], oup)

    return dict(
        w1=jax.random.normal(keys[0], (Cexp, inp), jnp.float32) / np.sqrt(inp),
        wdw=jax.random.normal(keys[1], (Cexp, 9), jnp.float32) / 3.0,
        w3=jax.random.normal(keys[2], (oup, Cexp), jnp.float32) / np.sqrt(Cexp),
        s1=s1, b1=b1, s2=s2, b2=b2, s3=s3, b3=b3,
        sew1=jax.random.normal(keys[15], (Chid, Cexp), jnp.float32) / np.sqrt(Cexp),
        seb1=0.1 * jax.random.normal(keys[16], (Chid, 1), jnp.float32),
        sew2=jax.random.normal(keys[17], (Cexp, Chid), jnp.float32) / np.sqrt(Chid),
        seb2=0.1 * jax.random.normal(keys[18], (Cexp, 1), jnp.float32),
    )


# ----------------------------------------------------------------------------
# Pure-JAX reference (correctness guard), NCHW, same folded params and the
# same bf16-operand / f32-accumulation matmuls as the kernel.
# ----------------------------------------------------------------------------
def mbconv_ref(x_nchw, fp, *, stride, use_se, identity, bf16_silu=False):
    x = x_nchw.astype(jnp.float32)
    Cexp = fp['w1'].shape[0]

    def silu(v):
        if bf16_silu:
            return v * jax.nn.sigmoid(v.astype(jnp.bfloat16)).astype(jnp.float32)
        return v * jax.nn.sigmoid(v)

    a = jnp.einsum('oc,bchw->bohw', fp['w1'], x.astype(jnp.bfloat16),
                   preferred_element_type=jnp.float32) + fp['b1'][None, :, :, None]
    a = silu(a)
    kdw = fp['wdw'].reshape(Cexp, 1, 3, 3)
    dw = lax.conv_general_dilated(a, kdw, (stride, stride), ((1, 1), (1, 1)),
                                  dimension_numbers=('NCHW', 'OIHW', 'NCHW'),
                                  feature_group_count=Cexp,
                                  precision=lax.Precision.HIGHEST)
    dw = silu(dw + fp['b2'][None, :, :, None])
    if use_se:
        pooled = jnp.mean(dw, axis=(2, 3))                           # (B, Cexp)
        h = jnp.einsum('hc,bc->bh', fp['sew1'], pooled.astype(jnp.bfloat16),
                       preferred_element_type=jnp.float32) + fp['seb1'][:, 0][None, :]
        h = silu(h)
        g = jax.nn.sigmoid(
            jnp.einsum('ch,bh->bc', fp['sew2'], h.astype(jnp.bfloat16),
                       preferred_element_type=jnp.float32) + fp['seb2'][:, 0][None, :])
        dw = dw * g[:, :, None, None]
    out = jnp.einsum('oc,bchw->bohw', fp['w3'], dw.astype(jnp.bfloat16),
                     preferred_element_type=jnp.float32) + fp['b3'][None, :, :, None]
    if identity:
        out = out + x
    return out


if __name__ == "__main__":
    # MBConv(inp=16, oup=16, stride=1, expansion=4, use_se=True)
    inp, oup, stride, expansion, use_se = 16, 16, 1, 4, True
    identity = (stride == 1) and (inp == oup)

    key = jax.random.PRNGKey(0)
    kx, kp = jax.random.split(key)
    x = jax.random.normal(kx, (2, inp, 16, 16), jnp.float32)     # NCHW as PyTorch
    params = fold_params(init_params(kp, inp, oup, expansion))

    # Strict check with f32 SiLU (module semantics, valid on every TPU gen).
    out = jax.block_until_ready(
        mbconv_pallas(x, params, stride=stride, use_se=use_se,
                      identity=identity, bf16_silu=False))
    ref = jax.block_until_ready(
        mbconv_ref(x, params, stride=stride, use_se=use_se,
                   identity=identity, bf16_silu=False))
    np.testing.assert_allclose(np.asarray(out), np.asarray(ref),
                               rtol=5e-3, atol=5e-3)

    # v6e/v7x review item: SiLU sigmoid on the bf16 EUP path.  Only exercised on
    # chips with bf16 transcendentals; checked against a reference that mirrors
    # the same quantization (looser tolerance reflects the bf16 rounding).
    kind = jax.devices()[0].device_kind.lower()
    if ("v6" in kind) or ("v7" in kind) or ("7x" in kind):
        out_bf = jax.block_until_ready(
            mbconv_pallas(x, params, stride=stride, use_se=use_se,
                          identity=identity, bf16_silu=True))
        ref_bf = jax.block_until_ready(
            mbconv_ref(x, params, stride=stride, use_se=use_se,
                       identity=identity, bf16_silu=True))
        np.testing.assert_allclose(np.asarray(out_bf), np.asarray(ref_bf),
                                   rtol=5e-2, atol=5e-2)

    print("KERNEL_OK")
</pallas_src>

<mosaic_0001>
module attributes {stable_mosaic.version = 11 : i64} {
  func.func @_mbconv_kernel(%arg0: i32, %arg1: memref<1x16x256xf32, #tpu.memory_space<vmem>>, %arg2: memref<64x16xbf16, #tpu.memory_space<vmem>>, %arg3: memref<64x1xf32, #tpu.memory_space<vmem>>, %arg4: memref<64x9xf32, #tpu.memory_space<vmem>>, %arg5: memref<64x1xf32, #tpu.memory_space<vmem>>, %arg6: memref<8x64xbf16, #tpu.memory_space<vmem>>, %arg7: memref<8x1xf32, #tpu.memory_space<vmem>>, %arg8: memref<64x8xbf16, #tpu.memory_space<vmem>>, %arg9: memref<64x1xf32, #tpu.memory_space<vmem>>, %arg10: memref<16x64xbf16, #tpu.memory_space<vmem>>, %arg11: memref<16x1xf32, #tpu.memory_space<vmem>>, %arg12: memref<1x16x256xf32, #tpu.memory_space<vmem>>) attributes {dimension_semantics = [#tpu.dimension_semantics<parallel>], iteration_bounds = array<i64: 2>, scalar_prefetch = 0 : i64, scratch_operands = 0 : i64, tpu.core_type = #tpu.core_type<tc>, window_params = [{transform_indices = @transform_0, window_bounds = array<i64: 1, 16, 256>}, {pipeline_mode = #tpu.pipeline_mode<synchronous>, transform_indices = @transform_1, window_bounds = array<i64: 64, 16>}, {pipeline_mode = #tpu.pipeline_mode<synchronous>, transform_indices = @transform_2, window_bounds = array<i64: 64, 1>}, {pipeline_mode = #tpu.pipeline_mode<synchronous>, transform_indices = @transform_3, window_bounds = array<i64: 64, 9>}, {pipeline_mode = #tpu.pipeline_mode<synchronous>, transform_indices = @transform_4, window_bounds = array<i64: 64, 1>}, {pipeline_mode = #tpu.pipeline_mode<synchronous>, transform_indices = @transform_5, window_bounds = array<i64: 8, 64>}, {pipeline_mode = #tpu.pipeline_mode<synchronous>, transform_indices = @transform_6, window_bounds = array<i64: 8, 1>}, {pipeline_mode = #tpu.pipeline_mode<synchronous>, transform_indices = @transform_7, window_bounds = array<i64: 64, 8>}, {pipeline_mode = #tpu.pipeline_mode<synchronous>, transform_indices = @transform_8, window_bounds = array<i64: 64, 1>}, {pipeline_mode = #tpu.pipeline_mode<synchronous>, transform_indices = @transform_9, window_bounds = array<i64: 16, 64>}, {pipeline_mode = #tpu.pipeline_mode<synchronous>, transform_indices = @transform_10, window_bounds = array<i64: 16, 1>}, {transform_indices = @transform_11, window_bounds = array<i64: 1, 16, 256>}]} {
    %0 = tpu.iota {dimensions = array<i32: 1>} : vector<1x256xi32>
    %c15_i32 = arith.constant 15 : i32
    %1 = vector.broadcast %c15_i32 : i32 to vector<1x256xi32>
    %2 = arith.andi %0, %1 : vector<1x256xi32>
    %c1_i32 = arith.constant 1 : i32
    %3 = vector.broadcast %c1_i32 : i32 to vector<1x256xi32>
    %4 = arith.cmpi sge, %2, %3 : vector<1x256xi32>
    %c14_i32 = arith.constant 14 : i32
    %5 = vector.broadcast %c14_i32 : i32 to vector<1x256xi32>
    %6 = arith.cmpi sle, %2, %5 : vector<1x256xi32>
    %c16_i32 = arith.constant 16 : i32
    %7 = vector.broadcast %c16_i32 : i32 to vector<1x256xi32>
    %8 = arith.cmpi sge, %0, %7 : vector<1x256xi32>
    %c240_i32 = arith.constant 240 : i32
    %9 = vector.broadcast %c240_i32 : i32 to vector<1x256xi32>
    %10 = arith.cmpi slt, %0, %9 : vector<1x256xi32>
    %c0 = arith.constant 0 : index
    %c0_0 = arith.constant 0 : index
    %11 = vector.load %arg2[%c0, %c0_0] : memref<64x16xbf16, #tpu.memory_space<vmem>>, vector<64x16xbf16>
    %c0_1 = arith.constant 0 : index
    %c0_2 = arith.constant 0 : index
    %12 = vector.load %arg3[%c0_1, %c0_2] : memref<64x1xf32, #tpu.memory_space<vmem>>, vector<64x1xf32>
    %c0_3 = arith.constant 0 : index
    %c0_4 = arith.constant 0 : index
    %13 = vector.load %arg4[%c0_3, %c0_4] : memref<64x9xf32, #tpu.memory_space<vmem>>, vector<64x9xf32>
    %14 = vector.extract_strided_slice %13 {offsets = [0, 0], sizes = [64, 1], strides = [1, 1]} : vector<64x9xf32> to vector<64x1xf32>
    %15 = vector.extract_strided_slice %13 {offsets = [0, 1], sizes = [64, 1], strides = [1, 1]} : vector<64x9xf32> to vector<64x1xf32>
    %16 = vector.extract_strided_slice %13 {offsets = [0, 2], sizes = [64, 1], strides = [1, 1]} : vector<64x9xf32> to vector<64x1xf32>
    %17 = vector.extract_strided_slice %13 {offsets = [0, 3], sizes = [64, 1], strides = [1, 1]} : vector<64x9xf32> to vector<64x1xf32>
    %18 = vector.extract_strided_slice %13 {offsets = [0, 4], sizes = [64, 1], strides = [1, 1]} : vector<64x9xf32> to vector<64x1xf32>
    %19 = vector.extract_strided_slice %13 {offsets = [0, 5], sizes = [64, 1], strides = [1, 1]} : vector<64x9xf32> to vector<64x1xf32>
    %20 = vector.extract_strided_slice %13 {offsets = [0, 6], sizes = [64, 1], strides = [1, 1]} : vector<64x9xf32> to vector<64x1xf32>
    %21 = vector.extract_strided_slice %13 {offsets = [0, 7], sizes = [64, 1], strides = [1, 1]} : vector<64x9xf32> to vector<64x1xf32>
    %22 = vector.extract_strided_slice %13 {offsets = [0, 8], sizes = [64, 1], strides = [1, 1]} : vector<64x9xf32> to vector<64x1xf32>
    %c0_5 = arith.constant 0 : index
    %c0_6 = arith.constant 0 : index
    %23 = vector.load %arg5[%c0_5, %c0_6] : memref<64x1xf32, #tpu.memory_space<vmem>>, vector<64x1xf32>
    %c0_7 = arith.constant 0 : index
    %c0_8 = arith.constant 0 : index
    %24 = vector.load %arg10[%c0_7, %c0_8] : memref<16x64xbf16, #tpu.memory_space<vmem>>, vector<16x64xbf16>
    %c0_9 = arith.constant 0 : index
    %c0_10 = arith.constant 0 : index
    %25 = vector.load %arg11[%c0_9, %c0_10] : memref<16x1xf32, #tpu.memory_space<vmem>>, vector<16x1xf32>
    %c0_11 = arith.constant 0 : index
    %c0_12 = arith.constant 0 : index
    %c0_13 = arith.constant 0 : index
    %26 = vector.load %arg1[%c0_11, %c0_12, %c0_13] : memref<1x16x256xf32, #tpu.memory_space<vmem>>, vector<1x16x256xf32>
    %27 = vector.shape_cast %26 : vector<1x16x256xf32> to vector<16x256xf32>
    %28 = arith.truncf %27 : vector<16x256xf32> to vector<16x256xbf16>
    %cst = arith.constant dense<0.000000e+00> : vector<64x256xf32>
    %29 = tpu.matmul %11, %28, %cst {dimension_numbers = #tpu.dot_dimension_numbers<[1], [0], [0], [1], [0, 0, 1, 1], [], []>} : vector<64x16xbf16>, vector<16x256xbf16>, vector<64x256xf32> -> vector<64x256xf32>
    %30 = vector.broadcast %12 : vector<64x1xf32> to vector<64x256xf32>
    %31 = arith.addf %29, %30 : vector<64x256xf32>
    %32 = arith.negf %31 : vector<64x256xf32>
    %33 = math.exp %32 : vector<64x256xf32>
    %cst_14 = arith.constant 1.000000e+00 : f32
    %34 = vector.broadcast %cst_14 : f32 to vector<64x256xf32>
    %35 = arith.addf %34, %33 : vector<64x256xf32>
    %36 = arith.divf %34, %35 : vector<64x256xf32>
    %37 = arith.mulf %31, %36 : vector<64x256xf32>
    %c1_i32_15 = arith.constant 1 : i32
    %38 = tpu.dynamic_rotate %37 by %c1_i32_15 dim 1 : vector<64x256xf32>, i32 -> vector<64x256xf32>
    %cst_16 = arith.constant 0.000000e+00 : f32
    %39 = vector.shape_cast %4 : vector<1x256xi1> to vector<1x256xi1>
    %40 = vector.broadcast %39 : vector<1x256xi1> to vector<64x256xi1>
    %41 = vector.broadcast %cst_16 : f32 to vector<64x256xf32>
    %42 = arith.select %40, %38, %41 : vector<64x256xi1>, vector<64x256xf32>
    %c255_i32 = arith.constant 255 : i32
    %43 = tpu.dynamic_rotate %37 by %c255_i32 dim 1 : vector<64x256xf32>, i32 -> vector<64x256xf32>
    %cst_17 = arith.constant 0.000000e+00 : f32
    %44 = vector.shape_cast %6 : vector<1x256xi1> to vector<1x256xi1>
    %45 = vector.broadcast %44 : vector<1x256xi1> to vector<64x256xi1>
    %46 = vector.broadcast %cst_17 : f32 to vector<64x256xf32>
    %47 = arith.select %45, %43, %46 : vector<64x256xi1>, vector<64x256xf32>
    %48 = vector.broadcast %17 : vector<64x1xf32> to vector<64x256xf32>
    %49 = arith.mulf %42, %48 : vector<64x256xf32>
    %50 = vector.broadcast %18 : vector<64x1xf32> to vector<64x256xf32>
    %51 = arith.mulf %37, %50 : vector<64x256xf32>
    %52 = arith.addf %49, %51 : vector<64x256xf32>
    %53 = vector.broadcast %19 : vector<64x1xf32> to vector<64x256xf32>
    %54 = arith.mulf %47, %53 : vector<64x256xf32>
    %55 = arith.addf %52, %54 : vector<64x256xf32>
    %56 = vector.broadcast %14 : vector<64x1xf32> to vector<64x256xf32>
    %57 = arith.mulf %42, %56 : vector<64x256xf32>
    %58 = vector.broadcast %15 : vector<64x1xf32> to vector<64x256xf32>
    %59 = arith.mulf %37, %58 : vector<64x256xf32>
    %60 = arith.addf %57, %59 : vector<64x256xf32>
    %61 = vector.broadcast %16 : vector<64x1xf32> to vector<64x256xf32>
    %62 = arith.mulf %47, %61 : vector<64x256xf32>
    %63 = arith.addf %60, %62 : vector<64x256xf32>
    %c16_i32_18 = arith.constant 16 : i32
    %64 = tpu.dynamic_rotate %63 by %c16_i32_18 dim 1 : vector<64x256xf32>, i32 -> vector<64x256xf32>
    %cst_19 = arith.constant 0.000000e+00 : f32
    %65 = vector.shape_cast %8 : vector<1x256xi1> to vector<1x256xi1>
    %66 = vector.broadcast %65 : vector<1x256xi1> to vector<64x256xi1>
    %67 = vector.broadcast %cst_19 : f32 to vector<64x256xf32>
    %68 = arith.select %66, %64, %67 : vector<64x256xi1>, vector<64x256xf32>
    %69 = arith.addf %55, %68 : vector<64x256xf32>
    %70 = vector.broadcast %20 : vector<64x1xf32> to vector<64x256xf32>
    %71 = arith.mulf %42, %70 : vector<64x256xf32>
    %72 = vector.broadcast %21 : vector<64x1xf32> to vector<64x256xf32>
    %73 = arith.mulf %37, %72 : vector<64x256xf32>
    %74 = arith.addf %71, %73 : vector<64x256xf32>
    %75 = vector.broadcast %22 : vector<64x1xf32> to vector<64x256xf32>
    %76 = arith.mulf %47, %75 : vector<64x256xf32>
    %77 = arith.addf %74, %76 : vector<64x256xf32>
    %c240_i32_20 = arith.constant 240 : i32
    %78 = tpu.dynamic_rotate %77 by %c240_i32_20 dim 1 : vector<64x256xf32>, i32 -> vector<64x256xf32>
    %cst_21 = arith.constant 0.000000e+00 : f32
    %79 = vector.shape_cast %10 : vector<1x256xi1> to vector<1x256xi1>
    %80 = vector.broadcast %79 : vector<1x256xi1> to vector<64x256xi1>
    %81 = vector.broadcast %cst_21 : f32 to vector<64x256xf32>
    %82 = arith.select %80, %78, %81 : vector<64x256xi1>, vector<64x256xf32>
    %83 = arith.addf %69, %82 : vector<64x256xf32>
    %84 = vector.broadcast %23 : vector<64x1xf32> to vector<64x256xf32>
    %85 = arith.addf %83, %84 : vector<64x256xf32>
    %86 = arith.negf %85 : vector<64x256xf32>
    %87 = math.exp %86 : vector<64x256xf32>
    %cst_22 = arith.constant 1.000000e+00 : f32
    %88 = vector.broadcast %cst_22 : f32 to vector<64x256xf32>
    %89 = arith.addf %88, %87 : vector<64x256xf32>
    %90 = arith.divf %88, %89 : vector<64x256xf32>
    %91 = arith.mulf %85, %90 : vector<64x256xf32>
    %cst_23 = arith.constant dense<0.000000e+00> : vector<64xf32>
    %92 = vector.multi_reduction <add>, %91, %cst_23 [1] : vector<64x256xf32> to vector<64xf32>
    %93 = vector.shape_cast %92 : vector<64xf32> to vector<64x1xf32>
    %cst_24 = arith.constant 2.560000e+02 : f32
    %94 = vector.broadcast %cst_24 : f32 to vector<64x1xf32>
    %95 = arith.divf %93, %94 : vector<64x1xf32>
    %c0_25 = arith.constant 0 : index
    %c0_26 = arith.constant 0 : index
    %96 = vector.load %arg6[%c0_25, %c0_26] : memref<8x64xbf16, #tpu.memory_space<vmem>>, vector<8x64xbf16>
    %97 = arith.truncf %95 : vector<64x1xf32> to vector<64x1xbf16>
    %cst_27 = arith.constant dense<0.000000e+00> : vector<8x1xf32>
    %98 = tpu.matmul %96, %97, %cst_27 {dimension_numbers = #tpu.dot_dimension_numbers<[1], [0], [0], [1], [0, 0, 1, 1], [], []>} : vector<8x64xbf16>, vector<64x1xbf16>, vector<8x1xf32> -> vector<8x1xf32>
    %c0_28 = arith.constant 0 : index
    %c0_29 = arith.constant 0 : index
    %99 = vector.load %arg7[%c0_28, %c0_29] : memref<8x1xf32, #tpu.memory_space<vmem>>, vector<8x1xf32>
    %100 = arith.addf %98, %99 : vector<8x1xf32>
    %101 = arith.negf %100 : vector<8x1xf32>
    %102 = math.exp %101 : vector<8x1xf32>
    %cst_30 = arith.constant 1.000000e+00 : f32
    %103 = vector.broadcast %cst_30 : f32 to vector<8x1xf32>
    %104 = arith.addf %103, %102 : vector<8x1xf32>
    %105 = arith.divf %103, %104 : vector<8x1xf32>
    %106 = arith.mulf %100, %105 : vector<8x1xf32>
    %c0_31 = arith.constant 0 : index
    %c0_32 = arith.constant 0 : index
    %107 = vector.load %arg8[%c0_31, %c0_32] : memref<64x8xbf16, #tpu.memory_space<vmem>>, vector<64x8xbf16>
    %108 = arith.truncf %106 : vector<8x1xf32> to vector<8x1xbf16>
    %cst_33 = arith.constant dense<0.000000e+00> : vector<64x1xf32>
    %109 = tpu.matmul %107, %108, %cst_33 {dimension_numbers = #tpu.dot_dimension_numbers<[1], [0], [0], [1], [0, 0, 1, 1], [], []>} : vector<64x8xbf16>, vector<8x1xbf16>, vector<64x1xf32> -> vector<64x1xf32>
    %c0_34 = arith.constant 0 : index
    %c0_35 = arith.constant 0 : index
    %110 = vector.load %arg9[%c0_34, %c0_35] : memref<64x1xf32, #tpu.memory_space<vmem>>, vector<64x1xf32>
    %111 = arith.addf %109, %110 : vector<64x1xf32>
    %112 = arith.negf %111 : vector<64x1xf32>
    %113 = math.exp %112 : vector<64x1xf32>
    %cst_36 = arith.constant 1.000000e+00 : f32
    %114 = vector.broadcast %cst_36 : f32 to vector<64x1xf32>
    %115 = arith.addf %114, %113 : vector<64x1xf32>
    %116 = arith.divf %114, %115 : vector<64x1xf32>
    %117 = vector.broadcast %116 : vector<64x1xf32> to vector<64x256xf32>
    %118 = arith.mulf %91, %117 : vector<64x256xf32>
    %119 = arith.truncf %118 : vector<64x256xf32> to vector<64x256xbf16>
    %cst_37 = arith.constant dense<0.000000e+00> : vector<16x256xf32>
    %120 = tpu.matmul %24, %119, %cst_37 {dimension_numbers = #tpu.dot_dimension_numbers<[1], [0], [0], [1], [0, 0, 1, 1], [], []>} : vector<16x64xbf16>, vector<64x256xbf16>, vector<16x256xf32> -> vector<16x256xf32>
    %121 = vector.broadcast %25 : vector<16x1xf32> to vector<16x256xf32>
    %122 = arith.addf %120, %121 : vector<16x256xf32>
    %123 = arith.addf %122, %27 : vector<16x256xf32>
    %c0_38 = arith.constant 0 : index
    %c0_39 = arith.constant 0 : index
    %c0_40 = arith.constant 0 : index
    %124 = vector.load %arg12[%c0_38, %c0_39, %c0_40] : memref<1x16x256xf32, #tpu.memory_space<vmem>>, vector<1x16x256xf32>
    %125 = vector.shape_cast %124 : vector<1x16x256xf32> to vector<16x256xf32>
    %126 = vector.shape_cast %123 : vector<16x256xf32> to vector<1x16x256xf32>
    tpu.vector_store %arg12[%c0_38, %c0_39, %c0_40], %126 {strides = array<i32>} : memref<1x16x256xf32, #tpu.memory_space<vmem>>, vector<1x16x256xf32>,
    return
  }
  func.func @transform_0(%arg0: i32) -> (i32, i32, i32) {
    %c0_i32 = arith.constant 0 : i32
    %c0_i32_0 = arith.constant 0 : i32
    %c0_i32_1 = arith.constant 0 : i32
    return %arg0, %c0_i32, %c0_i32_0 : i32, i32, i32
  }
  func.func @transform_1(%arg0: i32) -> (i32, i32) {
    %c0_i32 = arith.constant 0 : i32
    %c0_i32_0 = arith.constant 0 : i32
    %c0_i32_1 = arith.constant 0 : i32
    return %c0_i32, %c0_i32_0 : i32, i32
  }
  func.func @transform_2(%arg0: i32) -> (i32, i32) {
    %c0_i32 = arith.constant 0 : i32
    %c0_i32_0 = arith.constant 0 : i32
    %c0_i32_1 = arith.constant 0 : i32
    return %c0_i32, %c0_i32_0 : i32, i32
  }
  func.func @transform_3(%arg0: i32) -> (i32, i32) {
    %c0_i32 = arith.constant 0 : i32
    %c0_i32_0 = arith.constant 0 : i32
    %c0_i32_1 = arith.constant 0 : i32
    return %c0_i32, %c0_i32_0 : i32, i32
  }
  func.func @transform_4(%arg0: i32) -> (i32, i32) {
    %c0_i32 = arith.constant 0 : i32
    %c0_i32_0 = arith.constant 0 : i32
    %c0_i32_1 = arith.constant 0 : i32
    return %c0_i32, %c0_i32_0 : i32, i32
  }
  func.func @transform_5(%arg0: i32) -> (i32, i32) {
    %c0_i32 = arith.constant 0 : i32
    %c0_i32_0 = arith.constant 0 : i32
    %c0_i32_1 = arith.constant 0 : i32
    return %c0_i32, %c0_i32_0 : i32, i32
  }
  func.func @transform_6(%arg0: i32) -> (i32, i32) {
    %c0_i32 = arith.constant 0 : i32
    %c0_i32_0 = arith.constant 0 : i32
    %c0_i32_1 = arith.constant 0 : i32
    return %c0_i32, %c0_i32_0 : i32, i32
  }
  func.func @transform_7(%arg0: i32) -> (i32, i32) {
    %c0_i32 = arith.constant 0 : i32
    %c0_i32_0 = arith.constant 0 : i32
    %c0_i32_1 = arith.constant 0 : i32
    return %c0_i32, %c0_i32_0 : i32, i32
  }
  func.func @transform_8(%arg0: i32) -> (i32, i32) {
    %c0_i32 = arith.constant 0 : i32
    %c0_i32_0 = arith.constant 0 : i32
    %c0_i32_1 = arith.constant 0 : i32
    return %c0_i32, %c0_i32_0 : i32, i32
  }
  func.func @transform_9(%arg0: i32) -> (i32, i32) {
    %c0_i32 = arith.constant 0 : i32
    %c0_i32_0 = arith.constant 0 : i32
    %c0_i32_1 = arith.constant 0 : i32
    return %c0_i32, %c0_i32_0 : i32, i32
  }
  func.func @transform_10(%arg0: i32) -> (i32, i32) {
    %c0_i32 = arith.constant 0 : i32
    %c0_i32_0 = arith.constant 0 : i32
    %c0_i32_1 = arith.constant 0 : i32
    return %c0_i32, %c0_i32_0 : i32, i32
  }
  func.func @transform_11(%arg0: i32) -> (i32, i32, i32) {
    %c0_i32 = arith.constant 0 : i32
    %c0_i32_0 = arith.constant 0 : i32
    %c0_i32_1 = arith.constant 0 : i32
    return %arg0, %c0_i32, %c0_i32_0 : i32, i32, i32
  }
}

module attributes {stable_mosaic.version = 11 : i64} {
  func.func @_mbconv_kernel(%arg0: i32, %arg1: memref<1x16x256xf32, #tpu.memory_space<vmem>>, %arg2: memref<64x16xbf16, #tpu.memory_space<vmem>>, %arg3: memref<64x1xf32, #tpu.memory_space<vmem>>, %arg4: memref<64x9xf32, #tpu.memory_space<vmem>>, %arg5: memref<64x1xf32, #tpu.memory_space<vmem>>, %arg6: memref<8x64xbf16, #tpu.memory_space<vmem>>, %arg7: memref<8x1xf32, #tpu.memory_space<vmem>>, %arg8: memref<64x8xbf16, #tpu.memory_space<vmem>>, %arg9: memref<64x1xf32, #tpu.memory_space<vmem>>, %arg10: memref<16x64xbf16, #tpu.memory_space<vmem>>, %arg11: memref<16x1xf32, #tpu.memory_space<vmem>>, %arg12: memref<1x16x256xf32, #tpu.memory_space<vmem>>) attributes {dimension_semantics = [#tpu.dimension_semantics<parallel>], iteration_bounds = array<i64: 2>, scalar_prefetch = 0 : i64, scratch_operands = 0 : i64, tpu.core_type = #tpu.core_type<tc>, window_params = [{transform_indices = @transform_0, window_bounds = array<i64: 1, 16, 256>}, {pipeline_mode = #tpu.pipeline_mode<synchronous>, transform_indices = @transform_1, window_bounds = array<i64: 64, 16>}, {pipeline_mode = #tpu.pipeline_mode<synchronous>, transform_indices = @transform_2, window_bounds = array<i64: 64, 1>}, {pipeline_mode = #tpu.pipeline_mode<synchronous>, transform_indices = @transform_3, window_bounds = array<i64: 64, 9>}, {pipeline_mode = #tpu.pipeline_mode<synchronous>, transform_indices = @transform_4, window_bounds = array<i64: 64, 1>}, {pipeline_mode = #tpu.pipeline_mode<synchronous>, transform_indices = @transform_5, window_bounds = array<i64: 8, 64>}, {pipeline_mode = #tpu.pipeline_mode<synchronous>, transform_indices = @transform_6, window_bounds = array<i64: 8, 1>}, {pipeline_mode = #tpu.pipeline_mode<synchronous>, transform_indices = @transform_7, window_bounds = array<i64: 64, 8>}, {pipeline_mode = #tpu.pipeline_mode<synchronous>, transform_indices = @transform_8, window_bounds = array<i64: 64, 1>}, {pipeline_mode = #tpu.pipeline_mode<synchronous>, transform_indices = @transform_9, window_bounds = array<i64: 16, 64>}, {pipeline_mode = #tpu.pipeline_mode<synchronous>, transform_indices = @transform_10, window_bounds = array<i64: 16, 1>}, {transform_indices = @transform_11, window_bounds = array<i64: 1, 16, 256>}]} {
    %0 = tpu.iota {dimensions = array<i32: 1>} : vector<1x256xi32>
    %c15_i32 = arith.constant 15 : i32
    %1 = vector.broadcast %c15_i32 : i32 to vector<1x256xi32>
    %2 = arith.andi %0, %1 : vector<1x256xi32>
    %c1_i32 = arith.constant 1 : i32
    %3 = vector.broadcast %c1_i32 : i32 to vector<1x256xi32>
    %4 = arith.cmpi sge, %2, %3 : vector<1x256xi32>
    %c14_i32 = arith.constant 14 : i32
    %5 = vector.broadcast %c14_i32 : i32 to vector<1x256xi32>
    %6 = arith.cmpi sle, %2, %5 : vector<1x256xi32>
    %c16_i32 = arith.constant 16 : i32
    %7 = vector.broadcast %c16_i32 : i32 to vector<1x256xi32>
    %8 = arith.cmpi sge, %0, %7 : vector<1x256xi32>
    %c240_i32 = arith.constant 240 : i32
    %9 = vector.broadcast %c240_i32 : i32 to vector<1x256xi32>
    %10 = arith.cmpi slt, %0, %9 : vector<1x256xi32>
    %c0 = arith.constant 0 : index
    %c0_0 = arith.constant 0 : index
    %11 = vector.load %arg2[%c0, %c0_0] : memref<64x16xbf16, #tpu.memory_space<vmem>>, vector<64x16xbf16>
    %c0_1 = arith.constant 0 : index
    %c0_2 = arith.constant 0 : index
    %12 = vector.load %arg3[%c0_1, %c0_2] : memref<64x1xf32, #tpu.memory_space<vmem>>, vector<64x1xf32>
    %c0_3 = arith.constant 0 : index
    %c0_4 = arith.constant 0 : index
    %13 = vector.load %arg4[%c0_3, %c0_4] : memref<64x9xf32, #tpu.memory_space<vmem>>, vector<64x9xf32>
    %14 = vector.extract_strided_slice %13 {offsets = [0, 0], sizes = [64, 1], strides = [1, 1]} : vector<64x9xf32> to vector<64x1xf32>
    %15 = vector.extract_strided_slice %13 {offsets = [0, 1], sizes = [64, 1], strides = [1, 1]} : vector<64x9xf32> to vector<64x1xf32>
    %16 = vector.extract_strided_slice %13 {offsets = [0, 2], sizes = [64, 1], strides = [1, 1]} : vector<64x9xf32> to vector<64x1xf32>
    %17 = vector.extract_strided_slice %13 {offsets = [0, 3], sizes = [64, 1], strides = [1, 1]} : vector<64x9xf32> to vector<64x1xf32>
    %18 = vector.extract_strided_slice %13 {offsets = [0, 4], sizes = [64, 1], strides = [1, 1]} : vector<64x9xf32> to vector<64x1xf32>
    %19 = vector.extract_strided_slice %13 {offsets = [0, 5], sizes = [64, 1], strides = [1, 1]} : vector<64x9xf32> to vector<64x1xf32>
    %20 = vector.extract_strided_slice %13 {offsets = [0, 6], sizes = [64, 1], strides = [1, 1]} : vector<64x9xf32> to vector<64x1xf32>
    %21 = vector.extract_strided_slice %13 {offsets = [0, 7], sizes = [64, 1], strides = [1, 1]} : vector<64x9xf32> to vector<64x1xf32>
    %22 = vector.extract_strided_slice %13 {offsets = [0, 8], sizes = [64, 1], strides = [1, 1]} : vector<64x9xf32> to vector<64x1xf32>
    %c0_5 = arith.constant 0 : index
    %c0_6 = arith.constant 0 : index
    %23 = vector.load %arg5[%c0_5, %c0_6] : memref<64x1xf32, #tpu.memory_space<vmem>>, vector<64x1xf32>
    %c0_7 = arith.constant 0 : index
    %c0_8 = arith.constant 0 : index
    %24 = vector.load %arg10[%c0_7, %c0_8] : memref<16x64xbf16, #tpu.memory_space<vmem>>, vector<16x64xbf16>
    %c0_9 = arith.constant 0 : index
    %c0_10 = arith.constant 0 : index
    %25 = vector.load %arg11[%c0_9, %c0_10] : memref<16x1xf32, #tpu.memory_space<vmem>>, vector<16x1xf32>
    %c0_11 = arith.constant 0 : index
    %c0_12 = arith.constant 0 : index
    %c0_13 = arith.constant 0 : index
    %26 = vector.load %arg1[%c0_11, %c0_12, %c0_13] : memref<1x16x256xf32, #tpu.memory_space<vmem>>, vector<1x16x256xf32>
    %27 = vector.shape_cast %26 : vector<1x16x256xf32> to vector<16x256xf32>
    %28 = arith.truncf %27 : vector<16x256xf32> to vector<16x256xbf16>
    %cst = arith.constant dense<0.000000e+00> : vector<64x256xf32>
    %29 = tpu.matmul %11, %28, %cst {dimension_numbers = #tpu.dot_dimension_numbers<[1], [0], [0], [1], [0, 0, 1, 1], [], []>} : vector<64x16xbf16>, vector<16x256xbf16>, vector<64x256xf32> -> vector<64x256xf32>
    %30 = vector.broadcast %12 : vector<64x1xf32> to vector<64x256xf32>
    %31 = arith.addf %29, %30 : vector<64x256xf32>
    %32 = arith.negf %31 : vector<64x256xf32>
    %33 = math.exp %32 : vector<64x256xf32>
    %cst_14 = arith.constant 1.000000e+00 : f32
    %34 = vector.broadcast %cst_14 : f32 to vector<64x256xf32>
    %35 = arith.addf %34, %33 : vector<64x256xf32>
    %36 = arith.divf %34, %35 : vector<64x256xf32>
    %37 = arith.mulf %31, %36 : vector<64x256xf32>
    %c1_i32_15 = arith.constant 1 : i32
    %38 = tpu.dynamic_rotate %37 by %c1_i32_15 dim 1 : vector<64x256xf32>, i32 -> vector<64x256xf32>
    %cst_16 = arith.constant 0.000000e+00 : f32
    %39 = vector.shape_cast %4 : vector<1x256xi1> to vector<1x256xi1>
    %40 = vector.broadcast %39 : vector<1x256xi1> to vector<64x256xi1>
    %41 = vector.broadcast %cst_16 : f32 to vector<64x256xf32>
    %42 = arith.select %40, %38, %41 : vector<64x256xi1>, vector<64x256xf32>
    %c255_i32 = arith.constant 255 : i32
    %43 = tpu.dynamic_rotate %37 by %c255_i32 dim 1 : vector<64x256xf32>, i32 -> vector<64x256xf32>
    %cst_17 = arith.constant 0.000000e+00 : f32
    %44 = vector.shape_cast %6 : vector<1x256xi1> to vector<1x256xi1>
    %45 = vector.broadcast %44 : vector<1x256xi1> to vector<64x256xi1>
    %46 = vector.broadcast %cst_17 : f32 to vector<64x256xf32>
    %47 = arith.select %45, %43, %46 : vector<64x256xi1>, vector<64x256xf32>
    %48 = vector.broadcast %17 : vector<64x1xf32> to vector<64x256xf32>
    %49 = arith.mulf %42, %48 : vector<64x256xf32>
    %50 = vector.broadcast %18 : vector<64x1xf32> to vector<64x256xf32>
    %51 = arith.mulf %37, %50 : vector<64x256xf32>
    %52 = arith.addf %49, %51 : vector<64x256xf32>
    %53 = vector.broadcast %19 : vector<64x1xf32> to vector<64x256xf32>
    %54 = arith.mulf %47, %53 : vector<64x256xf32>
    %55 = arith.addf %52, %54 : vector<64x256xf32>
    %56 = vector.broadcast %14 : vector<64x1xf32> to vector<64x256xf32>
    %57 = arith.mulf %42, %56 : vector<64x256xf32>
    %58 = vector.broadcast %15 : vector<64x1xf32> to vector<64x256xf32>
    %59 = arith.mulf %37, %58 : vector<64x256xf32>
    %60 = arith.addf %57, %59 : vector<64x256xf32>
    %61 = vector.broadcast %16 : vector<64x1xf32> to vector<64x256xf32>
    %62 = arith.mulf %47, %61 : vector<64x256xf32>
    %63 = arith.addf %60, %62 : vector<64x256xf32>
    %c16_i32_18 = arith.constant 16 : i32
    %64 = tpu.dynamic_rotate %63 by %c16_i32_18 dim 1 : vector<64x256xf32>, i32 -> vector<64x256xf32>
    %cst_19 = arith.constant 0.000000e+00 : f32
    %65 = vector.shape_cast %8 : vector<1x256xi1> to vector<1x256xi1>
    %66 = vector.broadcast %65 : vector<1x256xi1> to vector<64x256xi1>
    %67 = vector.broadcast %cst_19 : f32 to vector<64x256xf32>
    %68 = arith.select %66, %64, %67 : vector<64x256xi1>, vector<64x256xf32>
    %69 = arith.addf %55, %68 : vector<64x256xf32>
    %70 = vector.broadcast %20 : vector<64x1xf32> to vector<64x256xf32>
    %71 = arith.mulf %42, %70 : vector<64x256xf32>
    %72 = vector.broadcast %21 : vector<64x1xf32> to vector<64x256xf32>
    %73 = arith.mulf %37, %72 : vector<64x256xf32>
    %74 = arith.addf %71, %73 : vector<64x256xf32>
    %75 = vector.broadcast %22 : vector<64x1xf32> to vector<64x256xf32>
    %76 = arith.mulf %47, %75 : vector<64x256xf32>
    %77 = arith.addf %74, %76 : vector<64x256xf32>
    %c240_i32_20 = arith.constant 240 : i32
    %78 = tpu.dynamic_rotate %77 by %c240_i32_20 dim 1 : vector<64x256xf32>, i32 -> vector<64x256xf32>
    %cst_21 = arith.constant 0.000000e+00 : f32
    %79 = vector.shape_cast %10 : vector<1x256xi1> to vector<1x256xi1>
    %80 = vector.broadcast %79 : vector<1x256xi1> to vector<64x256xi1>
    %81 = vector.broadcast %cst_21 : f32 to vector<64x256xf32>
    %82 = arith.select %80, %78, %81 : vector<64x256xi1>, vector<64x256xf32>
    %83 = arith.addf %69, %82 : vector<64x256xf32>
    %84 = vector.broadcast %23 : vector<64x1xf32> to vector<64x256xf32>
    %85 = arith.addf %83, %84 : vector<64x256xf32>
    %86 = arith.negf %85 : vector<64x256xf32>
    %87 = math.exp %86 : vector<64x256xf32>
    %cst_22 = arith.constant 1.000000e+00 : f32
    %88 = vector.broadcast %cst_22 : f32 to vector<64x256xf32>
    %89 = arith.addf %88, %87 : vector<64x256xf32>
    %90 = arith.divf %88, %89 : vector<64x256xf32>
    %91 = arith.mulf %85, %90 : vector<64x256xf32>
    %cst_23 = arith.constant dense<0.000000e+00> : vector<64xf32>
    %92 = vector.multi_reduction <add>, %91, %cst_23 [1] : vector<64x256xf32> to vector<64xf32>
    %93 = vector.shape_cast %92 : vector<64xf32> to vector<64x1xf32>
    %cst_24 = arith.constant 2.560000e+02 : f32
    %94 = vector.broadcast %cst_24 : f32 to vector<64x1xf32>
    %95 = arith.divf %93, %94 : vector<64x1xf32>
    %c0_25 = arith.constant 0 : index
    %c0_26 = arith.constant 0 : index
    %96 = vector.load %arg6[%c0_25, %c0_26] : memref<8x64xbf16, #tpu.memory_space<vmem>>, vector<8x64xbf16>
    %97 = arith.truncf %95 : vector<64x1xf32> to vector<64x1xbf16>
    %cst_27 = arith.constant dense<0.000000e+00> : vector<8x1xf32>
    %98 = tpu.matmul %96, %97, %cst_27 {dimension_numbers = #tpu.dot_dimension_numbers<[1], [0], [0], [1], [0, 0, 1, 1], [], []>} : vector<8x64xbf16>, vector<64x1xbf16>, vector<8x1xf32> -> vector<8x1xf32>
    %c0_28 = arith.constant 0 : index
    %c0_29 = arith.constant 0 : index
    %99 = vector.load %arg7[%c0_28, %c0_29] : memref<8x1xf32, #tpu.memory_space<vmem>>, vector<8x1xf32>
    %100 = arith.addf %98, %99 : vector<8x1xf32>
    %101 = arith.negf %100 : vector<8x1xf32>
    %102 = math.exp %101 : vector<8x1xf32>
    %cst_30 = arith.constant 1.000000e+00 : f32
    %103 = vector.broadcast %cst_30 : f32 to vector<8x1xf32>
    %104 = arith.addf %103, %102 : vector<8x1xf32>
    %105 = arith.divf %103, %104 : vector<8x1xf32>
    %106 = arith.mulf %100, %105 : vector<8x1xf32>
    %c0_31 = arith.constant 0 : index
    %c0_32 = arith.constant 0 : index
    %107 = vector.load %arg8[%c0_31, %c0_32] : memref<64x8xbf16, #tpu.memory_space<vmem>>, vector<64x8xbf16>
    %108 = arith.truncf %106 : vector<8x1xf32> to vector<8x1xbf16>
    %cst_33 = arith.constant dense<0.000000e+00> : vector<64x1xf32>
    %109 = tpu.matmul %107, %108, %cst_33 {dimension_numbers = #tpu.dot_dimension_numbers<[1], [0], [0], [1], [0, 0, 1, 1], [], []>} : vector<64x8xbf16>, vector<8x1xbf16>, vector<64x1xf32> -> vector<64x1xf32>
    %c0_34 = arith.constant 0 : index
    %c0_35 = arith.constant 0 : index
    %110 = vector.load %arg9[%c0_34, %c0_35] : memref<64x1xf32, #tpu.memory_space<vmem>>, vector<64x1xf32>
    %111 = arith.addf %109, %110 : vector<64x1xf32>
    %112 = arith.negf %111 : vector<64x1xf32>
    %113 = math.exp %112 : vector<64x1xf32>
    %cst_36 = arith.constant 1.000000e+00 : f32
    %114 = vector.broadcast %cst_36 : f32 to vector<64x1xf32>
    %115 = arith.addf %114, %113 : vector<64x1xf32>
    %116 = arith.divf %114, %115 : vector<64x1xf32>
    %117 = vector.broadcast %116 : vector<64x1xf32> to vector<64x256xf32>
    %118 = arith.mulf %91, %117 : vector<64x256xf32>
    %119 = arith.truncf %118 : vector<64x256xf32> to vector<64x256xbf16>
    %cst_37 = arith.constant dense<0.000000e+00> : vector<16x256xf32>
    %120 = tpu.matmul %24, %119, %cst_37 {dimension_numbers = #tpu.dot_dimension_numbers<[1], [0], [0], [1], [0, 0, 1, 1], [], []>} : vector<16x64xbf16>, vector<64x256xbf16>, vector<16x256xf32> -> vector<16x256xf32>
    %121 = vector.broadcast %25 : vector<16x1xf32> to vector<16x256xf32>
    %122 = arith.addf %120, %121 : vector<16x256xf32>
    %123 = arith.addf %122, %27 : vector<16x256xf32>
    %c0_38 = arith.constant 0 : index
    %c0_39 = arith.constant 0 : index
    %c0_40 = arith.constant 0 : index
    %124 = vector.load %arg12[%c0_38, %c0_39, %c0_40] : memref<1x16x256xf32, #tpu.memory_space<vmem>>, vector<1x16x256xf32>
    %125 = vector.shape_cast %124 : vector<1x16x256xf32> to vector<16x256xf32>
    %126 = vector.shape_cast %123 : vector<16x256xf32> to vector<1x16x256xf32>
    tpu.vector_store %arg12[%c0_38, %c0_39, %c0_40], %126 {strides = array<i32>} : memref<1x16x256xf32, #tpu.memory_space<vmem>>, vector<1x16x256xf32>,
    return
  }
  func.func @transform_0(%arg0: i32) -> (i32, i32, i32) {
    %c0_i32 = arith.constant 0 : i32
    %c0_i32_0 = arith.constant 0 : i32
    %c0_i32_1 = arith.constant 0 : i32
    return %arg0, %c0_i32, %c0_i32_0 : i32, i32, i32
  }
  func.func @transform_1(%arg0: i32) -> (i32, i32) {
    %c0_i32 = arith.constant 0 : i32
    %c0_i32_0 = arith.constant 0 : i32
    %c0_i32_1 = arith.constant 0 : i32
    return %c0_i32, %c0_i32_0 : i32, i32
  }
  func.func @transform_2(%arg0: i32) -> (i32, i32) {
    %c0_i32 = arith.constant 0 : i32
    %c0_i32_0 = arith.constant 0 : i32
    %c0_i32_1 = arith.constant 0 : i32
    return %c0_i32, %c0_i32_0 : i32, i32
  }
  func.func @transform_3(%arg0: i32) -> (i32, i32) {
    %c0_i32 = arith.constant 0 : i32
    %c0_i32_0 = arith.constant 0 : i32
    %c0_i32_1 = arith.constant 0 : i32
    return %c0_i32, %c0_i32_0 : i32, i32
  }
  func.func @transform_4(%arg0: i32) -> (i32, i32) {
    %c0_i32 = arith.constant 0 : i32
    %c0_i32_0 = arith.constant 0 : i32
    %c0_i32_1 = arith.constant 0 : i32
    return %c0_i32, %c0_i32_0 : i32, i32
  }
  func.func @transform_5(%arg0: i32) -> (i32, i32) {
    %c0_i32 = arith.constant 0 : i32
    %c0_i32_0 = arith.constant 0 : i32
    %c0_i32_1 = arith.constant 0 : i32
    return %c0_i32, %c0_i32_0 : i32, i32
  }
  func.func @transform_6(%arg0: i32) -> (i32, i32) {
    %c0_i32 = arith.constant 0 : i32
    %c0_i32_0 = arith.constant 0 : i32
    %c0_i32_1 = arith.constant 0 : i32
    return %c0_i32, %c0_i32_0 : i32, i32
  }
  func.func @transform_7(%arg0: i32) -> (i32, i32) {
    %c0_i32 = arith.constant 0 : i32
    %c0_i32_0 = arith.constant 0 : i32
    %c0_i32_1 = arith.constant 0 : i32
    return %c0_i32, %c0_i32_0 : i32, i32
  }
  func.func @transform_8(%arg0: i32) -> (i32, i32) {
    %c0_i32 = arith.constant 0 : i32
    %c0_i32_0 = arith.constant 0 : i32
    %c0_i32_1 = arith.constant 0 : i32
    return %c0_i32, %c0_i32_0 : i32, i32
  }
  func.func @transform_9(%arg0: i32) -> (i32, i32) {
    %c0_i32 = arith.constant 0 : i32
    %c0_i32_0 = arith.constant 0 : i32
    %c0_i32_1 = arith.constant 0 : i32
    return %c0_i32, %c0_i32_0 : i32, i32
  }
  func.func @transform_10(%arg0: i32) -> (i32, i32) {
    %c0_i32 = arith.constant 0 : i32
    %c0_i32_0 = arith.constant 0 : i32
    %c0_i32_1 = arith.constant 0 : i32
    return %c0_i32, %c0_i32_0 : i32, i32
  }
  func.func @transform_11(%arg0: i32) -> (i32, i32, i32) {
    %c0_i32 = arith.constant 0 : i32
    %c0_i32_0 = arith.constant 0 : i32
    %c0_i32_1 = arith.constant 0 : i32
    return %arg0, %c0_i32, %c0_i32_0 : i32, i32, i32
  }
}

</mosaic_0001>

<bundles_post_ra>
// kernel: tpu_custom_call.1
= control target key start
LH: loop header
LB: loop body
LE: loop exit
PB: predicated region body
PF: predicated region fallthrough
CT: control target
= control target key end

     0   :  { %s5329_s0 = inlined_call_operand.vmem [shape: f32[2,16,256], index: 0, kind: input, shape index: {}]   ;;  %s5330_s1 = inlined_call_operand.vmem [shape: bf16[64,16], index: 1, kind: input, shape index: {}]   ;;  %s5331_s2 = inlined_call_operand.vmem [shape: f32[64,1], index: 2, kind: input, shape index: {}]   ;;  %s5332_s3 = inlined_call_operand.vmem [shape: f32[64,9], index: 3, kind: input, shape index: {}]   ;;  %s5333_s4 = inlined_call_operand.vmem [shape: f32[64,1], index: 4, kind: input, shape index: {}]   ;;  %s5334_s5 = inlined_call_operand.vmem [shape: bf16[8,64], index: 5, kind: input, shape index: {}]   ;;  %s5335_s6 = inlined_call_operand.vmem [shape: f32[8,1], index: 6, kind: input, shape index: {}]   ;;  %s5336_s7 = inlined_call_operand.vmem [shape: bf16[64,8], index: 7, kind: input, shape index: {}]   ;;  %s5337_s8 = inlined_call_operand.vmem [shape: f32[64,1], index: 8, kind: input, shape index: {}]   ;;  %s5338_s9 = inlined_call_operand.vmem [shape: bf16[16,64], index: 9, kind: input, shape index: {}]   ;;  %s5339_s10 = inlined_call_operand.vmem [shape: f32[16,1], index: 10, kind: input, shape index: {}]   ;;  %s5340_s11 = inlined_call_operand.hbm [shape: f32[2,16,256], index: 11, kind: output, shape index: {}]  }
   0x1   :  { %5429 = sst [smem:[#allocation63_spill]] %s5329_s0 }
   0x2   :  { %5430 = sst [smem:[#allocation64_spill]] %s5330_s1 }
   0x3   :  { %16 = vsyncpa [#allocation3], 0 }
   0x4   :  { %18 = vsyncpa [#allocation3 + $0x1], 0  ;;  %s3176_s17 = smov 0   ;;  %s3178_s18 = smov 0  }
   0x5   :  { %s3180_s19 = smov 0   ;;  %s3182_s20 = smov 0  }
   0x6 LB: > { %s3197_s21 = sadd.s32 4294967295, %s3099_s20   ;;  %s2625_s22 = sadd.s32 4294967294, %s3099_s20   ;;  %s3099_s20 = sphi %s3182_s20, %s5632_s20   ;;  %s3095_s19 = sphi %s3180_s19, %s5631_s19   ;;  %s3091_s18 = sphi %s3178_s18, %s5630_s18   ;;  %s3087_s17 = sphi %s3176_s17, %s5629_s17  }
   0x7   : > { %s3201_s23 = sadd.s32 1, %s3099_s20   ;;  %s267_s24 = sadd.s32 1, %s3095_s19 }
   0x8   : > { %s264_s25 = ssub.s32 %s3099_s20, %s3201_s23  ;;  %p277_p0 = scmp.ne.s32.totalorder %s3095_s19, %s3091_s18 }
   0x9   : > { %p265_p1 = scmp.eq.s32.totalorder %s264_s25, 0  ;;  %p278_p2 = scmp.eq.s32.totalorder %s3197_s21, 1 }
   0xa   : > { %p283_p3 = scmp.ne.s32.totalorder %s3091_s18, %s3087_s17  ;;  %p284_p4 = scmp.eq.s32.totalorder %s2625_s22, 1 }
   0xb   : > { %s3212_s26 = scalar_select %p265_p1, %s3095_s19, %s267_s24  }
   0xc   : > { %p3214_p5 = por %p278_p2, %p277_p0  ;;  %p3218_p6 = por %p284_p4, %p283_p3 }
   0xd   : > { %p2628_p7 = scmp.ge.s32.totalorder %s3099_s20, 1  ;;  %p340_p8 = scmp.lt.s32.totalorder %s3099_s20, 3 }
   0xf   : > { %p341_p9 = pnand %p2628_p7, %p340_p8 }
  0x11   : > { %344 = sbr.rel (%p341_p9) target bundleno = 1522 (0x5f2), region = 64 }
  0x16   : > { %v3227_v0 = vld [vmem:[%s5332_s3 + $0x30] sm:$0xff]  ;;  %v411_v1 = vld [vmem:[%s5331_s2 + $0x20] sm:$0xff]  ;;  %p380_p10 = scmp.lt.s32.totalorder %s3197_s21, 1  ;;  %v5347_v3 = vmov 1   ;;  %v5341_v4 = vmov 0   ;;  %s5433_s0 = sld [smem:[#allocation63_spill]] }
  0x17   : > { %v409_v2 = vld [vmem:[%s5331_s2 + $0x10] sm:$0xff]  ;;  %2796 = vset.pattern.permute.xlu0 %v5347_v3  ;;  %2795 = vset.pattern.permute.xlu2 %v5341_v4  ;;  %v412_v11 = vld [vmem:[%s5331_s2 + $0x28] sm:$0xff]  ;;  %v410_v12 = vld [vmem:[%s5331_s2 + $0x18] sm:$0xff]  ;;  %s5434_s1 = sld [smem:[#allocation64_spill]]  ;;  %vm501_vm0 = vcmask 130048   ;;  %v5343_v14 = vmov 6  }
  0x18   : > { %2794 = vset.pattern.permute.xlu1 %v5341_v4  ;;  %1287 = vperm.xlu0 %2796, %v3227_v0   ;;  %s381_s16 = scalar_select %p380_p10, %s3197_s21, 1  ;;  %v422_v15 = vld [vmem:[%s5332_s3 + $0x38] sm:$0xff]  ;;  %v408_v16 = vld [vmem:[%s5331_s2 + $0x8] sm:$0xff]  ;;  %v419_v17 = vld [vmem:[%s5332_s3 + $0x20] sm:$0xff]  ;;  %v5345_v18 = vmov 2   ;;  %v5348_v22 = vmov 7  }
  0x19   : > { %463 = vperm.xlu1 %2794, %v411_v1   ;;  %453 = vperm.xlu2 %2795, %v409_v2   ;;  %v3279_v20 = vld [vmem:[%s5332_s3 + $0x10] sm:$0xff]  ;;  %v414_v24 = vld [vmem:[%s5331_s2 + $0x38] sm:$0xff]  ;;  %v407_v25 = vld [vmem:[%s5331_s2] sm:$0xff]  ;;  %v5350_v26 = vmov 8   ;;  %s377_s12 = sand.u32 1, %s3091_s18   ;;  %s2739_s15 = sshll.u32 %s3197_s21, 5 }
  0x1a   : > { %s2729_s22 = sshll.u32 %s381_s16, 5  ;;  %v413_v21 = vld [vmem:[%s5331_s2 + $0x30] sm:$0xff]  ;;  %v3320_v28 = vld [vmem:[%s5332_s3 + $0x28] sm:$0xff]  ;;  %v3329_v29 = vld [vmem:[%s5332_s3] sm:$0xff]  ;;  %s3107_s16 = smov 1  }
  0x1b   : > { %v3348_v30 = vld [vmem:[%s5332_s3 + $0x18] sm:$0xff]  ;;  %s2629_s13 = sshll.u32 %s377_s12, 5  ;;  %s2559_s25 = scalar_lea.hbm %s5340_s11, %s2739_s15 }
  0x1c   : > { %s3244_s29 = scalar_lea.vmem %s5433_s0, %s2729_s22  ;;  %s3108_s22 = smov 127  }
  0x1d   : > { %v435_v5 = vld [vmem:[%s3244_s29] sm:$0xff]  ;;  %v437_v6 = vld [vmem:[%s3244_s29 + $0x10] sm:$0xff]  ;;  %v436_v7 = vld [vmem:[%s3244_s29 + $0x8] sm:$0xff]  ;;  %s379_s14 = scalar_lea.vmem [#allocation2], %s2629_s13  ;;  %s2562_s13 = sshll.u32 %s2559_s25, 4  ;;  %s2563_s13 = int_to_ptr.hbm [resolvable:$true] %s2562_s13 }
  0x1e   : > { %v439_v8 = vpack.c.bf16 %v437_v6, %v435_v5  ;;  %v438_v9 = vld [vmem:[%s3244_s29 + $0x18] sm:$0xff]  ;;  %v2730_v13 = vld [vmem:[%s5434_s1] sm:$0xff]  ;;  %v2731_v19 = vld [vmem:[%s5434_s1 + $0x8] sm:$0xff]  ;;  %s2560_s30 = sshll.u32 %s379_s14, 4  ;;  %s3051_s21 = sshra.s32 %s2563_s13, 4  ;;  %s2561_s30 = int_to_ptr.vmem [resolvable:$true] %s2560_s30  ;;  %s3052_s21 = int_to_ptr.hbm [resolvable:$true] %s3051_s21 }
  0x1f   : > { %v440_v10 = vpack.c.bf16 %v438_v9, %v436_v7  ;;  %v2732_v23 = vld [vmem:[%s5434_s1 + $0x10] sm:$0xff]  ;;  %v2733_v27 = vld [vmem:[%s5434_s1 + $0x18] sm:$0xff]  ;;  %s3053_s0 = scalar_lea.hbm %s3052_s21, 32  ;;  %s3057_s24 = scalar_lea.hbm %s5340_s11, 64 }
  0x20   : > { %521 = vmatpush.bf16.msra.mxu0 %v439_v8  ;;  %2800 = vset.pattern.permute.xlu0 %v5343_v14  ;;  %p3054_p11 = scmp.ne.s32.totalorder %s3052_s21, %s3053_s0  ;;  %p3058_p0 = scmp.lt.s32.totalorder %s3052_s21, %s5340_s11 }
  0x21   : > { %550 = vmatpush.bf16.msra.mxu1 %v440_v10  ;;  %468 = vperm.xlu1 %2794, %v412_v11   ;;  %p3059_p1 = scmp.lt.s32.totalorder %s3057_s24, %s3053_s0 }
  0x22   : > { %458 = vperm.xlu2 %2795, %v410_v12   ;;  %1500 = vperm.xlu0 %2800, %v3227_v0   ;;  %p3055_p12 = pnand %p3054_p11, %p3214_p5 }
  0x23   : > { %2648 = vmatmul.msk.bf16.vlgmr.msra.gmra.mxu0 %vm501_vm0, %v2730_v13  ;;  %p3060_p2 = por %p3059_p1, %p3058_p0 }
  0x24   : > { %2652 = vmatmul.msk.bf16.vlgmr.msra.gmra.mxu1 %vm501_vm0, %v2730_v13  ;;  %p3056_p13 = pneg %p3055_p12 }
  0x26   : > { %p3061_p3 = pnand %p3060_p2, %p3056_p13 }
  0x29   : > { %448 = vperm.xlu1 %2794, %v408_v16  }
  0x2a   : > { %1243 = vperm.xlu2 %2795, %v422_v15   ;;  %2808 = vset.pattern.permute.xlu0 %v5345_v18 }
  0x2b   : > { %1343 = vperm.xlu0 %2808, %v419_v17  }
  0x31   : > { %1239 = vperm.xlu1 %2794, %v3227_v0  }
  0x32   : > { %2799 = vset.pattern.permute.xlu2 %v5345_v18 }
  0x33   : > { %1355 = vperm.xlu2 %2799, %v422_v15   ;;  %2649 = vmatmul.msk.bf16.gmra.mxu0 %vm501_vm0, %v2731_v19 }
  0x34   : > { %1335 = vperm.xlu0 %2808, %v3279_v20   ;;  %2653 = vmatmul.msk.bf16.gmra.mxu1 %vm501_vm0, %v2731_v19 }
  0x39   : > { %2797 = vset.pattern.permute.xlu1 %v5347_v3 }
  0x3a   : > { %1291 = vperm.xlu1 %2797, %v422_v15  }
  0x3b   : > { %2802 = vset.pattern.permute.xlu2 %v5348_v22 }
  0x3c   : > { %2817 = vset.pattern.permute.xlu0 %v5341_v4  ;;  %1548 = vperm.xlu2 %2802, %v3227_v0  }
  0x3d   : > { %473 = vperm.xlu0 %2817, %v413_v21  }
  0x42   : > { %2798 = vset.pattern.permute.xlu1 %v5345_v18 }
  0x43   : > { %2650 = vmatmul.msk.bf16.gmra.mxu0 %vm501_vm0, %v2732_v23  ;;  %1351 = vperm.xlu1 %2798, %v3227_v0  }
  0x44   : > { %2805 = vset.pattern.permute.xlu2 %v5347_v3  ;;  %2654 = vmatmul.msk.bf16.gmra.mxu1 %vm501_vm0, %v2732_v23 }
  0x45   : > { %478 = vperm.xlu0 %2817, %v414_v24   ;;  %1279 = vperm.xlu2 %2805, %v419_v17  }
  0x4b   : > { %2801 = vset.pattern.permute.xlu1 %v5343_v14 }
  0x4c   : > { %1504 = vperm.xlu1 %2801, %v422_v15  }
  0x4d   : > { %443 = vperm.xlu0 %2817, %v407_v25   ;;  %2807 = vset.pattern.permute.xlu2 %v5350_v26 }
  0x4e   : > { %1612 = vperm.xlu2 %2807, %v3227_v0  }
  0x53   : > { %2651 = vmatmul.msk.bf16.gmra.mxu0 %vm501_vm0, %v2733_v27 }
  0x54   : > { %2655 = vmatmul.msk.bf16.gmra.mxu1 %vm501_vm0, %v2733_v27  ;;  %2803 = vset.pattern.permute.xlu1 %v5348_v22 }
  0x55   : > { %1231 = vperm.xlu0 %2817, %v419_v17   ;;  %1552 = vperm.xlu1 %2803, %v422_v15  }
  0x56   : > { %2810 = vset.pattern.permute.xlu2 %v5343_v14 }
  0x57   : > { %1492 = vperm.xlu2 %2810, %v419_v17  }
  0x5d   : > { %1223 = vperm.xlu0 %2817, %v3279_v20   ;;  %2804 = vset.pattern.permute.xlu1 %v5341_v4 }
  0x5e   : > { %1235 = vperm.xlu1 %2804, %v3320_v28  }
  0x5f   : > { %2812 = vset.pattern.permute.xlu2 %v5348_v22 }
  0x60   : > { %1540 = vperm.xlu2 %2812, %v419_v17  }
  0x65   : > { %1215 = vperm.xlu0 %2817, %v3329_v29  }
  0x66   : > { %2806 = vset.pattern.permute.xlu1 %v5347_v3 }
  0x67   : > { %1283 = vperm.xlu1 %2806, %v3320_v28  }
  0x68   : > { %2814 = vset.pattern.permute.xlu2 %v5347_v3 }
  0x69   : > { %1271 = vperm.xlu2 %2814, %v3279_v20  }
  0x6d   : > { %2822 = vset.pattern.permute.xlu0 %v5350_v26 }
  0x6e   : > { %1616 = vperm.xlu0 %2822, %v422_v15  }
  0x6f   : > { %2809 = vset.pattern.permute.xlu1 %v5345_v18 }
  0x70   : > { %1347 = vperm.xlu1 %2809, %v3320_v28  }
  0x71   : > { %2816 = vset.pattern.permute.xlu2 %v5350_v26 }
  0x72   : > { %1604 = vperm.xlu2 %2816, %v419_v17  }
  0x73   : > { %v3371_v38 = vpop.permute.xlu2 %453 }
  0x76   : > { %1608 = vperm.xlu0 %2822, %v3320_v28  }
  0x78   : > { %2811 = vset.pattern.permute.xlu1 %v5343_v14 }
  0x79   : > { %1496 = vperm.xlu1 %2811, %v3320_v28  }
  0x7a   : > { %2819 = vset.pattern.permute.xlu2 %v5343_v14 }
  0x7b   : > { %1484 = vperm.xlu2 %2819, %v3279_v20  }
  0x7c   : > { %v459_v47 = vpop.permute.xlu2 %458 }
  0x81   : > { %2813 = vset.pattern.permute.xlu1 %v5341_v4 }
  0x82   : > { %1227 = vperm.xlu1 %2813, %v3348_v30  }
  0x83   : > { %2821 = vset.pattern.permute.xlu2 %v5348_v22 }
  0x84   : > { %1532 = vperm.xlu2 %2821, %v3279_v20   ;;  %v3383_v55 = vpop.permute.xlu2 %1243 }
  0x85   : > { %5436 = vst [vmem:[#allocation6_spill] sm:$0xff] %v3383_v55 }
  0x8a   : > { %2815 = vset.pattern.permute.xlu1 %v5347_v3  ;;  %v3355_v31 = vpop.permute.xlu0 %1287 }
  0x8b   : > { %1275 = vperm.xlu1 %2815, %v3348_v30   ;;  %v3359_v32 = vpop.permute.xlu1 %463 }
  0x8c   : > { %2824 = vset.pattern.permute.xlu2 %v5347_v3 }
  0x8d   : > { %v3396_v11 = vpop.permute.xlu2 %1355 }
  0x8e   : > { %5437 = vst [vmem:[#allocation7_spill] sm:$0xff] %v3396_v11 }
  0x93   : > { %2818 = vset.pattern.permute.xlu1 %v5345_v18  ;;  %v3368_v35 = vpop.permute.xlu1 %468 }
  0x94   : > { %v3362_v33 = vpop.permute.xlu0 %1500  ;;  %1339 = vperm.xlu1 %2818, %v3348_v30  }
  0x9b   : > { %v449_v40 = vpop.permute.xlu1 %448 }
  0x9c   : > { %2820 = vset.pattern.permute.xlu1 %v5343_v14 }
  0x9d   : > { %v3366_v34 = vpop.permute.xlu0 %1343  ;;  %1488 = vperm.xlu1 %2820, %v3348_v30  }
  0xa0   : > { %v523_v36 = vpop.f32.mrf.mxu0 }
  0xa1   : > { %v552_v37 = vpop.f32.mrf.mxu1 }
  0xa5   : > { %2823 = vset.pattern.permute.xlu1 %v5341_v4 }
  0xa6   : > { %v3373_v39 = vpop.permute.xlu0 %1335 }
  0xa7   : > { %5435 = vst [vmem:[#allocation5_spill] sm:$0xff] %v3373_v39 }
  0xa8   : > { %v525_v41 = vpop.f32.mrf.mxu0 }
  0xa9   : > { %v526_v42 = vadd.f32 %v525_v41, %v449_v40  ;;  %v554_v43 = vpop.f32.mrf.mxu1 }
  0xaa   : > { %v3376_v44 = vadd.f32 %v554_v43, %v449_v40 }
  0xab   : > { %v2658_v45 = vmul.f32 -1.442695, %v526_v42 }
  0xac   : > { %v2659_v46 = vmul.f32 -1.442695, %v3376_v44 }
  0xad   : > { %2860 = vpow2.f32 %v2658_v45 }
  0xae   : > { %2862 = vpow2.f32 %v2659_v46 }
  0xaf   : > { %v3379_v48 = vpop.permute.xlu0 %473 }
  0xb0   : > { %v528_v49 = vpop.f32.mrf.mxu0 }
  0xb1   : > { %v3381_v51 = vpop.f32.mrf.mxu1  ;;  %v3401_v17 = vadd.f32 %v528_v49, %v3371_v38 }
  0xb3   : > { %v2861_v50 = vpop.eup %2860  ;;  %v2660_v45 = vmul.f32 -1.442695, %v3401_v17 }
  0xb4   : > { %v2863_v52 = vpop.eup %2862  ;;  %v622_v53 = vadd.f32 1.0, %v2861_v50  ;;  %v3412_v50 = vpop.permute.xlu2 %1548 }
  0xb5   : > { %v623_v54 = vadd.f32 1.0, %v2863_v52 }
  0xb6   : > { %2864 = vrcp.f32 %v622_v53  ;;  %v675_v2 = vand.u32 2147483647, %v622_v53  ;;  %v677_v6 = vand.u32 2147483648, %v622_v53  ;;  %vm671_vm1 = vweird.f32 %v622_v53 }
  0xb7   : > { %2866 = vrcp.f32 %v623_v54  ;;  %v3385_v56 = vpop.permute.xlu0 %478  ;;  %vm686_vm3 = vweird.f32 %v623_v54  ;;  %v690_v40 = vand.u32 2147483647, %v623_v54 }
  0xb8   : > { %v530_v57 = vpop.f32.mrf.mxu0  ;;  %vm676_vm5 = vcmp.eq.f32.partialorder %v675_v2, 8.507059e+37  ;;  %v678_v20 = vor.u32 1.1754944e-38, %v677_v6 }
  0xb9   : > { %v3387_v58 = vadd.f32 %v530_v57, %v459_v47  ;;  %v559_v62 = vpop.f32.mrf.mxu1  ;;  %vm691_vm8 = vcmp.eq.f32.partialorder %v690_v40, 8.507059e+37 }
  0xba   : > { %v3390_v8 = vadd.f32 %v559_v62, %v459_v47 }
  0xbb   : > { %v2662_v0 = vmul.f32 -1.442695, %v3387_v58 }
  0xbc   : > { %v2865_v59 = vpop.eup %2864  ;;  %v2663_v21 = vmul.f32 -1.442695, %v3390_v8 }
  0xbd   : > { %v2867_v60 = vpop.eup %2866  ;;  %v667_v61 = vmul.f32 %v2865_v59, %v622_v53  ;;  %vm672_vm2 = vweird.f32 %v2865_v59  ;;  %2868 = vpow2.f32 %v2662_v0 }
  0xbe   : > { %v682_v63 = vmul.f32 %v2867_v60, %v623_v54  ;;  %vm673_vm4 = vmor %vm671_vm1, %vm672_vm2  ;;  %vm687_vm6 = vweird.f32 %v2867_v60 }
  0xbf   : > { %v668_v1 = vsub.f32 1.0, %v667_v61  ;;  %v444_v5 = vpop.permute.xlu0 %443  ;;  %vm688_vm7 = vmor %vm686_vm3, %vm687_vm6  ;;  %v3423_v61 = vadd.f32 %v3381_v51, %v3371_v38  ;;  %v3438_v51 = vpop.permute.xlu2 %1279 }
  0xc0   : > { %v683_v7 = vsub.f32 1.0, %v682_v63  ;;  %v3392_v9 = vadd.f32 %v523_v36, %v444_v5  ;;  %v3394_v10 = vpop.f32.mrf.mxu0  ;;  %v3398_v13 = vadd.f32 %v552_v37, %v444_v5  ;;  %v692_v36 = vand.u32 2147483648, %v623_v54 }
  0xc1   : > { %v669_v12 = vmul.f32 %v2865_v59, %v668_v1  ;;  %v3416_v54 = vpop.f32.mrf.mxu1  ;;  %v3432_v1 = vpop.permute.xlu1 %1239  ;;  %v2661_v2 = vmul.f32 -1.442695, %v3423_v61 }
  0xc2   : > { %v684_v15 = vmul.f32 %v2867_v60, %v683_v7  ;;  %v2656_v19 = vmul.f32 -1.442695, %v3392_v9  ;;  %v2657_v25 = vmul.f32 -1.442695, %v3398_v13  ;;  %v693_v46 = vor.u32 1.1754944e-38, %v692_v36 }
  0xc3   : > { %v670_v16 = vadd.f32 %v2865_v59, %v669_v12  ;;  %v2869_v41 = vpop.eup %2868 }
  0xc4   : > { %v685_v24 = vadd.f32 %v2867_v60, %v684_v15  ;;  %2870 = vpow2.f32 %v2656_v19 }
  0xc5   : > { %v674_v23 = vsel %vm673_vm4, %v2865_v59, %v670_v16  ;;  %2872 = vpow2.f32 %v2663_v21  ;;  %v3445_v16 = vadd.f32 %v3394_v10, %v3359_v32 }
  0xc6   : > { %v679_v27 = vsel %vm676_vm5, %v678_v20, %v674_v23  ;;  %v689_v43 = vsel %vm688_vm7, %v2867_v60, %v685_v24  ;;  %2874 = vpow2.f32 %v2657_v25 }
  0xc7   : > { %v3406_v37 = vmul.f32 %v679_v27, %v526_v42  ;;  %v3414_v42 = vadd.f32 1.0, %v2869_v41  ;;  %v694_v52 = vsel %vm691_vm8, %v693_v46, %v689_v43  ;;  %2876 = vpow2.f32 %v2660_v45 }
  0xc8   : > { %v535_v47 = vpop.f32.mrf.mxu0  ;;  %v3419_v60 = vmul.f32 %v694_v52, %v3376_v44  ;;  %v2664_v46 = vmul.f32 -1.442695, %v3445_v16 }
  0xc9   : > { %5438 = vst [vmem:[#allocation8_spill] sm:$0xff] %v3406_v37  ;;  %894 = vrot.lane.b32.xlu2 %v3406_v37, %s3107_s16  ;;  %v564_v7 = vpop.f32.mrf.mxu1  ;;  %v3450_v23 = vadd.f32 %v535_v47, %v3368_v35  ;;  %v3467_v52 = vpop.permute.xlu1 %1291  ;;  %vm731_vm15 = vweird.f32 %v3414_v42 }
  0xca   : > { %v2871_v49 = vpop.eup %2870  ;;  %5439 = vst [vmem:[#allocation9_spill] sm:$0xff] %v3419_v60  ;;  %v3453_v27 = vadd.f32 %v564_v7, %v3368_v35  ;;  %v3471_v7 = vpop.permute.xlu2 %1612 }
  0xcb   : > { %v620_v53 = vadd.f32 1.0, %v2871_v49  ;;  %v2873_v57 = vpop.eup %2872  ;;  %v2666_v41 = vmul.f32 -1.442695, %v3450_v23  ;;  %5440 = vst [vmem:[#allocation10_spill] sm:$0xff] %v3467_v52 }
  0xcc   : > { %v2875_v59 = vpop.eup %2874  ;;  %v3430_v63 = vadd.f32 1.0, %v2873_v57  ;;  %v2667_v47 = vmul.f32 -1.442695, %v3453_v27 }
  0xcd   : > { %2878 = vrcp.f32 %v620_v53  ;;  %v3426_v62 = vadd.f32 1.0, %v2875_v59  ;;  %v2877_v0 = vpop.eup %2876  ;;  %v645_v20 = vand.u32 2147483647, %v620_v53  ;;  %v647_v21 = vand.u32 2147483648, %v620_v53 }
  0xce   : > { %2880 = vrcp.f32 %v3414_v42  ;;  %v3441_v12 = vadd.f32 1.0, %v2877_v0  ;;  %vm641_vm10 = vweird.f32 %v620_v53  ;;  %vm746_vm5 = vweird.f32 %v3430_v63 }
  0xcf   : > { %2882 = vrcp.f32 %v3426_v62  ;;  %v648_v35 = vor.u32 1.1754944e-38, %v647_v21  ;;  %vm646_vm12 = vcmp.eq.f32.partialorder %v645_v20, 8.507059e+37  ;;  %v660_v21 = vand.u32 2147483647, %v3426_v62 }
  0xd0   : > { %v538_v5 = vpop.f32.mrf.mxu0  ;;  %2884 = vrcp.f32 %v3430_v63  ;;  %vm656_vm14 = vweird.f32 %v3426_v62  ;;  %vm701_vm8 = vweird.f32 %v3441_v12 }
  0xd1   : > { %910 = vrot.lane.b32.xlu2 %v3419_v60, %s3107_s16  ;;  %2886 = vpow2.f32 %v2661_v2  ;;  %v3456_v36 = vadd.f32 %v538_v5, %v3379_v48  ;;  %v662_v5 = vand.u32 2147483648, %v3426_v62  ;;  %vm661_vm2 = vcmp.eq.f32.partialorder %v660_v21, 8.507059e+37  ;;  %v3524_v21 = vpop.permute.xlu1 %1351 }
  0xd2   : > { %2888 = vrcp.f32 %v3441_v12 }
  0xd3   : > { %v2879_v44 = vpop.eup %2878  ;;  %v2668_v0 = vmul.f32 -1.442695, %v3456_v36  ;;  %2890 = vpow2.f32 %v2666_v41 }
  0xd4   : > { %v3436_v38 = vpop.eup %2880  ;;  %v637_v6 = vmul.f32 %v2879_v44, %v620_v53  ;;  %vm642_vm9 = vweird.f32 %v2879_v44  ;;  %2892 = vpow2.f32 %v2667_v47 }
  0xd5   : > { %v727_v19 = vmul.f32 %v3436_v38, %v3414_v42  ;;  %v2883_v24 = vpop.eup %2882  ;;  %vm643_vm11 = vmor %vm641_vm10, %vm642_vm9  ;;  %2894 = vpow2.f32 %v2668_v0  ;;  %vm732_vm1 = vweird.f32 %v3436_v38 }
  0xd6   : > { %v638_v15 = vsub.f32 1.0, %v637_v6  ;;  %v652_v10 = vmul.f32 %v2883_v24, %v3426_v62  ;;  %v3463_v43 = vpop.eup %2884  ;;  %vm657_vm13 = vweird.f32 %v2883_v24  ;;  %2896 = vpow2.f32 %v2664_v46  ;;  %vm3516_vm3 = vmor %vm731_vm15, %vm732_vm1 }
  0xd7   : > { %v2887_v49 = vpop.eup %2886  ;;  %v728_v57 = vsub.f32 1.0, %v727_v19  ;;  %vm3487_vm0 = vmor %vm656_vm14, %vm657_vm13  ;;  %vm747_vm6 = vweird.f32 %v3463_v43 }
  0xd8   : > { %v639_v25 = vmul.f32 %v2879_v44, %v638_v15  ;;  %v653_v45 = vsub.f32 1.0, %v652_v10  ;;  %v540_v6 = vpop.f32.mrf.mxu0  ;;  %v742_v15 = vmul.f32 %v3463_v43, %v3430_v63  ;;  %v3482_v20 = vpop.eup %2888  ;;  %vm3556_vm7 = vmor %vm746_vm5, %vm747_vm6 }
  0xd9   : > { %963 = vrot.lane.b32.xlu2 %v3406_v37, %s3108_s22  ;;  %v729_v10 = vmul.f32 %v3436_v38, %v728_v57  ;;  %v3494_v41 = vadd.f32 %v540_v6, %v3385_v56  ;;  %v735_v57 = vand.u32 2147483647, %v3414_v42  ;;  %vm702_vm10 = vweird.f32 %v3482_v20 }
  0xda   : > { %v640_v40 = vadd.f32 %v2879_v44, %v639_v25  ;;  %v654_v2 = vmul.f32 %v2883_v24, %v653_v45  ;;  %v3504_v45 = vadd.f32 %v3416_v54, %v3359_v32  ;;  %v743_v47 = vsub.f32 1.0, %v742_v15 }
  0xdb   : > { %v730_v46 = vadd.f32 %v3436_v38, %v729_v10  ;;  %v697_v32 = vmul.f32 %v3482_v20, %v3441_v12  ;;  %vm3531_vm4 = vcmp.eq.f32.partialorder %v735_v57, 8.507059e+37  ;;  %v752_v57 = vand.u32 2147483648, %v3430_v63 }
  0xdc   : > { %v644_v59 = vsel %vm643_vm11, %v2879_v44, %v640_v40  ;;  %v3479_v44 = vadd.f32 1.0, %v2887_v49  ;;  %v655_v19 = vadd.f32 %v2883_v24, %v654_v2  ;;  %v2670_v49 = vmul.f32 -1.442695, %v3494_v41  ;;  %vm3608_vm11 = vmor %vm701_vm8, %vm702_vm10 }
  0xdd   : > { %v649_v53 = vsel %vm646_vm12, %v648_v35, %v644_v59  ;;  %v663_v35 = vor.u32 1.1754944e-38, %v662_v5  ;;  %v737_v59 = vand.u32 2147483648, %v3414_v42  ;;  %v2665_v2 = vmul.f32 -1.442695, %v3504_v45 }
  0xde   : > { %v3477_v25 = vmul.f32 %v649_v53, %v3392_v9  ;;  %v3491_v9 = vpop.f32.mrf.mxu1  ;;  %v659_v62 = vsel %vm3487_vm0, %v2883_v24, %v655_v19  ;;  %2898 = vrcp.f32 %v3479_v44  ;;  %v2891_v24 = vpop.eup %2890  ;;  %v744_v15 = vmul.f32 %v3463_v43, %v743_v47 }
  0xdf   : > { %v664_v0 = vsel %vm661_vm2, %v663_v35, %v659_v62  ;;  %v2893_v53 = vpop.eup %2892  ;;  %v3521_v5 = vadd.f32 1.0, %v2891_v24  ;;  %2900 = vpow2.f32 %v2670_v49  ;;  %v738_v62 = vor.u32 1.1754944e-38, %v737_v59  ;;  %v3536_v35 = vpop.permute.xlu2 %1492 }
  0xe0   : > { %5441 = vst [vmem:[#allocation11_spill] sm:$0xff] %v3477_v25  ;;  %892 = vrot.lane.b32.xlu1 %v3477_v25, %s3107_s16  ;;  %v2895_v6 = vpop.eup %2894  ;;  %v3527_v19 = vmul.f32 %v664_v0, %v3398_v13  ;;  %v3529_v10 = vadd.f32 1.0, %v2893_v53  ;;  %v734_v47 = vsel %vm3516_vm3, %v3436_v38, %v730_v46  ;;  %v698_v49 = vsub.f32 1.0, %v697_v32 }
  0xe1   : > { %979 = vrot.lane.b32.xlu2 %v3419_v60, %s3108_s22  ;;  %v2897_v42 = vpop.eup %2896  ;;  %2902 = vrcp.f32 %v3521_v5  ;;  %v3550_v59 = vadd.f32 1.0, %v2895_v6  ;;  %v745_v38 = vadd.f32 %v3463_v43, %v744_v15  ;;  %v750_v0 = vand.u32 2147483647, %v3430_v63 }
  0xe2   : > { %5446 = vst [vmem:[#allocation12_spill] sm:$0xff] %v3527_v19  ;;  %2904 = vrcp.f32 %v3529_v10  ;;  %v739_v46 = vsel %vm3531_vm4, %v738_v62, %v734_v47  ;;  %v3560_v54 = vadd.f32 1.0, %v2897_v42  ;;  %v699_v63 = vmul.f32 %v3482_v20, %v698_v49 }
  0xe3   : > { %2906 = vpow2.f32 %v2665_v2  ;;  %v753_v15 = vor.u32 1.1754944e-38, %v752_v57  ;;  %v3573_v42 = vmul.f32 %v739_v46, %v3387_v58  ;;  %v749_v47 = vsel %vm3556_vm7, %v3463_v43, %v745_v38  ;;  %v3589_v43 = vpop.permute.xlu1 %1504 }
  0xe4   : > { %v3547_v13 = vpop.eup %2898  ;;  %2908 = vrcp.f32 %v3550_v59  ;;  %vm3578_vm9 = vcmp.eq.f32.partialorder %v750_v0, 8.507059e+37  ;;  %v707_v57 = vand.u32 2147483648, %v3441_v12  ;;  %v700_v53 = vadd.f32 %v3482_v20, %v699_v63 }
  0xe5   : > { %v2901_v32 = vpop.eup %2900  ;;  %v712_v2 = vmul.f32 %v3547_v13, %v3479_v44  ;;  %2910 = vrcp.f32 %v3560_v54  ;;  %v754_v18 = vsel %vm3578_vm9, %v753_v15, %v749_v47  ;;  %v810_v4 = vand.u32 2147483647, %v3529_v10 }
  0xe6   : > { %v569_v24 = vpop.f32.mrf.mxu1  ;;  %v3591_v0 = vadd.f32 1.0, %v2901_v32  ;;  %v812_v63 = vand.u32 2147483648, %v3529_v10  ;;  %vm716_vm14 = vweird.f32 %v3479_v44  ;;  %vm806_vm15 = vweird.f32 %v3529_v10 }
  0xe7   : > { %v3565_v6 = vpop.eup %2902  ;;  %v3570_v40 = vadd.f32 %v569_v24, %v3385_v56  ;;  %v705_v56 = vand.u32 2147483647, %v3441_v12  ;;  %v713_v24 = vsub.f32 1.0, %v712_v2  ;;  %vm811_vm1 = vcmp.eq.f32.partialorder %v810_v4, 8.507059e+37 }
  0xe8   : > { %908 = vrot.lane.b32.xlu1 %v3527_v19, %s3107_s16  ;;  %v2905_v62 = vpop.eup %2904  ;;  %v787_v49 = vmul.f32 %v3565_v6, %v3521_v5  ;;  %2912 = vrcp.f32 %v3591_v0  ;;  %vm792_vm2 = vweird.f32 %v3565_v6  ;;  %vm717_vm3 = vweird.f32 %v3547_v13 }
  0xe9   : > { %1263 = vperm.xlu2 %2824, %v3329_v29   ;;  %v2907_v14 = vpop.eup %2906  ;;  %v802_v58 = vmul.f32 %v2905_v62, %v3529_v10  ;;  %v2671_v2 = vmul.f32 -1.442695, %v3570_v40  ;;  %vm807_vm12 = vweird.f32 %v2905_v62  ;;  %vm3622_vm13 = vcmp.eq.f32.partialorder %v705_v56, 8.507059e+37  ;;  %vm3682_vm6 = vmor %vm716_vm14, %vm717_vm3 }
  0xea   : > { %v788_v38 = vsub.f32 1.0, %v787_v49  ;;  %v3597_v46 = vpop.eup %2908  ;;  %v3612_v49 = vpop.permute.xlu2 %1540  ;;  %v3614_v22 = vadd.f32 1.0, %v2907_v14  ;;  %v714_v14 = vmul.f32 %v3547_v13, %v713_v24  ;;  %v3635_v56 = vmul.f32 %v754_v18, %v3390_v8  ;;  %vm808_vm0 = vmor %vm806_vm15, %vm807_vm12 }
  0xeb   : > { %v803_v3 = vsub.f32 1.0, %v802_v58  ;;  %v817_v12 = vmul.f32 %v3597_v46, %v3550_v59  ;;  %v3628_v39 = vpop.eup %2910  ;;  %2914 = vpow2.f32 %v2671_v2  ;;  %v797_v18 = vand.u32 2147483648, %v3521_v5 }
  0xec   : > { %v789_v15 = vmul.f32 %v3565_v6, %v788_v38  ;;  %v704_v38 = vsel %vm3608_vm11, %v3482_v20, %v700_v53  ;;  %5457 = vst [vmem:[#allocation13_spill] sm:$0xff] %v3635_v56  ;;  %2916 = vrcp.f32 %v3614_v22  ;;  %v720_v20 = vand.u32 2147483647, %v3479_v44 }
  0xed   : > { %v804_v47 = vmul.f32 %v2905_v62, %v803_v3  ;;  %v818_v11 = vsub.f32 1.0, %v817_v12  ;;  %v757_v10 = vmul.f32 %v3628_v39, %v3560_v54  ;;  %vm791_vm4 = vweird.f32 %v3521_v5 }
  0xee   : > { %v790_v24 = vadd.f32 %v3565_v6, %v789_v15  ;;  %v3640_v32 = vpop.eup %2912  ;;  %vm3661_vm5 = vmor %vm791_vm4, %vm792_vm2  ;;  %vm3688_vm7 = vcmp.eq.f32.partialorder %v720_v20, 8.507059e+37  ;;  %vm822_vm9 = vweird.f32 %v3597_v46  ;;  %vm821_vm10 = vweird.f32 %v3550_v59 }
  0xef   : > { %v805_v3 = vadd.f32 %v2905_v62, %v804_v47  ;;  %v715_v47 = vadd.f32 %v3547_v13, %v714_v14  ;;  %v758_v14 = vsub.f32 1.0, %v757_v10  ;;  %vm3717_vm11 = vmor %vm821_vm10, %vm822_vm9  ;;  %vm762_vm12 = vweird.f32 %v3628_v39 }
  0xf0   : > { %961 = vrot.lane.b32.xlu1 %v3477_v25, %s3108_s22  ;;  %vm761_vm14 = vweird.f32 %v3560_v54 }
  0xf1   : > { %898 = vrot.lane.b32.xlu2 %v3573_v42, %s3107_s16  ;;  %v809_v60 = vsel %vm808_vm0, %v2905_v62, %v805_v3  ;;  %v795_v62 = vand.u32 2147483647, %v3521_v5  ;;  %v2915_v15 = vpop.eup %2914  ;;  %v819_v5 = vmul.f32 %v3597_v46, %v818_v11  ;;  %v798_v11 = vor.u32 1.1754944e-38, %v797_v18  ;;  %vm3745_vm15 = vmor %vm761_vm14, %vm762_vm12 }
  0xf2   : > { %2826 = vset.pattern.permute.xlu2 %v5350_v26  ;;  %v708_v26 = vor.u32 1.1754944e-38, %v707_v57  ;;  %v813_v57 = vor.u32 1.1754944e-38, %v812_v63  ;;  %v3665_v63 = vpop.permute.xlu1 %1552  ;;  %v3676_v12 = vpop.eup %2916  ;;  %v759_v18 = vmul.f32 %v3628_v39, %v758_v14  ;;  %vm852_vm0 = vweird.f32 %v3640_v32 }
  0xf3   : > { %vm796_vm8 = vcmp.eq.f32.partialorder %v795_v62, 8.507059e+37  ;;  %v820_v10 = vadd.f32 %v3597_v46, %v819_v5  ;;  %v772_v62 = vmul.f32 %v3676_v12, %v3614_v22  ;;  %vm777_vm4 = vweird.f32 %v3676_v12 }
  0xf4   : > { %v814_v8 = vsel %vm811_vm1, %v813_v57, %v809_v60  ;;  %v709_v2 = vsel %vm3622_vm13, %v708_v26, %v704_v38  ;;  %v722_v60 = vand.u32 2147483648, %v3479_v44  ;;  %v847_v26 = vmul.f32 %v3640_v32, %v3591_v0 }
  0xf5   : > { %v3654_v53 = vmul.f32 %v814_v8, %v3453_v27  ;;  %v794_v27 = vsel %vm3661_vm5, %v3565_v6, %v790_v24  ;;  %v3686_v6 = vpop.permute.xlu2 %1271  ;;  %v3693_v3 = vmul.f32 %v709_v2, %v3401_v17  ;;  %v3695_v8 = vadd.f32 1.0, %v2915_v15 }
  0xf6   : > { %5463 = vst [vmem:[#allocation15_spill] sm:$0xff] %v3686_v6  ;;  %v723_v57 = vor.u32 1.1754944e-38, %v722_v60  ;;  %v799_v24 = vsel %vm796_vm8, %v798_v11, %v794_v27  ;;  %v719_v44 = vsel %vm3682_vm6, %v3547_v13, %v715_v47  ;;  %v848_v20 = vsub.f32 1.0, %v847_v26 }
  0xf7   : > { %5458 = vst [vmem:[#allocation14_spill] sm:$0xff] %v3654_v53  ;;  %918 = vrot.lane.b32.xlu0 %v3654_v53, %s3107_s16  ;;  %v827_v17 = vand.u32 2147483648, %v3550_v59  ;;  %v3711_v13 = vmul.f32 %v799_v24, %v3450_v23  ;;  %v825_v2 = vand.u32 2147483647, %v3550_v59  ;;  %v3723_v15 = vadd.f32 %v3491_v9, %v3379_v48 }
  0xf8   : > { %977 = vrot.lane.b32.xlu1 %v3527_v19, %s3108_s22  ;;  %5466 = vst [vmem:[#allocation16_spill] sm:$0xff] %v3693_v3  ;;  %v724_v60 = vsel %vm3688_vm7, %v723_v57, %v719_v44  ;;  %2918 = vrcp.f32 %v3695_v8  ;;  %v824_v23 = vsel %vm3717_vm11, %v3597_v46, %v820_v10  ;;  %v849_v47 = vmul.f32 %v3640_v32, %v848_v20 }
  0xf9   : > { %914 = vrot.lane.b32.xlu2 %v3635_v56, %s3107_s16  ;;  %v760_v59 = vadd.f32 %v3628_v39, %v759_v18  ;;  %v773_v27 = vsub.f32 1.0, %v772_v62  ;;  %v828_v5 = vor.u32 1.1754944e-38, %v827_v17  ;;  %v3737_v48 = vmul.f32 %v724_v60, %v3423_v61 }
  0xfa   : > { %v3734_v26 = vpop.permute.xlu1 %1235  ;;  %v767_v9 = vand.u32 2147483648, %v3560_v54  ;;  %vm826_vm13 = vcmp.eq.f32.partialorder %v825_v2, 8.507059e+37  ;;  %v765_v46 = vand.u32 2147483647, %v3560_v54  ;;  %v2669_v11 = vmul.f32 -1.442695, %v3723_v15 }
  0xfb   : > { %5469 = vst [vmem:[#allocation17_spill] sm:$0xff] %v3737_v48  ;;  %v829_v14 = vsel %vm826_vm13, %v828_v5, %v824_v23  ;;  %v850_v57 = vadd.f32 %v3640_v32, %v849_v47  ;;  %v764_v24 = vsel %vm3745_vm15, %v3628_v39, %v760_v59  ;;  %v774_v54 = vmul.f32 %v3676_v12, %v773_v27 }
  0xfc   : > { %v857_v44 = vand.u32 2147483648, %v3591_v0  ;;  %v768_v10 = vor.u32 1.1754944e-38, %v767_v9  ;;  %v3761_v20 = vmul.f32 %v829_v14, %v3456_v36  ;;  %vm851_vm1 = vweird.f32 %v3591_v0 }
  0xfd   : > { %v3742_v58 = vpop.permute.xlu2 %1604  ;;  %v855_v18 = vand.u32 2147483647, %v3591_v0  ;;  %vm766_vm2 = vcmp.eq.f32.partialorder %v765_v46, 8.507059e+37  ;;  %2920 = vpow2.f32 %v2669_v11  ;;  %vm853_vm3 = vmor %vm851_vm1, %vm852_vm0  ;;  %v775_v2 = vadd.f32 %v3676_v12, %v774_v54 }
  0xfe   : > { %v2919_v61 = vpop.eup %2918  ;;  %v769_v39 = vsel %vm766_vm2, %v768_v10, %v764_v24  ;;  %v854_v62 = vsel %vm853_vm3, %v3640_v32, %v850_v57  ;;  %v858_v36 = vor.u32 1.1754944e-38, %v857_v44  ;;  %v782_v60 = vand.u32 2147483648, %v3614_v22  ;;  %v3809_v10 = vld [vmem:[%s5332_s3 + $0x8] sm:$0xff] }
  0xff   : > { %971 = vrot.lane.b32.xlu0 %v3711_v13, %s3108_s22  ;;  %v862_v17 = vmul.f32 %v2919_v61, %v3695_v8  ;;  %vm856_vm5 = vcmp.eq.f32.partialorder %v855_v18, 8.507059e+37  ;;  %v3773_v0 = vmul.f32 %v769_v39, %v3445_v16  ;;  %vm776_vm6 = vweird.f32 %v3614_v22  ;;  %5477 = vst [vmem:[#allocation23_spill] sm:$0xff] %v3809_v10 }
 0x100   : > { %896 = vrot.lane.b32.xlu1 %v3693_v3, %s3107_s16  ;;  %v780_v32 = vand.u32 2147483647, %v3614_v22  ;;  %v859_v4 = vsel %vm856_vm5, %v858_v36, %v854_v62  ;;  %vm778_vm7 = vmor %vm776_vm6, %vm777_vm4  ;;  %v783_v16 = vor.u32 1.1754944e-38, %v782_v60  ;;  %vm867_vm9 = vweird.f32 %v2919_v61 }
 0x101   : > { %967 = vrot.lane.b32.xlu2 %v3573_v42, %s3108_s22  ;;  %5472 = vst [vmem:[#allocation18_spill] sm:$0xff] %v3773_v0  ;;  %v863_v47 = vsub.f32 1.0, %v862_v17  ;;  %v779_v27 = vsel %vm778_vm7, %v3676_v12, %v775_v2  ;;  %v3787_v9 = vmul.f32 %v859_v4, %v3494_v41  ;;  %v872_v38 = vand.u32 2147483648, %v3695_v8 }
 0x102   : > { %v3777_v23 = vpop.permute.xlu1 %1283  ;;  %vm781_vm8 = vcmp.eq.f32.partialorder %v780_v32, 8.507059e+37  ;;  %vm866_vm10 = vweird.f32 %v3695_v8  ;;  %v870_v41 = vand.u32 2147483647, %v3695_v8  ;;  %v5479_v2 = vmov 7  }
 0x103   : > { %v2921_v59 = vpop.eup %2920  ;;  %5474 = vst [vmem:[#allocation20_spill] sm:$0xff] %v3787_v9  ;;  %v784_v22 = vsel %vm781_vm8, %v783_v16, %v779_v27  ;;  %v864_v14 = vmul.f32 %v2919_v61, %v863_v47  ;;  %vm868_vm11 = vmor %vm866_vm10, %vm867_vm9  ;;  %v873_v54 = vor.u32 1.1754944e-38, %v872_v38  ;;  %v5480_v60 = vmov 1  }
 0x104   : > { %v633_v46 = vadd.f32 1.0, %v2921_v59  ;;  %v3792_v12 = vmul.f32 %v784_v22, %v3504_v45  ;;  %vm871_vm12 = vcmp.eq.f32.partialorder %v870_v41, 8.507059e+37  ;;  %v386_v22 = vlaneseq }
 0x105   : > { %v3780_v5 = vpop.permute.xlu2 %1484  ;;  %v865_v11 = vadd.f32 %v2919_v61, %v864_v14 }
 0x106   : > { %5473 = vst [vmem:[#allocation19_spill] sm:$0xff] %v3780_v5  ;;  %2922 = vrcp.f32 %v633_v46  ;;  %v842_v47 = vand.u32 2147483648, %v633_v46  ;;  %vm836_vm14 = vweird.f32 %v633_v46  ;;  %v840_v59 = vand.u32 2147483647, %v633_v46 }
 0x107   : > { %973 = vrot.lane.b32.xlu0 %v3761_v20, %s3108_s22  ;;  %5475 = vst [vmem:[#allocation21_spill] sm:$0xff] %v3792_v12  ;;  %v869_v24 = vsel %vm868_vm11, %v2919_v61, %v865_v11  ;;  %v5492_v5 = vmov 6  }
 0x108   : > { %912 = vrot.lane.b32.xlu1 %v3737_v48, %s3107_s16  ;;  %v874_v18 = vsel %vm871_vm12, %v873_v54, %v869_v24  ;;  %v843_v16 = vor.u32 1.1754944e-38, %v842_v47  ;;  %vm841_vm0 = vcmp.eq.f32.partialorder %v840_v59, 8.507059e+37  ;;  %v3860_v54 = vpop.permute.xlu0 %1231  ;;  %v5489_v47 = vmov 2  }
 0x109   : > { %983 = vrot.lane.b32.xlu2 %v3635_v56, %s3108_s22  ;;  %v3815_v8 = vmul.f32 %v874_v18, %v3570_v40  ;;  %v5502_v56 = vmov 8  }
 0x10a   : > { %v3795_v57 = vpop.permute.xlu1 %1347 }
 0x10c   : > { %v2923_v44 = vpop.eup %2922 }
 0x10d   : > { %v3803_v45 = vpop.permute.xlu2 %1532  ;;  %v832_v39 = vmul.f32 %v2923_v44, %v633_v46  ;;  %vm837_vm13 = vweird.f32 %v2923_v44  ;;  %v3844_v46 = vand.u32 127, %v386_v22 }
 0x10e   : > { %5476 = vst [vmem:[#allocation22_spill] sm:$0xff] %v3803_v45  ;;  %vm838_vm15 = vmor %vm836_vm14, %vm837_vm13 }
 0x10f   : > { %906 = vrot.lane.b32.xlu0 %v3787_v9, %s3107_s16  ;;  %v833_v17 = vsub.f32 1.0, %v832_v39  ;;  %vm993_vm1 = vcmp.lt.s32.totalorder %v3844_v46, 127  ;;  %v5356_v39 = vmov 4   ;;  %vm924_vm2 = vcmp.lt.s32.totalorder %v3844_v46, 1 }
 0x110   : > { %965 = vrot.lane.b32.xlu1 %v3693_v3, %s3108_s22  ;;  %v3939_v3 = vld [vmem:[%s5332_s3 + $0x20] sm:$0xff]  ;;  %v5517_v52 = vand.u32 15, %v3844_v46  ;;  %vm1422_vm7 = vcmp.lt.s32.totalorder %v3844_v46, 16  ;;  %vm395_vm8 = vcmp.ge.s32.totalorder %v3844_v46, 16  ;;  %vm1683_vm9 = vcmp.lt.s32.totalorder %v3844_v46, 112 }
 0x111   : > { %900 = vrot.lane.b32.xlu2 %v3773_v0, %s3107_s16  ;;  %v834_v36 = vmul.f32 %v2923_v44, %v833_v17  ;;  %v3870_v17 = vpop.permute.xlu0 %1223  ;;  %5499 = vst [vmem:[#allocation37_spill] sm:$0xff] %v3939_v3 }
 0x112   : > { %v3817_v61 = vpop.permute.xlu1 %1496  ;;  %5486 = vst [vmem:[#allocation30_spill] sm:$0xff] %v3870_v17  ;;  %vm4046_vm5 = vcmp.le.s32.totalorder %v5517_v52, 14 }
 0x113   : > { %5478 = vst [vmem:[#allocation24_spill] sm:$0xff] %v3817_v61  ;;  %v835_v32 = vadd.f32 %v2923_v44, %v834_v36 }
 0x115   : > { %v839_v27 = vsel %vm838_vm15, %v2923_v44, %v835_v32 }
 0x116   : > { %v844_v11 = vsel %vm841_vm0, %v843_v16, %v839_v27  ;;  %v3888_v16 = vadd.s32 128, %v3844_v46 }
 0x117   : > { %1600 = vperm.xlu0 %2822, %v3348_v30   ;;  %v3840_v38 = vmul.f32 %v844_v11, %v3723_v15  ;;  %v5360_v11 = vmov 3  }
 0x118   : > { %981 = vrot.lane.b32.xlu1 %v3737_v48, %s3108_s22  ;;  %5490 = vst [vmem:[#allocation33_spill] sm:$0xff] %v3888_v16 }
 0x119   : > { %916 = vrot.lane.b32.xlu2 %v3792_v12, %s3107_s16 }
 0x11a   : > { %v3832_v4 = vpop.permute.xlu1 %1227 }
 0x11b   : > { %5481 = vst [vmem:[#allocation25_spill] sm:$0xff] %v3832_v4 }
 0x11f   : > { %991 = vrot.lane.b32.xlu0 %v3815_v8, %s3108_s22 }
 0x120   : > { %1219 = vperm.xlu1 %2823, %v3809_v10   ;;  %2827 = vset.pattern.permute.xlu0 %v5479_v2 }
 0x121   : > { %969 = vrot.lane.b32.xlu2 %v3773_v0, %s3108_s22 }
 0x122   : > { %v3842_v41 = vpop.permute.xlu1 %1275 }
 0x123   : > { %v3819_v62 = vpop.permute.xlu2 %894  ;;  %5482 = vst [vmem:[#allocation26_spill] sm:$0xff] %v3842_v41 }
 0x127   : > { %1544 = vperm.xlu0 %2827, %v3320_v28  }
 0x128   : > { %985 = vrot.lane.b32.xlu1 %v3792_v12, %s3108_s22 }
 0x129   : > { %987 = vrot.lane.b32.xlu2 %v3654_v53, %s3108_s22  ;;  %2825 = vset.pattern.permute.xlu1 %v5480_v60  ;;  %v3878_v60 = vld [vmem:[%s5332_s3 + $0x10] sm:$0xff] }
 0x12a   : > { %v3862_v44 = vpop.permute.xlu1 %1339  ;;  %5488 = vst [vmem:[#allocation32_spill] sm:$0xff] %v3878_v60 }
 0x12b   : > { %v3829_v40 = vpop.permute.xlu2 %910  ;;  %5485 = vst [vmem:[#allocation29_spill] sm:$0xff] %v3862_v44  ;;  %v5509_v44 = vmov 4  }
 0x12f   : > { %1536 = vperm.xlu0 %2827, %v3348_v30  }
 0x130   : > { %902 = vrot.lane.b32.xlu1 %v3711_v13, %s3107_s16 }
 0x131   : > { %904 = vrot.lane.b32.xlu2 %v3761_v20, %s3107_s16 }
 0x132   : > { %v3873_v36 = vpop.permute.xlu1 %1488 }
 0x133   : > { %v964_v14 = vpop.permute.xlu2 %963  ;;  %5487 = vst [vmem:[#allocation31_spill] sm:$0xff] %v3873_v36 }
 0x137   : > { %1524 = vperm.xlu0 %2827, %v3329_v29  }
 0x138   : > { %920 = vrot.lane.b32.xlu1 %v3840_v38, %s3107_s16 }
 0x139   : > { %989 = vrot.lane.b32.xlu2 %v3840_v38, %s3108_s22 }
 0x13b   : > { %v980_v24 = vpop.permute.xlu2 %979 }
 0x13c   : > { %v3854_v30 = vsel %vm993_vm1, %v964_v14, %v980_v24  ;;  %v3858_v15 = vsel %vm993_vm1, %v980_v24, %v964_v14  ;;  %v3027_v24 = vld [vmem:[%s5332_s3 + $0x38] sm:$0xff] }
 0x13d   : > { %5483 = vst [vmem:[#allocation27_spill] sm:$0xff] %v3854_v30 }
 0x13e   : > { %5484 = vst [vmem:[#allocation28_spill] sm:$0xff] %v3858_v15 }
 0x13f   : > { %2842 = vset.pattern.permute.xlu0 %v5356_v39  ;;  %v5366_v39 = vand.u32 15, %v3888_v16 }
 0x140   : > { %975 = vrot.lane.b32.xlu1 %v3787_v9, %s3108_s22  ;;  %1107 = vperm.xlu0 %2842, %v3320_v28   ;;  %v1216_v28 = vpop.permute.xlu0 %1215  ;;  %s3113_s22 = smov 112   ;;  %v5577_v9 = vld [vmem:[#allocation16_spill] sm:$0xff] }
 0x141   : > { %922 = vrot.lane.b32.xlu2 %v3815_v8, %s3107_s16  ;;  %vm3918_vm4 = vcmp.ge.s32.totalorder %v5366_v39, 1  ;;  %s5428_s16 = smov 16  }
 0x143   : > { %v1264_v18 = vpop.permute.xlu2 %1263 }
 0x144   : > { %v1294_v6 = vmul.f32 %v1264_v18, %v3477_v25  ;;  %v1295_v39 = vmul.f32 %v1264_v18, %v3527_v19 }
 0x148   : > { %1267 = vperm.xlu1 %2825, %v3809_v10   ;;  %1095 = vperm.xlu0 %2842, %v3878_v60   ;;  %v3904_v45 = vpop.permute.xlu0 %1616 }
 0x149   : > { %1596 = vperm.xlu2 %2826, %v3878_v60  }
 0x14b   : > { %v899_v32 = vpop.permute.xlu2 %898 }
 0x150   : > { %2828 = vset.pattern.permute.xlu1 %v5489_v47  ;;  %2846 = vset.pattern.permute.xlu0 %v5360_v11  ;;  %v3950_v19 = vpop.permute.xlu0 %1608  ;;  %v5574_v11 = vmov 4  }
 0x151   : > { %2829 = vset.pattern.permute.xlu2 %v5489_v47  ;;  %1327 = vperm.xlu1 %2828, %v3329_v29   ;;  %v5364_v47 = vand.u32 15, %v3844_v46  ;;  %5503 = vst [vmem:[#allocation40_spill] sm:$0xff] %v3950_v19 }
 0x152   : > { %1331 = vperm.xlu2 %2829, %v3809_v10   ;;  %v893_v59 = vpop.permute.xlu1 %892  ;;  %1067 = vperm.xlu0 %2846, %v3027_v24  }
 0x153   : > { %v915_v27 = vpop.permute.xlu2 %914  ;;  %vm3912_vm3 = vcmp.ge.s32.totalorder %v5364_v47, 1 }
 0x154   : > { %v3892_v22 = vsel %vm924_vm2, %v899_v32, %v915_v27  ;;  %v3896_v14 = vsel %vm924_vm2, %v915_v27, %v899_v32 }
 0x155   : > { %5491 = vst [vmem:[#allocation34_spill] sm:$0xff] %v3892_v22 }
 0x159   : > { %2830 = vset.pattern.permute.xlu1 %v5492_v5 }
 0x15a   : > { %2831 = vset.pattern.permute.xlu2 %v5492_v5  ;;  %1476 = vperm.xlu1 %2830, %v3329_v29   ;;  %v909_v32 = vpop.permute.xlu1 %908 }
 0x15b   : > { %1480 = vperm.xlu2 %2831, %v3809_v10   ;;  %v968_v27 = vpop.permute.xlu2 %967  ;;  %v925_v5 = vsel %vm924_vm2, %v893_v59, %v909_v32  ;;  %v933_v29 = vsel %vm924_vm2, %v909_v32, %v893_v59  ;;  %1052 = vperm.xlu0 %2846, %v3939_v3  }
 0x15c   : > { %v3928_v48 = vsel %vm3912_vm3, %v933_v29, 0.0  ;;  %v3932_v47 = vsel %vm3918_vm4, %v925_v5, 0.0 }
 0x15d   : > { %5497 = vst [vmem:[#allocation35_spill] sm:$0xff] %v3928_v48  ;;  %v1246_v59 = vmul.f32 %v1216_v28, %v3928_v48  ;;  %v1247_v32 = vmul.f32 %v1216_v28, %v3932_v47 }
 0x15e   : > { %5498 = vst [vmem:[#allocation36_spill] sm:$0xff] %v3932_v47 }
 0x15f   : > { %v3944_v29 = vadd.f32 %v1295_v39, %v1247_v32  ;;  %v3946_v17 = vadd.f32 %v1294_v6, %v1246_v59  ;;  %v3964_v6 = vld [vmem:[%s5332_s3] sm:$0xff] }
 0x160   : > { %5505 = vst [vmem:[#allocation42_spill] sm:$0xff] %v3964_v6 }
 0x161   : > { %5500 = vst [vmem:[#allocation38_spill] sm:$0xff] %v3944_v29 }
 0x162   : > { %5501 = vst [vmem:[#allocation39_spill] sm:$0xff] %v3946_v17  ;;  %2832 = vset.pattern.permute.xlu1 %v5479_v2  ;;  %v962_v5 = vpop.permute.xlu1 %961 }
 0x163   : > { %2833 = vset.pattern.permute.xlu2 %v5502_v56  ;;  %v984_v18 = vpop.permute.xlu2 %983  ;;  %1528 = vperm.xlu1 %2832, %v3809_v10  }
 0x164   : > { %v3955_v22 = vsel %vm993_vm1, %v968_v27, %v984_v18  ;;  %v3959_v39 = vsel %vm993_vm1, %v984_v18, %v968_v27  ;;  %1588 = vperm.xlu2 %2833, %v3964_v6   ;;  %v5508_v27 = vmov 3   ;;  %v3030_v18 = vld [vmem:[%s5332_s3 + $0x30] sm:$0xff] }
 0x165   : > { %5504 = vst [vmem:[#allocation41_spill] sm:$0xff] %v3959_v39 }
 0x169   : > { %v3981_v47 = vpop.permute.xlu0 %918 }
 0x16a   : > { %v978_v2 = vpop.permute.xlu1 %977 }
 0x16b   : > { %v901_v28 = vpop.permute.xlu2 %900  ;;  %v3969_v59 = vsel %vm993_vm1, %v962_v5, %v978_v2  ;;  %v3973_v32 = vsel %vm993_vm1, %v978_v2, %v962_v5  ;;  %2834 = vset.pattern.permute.xlu1 %v5502_v56 }
 0x16c   : > { %5506 = vst [vmem:[#allocation43_spill] sm:$0xff] %v3969_v59  ;;  %2835 = vset.pattern.permute.xlu2 %v5508_v27  ;;  %1592 = vperm.xlu1 %2834, %v3809_v10   ;;  %v5387_v59 = vmov 5  }
 0x16d   : > { %5507 = vst [vmem:[#allocation44_spill] sm:$0xff] %v3973_v32  ;;  %1062 = vperm.xlu2 %2835, %v3030_v18  }
 0x171   : > { %v972_v5 = vpop.permute.xlu0 %971 }
 0x172   : > { %v897_v17 = vpop.permute.xlu1 %896 }
 0x173   : > { %v917_v39 = vpop.permute.xlu2 %916 }
 0x174   : > { %2836 = vset.pattern.permute.xlu1 %v5509_v44 }
 0x175   : > { %2837 = vset.pattern.permute.xlu2 %v5509_v44  ;;  %1111 = vperm.xlu1 %2836, %v3030_v18  }
 0x176   : > { %1115 = vperm.xlu2 %2837, %v3027_v24  }
 0x179   : > { %v3993_v4 = vpop.permute.xlu0 %973 }
 0x17a   : > { %v913_v56 = vpop.permute.xlu1 %912 }
 0x17b   : > { %v970_v2 = vpop.permute.xlu2 %969  ;;  %v3987_v10 = vsel %vm924_vm2, %v897_v17, %v913_v56  ;;  %v3991_v41 = vsel %vm924_vm2, %v913_v56, %v897_v17  ;;  %v3031_v17 = vld [vmem:[%s5332_s3 + $0x28] sm:$0xff] }
 0x17c   : > { %5510 = vst [vmem:[#allocation45_spill] sm:$0xff] %v3987_v10 }
 0x17d   : > { %5511 = vst [vmem:[#allocation46_spill] sm:$0xff] %v3991_v41  ;;  %2838 = vset.pattern.permute.xlu1 %v5387_v59  ;;  %v5514_v41 = vmov 5  }
 0x17e   : > { %1175 = vperm.xlu1 %2838, %v3030_v18   ;;  %2839 = vset.pattern.permute.xlu2 %v5387_v59 }
 0x17f   : > { %1179 = vperm.xlu2 %2839, %v3027_v24  }
 0x181   : > { %v3997_v6 = vpop.permute.xlu0 %906 }
 0x182   : > { %v966_v48 = vpop.permute.xlu1 %965 }
 0x183   : > { %v988_v25 = vpop.permute.xlu2 %987 }
 0x186   : > { %2840 = vset.pattern.permute.xlu1 %v5508_v27 }
 0x187   : > { %1057 = vperm.xlu1 %2840, %v3031_v17   ;;  %2841 = vset.pattern.permute.xlu2 %v5509_v44 }
 0x188   : > { %1103 = vperm.xlu2 %2841, %v3939_v3   ;;  %v4022_v3 = vld [vmem:[%s5332_s3 + $0x18] sm:$0xff] }
 0x189   : > { %v4015_v10 = vpop.permute.xlu0 %1600 }
 0x18a   : > { %v982_v56 = vpop.permute.xlu1 %981 }
 0x18b   : > { %v4005_v18 = vpop.permute.xlu2 %904  ;;  %v4009_v24 = vsel %vm993_vm1, %v966_v48, %v982_v56  ;;  %v4013_v59 = vsel %vm993_vm1, %v982_v56, %v966_v48  ;;  %v937_v48 = vsel %vm924_vm2, %v917_v39, %v901_v28 }
 0x18c   : > { %5512 = vst [vmem:[#allocation47_spill] sm:$0xff] %v4009_v24 }
 0x18d   : > { %5513 = vst [vmem:[#allocation48_spill] sm:$0xff] %v4013_v59 }
 0x18f   : > { %2843 = vset.pattern.permute.xlu1 %v5514_v41 }
 0x190   : > { %1171 = vperm.xlu1 %2843, %v3031_v17   ;;  %2845 = vset.pattern.permute.xlu2 %v5508_v27  ;;  %v4035_v17 = vsel %vm3912_vm3, %v937_v48, 0.0  ;;  %v929_v48 = vsel %vm924_vm2, %v901_v28, %v917_v39  ;;  %v5523_v28 = vand.u32 15, %v3888_v16 }
 0x191   : > { %1047 = vperm.xlu2 %2845, %v4022_v3   ;;  %v4031_v56 = vpop.permute.xlu0 %991  ;;  %5516 = vst [vmem:[#allocation50_spill] sm:$0xff] %v4035_v17  ;;  %v1254_v59 = vmul.f32 %v3860_v54, %v4035_v17  ;;  %v4068_v39 = vsel %vm3918_vm4, %v929_v48, 0.0 }
 0x192   : > { %v4025_v29 = vpop.permute.xlu1 %1219  ;;  %5522 = vst [vmem:[#allocation53_spill] sm:$0xff] %v4068_v39  ;;  %vm4072_vm6 = vcmp.le.s32.totalorder %v5523_v28, 14  ;;  %v1305_v28 = vmul.f32 %v3777_v23, %v3654_v53 }
 0x193   : > { %5515 = vst [vmem:[#allocation49_spill] sm:$0xff] %v4025_v29  ;;  %v4027_v24 = vpop.permute.xlu2 %989 }
 0x198   : > { %2844 = vset.pattern.permute.xlu1 %v5508_v27 }
 0x199   : > { %1042 = vperm.xlu1 %2844, %v3878_v60   ;;  %2849 = vset.pattern.permute.xlu2 %v5514_v41  ;;  %v1302_v60 = vmul.f32 %v3438_v51, %v3773_v0  ;;  %v4060_v37 = vpop.permute.xlu0 %1544 }
 0x19a   : > { %v986_v32 = vpop.permute.xlu1 %985  ;;  %5521 = vst [vmem:[#allocation52_spill] sm:$0xff] %v4060_v37  ;;  %v999_v37 = vsel %vm993_vm1, %v972_v5, %v988_v25 }
 0x19b   : > { %v4042_v19 = vpop.permute.xlu2 %922  ;;  %v998_v27 = vsel %vm993_vm1, %v970_v2, %v986_v32  ;;  %v1006_v52 = vsel %vm993_vm1, %v986_v32, %v970_v2  ;;  %v1318_v29 = vadd.f32 %v1302_v60, %v1254_v59  ;;  %v1255_v60 = vmul.f32 %v3860_v54, %v4068_v39 }
 0x19c   : > { %v4058_v30 = vsel %vm4046_vm5, %v998_v27, 0.0  ;;  %v4080_v32 = vsel %vm4072_vm6, %v1006_v52, 0.0  ;;  %v1007_v59 = vsel %vm993_vm1, %v988_v25, %v972_v5  ;;  %v1303_v54 = vmul.f32 %v3438_v51, %v3792_v12 }
 0x19d   : > { %5520 = vst [vmem:[#allocation51_spill] sm:$0xff] %v4058_v30  ;;  %v1366_v55 = vmul.f32 %v3366_v34, %v4058_v30  ;;  %v4100_v25 = vsel %vm4046_vm5, %v999_v37, 0.0  ;;  %v1367_v5 = vmul.f32 %v3366_v34, %v4080_v32  ;;  %v1304_v52 = vmul.f32 %v3777_v23, %v3711_v13 }
 0x19e   : > { %5526 = vst [vmem:[#allocation54_spill] sm:$0xff] %v4080_v32  ;;  %v4114_v51 = vsel %vm4072_vm6, %v1007_v59, 0.0  ;;  %v1368_v23 = vmul.f32 %v3795_v57, %v4100_v25 }
 0x19f   : > { %v1382_v27 = vadd.f32 %v1366_v55, %v1318_v29  ;;  %v4091_v55 = vsel %vm3912_vm3, %v3896_v14, 0.0 }
 0x1a1   : > { %2847 = vset.pattern.permute.xlu1 %v5509_v44  ;;  %1398 = vrot.lane.b32.xlu2 %v1382_v27, %s5428_s16  ;;  %v4126_v27 = vpop.permute.xlu0 %1536 }
 0x1a2   : > { %1099 = vperm.xlu1 %2847, %v4022_v3   ;;  %v903_v29 = vpop.permute.xlu1 %902  ;;  %5529 = vst [vmem:[#allocation57_spill] sm:$0xff] %v4126_v27  ;;  %v1561_v16 = vmul.f32 %v4126_v27, %v3573_v42  ;;  %v1515_v27 = vmul.f32 %v3536_v35, %v4035_v17 }
 0x1a3   : > { %v4094_v2 = vpop.permute.xlu2 %1596  ;;  %v930_v14 = vsel %vm924_vm2, %v903_v29, %v3981_v47  ;;  %v938_v48 = vsel %vm924_vm2, %v3981_v47, %v903_v29  ;;  %v1319_v29 = vadd.f32 %v1303_v54, %v1255_v60 }
 0x1a4   : > { %5527 = vst [vmem:[#allocation55_spill] sm:$0xff] %v4094_v2  ;;  %v4118_v37 = vsel %vm3912_vm3, %v938_v48, 0.0  ;;  %v4122_v34 = vsel %vm3918_vm4, %v930_v14, 0.0  ;;  %v1513_v48 = vmul.f32 %v3873_v36, %v4091_v55  ;;  %v4137_v14 = vsel %vm4046_vm5, %v3955_v22, 0.0 }
 0x1a5   : > { %5528 = vst [vmem:[#allocation56_spill] sm:$0xff] %v4122_v34  ;;  %v1256_v47 = vmul.f32 %v3734_v26, %v4118_v37  ;;  %v1257_v59 = vmul.f32 %v3734_v26, %v4122_v34  ;;  %v1369_v2 = vmul.f32 %v3795_v57, %v4114_v51  ;;  %v1383_v44 = vadd.f32 %v1367_v5, %v1319_v29 }
 0x1a6   : > { %5530 = vst [vmem:[#allocation58_spill] sm:$0xff] %v4137_v14  ;;  %v1625_v54 = vmul.f32 %v4015_v10, %v4137_v14  ;;  %v1577_v36 = vadd.f32 %v1561_v16, %v1513_v48  ;;  %v1000_v22 = vsel %vm993_vm1, %v3993_v4, %v4027_v24 }
 0x1a7   : > { %v1320_v26 = vadd.f32 %v1304_v52, %v1256_v47  ;;  %v1321_v60 = vadd.f32 %v1305_v28, %v1257_v59  ;;  %v932_v59 = vsel %vm924_vm2, %v3997_v6, %v4042_v19 }
 0x1a8   : > { %v4154_v57 = vadd.f32 %v1625_v54, %v1577_v36  ;;  %v1563_v36 = vmul.f32 %v3612_v49, %v3773_v0 }
 0x1a9   : > { %1414 = vrot.lane.b32.xlu2 %v1383_v44, %s5428_s16  ;;  %v1384_v12 = vadd.f32 %v1368_v23, %v1320_v26  ;;  %v1385_v32 = vadd.f32 %v1369_v2, %v1321_v60  ;;  %v4171_v2 = vsel %vm4046_vm5, %v1000_v22, 0.0  ;;  %v4183_v47 = vpop.permute.xlu0 %1524 }
 0x1aa   : > { %5531 = vst [vmem:[#allocation59_spill] sm:$0xff] %v4154_v57  ;;  %v921_v5 = vpop.permute.xlu1 %920  ;;  %2848 = vset.pattern.permute.xlu1 %v5514_v41  ;;  %v1579_v26 = vadd.f32 %v1563_v36, %v1515_v27  ;;  %v1370_v60 = vmul.f32 %v3524_v21, %v4171_v2  ;;  %v1631_v54 = vmul.f32 %v3471_v7, %v4171_v2 }
 0x1ab   : > { %v931_v16 = vsel %vm924_vm2, %v4005_v18, %v921_v5  ;;  %v939_v52 = vsel %vm924_vm2, %v921_v5, %v4005_v18  ;;  %1400 = vrot.lane.b32.xlu1 %v1384_v12, %s5428_s16  ;;  %1416 = vrot.lane.b32.xlu0 %v1385_v32, %s5428_s16  ;;  %v1567_v18 = vmul.f32 %v3412_v50, %v3761_v20 }
 0x1ac   : > { %v4165_v44 = vpop.permute.xlu2 %1331  ;;  %v4175_v28 = vsel %vm3912_vm3, %v939_v52, 0.0  ;;  %v1306_v12 = vmul.f32 %v3355_v31, %v3761_v20  ;;  %v1627_v32 = vmul.f32 %v3742_v58, %v4058_v30  ;;  %v4195_v23 = vsel %vm3918_vm4, %v931_v16, 0.0 }
 0x1ad   : > { %5532 = vst [vmem:[#allocation60_spill] sm:$0xff] %v4165_v44  ;;  %v1258_v29 = vmul.f32 %v3432_v1, %v4175_v28  ;;  %v1519_v48 = vmul.f32 %v3362_v33, %v4175_v28  ;;  %v1008_v52 = vsel %vm993_vm1, %v4027_v24, %v3993_v4  ;;  %v4207_v30 = vsel %vm3918_vm4, %v932_v59, 0.0 }
 0x1ae   : > { %v1520_v27 = vmul.f32 %v3362_v33, %v4195_v23  ;;  %v1643_v16 = vadd.f32 %v1627_v32, %v1579_v26  ;;  %v1259_v0 = vmul.f32 %v3432_v1, %v4195_v23  ;;  %v1568_v33 = vmul.f32 %v3412_v50, %v3840_v38 }
 0x1af   : > { %v1583_v22 = vadd.f32 %v1567_v18, %v1519_v48  ;;  %v1322_v5 = vadd.f32 %v1306_v12, %v1258_v29  ;;  %v1522_v12 = vmul.f32 %v3589_v43, %v4207_v30  ;;  %v4224_v24 = vsel %vm4072_vm6, %v1008_v52, 0.0 }
 0x1b0   : > { %v1307_v59 = vmul.f32 %v3355_v31, %v3840_v38  ;;  %v940_v50 = vsel %vm924_vm2, %v4042_v19, %v3997_v6  ;;  %v1584_v48 = vadd.f32 %v1568_v33, %v1520_v27  ;;  %v1570_v26 = vmul.f32 %v3665_v63, %v3815_v8 }
 0x1b1   : > { %v1647_v36 = vadd.f32 %v1631_v54, %v1583_v22  ;;  %v1386_v17 = vadd.f32 %v1370_v60, %v1322_v5  ;;  %v1632_v54 = vmul.f32 %v3471_v7, %v4224_v24  ;;  %v1371_v22 = vmul.f32 %v3524_v21, %v4224_v24 }
 0x1b2   : > { %v976_v18 = vpop.permute.xlu1 %975  ;;  %v4247_v60 = vpop.permute.xlu0 %1107  ;;  %v1323_v31 = vadd.f32 %v1307_v59, %v1259_v0  ;;  %v1586_v6 = vadd.f32 %v1570_v26, %v1522_v12  ;;  %v959_v5 = vsel %vm3912_vm3, %v940_v50, 0.0  ;;  %v5535_v0 = vld [vmem:[#allocation24_spill] sm:$0xff]  ;;  %v5539_v59 = vld [vmem:[#allocation6_spill] sm:$0xff] }
 0x1b3   : > { %v1009_v4 = vsel %vm993_vm1, %v4031_v56, %v976_v18  ;;  %1659 = vrot.lane.b32.xlu0 %v1643_v16, %s3113_s22  ;;  %1663 = vrot.lane.b32.xlu2 %v1647_v36, %s3113_s22  ;;  %5533 = vst [vmem:[#allocation61_spill] sm:$0xff] %v4247_v60  ;;  %v1001_v19 = vsel %vm993_vm1, %v976_v18, %v4031_v56  ;;  %v5536_v36 = vld [vmem:[#allocation49_spill] sm:$0xff]  ;;  %v5538_v12 = vld [vmem:[#allocation52_spill] sm:$0xff] }
 0x1b4   : > { %v4228_v1 = vsel %vm4072_vm6, %v1009_v4, 0.0  ;;  %1402 = vrot.lane.b32.xlu1 %v1386_v17, %s5428_s16  ;;  %v934_v17 = vsel %vm924_vm2, %v3829_v40, %v3819_v62  ;;  %v1518_v27 = vmul.f32 %v5535_v0, %v4122_v34  ;;  %v1648_v16 = vadd.f32 %v1632_v54, %v1584_v48  ;;  %v5540_v26 = vld [vmem:[#allocation8_spill] sm:$0xff] }
 0x1b5   : > { %v4231_v32 = vpop.permute.xlu2 %1480  ;;  %v1634_v29 = vmul.f32 %v3904_v45, %v4228_v1  ;;  %v4260_v52 = vsel %vm3912_vm3, %v934_v17, 0.0  ;;  %v4268_v56 = vsel %vm4046_vm5, %v1001_v19, 0.0  ;;  %v1387_v18 = vadd.f32 %v1371_v22, %v1323_v31  ;;  %v5543_v31 = vld [vmem:[#allocation20_spill] sm:$0xff]  ;;  %v5544_v19 = vld [vmem:[#allocation10_spill] sm:$0xff] }
 0x1b6   : > { %5534 = vst [vmem:[#allocation62_spill] sm:$0xff] %v4260_v52  ;;  %v1248_v4 = vmul.f32 %v5536_v36, %v4260_v52  ;;  %v1566_v33 = vmul.f32 %v5538_v12, %v3654_v53  ;;  %v1260_v50 = vmul.f32 %v5539_v59, %v959_v5  ;;  %v1521_v54 = vmul.f32 %v3589_v43, %v959_v5  ;;  %v5545_v52 = vld [vmem:[#allocation7_spill] sm:$0xff] }
 0x1b7   : > { %v1650_v7 = vadd.f32 %v1634_v29, %v1586_v6  ;;  %v5541_v29 = vld [vmem:[#allocation27_spill] sm:$0xff]  ;;  %v1308_v6 = vmul.f32 %v5544_v19, %v5543_v31  ;;  %v1633_v43 = vmul.f32 %v3904_v45, %v4268_v56  ;;  %v1261_v45 = vmul.f32 %v5539_v59, %v4207_v30 }
 0x1b8   : > { %v4282_v48 = vsel %vm4046_vm5, %v5541_v29, 0.0  ;;  %v1582_v57 = vadd.f32 %v1566_v33, %v1518_v27  ;;  %v5546_v29 = vld [vmem:[#allocation40_spill] sm:$0xff] }
 0x1b9   : > { %5542 = vst [vmem:[#allocation52_spill] sm:$0xff] %v4282_v48  ;;  %v1360_v22 = vmul.f32 %v4165_v44, %v4282_v48  ;;  %v1630_v53 = vmul.f32 %v5546_v29, %v4114_v51  ;;  %v1324_v48 = vadd.f32 %v1308_v6, %v1260_v50 }
 0x1ba   : > { %v4270_v21 = vpop.permute.xlu1 %1267  ;;  %v4294_v34 = vpop.permute.xlu0 %1095 }
 0x1bb   : > { %5537 = vst [vmem:[#allocation24_spill] sm:$0xff] %v4270_v21  ;;  %v1296_v17 = vmul.f32 %v4270_v21, %v5540_v26  ;;  %1679 = vrot.lane.b32.xlu2 %v1648_v16, %s3113_s22  ;;  %1681 = vrot.lane.b32.xlu0 %v1650_v7, %s3113_s22  ;;  %v1372_v16 = vmul.f32 %v5545_v52, %v4268_v56  ;;  %v5547_v21 = vld [vmem:[#allocation44_spill] sm:$0xff] }
 0x1bc   : > { %1418 = vrot.lane.b32.xlu1 %v1387_v18, %s5428_s16  ;;  %v1569_v18 = vmul.f32 %v3665_v63, %v5543_v31  ;;  %v1646_v36 = vadd.f32 %v1630_v53, %v1582_v57  ;;  %v4307_v27 = vsel %vm4072_vm6, %v5547_v21, 0.0  ;;  %v1373_v57 = vmul.f32 %v5545_v52, %v4228_v1  ;;  %v5548_v21 = vld [vmem:[#allocation38_spill] sm:$0xff] }
 0x1bd   : > { %v1312_v26 = vadd.f32 %v1296_v17, %v1248_v4  ;;  %v1388_v4 = vadd.f32 %v1372_v16, %v1324_v48  ;;  %v1517_v52 = vmul.f32 %v5535_v0, %v4118_v37  ;;  %v1565_v16 = vmul.f32 %v5538_v12, %v3711_v13 }
 0x1be   : > { %v4292_v7 = vpop.permute.xlu2 %1588  ;;  %v1585_v44 = vadd.f32 %v1569_v18, %v1521_v54  ;;  %v5552_v18 = vld [vmem:[#allocation35_spill] sm:$0xff] }
 0x1bf   : > { %v4302_v60 = vadd.f32 %v1360_v22, %v1312_v26 }
 0x1c0   : > { %v1649_v17 = vadd.f32 %v1633_v43, %v1585_v44  ;;  %v1309_v44 = vmul.f32 %v5544_v19, %v3815_v8  ;;  %v5549_v19 = vld [vmem:[#allocation42_spill] sm:$0xff] }
 0x1c2   : > { %v1325_v48 = vadd.f32 %v1309_v44, %v1261_v45 }
 0x1c3   : > { %1677 = vrot.lane.b32.xlu0 %v1646_v36, %s3113_s22  ;;  %1404 = vrot.lane.b32.xlu2 %v1388_v4, %s5428_s16  ;;  %v4313_v63 = vpop.permute.xlu1 %1327  ;;  %v5553_v4 = vld [vmem:[#allocation43_spill] sm:$0xff] }
 0x1c4   : > { %1665 = vrot.lane.b32.xlu1 %v1649_v17, %s3113_s22  ;;  %v1359_v53 = vmul.f32 %v4313_v63, %v4307_v27  ;;  %v1068_v36 = vpop.permute.xlu0 %1067  ;;  %v1389_v22 = vadd.f32 %v1373_v57, %v1325_v48  ;;  %v4348_v0 = vsel %vm4046_vm5, %v5553_v4, 0.0  ;;  %v1581_v17 = vadd.f32 %v1565_v16, %v1517_v52  ;;  %v5561_v4 = vld [vmem:[#allocation29_spill] sm:$0xff] }
 0x1c5   : > { %v1084_v54 = vmul.f32 %v1068_v36, %v959_v5  ;;  %v1085_v6 = vmul.f32 %v1068_v36, %v4207_v30  ;;  %5554 = vst [vmem:[#allocation6_spill] sm:$0xff] %v4348_v0  ;;  %v1619_v45 = vmul.f32 %v4292_v7, %v4348_v0  ;;  %v926_v36 = vsel %vm924_vm2, %v3819_v62, %v3829_v40  ;;  %v5557_v40 = vld [vmem:[#allocation54_spill] sm:$0xff] }
 0x1c6   : > { %v4323_v33 = vadd.f32 %v1359_v53, %v5548_v21  ;;  %v1629_v53 = vmul.f32 %v5546_v29, %v4100_v25  ;;  %v5555_v29 = vld [vmem:[#allocation25_spill] sm:$0xff]  ;;  %v4372_v62 = vsel %vm3918_vm4, %v926_v36, 0.0 }
 0x1c7   : > { %v1063_v59 = vpop.permute.xlu2 %1062 }
 0x1c8   : > { %v4326_v50 = vmul.f32 %v1063_v59, %v4175_v28  ;;  %v4329_v26 = vmul.f32 %v1063_v59, %v4195_v23  ;;  %v5550_v28 = vld [vmem:[#allocation32_spill] sm:$0xff]  ;;  %v5551_v23 = vld [vmem:[#allocation11_spill] sm:$0xff]  ;;  %v1645_v48 = vadd.f32 %v1629_v53, %v1581_v17  ;;  %v1364_v17 = vmul.f32 %v5561_v4, %v4137_v14 }
 0x1c9   : > { %v1555_v5 = vmul.f32 %v4183_v47, %v5551_v23 }
 0x1cb   : > { %1032 = vperm.xlu0 %2846, %v5549_v19   ;;  %1420 = vrot.lane.b32.xlu2 %v1389_v22, %s5428_s16  ;;  %v1516_v22 = vmul.f32 %v3536_v35, %v4068_v39  ;;  %v1628_v35 = vmul.f32 %v3742_v58, %v5557_v40 }
 0x1cc   : > { %1159 = vperm.xlu1 %2848, %v5550_v28   ;;  %v4339_v43 = vpop.permute.xlu1 %1476  ;;  %v5559_v28 = vld [vmem:[#allocation21_spill] sm:$0xff] }
 0x1cd   : > { %v1507_v30 = vmul.f32 %v4339_v43, %v5552_v18 }
 0x1cf   : > { %v1571_v12 = vadd.f32 %v1555_v5, %v1507_v30  ;;  %v5560_v5 = vld [vmem:[#allocation26_spill] sm:$0xff] }
 0x1d0   : > { %v1116_v57 = vpop.permute.xlu2 %1115  ;;  %v1300_v30 = vmul.f32 %v5560_v5, %v3573_v42 }
 0x1d1   : > { %v4354_v44 = vadd.f32 %v1619_v45, %v1571_v12  ;;  %v1132_v21 = vmul.f32 %v1116_v57, %v5543_v31  ;;  %v1133_v59 = vmul.f32 %v1116_v57, %v3815_v8  ;;  %v1252_v31 = vmul.f32 %v5555_v29, %v4091_v55  ;;  %v5556_v8 = vld [vmem:[#allocation37_spill] sm:$0xff] }
 0x1d2   : > { %v1510_v45 = vmul.f32 %v4231_v32, %v4372_v62  ;;  %v5562_v12 = vld [vmem:[#allocation9_spill] sm:$0xff] }
 0x1d3   : > { %v1148_v52 = vadd.f32 %v1132_v21, %v1084_v54  ;;  %v1149_v16 = vadd.f32 %v1133_v59, %v1085_v6  ;;  %2852 = vset.pattern.permute.xlu0 %v5514_v41  ;;  %1163 = vperm.xlu2 %2849, %v4022_v3   ;;  %v5558_v6 = vmov 0   ;;  %v1564_v3 = vmul.f32 %v3612_v49, %v5559_v28  ;;  %v429_v49 = vld [vmem:[%s5333_s4 + $0x30] sm:$0xff] }
 0x1d4   : > { %1661 = vrot.lane.b32.xlu1 %v1645_v48, %s3113_s22  ;;  %1167 = vperm.xlu0 %2852, %v5556_v8   ;;  %v1316_v21 = vadd.f32 %v1300_v30, %v1252_v31  ;;  %v5563_v31 = vld [vmem:[#allocation34_spill] sm:$0xff]  ;;  %v5567_v30 = vmov 3   ;;  %v5582_v28 = vld [vmem:[#allocation39_spill] sm:$0xff] }
 0x1d5   : > { %v4376_v54 = vpop.permute.xlu1 %1528  ;;  %2850 = vset.pattern.permute.xlu1 %v5558_v6  ;;  %v1580_v58 = vadd.f32 %v1564_v3, %v1516_v22  ;;  %v5566_v3 = vld [vmem:[#allocation31_spill] sm:$0xff] }
 0x1d6   : > { %v1558_v53 = vmul.f32 %v4376_v54, %v5562_v12  ;;  %v1380_v23 = vadd.f32 %v1364_v17, %v1316_v21  ;;  %v5568_v17 = vld [vmem:[#allocation23_spill] sm:$0xff] }
 0x1d7   : > { %v1644_v36 = vadd.f32 %v1628_v35, %v1580_v58  ;;  %v5565_v35 = vld [vmem:[#allocation57_spill] sm:$0xff] }
 0x1d8   : > { %v4389_v57 = vadd.f32 %v1558_v53, %v1510_v45  ;;  %v5569_v53 = vld [vmem:[#allocation41_spill] sm:$0xff] }
 0x1d9   : > { %v1180_v59 = vpop.permute.xlu2 %1179  ;;  %v4423_v58 = vsel %vm4072_vm6, %v5569_v53, 0.0 }
 0x1da   : > { %v1196_v48 = vmul.f32 %v1180_v59, %v4268_v56  ;;  %v1197_v8 = vmul.f32 %v1180_v59, %v4228_v1  ;;  %v430_v56 = vld [vmem:[%s5333_s4 + $0x38] sm:$0xff]  ;;  %v4411_v1 = vsel %vm3918_vm4, %v5563_v31, 0.0  ;;  %v1626_v59 = vmul.f32 %v4015_v10, %v4423_v58 }
 0x1db   : > { %1675 = vrot.lane.b32.xlu2 %v1644_v36, %s3113_s22 }
 0x1dc   : > { %v4397_v18 = vadd.f32 %v1196_v48, %v1148_v52  ;;  %v4399_v40 = vadd.f32 %v1197_v8, %v1149_v16  ;;  %1768 = vperm.xlu1 %2850, %v429_v49   ;;  %1396 = vrot.lane.b32.xlu0 %v1380_v23, %s5428_s16  ;;  %v5564_v52 = vld [vmem:[#allocation13_spill] sm:$0xff]  ;;  %v1514_v23 = vmul.f32 %v5566_v3, %v4411_v1  ;;  %v5570_v48 = vld [vmem:[#allocation46_spill] sm:$0xff] }
 0x1dd   : > { %2851 = vset.pattern.permute.xlu2 %v5558_v6  ;;  %v1562_v16 = vmul.f32 %v5565_v35, %v5564_v52  ;;  %v4432_v8 = vsel %vm3912_vm3, %v5570_v48, 0.0  ;;  %v5572_v3 = vld [vmem:[#allocation45_spill] sm:$0xff] }
 0x1de   : > { %v4403_v22 = vpop.permute.xlu1 %1592  ;;  %v4441_v10 = vsel %vm3918_vm4, %v5572_v3, 0.0 }
 0x1df   : > { %v1578_v45 = vadd.f32 %v1562_v16, %v1514_v23  ;;  %v5575_v23 = vld [vmem:[#allocation30_spill] sm:$0xff] }
 0x1e0   : > { %v1251_v53 = vmul.f32 %v5575_v23, %v4441_v10 }
 0x1e1   : > { %v1642_v16 = vadd.f32 %v1626_v59, %v1578_v45 }
 0x1e3   : > { %1773 = vperm.xlu2 %2851, %v430_v56   ;;  %v4434_v56 = vpop.permute.xlu2 %1103 }
 0x1e4   : > { %2853 = vset.pattern.permute.xlu1 %v5567_v30  ;;  %1151 = vperm.xlu0 %2852, %v5549_v19   ;;  %5571 = vst [vmem:[#allocation27_spill] sm:$0xff] %v4434_v56  ;;  %v1250_v30 = vmul.f32 %v5575_v23, %v4432_v8  ;;  %v1253_v56 = vmul.f32 %v5555_v29, %v4411_v1 }
 0x1e5   : > { %1037 = vperm.xlu1 %2853, %v5568_v17   ;;  %v1365_v29 = vmul.f32 %v5561_v4, %v4423_v58 }
 0x1e7   : > { %v1112_v21 = vpop.permute.xlu1 %1111 }
 0x1e8   : > { %v1130_v49 = vmul.f32 %v1112_v21, %v3761_v20  ;;  %v1131_v36 = vmul.f32 %v1112_v21, %v3840_v38  ;;  %v5573_v20 = vld [vmem:[#allocation47_spill] sm:$0xff]  ;;  %v5579_v21 = vld [vmem:[#allocation5_spill] sm:$0xff] }
 0x1e9   : > { %v4446_v38 = vsel %vm4046_vm5, %v5573_v20, 0.0 }
 0x1ea   : > { %v1146_v31 = vadd.f32 %v1130_v49, %v4326_v50  ;;  %v1147_v35 = vadd.f32 %v1131_v36, %v4329_v26  ;;  %v5576_v50 = vld [vmem:[#allocation48_spill] sm:$0xff]  ;;  %v5578_v26 = vld [vmem:[#allocation15_spill] sm:$0xff]  ;;  %v1362_v59 = vmul.f32 %v5579_v21, %v4446_v38  ;;  %v5580_v49 = vld [vmem:[#allocation17_spill] sm:$0xff] }
 0x1eb   : > { %2854 = vset.pattern.permute.xlu2 %v5574_v11  ;;  %v4456_v15 = vsel %vm4072_vm6, %v5576_v50, 0.0  ;;  %v1298_v45 = vmul.f32 %v5578_v26, %v5577_v9  ;;  %v1299_v36 = vmul.f32 %v5578_v26, %v5580_v49  ;;  %v5581_v50 = vld [vmem:[#allocation24_spill] sm:$0xff]  ;;  %v4480_v26 = vpop.permute.xlu2 %1047 }
 0x1ec   : > { %1673 = vrot.lane.b32.xlu0 %v1642_v16, %s3113_s22  ;;  %1087 = vperm.xlu2 %2854, %v5549_v19   ;;  %v1358_v19 = vmul.f32 %v4313_v63, %v4348_v0  ;;  %v1363_v48 = vmul.f32 %v5579_v21, %v4456_v15  ;;  %v1297_v39 = vmul.f32 %v5581_v50, %v5562_v12 }
 0x1ed   : > { %2855 = vset.pattern.permute.xlu1 %v5574_v11  ;;  %2859 = vset.pattern.permute.xlu0 %v5558_v6  ;;  %v1314_v3 = vadd.f32 %v1298_v45, %v1250_v30  ;;  %v1315_v23 = vadd.f32 %v1299_v36, %v1251_v53  ;;  %v5587_v36 = vld [vmem:[#allocation14_spill] sm:$0xff] }
 0x1ee   : > { %1091 = vperm.xlu1 %2855, %v5568_v17   ;;  %v1374_v63 = vadd.f32 %v1358_v19, %v5582_v28  ;;  %v1301_v28 = vmul.f32 %v5560_v5, %v5564_v52  ;;  %v5586_v19 = vld [vmem:[#allocation61_spill] sm:$0xff] }
 0x1ef   : > { %v1378_v0 = vadd.f32 %v1362_v59, %v1314_v3  ;;  %v1379_v30 = vadd.f32 %v1363_v48, %v1315_v23  ;;  %v1128_v4 = vmul.f32 %v5586_v19, %v3711_v13 }
 0x1f0   : > { %v1176_v16 = vpop.permute.xlu1 %1175  ;;  %v1317_v53 = vadd.f32 %v1301_v28, %v1253_v56 }
 0x1f1   : > { %v1194_v20 = vmul.f32 %v1176_v16, %v4171_v2  ;;  %v1195_v11 = vmul.f32 %v1176_v16, %v4224_v24  ;;  %v5583_v2 = vld [vmem:[#allocation49_spill] sm:$0xff]  ;;  %v5588_v16 = vld [vmem:[#allocation36_spill] sm:$0xff] }
 0x1f2   : > { %v1249_v24 = vmul.f32 %v5583_v2, %v4372_v62  ;;  %v1381_v5 = vadd.f32 %v1365_v29, %v1317_v53  ;;  %v1508_v3 = vmul.f32 %v4339_v43, %v5588_v16  ;;  %v5592_v43 = vld [vmem:[#allocation22_spill] sm:$0xff] }
 0x1f3   : > { %v4482_v14 = vadd.f32 %v1194_v20, %v1146_v31  ;;  %v4484_v21 = vadd.f32 %v1195_v11, %v1147_v35  ;;  %v5584_v35 = vld [vmem:[#allocation28_spill] sm:$0xff] }
 0x1f4   : > { %1394 = vrot.lane.b32.xlu2 %v1378_v0, %s5428_s16  ;;  %1390 = vrot.lane.b32.xlu0 %v1374_v63, %s5428_s16  ;;  %v1313_v31 = vadd.f32 %v1297_v39, %v1249_v24  ;;  %v4499_v45 = vsel %vm4072_vm6, %v5584_v35, 0.0  ;;  %v5585_v0 = vld [vmem:[#allocation60_spill] sm:$0xff]  ;;  %v1129_v39 = vmul.f32 %v5586_v19, %v5587_v36  ;;  %v1559_v24 = vmul.f32 %v5592_v43, %v5577_v9 }
 0x1f5   : > { %2858 = vset.pattern.permute.xlu2 %v5558_v6  ;;  %v1361_v59 = vmul.f32 %v5585_v0, %v4499_v45  ;;  %v5589_v20 = vld [vmem:[#allocation56_spill] sm:$0xff]  ;;  %v1620_v35 = vmul.f32 %v4292_v7, %v4307_v27 }
 0x1f6   : > { %1410 = vrot.lane.b32.xlu1 %v1379_v30, %s5428_s16  ;;  %v5591_v63 = vld [vmem:[#allocation12_spill] sm:$0xff] }
 0x1f7   : > { %2856 = vset.pattern.permute.xlu1 %v5514_v41  ;;  %v1377_v11 = vadd.f32 %v1361_v59, %v1313_v31  ;;  %v5590_v41 = vld [vmem:[#allocation19_spill] sm:$0xff]  ;;  %v1556_v30 = vmul.f32 %v4183_v47, %v5591_v63 }
 0x1f8   : > { %v1511_v23 = vmul.f32 %v5590_v41, %v4432_v8 }
 0x1f9   : > { %v1058_v48 = vpop.permute.xlu1 %1057  ;;  %v1572_v29 = vadd.f32 %v1556_v30, %v1508_v3 }
 0x1fa   : > { %v1080_v61 = vmul.f32 %v1058_v48, %v4118_v37  ;;  %v1081_v56 = vmul.f32 %v1058_v48, %v5589_v20  ;;  %v5593_v37 = vld [vmem:[#allocation55_spill] sm:$0xff]  ;;  %v1575_v31 = vadd.f32 %v1559_v24, %v1511_v23  ;;  %v1123_v23 = vmul.f32 %v4294_v34, %v5580_v49 }
 0x1fb   : > { %v1399_v50 = vpop.permute.xlu2 %1398  ;;  %v1623_v28 = vmul.f32 %v5593_v37, %v4446_v38  ;;  %v1636_v0 = vadd.f32 %v1620_v35, %v1572_v29  ;;  %v5594_v48 = vld [vmem:[#allocation59_spill] sm:$0xff] }
 0x1fc   : > { %v1144_v13 = vadd.f32 %v1128_v4, %v1080_v61  ;;  %v1145_v2 = vadd.f32 %v1129_v39, %v1081_v56  ;;  %1412 = vrot.lane.b32.xlu2 %v1381_v5, %s5428_s16  ;;  %1408 = vrot.lane.b32.xlu0 %v1377_v11, %s5428_s16  ;;  %v1512_v4 = vmul.f32 %v5590_v41, %v4441_v10  ;;  %v426_v61 = vld [vmem:[%s5333_s4 + $0x18] sm:$0xff]  ;;  %v427_v41 = vld [vmem:[%s5333_s4 + $0x20] sm:$0xff] }
 0x1fd   : > { %v1639_v47 = vadd.f32 %v1623_v28, %v1575_v31  ;;  %v1624_v39 = vmul.f32 %v5593_v37, %v4456_v15  ;;  %v1122_v56 = vmul.f32 %v4294_v34, %v5577_v9  ;;  %v5595_v31 = vld [vmem:[#allocation8_spill] sm:$0xff] }
 0x1fe   : > { %1155 = vperm.xlu1 %2856, %v5568_v17   ;;  %v1557_v35 = vmul.f32 %v4376_v54, %v5595_v31 }
 0x202   : > { %v1172_v53 = vpop.permute.xlu1 %1171 }
 0x203   : > { %v1192_v59 = vmul.f32 %v1172_v53, %v4100_v25  ;;  %v1193_v5 = vmul.f32 %v1172_v53, %v4114_v51  ;;  %v1415_v19 = vpop.permute.xlu2 %1414  ;;  %v1560_v51 = vmul.f32 %v5592_v43, %v5580_v49  ;;  %v4569_v49 = vpop.permute.xlu0 %1052 }
 0x204   : > { %v4532_v17 = vsel %vm1422_vm7, %v1399_v50, %v1415_v19  ;;  %v4536_v7 = vsel %vm1422_vm7, %v1415_v19, %v1399_v50  ;;  %1655 = vrot.lane.b32.xlu2 %v1639_v47, %s3113_s22  ;;  %1667 = vrot.lane.b32.xlu0 %v1636_v0, %s3113_s22  ;;  %v1622_v0 = vmul.f32 %v4403_v22, %v4499_v45 }
 0x205   : > { %v1208_v36 = vadd.f32 %v1192_v59, %v1144_v13  ;;  %v1209_v25 = vadd.f32 %v1193_v5, %v1145_v2  ;;  %v1576_v3 = vadd.f32 %v1560_v51, %v1512_v4  ;;  %v428_v2 = vld [vmem:[%s5333_s4 + $0x28] sm:$0xff] }
 0x206   : > { %1657 = vrot.lane.b32.xlu1 %v5594_v48, %s3113_s22  ;;  %v1638_v19 = vadd.f32 %v1622_v0, %v4389_v57  ;;  %v5600_v0 = vld [vmem:[#allocation18_spill] sm:$0xff] }
 0x207   : > { %2857 = vset.pattern.permute.xlu1 %v5558_v6  ;;  %v1640_v20 = vadd.f32 %v1624_v39, %v1576_v3  ;;  %v425_v3 = vld [vmem:[%s5333_s4 + $0x10] sm:$0xff] }
 0x20b   : > { %v1043_v11 = vpop.permute.xlu1 %1042 }
 0x20c   : > { %v1074_v50 = vmul.f32 %v1043_v11, %v4432_v8  ;;  %v1075_v6 = vmul.f32 %v1043_v11, %v4441_v10  ;;  %1671 = vrot.lane.b32.xlu2 %v1640_v20, %s3113_s22  ;;  %1753 = vperm.xlu0 %2859, %v426_v61   ;;  %v1076_v8 = vmul.f32 %v4480_v26, %v4091_v55  ;;  %v423_v61 = vld [vmem:[%s5333_s4] sm:$0xff]  ;;  %v5598_v11 = vld [vmem:[#allocation58_spill] sm:$0xff] }
 0x20d   : > { %v4560_v30 = vpop.permute.xlu2 %1663  ;;  %v1077_v10 = vmul.f32 %v4480_v26, %v4411_v1  ;;  %v5596_v1 = vld [vmem:[#allocation62_spill] sm:$0xff]  ;;  %v5597_v26 = vld [vmem:[#allocation52_spill] sm:$0xff] }
 0x20e   : > { %v4562_v13 = vadd.f32 %v1122_v56, %v1074_v50  ;;  %v4564_v9 = vadd.f32 %v1123_v23, %v1075_v6  ;;  %1758 = vperm.xlu1 %2857, %v427_v41   ;;  %v424_v6 = vld [vmem:[%s5333_s4 + $0x8] sm:$0xff] }
 0x214   : > { %1763 = vperm.xlu2 %2858, %v428_v2   ;;  %v1100_v34 = vpop.permute.xlu1 %1099 }
 0x215   : > { %v1124_v43 = vmul.f32 %v1100_v34, %v3573_v42  ;;  %v1125_v24 = vmul.f32 %v1100_v34, %v5564_v52  ;;  %v4577_v37 = vpop.permute.xlu2 %1679  ;;  %v1509_v42 = vmul.f32 %v4231_v32, %v5596_v1  ;;  %v1621_v52 = vmul.f32 %v4403_v22, %v5597_v26 }
 0x216   : > { %1392 = vrot.lane.b32.xlu1 %v4302_v60, %s5428_s16 }
 0x217   : > { %v1140_v28 = vadd.f32 %v1124_v43, %v1076_v8  ;;  %v1141_v29 = vadd.f32 %v1125_v24, %v1077_v10  ;;  %v1573_v54 = vadd.f32 %v1557_v35, %v1509_v42  ;;  %v5599_v43 = vld [vmem:[#allocation33_spill] sm:$0xff] }
 0x218   : > { %vm398_vm10 = vcmp.lt.s32.totalorder %v5599_v43, 240 }
 0x21c   : > { %1406 = vrot.lane.b32.xlu2 %v4323_v33, %s5428_s16  ;;  %s2548_s16 = scalar_lea.sflag [#allocation3], %s377_s12 }
 0x21d   : > { %v1417_v55 = vpop.permute.xlu0 %1416  ;;  %v1405_v47 = vpop.permute.xlu2 %1404 }
 0x21e   : > { %v1401_v53 = vpop.permute.xlu1 %1400  ;;  %1651 = vrot.lane.b32.xlu1 %v4354_v44, %s3113_s22  ;;  %v1637_v44 = vadd.f32 %v1621_v52, %v1573_v54 }
 0x21f   : > { %v1428_v60 = vsel %vm1422_vm7, %v1401_v53, %v1417_v55  ;;  %v1436_v33 = vsel %vm1422_vm7, %v1417_v55, %v1401_v53 }
 0x220   : > { %v1453_v32 = vsel %vm395_vm8, %v1436_v33, 0.0  ;;  %v4600_v59 = vadd.f32 %v1428_v60, %v1209_v25 }
 0x221   : > { %v4602_v5 = vadd.f32 %v1453_v32, %v1208_v36  ;;  %v5601_v32 = vld [vmem:[#allocation27_spill] sm:$0xff] }
 0x224   : > { %1653 = vrot.lane.b32.xlu2 %v1637_v44, %s3113_s22  ;;  %v1126_v44 = vmul.f32 %v5601_v32, %v5600_v0 }
 0x225   : > { %v1660_v4 = vpop.permute.xlu0 %1659  ;;  %v1421_v51 = vpop.permute.xlu2 %1420 }
 0x226   : > { %v1430_v39 = vsel %vm1422_vm7, %v1405_v47, %v1421_v51  ;;  %v1438_v22 = vsel %vm1422_vm7, %v1421_v51, %v1405_v47  ;;  %v1403_v48 = vpop.permute.xlu1 %1402  ;;  %1669 = vrot.lane.b32.xlu1 %v1638_v19, %s3113_s22  ;;  %v5602_v19 = vld [vmem:[#allocation21_spill] sm:$0xff] }
 0x227   : > { %v1457_v36 = vsel %vm395_vm8, %v1438_v22, 0.0  ;;  %v1474_v25 = vadd.f32 %v1430_v39, %v4399_v40  ;;  %v5603_v39 = vld [vmem:[#allocation50_spill] sm:$0xff]  ;;  %v5604_v22 = vld [vmem:[#allocation53_spill] sm:$0xff] }
 0x228   : > { %v1473_v57 = vadd.f32 %v1457_v36, %v4397_v18 }
 0x22c   : > { %1748 = vperm.xlu2 %2858, %v425_v3  }
 0x22d   : > { %v1682_v20 = vpop.permute.xlu0 %1681  ;;  %v1164_v56 = vpop.permute.xlu2 %1163 }
 0x22e   : > { %v1188_v41 = vmul.f32 %v1164_v56, %v5598_v11  ;;  %v1189_v23 = vmul.f32 %v1164_v56, %v4423_v58  ;;  %v1419_v50 = vpop.permute.xlu1 %1418  ;;  %1738 = vperm.xlu1 %2857, %v423_v61   ;;  %v5605_v56 = vld [vmem:[#allocation51_spill] sm:$0xff]  ;;  %v5606_v11 = vld [vmem:[#allocation54_spill] sm:$0xff] }
 0x22f   : > { %v1437_v51 = vsel %vm1422_vm7, %v1419_v50, %v1403_v48 }
 0x230   : > { %v4623_v40 = vadd.f32 %v1188_v41, %v1140_v28  ;;  %v4625_v18 = vadd.f32 %v1189_v23, %v1141_v29  ;;  %v1455_v36 = vsel %vm395_vm8, %v1437_v51, 0.0 }
 0x234   : > { %1743 = vperm.xlu2 %2858, %v424_v6  }
 0x235   : > { %v4631_v2 = vpop.permute.xlu0 %1677  ;;  %v1676_v34 = vpop.permute.xlu2 %1675 }
 0x236   : > { %v1688_v8 = vsel %vm1683_vm9, %v1660_v4, %v1676_v34  ;;  %v1696_v58 = vsel %vm1683_vm9, %v1676_v34, %v1660_v4  ;;  %v1666_v10 = vpop.permute.xlu1 %1665  ;;  %v1127_v4 = vmul.f32 %v5601_v32, %v5602_v19  ;;  %v5608_v34 = vld [vmem:[#allocation11_spill] sm:$0xff] }
 0x237   : > { %v1691_v24 = vsel %vm1683_vm9, %v1666_v10, %v1682_v20  ;;  %v1699_v28 = vsel %vm1683_vm9, %v1682_v20, %v1666_v10  ;;  %v1698_v20 = vsel %vm1683_vm9, %v4577_v37, %v4560_v30 }
 0x238   : > { %v1719_v29 = vsel %vm398_vm10, %v1699_v28, 0.0  ;;  %v1734_v35 = vadd.f32 %v1691_v24, %v1473_v57  ;;  %v1471_v28 = vadd.f32 %v1455_v36, %v4482_v14  ;;  %v1717_v14 = vsel %vm398_vm10, %v1698_v20, 0.0 }
 0x239   : > { %v1735_v55 = vadd.f32 %v1719_v29, %v1474_v25 }
 0x23d   : > { %v1033_v47 = vpop.permute.xlu0 %1032  ;;  %v1774_v42 = vpop.permute.xlu2 %1773 }
 0x23e   : > { %v1160_v52 = vpop.permute.xlu1 %1159  ;;  %v4666_v25 = vadd.f32 %v1774_v42, %v1734_v35  ;;  %v1071_v6 = vmul.f32 %v1033_v47, %v5588_v16  ;;  %v1451_v16 = vsel %vm395_vm8, %v4536_v7, 0.0 }
 0x23f   : > { %v1186_v53 = vmul.f32 %v1160_v52, %v4446_v38  ;;  %v1187_v60 = vmul.f32 %v1160_v52, %v4456_v15  ;;  %v1078_v38 = vmul.f32 %v4569_v49, %v5603_v39  ;;  %v1079_v15 = vmul.f32 %v4569_v49, %v5604_v22 }
 0x241   : > { %v4647_v33 = vadd.f32 %v1186_v53, %v4562_v13  ;;  %v4650_v54 = vadd.f32 %v1187_v60, %v4564_v9  ;;  %v1142_v13 = vadd.f32 %v1126_v44, %v1078_v38  ;;  %v1429_v9 = vsel %vm1422_vm7, %v1403_v48, %v1419_v50  ;;  %v5607_v48 = vld [vmem:[#allocation35_spill] sm:$0xff] }
 0x242   : > { %v1143_v61 = vadd.f32 %v1127_v4, %v1079_v15  ;;  %v1070_v50 = vmul.f32 %v1033_v47, %v5607_v48  ;;  %v1472_v29 = vadd.f32 %v1429_v9, %v4484_v21  ;;  %v4682_v53 = vadd.f32 %v1774_v42, %v1735_v55  ;;  %v5609_v9 = vld [vmem:[#allocation6_spill] sm:$0xff] }
 0x243   : > { %v2686_v60 = vmul.f32 -1.442695, %v4666_v25  ;;  %v1713_v44 = vsel %vm398_vm10, %v1696_v58, 0.0 }
 0x244   : > { %v1733_v47 = vadd.f32 %v1717_v14, %v1472_v29  ;;  %v2687_v19 = vmul.f32 -1.442695, %v4682_v53 }
 0x245   : > { %2924 = vpow2.f32 %v2686_v60 }
 0x246   : > { %v4668_v57 = vpop.permute.xlu1 %1661  ;;  %v1168_v3 = vpop.permute.xlu0 %1167  ;;  %2926 = vpow2.f32 %v2687_v19 }
 0x247   : > { %v1190_v49 = vmul.f32 %v1168_v3, %v5605_v56  ;;  %v1191_v41 = vmul.f32 %v1168_v3, %v5606_v11  ;;  %v1088_v23 = vpop.permute.xlu2 %1087 }
 0x248   : > { %v1118_v10 = vmul.f32 %v1088_v23, %v5608_v34  ;;  %v1119_v24 = vmul.f32 %v1088_v23, %v5591_v63  ;;  %v1690_v63 = vsel %vm1683_vm9, %v4560_v30, %v4577_v37 }
 0x249   : > { %v1206_v35 = vadd.f32 %v1190_v49, %v1142_v13  ;;  %v1207_v52 = vadd.f32 %v1191_v41, %v1143_v61  ;;  %v1732_v21 = vadd.f32 %v1690_v63, %v1471_v28 }
 0x24a   : > { %v1134_v0 = vadd.f32 %v1118_v10, %v1070_v50  ;;  %v1135_v32 = vadd.f32 %v1119_v24, %v1071_v6 }
 0x24b   : > { %v1467_v55 = vadd.f32 %v1451_v16, %v1206_v35  ;;  %v1468_v42 = vadd.f32 %v4532_v17, %v1207_v52  ;;  %v2925_v22 = vpop.eup %2924 }
 0x24c   : > { %v4712_v13 = vadd.f32 1.0, %v2925_v22  ;;  %v2927_v20 = vpop.eup %2926 }
 0x24d   : > { %v4706_v39 = vadd.f32 %v1688_v8, %v1467_v55  ;;  %v4708_v38 = vadd.f32 %v1713_v44, %v1468_v42  ;;  %v4724_v48 = vadd.f32 1.0, %v2927_v20 }
 0x24e   : > { %v1769_v7 = vpop.permute.xlu1 %1768  ;;  %v4698_v4 = vpop.permute.xlu0 %1396  ;;  %vm2071_vm4 = vweird.f32 %v4712_v13 }
 0x24f   : > { %v4700_v51 = vadd.f32 %v1769_v7, %v1732_v21  ;;  %v4702_v30 = vadd.f32 %v1769_v7, %v1733_v47  ;;  %v4704_v37 = vpop.permute.xlu2 %1394 }
 0x251   : > { %v2684_v17 = vmul.f32 -1.442695, %v4700_v51  ;;  %v2685_v58 = vmul.f32 -1.442695, %v4702_v30 }
 0x253   : > { %2928 = vpow2.f32 %v2684_v17 }
 0x254   : > { %2930 = vpow2.f32 %v2685_v58  ;;  %v1689_v58 = vsel %vm1683_vm9, %v4668_v57, %v4631_v2 }
 0x255   : > { %2932 = vrcp.f32 %v4712_v13 }
 0x256   : > { %v1152_v15 = vpop.permute.xlu0 %1151 }
 0x257   : > { %v1182_v36 = vmul.f32 %v1152_v15, %v5609_v9  ;;  %v1183_v3 = vmul.f32 %v1152_v15, %v4307_v27  ;;  %v4716_v61 = vpop.permute.xlu2 %1412  ;;  %v4718_v8 = vpop.permute.xlu1 %1037 }
 0x259   : > { %v2929_v56 = vpop.eup %2928  ;;  %v4720_v49 = vadd.f32 %v1182_v36, %v1134_v0  ;;  %v4722_v11 = vadd.f32 %v1183_v3, %v1135_v32  ;;  %v1697_v32 = vsel %vm1683_vm9, %v4631_v2, %v4668_v57 }
 0x25a   : > { %v2931_v41 = vpop.eup %2930  ;;  %v1852_v23 = vadd.f32 1.0, %v2929_v56  ;;  %v1715_v3 = vsel %vm398_vm10, %v1697_v32, 0.0 }
 0x25b   : > { %v1853_v50 = vadd.f32 1.0, %v2931_v41  ;;  %v4734_v10 = vpop.eup %2932 }
 0x25c   : > { %2934 = vrcp.f32 %v1852_v23  ;;  %v2067_v0 = vmul.f32 %v4734_v10, %v4712_v13  ;;  %v2047_v16 = vand.u32 2147483648, %v1852_v23  ;;  %v2045_v47 = vand.u32 2147483647, %v1852_v23 }
 0x25d   : > { %2936 = vrcp.f32 %v1853_v50  ;;  %v2062_v55 = vand.u32 2147483648, %v1853_v50  ;;  %v2060_v7 = vand.u32 2147483647, %v1853_v50  ;;  %vm2041_vm13 = vweird.f32 %v1852_v23 }
 0x25e   : > { %v4727_v27 = vpop.permute.xlu0 %1673  ;;  %2938 = vrcp.f32 %v4724_v48  ;;  %v2068_v15 = vsub.f32 1.0, %v2067_v0  ;;  %v2048_v9 = vor.u32 1.1754944e-38, %v2047_v16  ;;  %vm2056_vm15 = vweird.f32 %v1853_v50 }
 0x25f   : > { %v4730_v6 = vpop.permute.xlu2 %1655  ;;  %vm2046_vm0 = vcmp.eq.f32.partialorder %v2045_v47, 8.507059e+37  ;;  %v2063_v56 = vor.u32 1.1754944e-38, %v2062_v55  ;;  %vm2061_vm2 = vcmp.eq.f32.partialorder %v2060_v7, 8.507059e+37  ;;  %vm2072_vm3 = vweird.f32 %v4734_v10 }
 0x260   : > { %v4732_v34 = vpop.permute.xlu1 %1091  ;;  %v2069_v57 = vmul.f32 %v4734_v10, %v2068_v15  ;;  %v2077_v47 = vand.u32 2147483648, %v4712_v13  ;;  %v2075_v55 = vand.u32 2147483647, %v4712_v13  ;;  %vm4787_vm6 = vmor %vm2071_vm4, %vm2072_vm3  ;;  %v2092_v7 = vand.u32 2147483648, %v4724_v48 }
 0x262   : > { %v2935_v24 = vpop.eup %2934 }
 0x263   : > { %v2937_v28 = vpop.eup %2936  ;;  %v2037_v29 = vmul.f32 %v2935_v24, %v1852_v23  ;;  %vm2042_vm11 = vweird.f32 %v2935_v24  ;;  %v1730_v23 = vadd.f32 %v1689_v58, %v4602_v5  ;;  %v2070_v5 = vadd.f32 %v4734_v10, %v2069_v57 }
 0x264   : > { %v2052_v35 = vmul.f32 %v2937_v28, %v1853_v50  ;;  %v4736_v52 = vpop.eup %2938  ;;  %vm2057_vm12 = vweird.f32 %v2937_v28  ;;  %vm2043_vm14 = vmor %vm2041_vm13, %vm2042_vm11  ;;  %v1434_v58 = vsel %vm1422_vm7, %v4716_v61, %v4698_v4  ;;  %vm2086_vm11 = vweird.f32 %v4724_v48 }
 0x265   : > { %v2038_v60 = vsub.f32 1.0, %v2037_v29  ;;  %v2082_v44 = vmul.f32 %v4736_v52, %v4724_v48  ;;  %vm2058_vm1 = vmor %vm2056_vm15, %vm2057_vm12  ;;  %vm2087_vm5 = vweird.f32 %v4736_v52  ;;  %v2074_v13 = vsel %vm4787_vm6, %v4734_v10, %v2070_v5 }
 0x266   : > { %v2053_v63 = vsub.f32 1.0, %v2052_v35  ;;  %v4744_v14 = vpop.permute.xlu0 %1390  ;;  %vm4803_vm12 = vmor %vm2086_vm11, %vm2087_vm5  ;;  %vm2076_vm13 = vcmp.eq.f32.partialorder %v2075_v55, 8.507059e+37  ;;  %v1426_v10 = vsel %vm1422_vm7, %v4698_v4, %v4716_v61 }
 0x267   : > { %v2039_v21 = vmul.f32 %v2935_v24, %v2038_v60  ;;  %v4746_v42 = vpop.permute.xlu2 %1671  ;;  %v2083_v41 = vsub.f32 1.0, %v2082_v44 }
 0x268   : > { %v2054_v19 = vmul.f32 %v2937_v28, %v2053_v63  ;;  %v4750_v17 = vpop.permute.xlu1 %1410 }
 0x269   : > { %v2040_v22 = vadd.f32 %v2935_v24, %v2039_v21  ;;  %v2084_v16 = vmul.f32 %v4736_v52, %v2083_v41  ;;  %v1425_v5 = vsel %vm1422_vm7, %v4704_v37, %v4750_v17 }
 0x26a   : > { %v2055_v36 = vadd.f32 %v2937_v28, %v2054_v19  ;;  %v1464_v55 = vadd.f32 %v1425_v5, %v4650_v54 }
 0x26b   : > { %v2044_v20 = vsel %vm2043_vm14, %v2935_v24, %v2040_v22  ;;  %v1731_v24 = vadd.f32 %v1715_v3, %v4600_v59  ;;  %v2085_v44 = vadd.f32 %v4736_v52, %v2084_v16  ;;  %v2090_v22 = vand.u32 2147483647, %v4724_v48 }
 0x26c   : > { %v2049_v29 = vsel %vm2046_vm0, %v2048_v9, %v2044_v20  ;;  %v2059_v35 = vsel %vm2058_vm1, %v2937_v28, %v2055_v36  ;;  %v2078_v9 = vor.u32 1.1754944e-38, %v2077_v47  ;;  %v1449_v48 = vsel %vm395_vm8, %v1434_v58, 0.0 }
 0x26d   : > { %v2064_v60 = vsel %vm2061_vm2, %v2063_v56, %v2059_v35  ;;  %v4759_v2 = vmul.f32 %v2049_v29, %v4700_v51  ;;  %v2089_v20 = vsel %vm4803_vm12, %v4736_v52, %v2085_v44  ;;  %v2093_v29 = vor.u32 1.1754944e-38, %v2092_v7 }
 0x26e   : > { %v4764_v50 = vmul.f32 %v2064_v60, %v4702_v30  ;;  %v4767_v0 = vpop.permute.xlu0 %1408  ;;  %v2079_v41 = vsel %vm2076_vm13, %v2078_v9, %v2074_v13  ;;  %vm2091_vm14 = vcmp.eq.f32.partialorder %v2090_v22, 8.507059e+37  ;;  %v1433_v52 = vsel %vm1422_vm7, %v4750_v17, %v4704_v37 }
 0x26f   : > { %v1764_v32 = vpop.permute.xlu2 %1763  ;;  %v1121_v47 = vmul.f32 %v4732_v34, %v5562_v12  ;;  %v1694_v17 = vsel %vm1683_vm9, %v4746_v42, %v4730_v6  ;;  %v1073_v12 = vmul.f32 %v4718_v8, %v4372_v62 }
 0x270   : > { %v4770_v28 = vadd.f32 %v1764_v32, %v1730_v23  ;;  %v4772_v63 = vadd.f32 %v1764_v32, %v1731_v24  ;;  %v4774_v51 = vpop.permute.xlu1 %1155  ;;  %v2130_v21 = vadd.f32 %v4764_v50, %v4759_v2  ;;  %v2094_v23 = vsel %vm2091_vm14, %v2093_v29, %v2089_v20 }
 0x271   : > { %v1465_v24 = vadd.f32 %v1449_v48, %v4623_v40  ;;  %v1466_v32 = vadd.f32 %v1426_v10, %v4625_v18  ;;  %v4847_v18 = vmul.f32 %v2094_v23, %v4682_v53  ;;  %v1185_v29 = vmul.f32 %v4774_v51, %v4499_v45 }
 0x272   : > { %v2682_v59 = vmul.f32 -1.442695, %v4770_v28  ;;  %v2683_v30 = vmul.f32 -1.442695, %v4772_v63  ;;  %2131 = vadd.xlane.f32.xlu1 %v2130_v21  ;;  %v4835_v21 = vmul.f32 %v2079_v41, %v4666_v25  ;;  %v1120_v25 = vmul.f32 %v4732_v34, %v5595_v31 }
 0x273   : > { %v1072_v31 = vmul.f32 %v4718_v8, %v5596_v1  ;;  %v1709_v1 = vsel %vm398_vm10, %v1694_v17, 0.0  ;;  %v1137_v8 = vadd.f32 %v1121_v47, %v1073_v12  ;;  %v1184_v41 = vmul.f32 %v4774_v51, %v5597_v26 }
 0x274   : > { %2940 = vpow2.f32 %v2682_v59  ;;  %v1447_v59 = vsel %vm395_vm8, %v1433_v52, 0.0  ;;  %v4884_v62 = vadd.f32 %v4847_v18, %v4835_v21  ;;  %v1725_v36 = vadd.f32 %v1709_v1, %v1464_v55 }
 0x275   : > { %2942 = vpow2.f32 %v2683_v30  ;;  %v1463_v34 = vadd.f32 %v1447_v59, %v4647_v33  ;;  %v4878_v9 = vadd.f32 %v1120_v25, %v1072_v31 }
 0x276   : > { %v4801_v15 = vpop.permute.xlu0 %1667 }
 0x277   : > { %v4807_v3 = vpop.permute.xlu2 %1406 }
 0x278   : > { %v1658_v56 = vpop.permute.xlu1 %1657 }
 0x279   : > { %v1695_v35 = vsel %vm1683_vm9, %v4727_v27, %v1658_v56  ;;  %v1687_v4 = vsel %vm1683_vm9, %v1658_v56, %v4727_v27 }
 0x27a   : > { %v2941_v60 = vpop.eup %2940  ;;  %v1711_v61 = vsel %vm398_vm10, %v1695_v35, 0.0  ;;  %v1726_v40 = vadd.f32 %v1687_v4, %v1465_v24 }
 0x27b   : > { %v2943_v57 = vpop.eup %2942  ;;  %v4832_v16 = vadd.f32 1.0, %v2941_v60  ;;  %v1727_v30 = vadd.f32 %v1711_v61, %v1466_v32  ;;  %v1431_v60 = vsel %vm1422_vm7, %v4807_v3, %v4744_v14 }
 0x27c   : > { %v4841_v27 = vadd.f32 1.0, %v2943_v57  ;;  %v1443_v1 = vsel %vm395_vm8, %v1431_v60, 0.0 }
 0x27d   : > { %2944 = vrcp.f32 %v4832_v16  ;;  %vm2011_vm15 = vweird.f32 %v4832_v16  ;;  %v2017_v52 = vand.u32 2147483648, %v4832_v16 }
 0x27e   : > { %2946 = vrcp.f32 %v4841_v27  ;;  %v1754_v37 = vpop.permute.xlu0 %1753  ;;  %v2030_v26 = vand.u32 2147483647, %v4841_v27  ;;  %v2032_v61 = vand.u32 2147483648, %v4841_v27  ;;  %vm2026_vm3 = vweird.f32 %v4841_v27 }
 0x27f   : > { %v4859_v44 = vpop.permute.xlu2 %1653  ;;  %v4861_v53 = vadd.f32 %v1754_v37, %v1726_v40  ;;  %v4863_v19 = vadd.f32 %v1754_v37, %v1727_v30  ;;  %v2018_v25 = vor.u32 1.1754944e-38, %v2017_v52 }
 0x280   : > { %v1759_v7 = vpop.permute.xlu1 %1758  ;;  %vm2031_vm5 = vcmp.eq.f32.partialorder %v2030_v26, 8.507059e+37  ;;  %v2033_v55 = vor.u32 1.1754944e-38, %v2032_v61 }
 0x281   : > { %v2678_v58 = vmul.f32 -1.442695, %v4861_v53  ;;  %v2679_v13 = vmul.f32 -1.442695, %v4863_v19  ;;  %v4873_v54 = vadd.f32 %v1759_v7, %v4706_v39  ;;  %v4876_v22 = vadd.f32 %v1759_v7, %v4708_v38 }
 0x282   : > { %v1686_v39 = vsel %vm1683_vm9, %v4730_v6, %v4746_v42  ;;  %v2015_v42 = vand.u32 2147483647, %v4832_v16 }
 0x283   : > { %v2945_v33 = vpop.eup %2944  ;;  %2948 = vpow2.f32 %v2678_v58  ;;  %v2680_v10 = vmul.f32 -1.442695, %v4873_v54  ;;  %v1724_v48 = vadd.f32 %v1686_v39, %v1463_v34  ;;  %v2681_v35 = vmul.f32 -1.442695, %v4876_v22 }
 0x284   : > { %v2947_v38 = vpop.eup %2946  ;;  %v2007_v20 = vmul.f32 %v2945_v33, %v4832_v16  ;;  %2950 = vpow2.f32 %v2679_v13  ;;  %vm2012_vm0 = vweird.f32 %v2945_v33  ;;  %vm2016_vm2 = vcmp.eq.f32.partialorder %v2015_v42, 8.507059e+37 }
 0x285   : > { %v2022_v56 = vmul.f32 %v2947_v38, %v4841_v27  ;;  %2952 = vpow2.f32 %v2680_v10  ;;  %vm2027_vm1 = vweird.f32 %v2947_v38  ;;  %vm2013_vm4 = vmor %vm2011_vm15, %vm2012_vm0  ;;  %v1423_v13 = vsel %vm1422_vm7, %v4744_v14, %v4807_v3 }
 0x286   : > { %v2008_v6 = vsub.f32 1.0, %v2007_v20  ;;  %2954 = vpow2.f32 %v2681_v35  ;;  %vm2028_vm6 = vmor %vm2026_vm3, %vm2027_vm1  ;;  %v1200_v20 = vadd.f32 %v1184_v41, %v4878_v9  ;;  %v1201_v14 = vadd.f32 %v1185_v29, %v1137_v8 }
 0x287   : > { %v2023_v4 = vsub.f32 1.0, %v2022_v56  ;;  %v1749_v45 = vpop.permute.xlu2 %1748 }
 0x288   : > { %v2009_v51 = vmul.f32 %v2945_v33, %v2008_v6  ;;  %v4907_v57 = vadd.f32 %v1749_v45, %v1724_v48  ;;  %v1393_v23 = vpop.permute.xlu1 %1392  ;;  %v4909_v5 = vadd.f32 %v1749_v45, %v1725_v36  ;;  %v1460_v48 = vadd.f32 %v1423_v13, %v4722_v11 }
 0x289   : > { %v2949_v24 = vpop.eup %2948  ;;  %v2024_v32 = vmul.f32 %v2947_v38, %v2023_v4 }
 0x28a   : > { %v2951_v59 = vpop.eup %2950  ;;  %v2010_v40 = vadd.f32 %v2945_v33, %v2009_v51  ;;  %v4912_v30 = vadd.f32 1.0, %v2949_v24  ;;  %v2676_v31 = vmul.f32 -1.442695, %v4907_v57  ;;  %v2677_v27 = vmul.f32 -1.442695, %v4909_v5 }
 0x28b   : > { %v2025_v47 = vadd.f32 %v2947_v38, %v2024_v32  ;;  %v4916_v37 = vadd.f32 1.0, %v2951_v59  ;;  %v2953_v16 = vpop.eup %2952 }
 0x28c   : > { %v2014_v17 = vsel %vm2013_vm4, %v2945_v33, %v2010_v40  ;;  %2956 = vrcp.f32 %v4912_v30  ;;  %v2955_v33 = vpop.eup %2954  ;;  %v1955_v36 = vand.u32 2147483647, %v4912_v30  ;;  %v1957_v3 = vand.u32 2147483648, %v4912_v30 }
 0x28d   : > { %v2019_v12 = vsel %vm2016_vm2, %v2018_v25, %v2014_v17  ;;  %v2029_v34 = vsel %vm2028_vm6, %v2947_v38, %v2025_v47  ;;  %2958 = vrcp.f32 %v4916_v37  ;;  %v1424_v38 = vsel %vm1422_vm7, %v1393_v23, %v4767_v0 }
 0x28e   : > { %v2034_v7 = vsel %vm2031_vm5, %v2033_v55, %v2029_v34  ;;  %v4923_v58 = vmul.f32 %v2019_v12, %v4770_v28  ;;  %v1432_v28 = vsel %vm1422_vm7, %v4767_v0, %v1393_v23  ;;  %2960 = vpow2.f32 %v2676_v31 }
 0x28f   : > { %v4932_v39 = vmul.f32 %v2034_v7, %v4772_v63  ;;  %v1459_v63 = vadd.f32 %v1443_v1, %v4720_v49  ;;  %v4945_v56 = vadd.f32 1.0, %v2953_v16  ;;  %2962 = vpow2.f32 %v2677_v27  ;;  %v1744_v49 = vpop.permute.xlu2 %1743 }
 0x290   : > { %v1652_v10 = vpop.permute.xlu1 %1651  ;;  %v4947_v6 = vadd.f32 1.0, %v2955_v33  ;;  %v1445_v0 = vsel %vm395_vm8, %v1432_v28, 0.0  ;;  %v4951_v42 = vadd.f32 %v1424_v38, %v1201_v14  ;;  %vm1951_vm7 = vweird.f32 %v4912_v30 }
 0x291   : > { %v2127_v9 = vadd.f32 %v4932_v39, %v4923_v58  ;;  %vm4957_vm11 = vcmp.eq.f32.partialorder %v1955_v36, 8.507059e+37  ;;  %vm1966_vm12 = vweird.f32 %v4916_v37  ;;  %v1958_v11 = vor.u32 1.1754944e-38, %v1957_v3 }
 0x292   : > { %v2957_v35 = vpop.eup %2956  ;;  %v1970_v60 = vand.u32 2147483647, %v4916_v37  ;;  %v1692_v52 = vsel %vm1683_vm9, %v4801_v15, %v1652_v10  ;;  %v1972_v26 = vand.u32 2147483648, %v4916_v37  ;;  %2964 = vrcp.f32 %v4945_v56 }
 0x293   : > { %v2959_v8 = vpop.eup %2958  ;;  %v1947_v41 = vmul.f32 %v2957_v35, %v4912_v30  ;;  %2128 = vadd.xlane.f32.xlu2 %v2127_v9  ;;  %v1461_v61 = vadd.f32 %v1445_v0, %v1200_v20  ;;  %vm1952_vm8 = vweird.f32 %v2957_v35  ;;  %2966 = vrcp.f32 %v4947_v6 }
 0x294   : > { %v1962_v29 = vmul.f32 %v2959_v8, %v4916_v37  ;;  %v2961_v45 = vpop.eup %2960  ;;  %v1684_v23 = vsel %vm1683_vm9, %v1652_v10, %v4801_v15  ;;  %v1705_v40 = vsel %vm398_vm10, %v1692_v52, 0.0  ;;  %v1987_v25 = vand.u32 2147483648, %v4945_v56  ;;  %vm1953_vm15 = vmor %vm1951_vm7, %vm1952_vm8 }
 0x295   : > { %v1948_v4 = vsub.f32 1.0, %v1947_v41  ;;  %v2963_v24 = vpop.eup %2962  ;;  %v4973_v59 = vadd.f32 1.0, %v2961_v45  ;;  %vm1967_vm13 = vweird.f32 %v2959_v8  ;;  %v2002_v31 = vand.u32 2147483648, %v4947_v6 }
 0x296   : > { %v1963_v51 = vsub.f32 1.0, %v1962_v29  ;;  %v4978_v17 = vadd.f32 1.0, %v2963_v24  ;;  %vm4981_vm14 = vcmp.eq.f32.partialorder %v1970_v60, 8.507059e+37  ;;  %v1973_v15 = vor.u32 1.1754944e-38, %v1972_v26  ;;  %vm1968_vm0 = vmor %vm1966_vm12, %vm1967_vm13 }
 0x297   : > { %v1949_v32 = vmul.f32 %v2957_v35, %v1948_v4  ;;  %2968 = vrcp.f32 %v4973_v59  ;;  %v1720_v16 = vadd.f32 %v1684_v23, %v1459_v63  ;;  %v1721_v7 = vadd.f32 %v1705_v40, %v1460_v48 }
 0x298   : > { %v1964_v47 = vmul.f32 %v2959_v8, %v1963_v51  ;;  %v1670_v55 = vpop.permute.xlu1 %1669  ;;  %2970 = vrcp.f32 %v4978_v17  ;;  %v4990_v13 = vpop.eup %2964  ;;  %v1985_v33 = vand.u32 2147483647, %v4945_v56  ;;  %v4996_v36 = vor.u32 1.1754944e-38, %v1987_v25 }
 0x299   : > { %v1950_v12 = vadd.f32 %v2957_v35, %v1949_v32  ;;  %v2000_v38 = vand.u32 2147483647, %v4947_v6  ;;  %v4999_v30 = vpop.eup %2966  ;;  %v1685_v14 = vsel %vm1683_vm9, %v4859_v44, %v1670_v55  ;;  %v5007_v37 = vor.u32 1.1754944e-38, %v2002_v31 }
 0x29a   : > { %v1965_v27 = vadd.f32 %v2959_v8, %v1964_v47  ;;  %v1925_v10 = vand.u32 2147483647, %v4973_v59  ;;  %v1927_v63 = vand.u32 2147483648, %v4973_v59  ;;  %v1940_v48 = vand.u32 2147483647, %v4978_v17 }
 0x29b   : > { %v1954_v1 = vsel %vm1953_vm15, %v2957_v35, %v1950_v12  ;;  %2134 = vadd.xlane.f32.xlu2 %v4884_v62  ;;  %vm1981_vm1 = vweird.f32 %v4945_v56  ;;  %vm1921_vm2 = vweird.f32 %v4973_v59  ;;  %v1693_v62 = vsel %vm1683_vm9, %v1670_v55, %v4859_v44 }
 0x29c   : > { %v1959_v28 = vsel %vm4957_vm11, %v1958_v11, %v1954_v1  ;;  %v1969_v20 = vsel %vm1968_vm0, %v2959_v8, %v1965_v27  ;;  %v1722_v9 = vadd.f32 %v1685_v14, %v1461_v61  ;;  %vm1936_vm3 = vweird.f32 %v4978_v17 }
 0x29d   : > { %v1974_v3 = vsel %vm4981_vm14, %v1973_v15, %v1969_v20  ;;  %v5016_v35 = vmul.f32 %v1959_v28, %v4861_v53  ;;  %v2969_v8 = vpop.eup %2968  ;;  %v1942_v41 = vand.u32 2147483648, %v4978_v17  ;;  %v1707_v53 = vsel %vm398_vm10, %v1693_v62, 0.0 }
 0x29e   : > { %v5019_v0 = vmul.f32 %v1974_v3, %v4863_v19  ;;  %v1977_v19 = vmul.f32 %v4990_v13, %v4945_v56  ;;  %vm1982_vm4 = vweird.f32 %v4990_v13  ;;  %v2971_v11 = vpop.eup %2970  ;;  %v1917_v29 = vmul.f32 %v2969_v8, %v4973_v59 }
 0x29f   : > { %v1723_v46 = vadd.f32 %v1707_v53, %v4951_v42  ;;  %v5034_v44 = vadd.f32 %v1744_v49, %v1722_v9  ;;  %v1992_v52 = vmul.f32 %v4999_v30, %v4947_v6  ;;  %vm1996_vm9 = vweird.f32 %v4947_v6  ;;  %vm5065_vm11 = vmor %vm1981_vm1, %vm1982_vm4 }
 0x2a0   : > { %v1739_v60 = vpop.permute.xlu1 %1738  ;;  %vm1922_vm5 = vweird.f32 %v2969_v8  ;;  %v1932_v43 = vmul.f32 %v2971_v11, %v4978_v17  ;;  %vm5044_vm10 = vcmp.eq.f32.partialorder %v1985_v33, 8.507059e+37  ;;  %v1918_v42 = vsub.f32 1.0, %v1917_v29 }
 0x2a1   : > { %v5040_v4 = vadd.f32 %v1739_v60, %v1720_v16  ;;  %v5042_v26 = vadd.f32 %v1739_v60, %v1721_v7  ;;  %v5048_v45 = vadd.f32 %v1744_v49, %v1723_v46  ;;  %v2674_v51 = vmul.f32 -1.442695, %v5034_v44  ;;  %vm1923_vm8 = vmor %vm1921_vm2, %vm1922_vm5 }
 0x2a2   : > { %v2121_v23 = vadd.f32 %v5019_v0, %v5016_v35  ;;  %vm5053_vm6 = vcmp.eq.f32.partialorder %v2000_v38, 8.507059e+37  ;;  %v1933_v32 = vsub.f32 1.0, %v1932_v43  ;;  %v1978_v47 = vsub.f32 1.0, %v1977_v19 }
 0x2a3   : > { %v2672_v40 = vmul.f32 -1.442695, %v5040_v4  ;;  %v2673_v25 = vmul.f32 -1.442695, %v5042_v26  ;;  %v1919_v55 = vmul.f32 %v2969_v8, %v1918_v42  ;;  %2972 = vpow2.f32 %v2674_v51 }
 0x2a4   : > { %v2675_v31 = vmul.f32 -1.442695, %v5048_v45  ;;  %2122 = vadd.xlane.f32.xlu2 %v2121_v23  ;;  %v1993_v12 = vsub.f32 1.0, %v1992_v52  ;;  %v1934_v34 = vmul.f32 %v2971_v11, %v1933_v32  ;;  %vm1937_vm7 = vweird.f32 %v2971_v11 }
 0x2a5   : > { %2974 = vpow2.f32 %v2672_v40  ;;  %v1979_v15 = vmul.f32 %v4990_v13, %v1978_v47  ;;  %v1920_v27 = vadd.f32 %v2969_v8, %v1919_v55  ;;  %vm1997_vm12 = vweird.f32 %v4999_v30  ;;  %vm1938_vm14 = vmor %vm1936_vm3, %vm1937_vm7 }
 0x2a6   : > { %2976 = vpow2.f32 %v2675_v31  ;;  %v1994_v7 = vmul.f32 %v4999_v30, %v1993_v12  ;;  %v1928_v1 = vor.u32 1.1754944e-38, %v1927_v63  ;;  %v1935_v33 = vadd.f32 %v2971_v11, %v1934_v34  ;;  %vm1998_vm0 = vmor %vm1996_vm9, %vm1997_vm12 }
 0x2a7   : > { %2978 = vpow2.f32 %v2673_v25  ;;  %v1980_v38 = vadd.f32 %v4990_v13, %v1979_v15  ;;  %v1924_v28 = vsel %vm1923_vm8, %v2969_v8, %v1920_v27  ;;  %vm1926_vm13 = vcmp.eq.f32.partialorder %v1925_v10, 8.507059e+37 }
 0x2a8   : > { %v1943_v56 = vor.u32 1.1754944e-38, %v1942_v41  ;;  %v1995_v20 = vadd.f32 %v4999_v30, %v1994_v7  ;;  %v1929_v14 = vsel %vm1926_vm13, %v1928_v1, %v1924_v28  ;;  %v1939_v3 = vsel %vm1938_vm14, %v2971_v11, %v1935_v33 }
 0x2a9   : > { %vm1941_vm15 = vcmp.eq.f32.partialorder %v1940_v48, 8.507059e+37  ;;  %v1984_v59 = vsel %vm5065_vm11, %v4990_v13, %v1980_v38  ;;  %v2973_v10 = vpop.eup %2972  ;;  %v5087_v17 = vmul.f32 %v1929_v14, %v4907_v57 }
 0x2aa   : > { %v1944_v63 = vsel %vm1941_vm15, %v1943_v56, %v1939_v3  ;;  %v1989_v62 = vsel %vm5044_vm10, %v4996_v36, %v1984_v59  ;;  %v1999_v48 = vsel %vm1998_vm0, %v4999_v30, %v1995_v20  ;;  %v1842_v13 = vadd.f32 1.0, %v2973_v10 }
 0x2ab   : > { %v2975_v9 = vpop.eup %2974  ;;  %v5094_v8 = vmul.f32 %v1944_v63, %v4909_v5  ;;  %v2004_v6 = vsel %vm5053_vm6, %v5007_v37, %v1999_v48  ;;  %v5100_v41 = vmul.f32 %v1989_v62, %v4873_v54 }
 0x2ac   : > { %v2977_v57 = vpop.eup %2976  ;;  %v1840_v49 = vadd.f32 1.0, %v2975_v9  ;;  %v5103_v53 = vmul.f32 %v2004_v6, %v4876_v22  ;;  %2980 = vrcp.f32 %v1842_v13  ;;  %v1895_v54 = vand.u32 2147483647, %v1842_v13 }
 0x2ad   : > { %v2979_v36 = vpop.eup %2978  ;;  %v1843_v19 = vadd.f32 1.0, %v2977_v57  ;;  %v2118_v5 = vadd.f32 %v5094_v8, %v5087_v17  ;;  %v1897_v22 = vand.u32 2147483648, %v1842_v13  ;;  %vm1891_vm1 = vweird.f32 %v1842_v13 }
 0x2ae   : > { %v5107_v30 = vadd.f32 1.0, %v2979_v36  ;;  %2982 = vrcp.f32 %v1840_v49  ;;  %v2124_v37 = vadd.f32 %v5103_v53, %v5100_v41  ;;  %vm5112_vm2 = vcmp.eq.f32.partialorder %v1895_v54, 8.507059e+37 }
 0x2af   : > { %2984 = vrcp.f32 %v1843_v19  ;;  %2119 = vadd.xlane.f32.xlu1 %v2118_v5  ;;  %v1910_v29 = vand.u32 2147483647, %v1843_v19  ;;  %vm1906_vm3 = vweird.f32 %v1843_v19  ;;  %v1912_v61 = vand.u32 2147483648, %v1843_v19 }
 0x2b0   : > { %2986 = vrcp.f32 %v5107_v30  ;;  %2125 = vadd.xlane.f32.xlu0 %v2124_v37  ;;  %v1898_v24 = vor.u32 1.1754944e-38, %v1897_v22  ;;  %vm1861_vm4 = vweird.f32 %v1840_v49  ;;  %v1865_v47 = vand.u32 2147483647, %v1840_v49 }
 0x2b1   : > { %vm5116_vm9 = vcmp.eq.f32.partialorder %v1910_v29, 8.507059e+37  ;;  %v1867_v34 = vand.u32 2147483648, %v1840_v49  ;;  %v1913_v15 = vor.u32 1.1754944e-38, %v1912_v61  ;;  %v1882_v33 = vand.u32 2147483648, %v5107_v30 }
 0x2b2   : > { %v2981_v11 = vpop.eup %2980  ;;  %v1880_v56 = vand.u32 2147483647, %v5107_v30  ;;  %vm1876_vm8 = vweird.f32 %v5107_v30  ;;  %vm1866_vm14 = vcmp.eq.f32.partialorder %v1865_v47, 8.507059e+37  ;;  %v3114_v37 = vmov 256.0  }
 0x2b3   : > { %v1887_v60 = vmul.f32 %v2981_v11, %v1842_v13  ;;  %vm1892_vm5 = vweird.f32 %v2981_v11  ;;  %v1868_v3 = vor.u32 1.1754944e-38, %v1867_v34  ;;  %v1883_v13 = vor.u32 1.1754944e-38, %v1882_v33 }
 0x2b4   : > { %v2983_v46 = vpop.eup %2982  ;;  %vm1893_vm7 = vmor %vm1891_vm1, %vm1892_vm5  ;;  %vm1881_vm0 = vcmp.eq.f32.partialorder %v1880_v56, 8.507059e+37  ;;  %2988 = vrcp.f32 %v3114_v37  ;;  %v2735_v37 = vld [vmem:[%s5336_s7] sm:$0xff] }
 0x2b5   : > { %v2985_v52 = vpop.eup %2984  ;;  %v1857_v42 = vmul.f32 %v2983_v46, %v1840_v49  ;;  %v1888_v23 = vsub.f32 1.0, %v1887_v60  ;;  %vm1862_vm10 = vweird.f32 %v2983_v46 }
 0x2b6   : > { %v2987_v51 = vpop.eup %2986  ;;  %v1902_v32 = vmul.f32 %v2985_v52, %v1843_v19  ;;  %vm1907_vm6 = vweird.f32 %v2985_v52  ;;  %vm1863_vm12 = vmor %vm1861_vm4, %vm1862_vm10  ;;  %vm2244_vm10 = vcmask 1043456  }
 0x2b7   : > { %v1858_v25 = vsub.f32 1.0, %v1857_v42  ;;  %v1872_v55 = vmul.f32 %v2987_v51, %v5107_v30  ;;  %v1889_v31 = vmul.f32 %v2981_v11, %v1888_v23  ;;  %vm1877_vm11 = vweird.f32 %v2987_v51  ;;  %vm1908_vm13 = vmor %vm1906_vm3, %vm1907_vm6 }
 0x2b8   : > { %v1903_v12 = vsub.f32 1.0, %v1902_v32  ;;  %vm1878_vm15 = vmor %vm1876_vm8, %vm1877_vm11  ;;  %vm2231_vm6 = vcmask 64512  }
 0x2b9   : > { %v1859_v27 = vmul.f32 %v2983_v46, %v1858_v25  ;;  %v1873_v16 = vsub.f32 1.0, %v1872_v55  ;;  %v1890_v7 = vadd.f32 %v2981_v11, %v1889_v31 }
 0x2ba   : > { %v1904_v1 = vmul.f32 %v2985_v52, %v1903_v12  ;;  %v2989_v54 = vpop.eup %2988 }
 0x2bb   : > { %v1860_v38 = vadd.f32 %v2983_v46, %v1859_v27  ;;  %v1874_v28 = vmul.f32 %v2987_v51, %v1873_v16  ;;  %v1894_v20 = vsel %vm1893_vm7, %v2981_v11, %v1890_v7  ;;  %vm2141_vm1 = vweird.f32 %v2989_v54  ;;  %v2151_v16 = vld [vmem:[%s5334_s5] sm:$0xf] }
 0x2bc   : > { %v1905_v14 = vadd.f32 %v2985_v52, %v1904_v1  ;;  %v1899_v59 = vsel %vm5112_vm2, %v1898_v24, %v1894_v20  ;;  %vm2157_vm2 = vcmask 523264   ;;  %v2156_v7 = vld [vmem:[%s5335_s6] sm:$0xff] }
 0x2bd   : > { %v1864_v10 = vsel %vm1863_vm12, %v2983_v46, %v1860_v38  ;;  %v1875_v63 = vadd.f32 %v2987_v51, %v1874_v28  ;;  %v5130_v48 = vmul.f32 %v1899_v59, %v5034_v44 }
 0x2be   : > { %v1909_v62 = vsel %vm1908_vm13, %v2985_v52, %v1905_v14  ;;  %v1869_v9 = vsel %vm1866_vm14, %v1868_v3, %v1864_v10 }
 0x2bf   : > { %v1914_v6 = vsel %vm5116_vm9, %v1913_v15, %v1909_v62  ;;  %v1879_v57 = vsel %vm1878_vm15, %v2987_v51, %v1875_v63  ;;  %v5136_v49 = vmul.f32 %v1869_v9, %v5040_v4  ;;  %v2137_v4 = vmul.f32 256.0, %v2989_v54 }
 0x2c0   : > { %v5139_v36 = vmul.f32 %v1914_v6, %v5048_v45  ;;  %v1884_v19 = vsel %vm1881_vm0, %v1883_v13, %v1879_v57 }
 0x2c1   : > { %v5142_v5 = vmul.f32 %v1884_v19, %v5042_v26  ;;  %v2138_v22 = vsub.f32 1.0, %v2137_v4  ;;  %v2737_v4 = vld [vmem:[%s5336_s7 + $0x10] sm:$0xff] }
 0x2c2   : > { %v2115_v44 = vadd.f32 %v5139_v36, %v5130_v48 }
 0x2c3   : > { %v2112_v30 = vadd.f32 %v5142_v5, %v5136_v49  ;;  %v2139_v11 = vmul.f32 %v2989_v54, %v2138_v22  ;;  %v2738_v22 = vld [vmem:[%s5336_s7 + $0x18] sm:$0xff] }
 0x2c4   : > { %2116 = vadd.xlane.f32.xlu1 %v2115_v44 }
 0x2c5   : > { %2113 = vadd.xlane.f32.xlu0 %v2112_v30  ;;  %v2140_v29 = vadd.f32 %v2989_v54, %v2139_v11 }
 0x2c7   : > { %v2142_v46 = vsel %vm2141_vm1, %v2989_v54, %v2140_v29  ;;  %v2736_v54 = vld [vmem:[%s5336_s7 + $0x8] sm:$0xff] }
 0x2e5   : > { %v2132_v26 = vpop.xlane.xlu1 %2131 }
 0x2e6   : > { %v2149_v52 = vmul.f32 %v2142_v46, %v2132_v26 }
 0x306   : > { %v2129_v45 = vpop.xlane.xlu2 %2128 }
 0x307   : > { %v2148_v24 = vmul.f32 %v2142_v46, %v2129_v45 }
 0x30e   : > { %v2135_v60 = vpop.xlane.xlu2 %2134 }
 0x30f   : > { %v2150_v43 = vmul.f32 %v2142_v46, %v2135_v60 }
 0x311   : > { %v2155_v61 = vpack.c.bf16 %v2150_v43, %v2149_v52  ;;  %v2207_v43 = vld [vmem:[%s5337_s8 + $0x20] sm:$0xff] }
 0x313   : > { %2165 = vmatpush.bf16.msra.mxu2 %v2155_v61 }
 0x317   : > { %v2123_v51 = vpop.xlane.xlu2 %2122 }
 0x318   : > { %v2146_v25 = vmul.f32 %v2142_v46, %v2123_v51  ;;  %v2205_v51 = vld [vmem:[%s5337_s8 + $0x10] sm:$0xff] }
 0x322   : > { %v2120_v42 = vpop.xlane.xlu1 %2119 }
 0x323   : > { %v2126_v23 = vpop.xlane.xlu0 %2125  ;;  %v2145_v40 = vmul.f32 %v2142_v46, %v2120_v42 }
 0x324   : > { %v2147_v32 = vmul.f32 %v2142_v46, %v2126_v23 }
 0x325   : > { %v2153_v55 = vpack.c.bf16 %v2146_v25, %v2145_v40  ;;  %v2204_v25 = vld [vmem:[%s5337_s8 + $0x8] sm:$0xff] }
 0x326   : > { %v2154_v47 = vpack.c.bf16 %v2148_v24, %v2147_v32 }
 0x328   : > { %2166 = vmatpush.bf16.msra.mxu2 %v2154_v47 }
 0x32c   : > { %2167 = vmatpush.bf16.msra.mxu2 %v2153_v55 }
 0x337   : > { %v2117_v31 = vpop.xlane.xlu1 %2116 }
 0x338   : > { %v2114_v12 = vpop.xlane.xlu0 %2113  ;;  %v2144_v34 = vmul.f32 %v2142_v46, %v2117_v31  ;;  %v2208_v31 = vld [vmem:[%s5337_s8 + $0x28] sm:$0xff] }
 0x339   : > { %v2143_v15 = vmul.f32 %v2142_v46, %v2114_v12  ;;  %v2206_v46 = vld [vmem:[%s5337_s8 + $0x18] sm:$0xff] }
 0x33b   : > { %v2152_v27 = vpack.c.bf16 %v2144_v34, %v2143_v15 }
 0x33d   : > { %2168 = vmatpush.bf16.msra.mxu2 %v2152_v27 }
 0x340   : > { %2688 = vmatmul.msk.bf16.vlgmr.msra.gmra.mxu2 %vm2157_vm2, %v2151_v16  ;;  %v2209_v16 = vld [vmem:[%s5337_s8 + $0x30] sm:$0xff] }
 0x3c3   : > { %v2170_v1 = vpop.f32.mrf.mxu2 }
 0x3c4   : > { %v2171_v33 = vadd.f32 %v2170_v1, %v2156_v7 }
 0x3c6   : > { %v2689_v38 = vmul.f32 -1.442695, %v2171_v33 }
 0x3c8   : > { %2990 = vpow2.f32 %v2689_v38 }
 0x3cb   : > { %v2172_v28 = vpop.f32.mrf.mxu2 }
 0x3cc   : > { %v2203_v28 = vld [vmem:[%s5337_s8] sm:$0xff] }
 0x3ce   : > { %v2991_v56 = vpop.eup %2990 }
 0x3cf   : > { %v2177_v20 = vadd.f32 1.0, %v2991_v56 }
 0x3d1   : > { %2992 = vrcp.f32 %v2177_v20  ;;  %v2189_v10 = vand.u32 2147483648, %v2177_v20  ;;  %v2187_v62 = vand.u32 2147483647, %v2177_v20  ;;  %vm2183_vm4 = vweird.f32 %v2177_v20 }
 0x3d3   : > { %v2190_v13 = vor.u32 1.1754944e-38, %v2189_v10  ;;  %vm2188_vm5 = vcmp.eq.f32.partialorder %v2187_v62, 8.507059e+37 }
 0x3d7   : > { %v2993_v14 = vpop.eup %2992 }
 0x3d8   : > { %v2179_v3 = vmul.f32 %v2993_v14, %v2177_v20  ;;  %vm2184_vm3 = vweird.f32 %v2993_v14 }
 0x3d9   : > { %vm2185_vm9 = vmor %vm2183_vm4, %vm2184_vm3 }
 0x3da   : > { %v2180_v59 = vsub.f32 1.0, %v2179_v3 }
 0x3dc   : > { %v2181_v63 = vmul.f32 %v2993_v14, %v2180_v59 }
 0x3de   : > { %v2182_v9 = vadd.f32 %v2993_v14, %v2181_v63 }
 0x3e0   : > { %v2186_v6 = vsel %vm2185_vm9, %v2993_v14, %v2182_v9  ;;  %v2210_v9 = vld [vmem:[%s5337_s8 + $0x38] sm:$0xff] }
 0x3e1   : > { %v2191_v57 = vsel %vm2188_vm5, %v2190_v13, %v2186_v6 }
 0x3e2   : > { %v2193_v19 = vmul.f32 %v2191_v57, %v2171_v33 }
 0x3e4   : > { %v2202_v44 = vpack.c.bf16 %v2193_v19, %v2193_v19 }
 0x3e6   : > { %v2246_v30 = vsel %vm2244_vm10, %v2202_v44, 0 }
 0x3e7   : > { %2255 = vmatpush.bf16.msra.mxu3 %v2246_v30 }
 0x3ea   : > { %2706 = vmatmul.msk.bf16.vlgmr.msra.gmra.mxu3 %vm2231_vm6, %v2735_v37 }
 0x3fa   : > { %2707 = vmatmul.msk.bf16.gmra.mxu3 %vm2231_vm6, %v2736_v54 }
 0x40a   : > { %2708 = vmatmul.msk.bf16.gmra.mxu3 %vm2231_vm6, %v2737_v4 }
 0x41a   : > { %2709 = vmatmul.msk.bf16.gmra.mxu3 %vm2231_vm6, %v2738_v22 }
 0x46d   : > { %v2257_v11 = vpop.f32.mrf.mxu3 }
 0x46e   : > { %v2258_v10 = vadd.f32 %v2257_v11, %v2203_v28 }
 0x470   : > { %v2710_v57 = vmul.f32 -1.442695, %v2258_v10 }
 0x475   : > { %v2259_v45 = vpop.f32.mrf.mxu3 }
 0x476   : > { %v2260_v34 = vadd.f32 %v2259_v45, %v2204_v25 }
 0x478   : > { %v2711_v7 = vmul.f32 -1.442695, %v2260_v34 }
 0x47d   : > { %v2262_v29 = vpop.f32.mrf.mxu3 }
 0x47e   : > { %v2263_v32 = vadd.f32 %v2262_v29, %v2205_v51 }
 0x480   : > { %v2712_v55 = vmul.f32 -1.442695, %v2263_v32 }
 0x485   : > { %v2264_v26 = vpop.f32.mrf.mxu3 }
 0x486   : > { %v2265_v60 = vadd.f32 %v2264_v26, %v2206_v46 }
 0x488   : > { %v2713_v52 = vmul.f32 -1.442695, %v2265_v60 }
 0x48a   : > { %2994 = vpow2.f32 %v2713_v52 }
 0x48d   : > { %v2267_v61 = vpop.f32.mrf.mxu3 }
 0x48e   : > { %v2268_v42 = vadd.f32 %v2267_v61, %v2207_v43 }
 0x490   : > { %v2995_v23 = vpop.eup %2994  ;;  %v2714_v24 = vmul.f32 -1.442695, %v2268_v42 }
 0x491   : > { %v5176_v40 = vadd.f32 1.0, %v2995_v23 }
 0x492   : > { %2996 = vpow2.f32 %v2714_v24 }
 0x493   : > { %2998 = vrcp.f32 %v5176_v40  ;;  %v2365_v24 = vand.u32 2147483648, %v5176_v40  ;;  %vm2359_vm14 = vweird.f32 %v5176_v40  ;;  %v2363_v32 = vand.u32 2147483647, %v5176_v40 }
 0x494   : > { %3000 = vpow2.f32 %v2712_v55 }
 0x495   : > { %v2269_v47 = vpop.f32.mrf.mxu3  ;;  %vm2364_vm0 = vcmp.eq.f32.partialorder %v2363_v32, 8.507059e+37 }
 0x496   : > { %v2270_v27 = vadd.f32 %v2269_v47, %v2208_v31 }
 0x498   : > { %v2997_v12 = vpop.eup %2996  ;;  %v2715_v33 = vmul.f32 -1.442695, %v2270_v27 }
 0x499   : > { %v2305_v15 = vadd.f32 1.0, %v2997_v12  ;;  %v5188_v1 = vpop.eup %2998 }
 0x49a   : > { %v3001_v20 = vpop.eup %3000  ;;  %v2355_v3 = vmul.f32 %v5188_v1, %v5176_v40  ;;  %vm2360_vm13 = vweird.f32 %v5188_v1 }
 0x49b   : > { %3002 = vrcp.f32 %v2305_v15  ;;  %v5195_v62 = vadd.f32 1.0, %v3001_v20  ;;  %v2380_v44 = vand.u32 2147483648, %v2305_v15  ;;  %v2378_v4 = vand.u32 2147483647, %v2305_v15  ;;  %vm2361_vm15 = vmor %vm2359_vm14, %vm2360_vm13 }
 0x49c   : > { %3004 = vpow2.f32 %v2711_v7  ;;  %v2356_v6 = vsub.f32 1.0, %v2355_v3  ;;  %vm2374_vm11 = vweird.f32 %v2305_v15 }
 0x49d   : > { %v2272_v38 = vpop.f32.mrf.mxu3  ;;  %3006 = vpow2.f32 %v2715_v33  ;;  %v2381_v60 = vor.u32 1.1754944e-38, %v2380_v44  ;;  %vm2379_vm8 = vcmp.eq.f32.partialorder %v2378_v4, 8.507059e+37  ;;  %vm2344_vm10 = vweird.f32 %v5195_v62 }
 0x49e   : > { %v2273_v56 = vadd.f32 %v2272_v38, %v2209_v16  ;;  %v2357_v46 = vmul.f32 %v5188_v1, %v2356_v6 }
 0x4a0   : > { %v2716_v14 = vmul.f32 -1.442695, %v2273_v56  ;;  %v2358_v51 = vadd.f32 %v5188_v1, %v2357_v46  ;;  %v2348_v46 = vand.u32 2147483647, %v5195_v62 }
 0x4a1   : > { %v3003_v59 = vpop.eup %3002 }
 0x4a2   : > { %3008 = vpow2.f32 %v2716_v14  ;;  %v2370_v63 = vmul.f32 %v3003_v59, %v2305_v15  ;;  %v3005_v30 = vpop.eup %3004  ;;  %vm2375_vm7 = vweird.f32 %v3003_v59  ;;  %v2362_v55 = vsel %vm2361_vm15, %v5188_v1, %v2358_v51 }
 0x4a3   : > { %v3007_v22 = vpop.eup %3006  ;;  %3010 = vrcp.f32 %v5195_v62  ;;  %vm2376_vm12 = vmor %vm2374_vm11, %vm2375_vm7  ;;  %v5202_v52 = vadd.f32 1.0, %v3005_v30  ;;  %v2366_v15 = vor.u32 1.1754944e-38, %v2365_v24  ;;  %vm2349_vm13 = vcmp.eq.f32.partialorder %v2348_v46, 8.507059e+37 }
 0x4a4   : > { %v2371_v13 = vsub.f32 1.0, %v2370_v63  ;;  %3012 = vpow2.f32 %v2710_v57  ;;  %v5204_v61 = vadd.f32 1.0, %v3007_v22 }
 0x4a5   : > { %v2274_v19 = vpop.f32.mrf.mxu3  ;;  %v2367_v7 = vsel %vm2364_vm0, %v2366_v15, %v2362_v55  ;;  %vm2329_vm0 = vweird.f32 %v5202_v52 }
 0x4a6   : > { %v2275_v37 = vadd.f32 %v2274_v19, %v2210_v9  ;;  %v2372_v54 = vmul.f32 %v3003_v59, %v2371_v13  ;;  %v433_v13 = vld [vmem:[%s5339_s10] sm:$0xff]  ;;  %v2393_v15 = vand.u32 2147483647, %v5204_v61 }
 0x4a8   : > { %v3009_v11 = vpop.eup %3008  ;;  %v2717_v45 = vmul.f32 -1.442695, %v2275_v37  ;;  %v2373_v29 = vadd.f32 %v3003_v59, %v2372_v54 }
 0x4a9   : > { %v2307_v26 = vadd.f32 1.0, %v3009_v11  ;;  %v5208_v23 = vpop.eup %3010  ;;  %v2350_v11 = vand.u32 2147483648, %v5195_v62 }
 0x4aa   : > { %3014 = vpow2.f32 %v2717_v45  ;;  %v2377_v43 = vsel %vm2376_vm12, %v3003_v59, %v2373_v29  ;;  %v3013_v25 = vpop.eup %3012  ;;  %v2340_v31 = vmul.f32 %v5208_v23, %v5195_v62  ;;  %vm2345_vm5 = vweird.f32 %v5208_v23 }
 0x4ab   : > { %3016 = vrcp.f32 %v2307_v26  ;;  %v2382_v42 = vsel %vm2379_vm8, %v2381_v60, %v2377_v43  ;;  %v5218_v27 = vadd.f32 1.0, %v3013_v25  ;;  %v2410_v1 = vand.u32 2147483648, %v2307_v26  ;;  %vm2346_vm7 = vmor %vm2344_vm10, %vm2345_vm5 }
 0x4ac   : > { %2451 = vperm.xlu1 %2857, %v2382_v42   ;;  %3018 = vrcp.f32 %v5202_v52  ;;  %v2341_v38 = vsub.f32 1.0, %v2340_v31  ;;  %v2408_v20 = vand.u32 2147483647, %v2307_v26  ;;  %vm2404_vm3 = vweird.f32 %v2307_v26 }
 0x4ad   : > { %3020 = vrcp.f32 %v5204_v61  ;;  %v2411_v9 = vor.u32 1.1754944e-38, %v2410_v1  ;;  %v2351_v32 = vor.u32 1.1754944e-38, %v2350_v11 }
 0x4ae   : > { %v2342_v59 = vmul.f32 %v5208_v23, %v2341_v38  ;;  %vm2409_vm9 = vcmp.eq.f32.partialorder %v2408_v20, 8.507059e+37 }
 0x4b0   : > { %v3015_v47 = vpop.eup %3014  ;;  %v2343_v54 = vadd.f32 %v5208_v23, %v2342_v59 }
 0x4b1   : > { %v3017_v12 = vpop.eup %3016  ;;  %v2308_v34 = vadd.f32 1.0, %v3015_v47 }
 0x4b2   : > { %v2400_v16 = vmul.f32 %v3017_v12, %v2307_v26  ;;  %v5220_v40 = vpop.eup %3018  ;;  %vm2405_vm1 = vweird.f32 %v3017_v12  ;;  %v2347_v42 = vsel %vm2346_vm7, %v5208_v23, %v2343_v54 }
 0x4b3   : > { %3022 = vrcp.f32 %v2308_v34  ;;  %v5222_v28 = vpop.eup %3020  ;;  %v2325_v14 = vmul.f32 %v5220_v40, %v5202_v52  ;;  %vm2406_vm4 = vmor %vm2404_vm3, %vm2405_vm1  ;;  %v2425_v22 = vand.u32 2147483648, %v2308_v34  ;;  %v2423_v29 = vand.u32 2147483647, %v2308_v34 }
 0x4b4   : > { %2446 = vperm.xlu1 %2857, %v2367_v7   ;;  %v2401_v33 = vsub.f32 1.0, %v2400_v16  ;;  %3024 = vrcp.f32 %v5218_v27  ;;  %v2385_v10 = vmul.f32 %v5222_v28, %v5204_v61  ;;  %vm2419_vm11 = vweird.f32 %v2308_v34 }
 0x4b5   : > { %v2326_v44 = vsub.f32 1.0, %v2325_v14  ;;  %v2426_v24 = vor.u32 1.1754944e-38, %v2425_v22  ;;  %vm2424_vm8 = vcmp.eq.f32.partialorder %v2423_v29, 8.507059e+37  ;;  %v2352_v62 = vsel %vm2349_vm13, %v2351_v32, %v2347_v42 }
 0x4b6   : > { %v2402_v56 = vmul.f32 %v3017_v12, %v2401_v33  ;;  %v2386_v4 = vsub.f32 1.0, %v2385_v10  ;;  %vm2330_vm14 = vweird.f32 %v5220_v40  ;;  %vm2390_vm15 = vweird.f32 %v5222_v28  ;;  %v434_v10 = vld [vmem:[%s5339_s10 + $0x8] sm:$0xff] }
 0x4b7   : > { %v2327_v26 = vmul.f32 %v5220_v40, %v2326_v44  ;;  %vm2389_vm1 = vweird.f32 %v5204_v61  ;;  %vm2331_vm3 = vmor %vm2329_vm0, %vm2330_vm14  ;;  %v2333_v16 = vand.u32 2147483647, %v5202_v52 }
 0x4b8   : > { %v2403_v3 = vadd.f32 %v3017_v12, %v2402_v56  ;;  %v2387_v51 = vmul.f32 %v5222_v28, %v2386_v4 }
 0x4b9   : > { %v3023_v63 = vpop.eup %3022  ;;  %v2328_v23 = vadd.f32 %v5220_v40, %v2327_v26  ;;  %vm2334_vm5 = vcmp.eq.f32.partialorder %v2333_v16, 8.507059e+37  ;;  %v3036_v16 = vld [vmem:[%s3244_s29 + $0x18] sm:$0xff] }
 0x4ba   : > { %v2407_v6 = vsel %vm2406_vm4, %v3017_v12, %v2403_v3  ;;  %v2415_v57 = vmul.f32 %v3023_v63, %v2308_v34  ;;  %v5233_v30 = vpop.eup %3024  ;;  %vm2420_vm6 = vweird.f32 %v3023_v63  ;;  %v2388_v55 = vadd.f32 %v5222_v28, %v2387_v51  ;;  %vm2391_vm4 = vmor %vm2389_vm1, %vm2390_vm15 }
 0x4bb   : > { %v2412_v19 = vsel %vm2409_vm9, %v2411_v9, %v2407_v6  ;;  %v2310_v60 = vmul.f32 %v5233_v30, %v5218_v27  ;;  %vm2421_vm12 = vmor %vm2419_vm11, %vm2420_vm6  ;;  %v2395_v12 = vand.u32 2147483648, %v5204_v61  ;;  %v2335_v34 = vand.u32 2147483648, %v5202_v52 }
 0x4bc   : > { %2461 = vperm.xlu2 %2858, %v2412_v19   ;;  %2495 = vperm.xlu1 %2857, %v433_v13   ;;  %v2416_v37 = vsub.f32 1.0, %v2415_v57  ;;  %v2392_v7 = vsel %vm2391_vm4, %v5222_v28, %v2388_v55  ;;  %v2332_v33 = vsel %vm2331_vm3, %v5220_v40, %v2328_v23  ;;  %vm2394_vm9 = vcmp.eq.f32.partialorder %v2393_v15, 8.507059e+37 }
 0x4bd   : > { %v2311_v31 = vsub.f32 1.0, %v2310_v60  ;;  %v2396_v1 = vor.u32 1.1754944e-38, %v2395_v12  ;;  %v2336_v56 = vor.u32 1.1754944e-38, %v2335_v34  ;;  %vm2315_vm10 = vweird.f32 %v5233_v30 }
 0x4be   : > { %v2417_v45 = vmul.f32 %v3023_v63, %v2416_v37  ;;  %v2320_v52 = vand.u32 2147483648, %v5218_v27  ;;  %vm2314_vm6 = vweird.f32 %v5218_v27  ;;  %v2318_v40 = vand.u32 2147483647, %v5218_v27 }
 0x4bf   : > { %v2312_v38 = vmul.f32 %v5233_v30, %v2311_v31  ;;  %v2397_v20 = vsel %vm2394_vm9, %v2396_v1, %v2392_v7  ;;  %v2337_v14 = vsel %vm2334_vm5, %v2336_v56, %v2332_v33  ;;  %vm2316_vm7 = vmor %vm2314_vm6, %vm2315_vm10  ;;  %v3035_v31 = vld [vmem:[%s3244_s29 + $0x8] sm:$0xff] }
 0x4c0   : > { %v2418_v43 = vadd.f32 %v3023_v63, %v2417_v45  ;;  %v2321_v3 = vor.u32 1.1754944e-38, %v2320_v52  ;;  %vm2319_vm11 = vcmp.eq.f32.partialorder %v2318_v40, 8.507059e+37 }
 0x4c1   : > { %v2313_v61 = vadd.f32 %v5233_v30, %v2312_v38 }
 0x4c2   : > { %v2422_v25 = vsel %vm2421_vm12, %v3023_v63, %v2418_v43 }
 0x4c3   : > { %v2427_v47 = vsel %vm2424_vm8, %v2426_v24, %v2422_v25  ;;  %v2317_v28 = vsel %vm2316_vm7, %v5233_v30, %v2313_v61  ;;  %v3033_v24 = vld [vmem:[%s3244_s29] sm:$0xff] }
 0x4c4   : > { %2466 = vperm.xlu0 %2859, %v2427_v47   ;;  %2441 = vperm.xlu2 %2858, %v2352_v62   ;;  %v2322_v59 = vsel %vm2319_vm11, %v2321_v3, %v2317_v28  ;;  %v3034_v47 = vld [vmem:[%s3244_s29 + $0x10] sm:$0xff] }
 0x4cc   : > { %2456 = vperm.xlu0 %2859, %v2397_v20   ;;  %2436 = vperm.xlu2 %2858, %v2337_v14  }
 0x4d4   : > { %2431 = vperm.xlu0 %2859, %v2322_v59  }
 0x4dc   : > { %2500 = vperm.xlu0 %2859, %v434_v10  }
 0x516   : > { %v2462_v63 = vpop.permute.xlu2 %2461 }
 0x517   : > { %v2481_v6 = vmul.f32 %v2462_v63, %v4759_v2 }
 0x51e   : > { %v2452_v9 = vpop.permute.xlu1 %2451  ;;  %v2442_v19 = vpop.permute.xlu2 %2441 }
 0x51f   : > { %v2477_v37 = vmul.f32 %v2452_v9, %v5100_v41  ;;  %v2473_v11 = vmul.f32 %v2442_v19, %v5087_v17  ;;  %v2482_v41 = vmul.f32 %v2462_v63, %v4764_v50  ;;  %v2734_v17 = vld [vmem:[%s5338_s9] sm:$0xff]  ;;  %v2474_v50 = vmul.f32 %v2442_v19, %v5094_v8 }
 0x526   : > { %v2447_v44 = vpop.permute.xlu1 %2446  ;;  %v2437_v45 = vpop.permute.xlu2 %2436 }
 0x527   : > { %v2475_v4 = vmul.f32 %v2447_v44, %v5016_v35  ;;  %v2471_v46 = vmul.f32 %v2437_v45, %v5130_v48  ;;  %v2476_v48 = vmul.f32 %v2447_v44, %v5019_v0  ;;  %v2472_v42 = vmul.f32 %v2437_v45, %v5139_v36 }
 0x529   : > { %v2487_v29 = vpack.c.bf16 %v2475_v4, %v2473_v11 }
 0x52e   : > { %v2496_v0 = vpop.permute.xlu1 %2495 }
 0x536   : > { %v2467_v13 = vpop.permute.xlu0 %2466 }
 0x537   : > { %v2483_v57 = vmul.f32 %v2467_v13, %v4835_v21  ;;  %v2484_v2 = vmul.f32 %v2467_v13, %v4847_v18  ;;  %v2478_v18 = vmul.f32 %v2452_v9, %v5103_v53 }
 0x539   : > { %v2491_v27 = vpack.c.bf16 %v2483_v57, %v2481_v6 }
 0x53b   : > { %2515 = vmatpush.bf16.msrb.mxu2 %v2491_v27 }
 0x53e   : > { %v2457_v30 = vpop.permute.xlu0 %2456 }
 0x53f   : > { %v2479_v54 = vmul.f32 %v2457_v30, %v4923_v58  ;;  %v2492_v58 = vpack.c.bf16 %v2484_v2, %v2482_v41  ;;  %v2480_v35 = vmul.f32 %v2457_v30, %v4932_v39  ;;  %v2488_v39 = vpack.c.bf16 %v2476_v48, %v2474_v50 }
 0x541   : > { %v2489_v22 = vpack.c.bf16 %v2479_v54, %v2477_v37 }
 0x543   : > { %2516 = vmatpush.bf16.msrb.mxu2 %v2489_v22 }
 0x546   : > { %v2432_v21 = vpop.permute.xlu0 %2431 }
 0x547   : > { %v2469_v26 = vmul.f32 %v2432_v21, %v5136_v49  ;;  %2517 = vmatpush.bf16.msrb.mxu2 %v2487_v29  ;;  %v2490_v49 = vpack.c.bf16 %v2480_v35, %v2478_v18  ;;  %v2470_v43 = vmul.f32 %v2432_v21, %v5142_v5 }
 0x549   : > { %v2485_v60 = vpack.c.bf16 %v2471_v46, %v2469_v26  ;;  %v2486_v51 = vpack.c.bf16 %v2472_v42, %v2470_v43 }
 0x54b   : > { %2518 = vmatpush.bf16.msrb.mxu2 %v2485_v60 }
 0x54e   : > { %2722 = vmatmul.msk.bf16.vlgmr.msrb.gmra.mxu2 %vm2157_vm2, %v2734_v17  ;;  %v2501_v5 = vpop.permute.xlu0 %2500 }
 0x54f   : > { %2529 = vmatpush.bf16.msra.mxu2 %v2492_v58 }
 0x553   : > { %2530 = vmatpush.bf16.msra.mxu2 %v2490_v49 }
 0x557   : > { %2531 = vmatpush.bf16.msra.mxu2 %v2488_v39 }
 0x55b   : > { %2532 = vmatpush.bf16.msra.mxu2 %v2486_v51 }
 0x55e   : > { %2723 = vmatmul.msk.bf16.vlgmr.msra.gmra.mxu2 %vm2157_vm2, %v2734_v17 }
 0x5d1   : > { %v2520_v53 = vpop.f32.mrf.mxu2 }
 0x5d2   : > { %v2521_v8 = vadd.f32 %v2520_v53, %v2496_v0 }
 0x5d4   : > { %v2539_v32 = vadd.f32 %v3033_v24, %v2521_v8 }
 0x5d6   : > { %2543 = vst [vmem:[%s379_s14] sm:$0xff] %v2539_v32 }
 0x5d9   : > { %v2522_v36 = vpop.f32.mrf.mxu2 }
 0x5da   : > { %v2523_v25 = vadd.f32 %v2522_v36, %v2501_v5 }
 0x5dc   : > { %v2541_v62 = vadd.f32 %v3034_v47, %v2523_v25 }
 0x5de   : > { %2545 = vst [vmem:[%s379_s14 + $0x10] sm:$0xff] %v2541_v62 }
 0x5e1   : > { %v2534_v55 = vpop.f32.mrf.mxu2 }
 0x5e2   : > { %v2535_v23 = vadd.f32 %v2534_v55, %v2496_v0 }
 0x5e4   : > { %v2540_v12 = vadd.f32 %v3035_v31, %v2535_v23 }
 0x5e6   : > { %2544 = vst [vmem:[%s379_s14 + $0x8] sm:$0xff] %v2540_v12 }
 0x5e9   : > { %v2536_v34 = vpop.f32.mrf.mxu2 }
 0x5ea   : > { %v2537_v15 = vadd.f32 %v2536_v34, %v2501_v5 }
 0x5ec   : > { %v2542_v7 = vadd.f32 %v3036_v16, %v2537_v15 }
 0x5ee   : > { %2546 = vst [vmem:[%s379_s14 + $0x18] sm:$0xff] %v2542_v7 }
 0x5ef   : > { %3064 = shalt.err (!%p3061_p3)
}
 0x5f0   : > { %s3115_s29 = smov 256   ;;  %s5628_s12 = smov 16  }
 0x5f1   : > { %2740 = dma.vmem_to_hbm [thread:$0]  (%p3214_p5), %s2561_s30, 512, %s2563_s13, %s2548_s16, %s3115_s29, %s3115_s29, %s5628_s12  }
 0x5f2 PF: > { %p2746_p4 = scmp.ge.s32.totalorder %s3099_s20, 2  ;;  %s2577_s14 = sand.u32 1, %s3087_s17  }
 0x5f3   : > { %s2578_s1 = scalar_lea.sflag [#allocation3], %s2577_s14 }
 0x5f4   : > { %p2743_p7 = pnand %p2746_p4, %p3218_p6 }
 0x5f6   : > { %p2744_p8 = pneg %p2743_p7 }
 0x5f8   : > { %3082 = dma.done.wait (%p2744_p8), %s2578_s1, 512  }
 0x5f9   : > { %3084 = vsyncadd (%p2744_p8), %s2578_s1, 4294966784  ;;  %p21_p9 = scmp.ge.s32.totalorder %s3201_s23, 4   ;;  %s5629_s17 = smov %s3091_s18 }
 0x5fa   : > { %s5630_s18 = smov %s3095_s19  ;;  %s5631_s19 = smov %s3212_s26 }
 0x5fb   : > { %s5632_s20 = smov %s3201_s23  ;;  %23 = sbr.rel (!%p21_p9) target bundleno = 6 (0x6), region = 99 }
 0x600   :  { %2584 = vsyncpa [#allocation3], 1 }
 0x601   :  { %2586 = vsyncpa [#allocation3 + $0x1], 1 }

// kernel: tpu_custom_call.1
= control target key start
LH: loop header
LB: loop body
LE: loop exit
PB: predicated region body
PF: predicated region fallthrough
CT: control target
= control target key end

     0   :  { %s5329_s0 = inlined_call_operand.vmem [shape: f32[2,16,256], index: 0, kind: input, shape index: {}]   ;;  %s5330_s1 = inlined_call_operand.vmem [shape: bf16[64,16], index: 1, kind: input, shape index: {}]   ;;  %s5331_s2 = inlined_call_operand.vmem [shape: f32[64,1], index: 2, kind: input, shape index: {}]   ;;  %s5332_s3 = inlined_call_operand.vmem [shape: f32[64,9], index: 3, kind: input, shape index: {}]   ;;  %s5333_s4 = inlined_call_operand.vmem [shape: f32[64,1], index: 4, kind: input, shape index: {}]   ;;  %s5334_s5 = inlined_call_operand.vmem [shape: bf16[8,64], index: 5, kind: input, shape index: {}]   ;;  %s5335_s6 = inlined_call_operand.vmem [shape: f32[8,1], index: 6, kind: input, shape index: {}]   ;;  %s5336_s7 = inlined_call_operand.vmem [shape: bf16[64,8], index: 7, kind: input, shape index: {}]   ;;  %s5337_s8 = inlined_call_operand.vmem [shape: f32[64,1], index: 8, kind: input, shape index: {}]   ;;  %s5338_s9 = inlined_call_operand.vmem [shape: bf16[16,64], index: 9, kind: input, shape index: {}]   ;;  %s5339_s10 = inlined_call_operand.vmem [shape: f32[16,1], index: 10, kind: input, shape index: {}]   ;;  %s5340_s11 = inlined_call_operand.hbm [shape: f32[2,16,256], index: 11, kind: output, shape index: {}]  }
   0x1   :  { %5429 = sst [smem:[#allocation63_spill]] %s5329_s0 }
   0x2   :  { %5430 = sst [smem:[#allocation64_spill]] %s5330_s1 }
   0x3   :  { %16 = vsyncpa [#allocation3], 0 }
   0x4   :  { %18 = vsyncpa [#allocation3 + $0x1], 0  ;;  %s3176_s17 = smov 0   ;;  %s3178_s18 = smov 0  }
   0x5   :  { %s3180_s19 = smov 0   ;;  %s3182_s20 = smov 0  }
   0x6 LB: > { %s3197_s21 = sadd.s32 4294967295, %s3099_s20   ;;  %s2625_s22 = sadd.s32 4294967294, %s3099_s20   ;;  %s3099_s20 = sphi %s3182_s20, %s5632_s20   ;;  %s3095_s19 = sphi %s3180_s19, %s5631_s19   ;;  %s3091_s18 = sphi %s3178_s18, %s5630_s18   ;;  %s3087_s17 = sphi %s3176_s17, %s5629_s17  }
   0x7   : > { %s3201_s23 = sadd.s32 1, %s3099_s20   ;;  %s267_s24 = sadd.s32 1, %s3095_s19 }
   0x8   : > { %s264_s25 = ssub.s32 %s3099_s20, %s3201_s23  ;;  %p277_p0 = scmp.ne.s32.totalorder %s3095_s19, %s3091_s18 }
   0x9   : > { %p265_p1 = scmp.eq.s32.totalorder %s264_s25, 0  ;;  %p278_p2 = scmp.eq.s32.totalorder %s3197_s21, 1 }
   0xa   : > { %p283_p3 = scmp.ne.s32.totalorder %s3091_s18, %s3087_s17  ;;  %p284_p4 = scmp.eq.s32.totalorder %s2625_s22, 1 }
   0xb   : > { %s3212_s26 = scalar_select %p265_p1, %s3095_s19, %s267_s24  }
   0xc   : > { %p3214_p5 = por %p278_p2, %p277_p0  ;;  %p3218_p6 = por %p284_p4, %p283_p3 }
   0xd   : > { %p2628_p7 = scmp.ge.s32.totalorder %s3099_s20, 1  ;;  %p340_p8 = scmp.lt.s32.totalorder %s3099_s20, 3 }
   0xf   : > { %p341_p9 = pnand %p2628_p7, %p340_p8 }
  0x11   : > { %344 = sbr.rel (%p341_p9) target bundleno = 1522 (0x5f2), region = 64 }
  0x16   : > { %v3227_v0 = vld [vmem:[%s5332_s3 + $0x30] sm:$0xff]  ;;  %v411_v1 = vld [vmem:[%s5331_s2 + $0x20] sm:$0xff]  ;;  %p380_p10 = scmp.lt.s32.totalorder %s3197_s21, 1  ;;  %v5347_v3 = vmov 1   ;;  %v5341_v4 = vmov 0   ;;  %s5433_s0 = sld [smem:[#allocation63_spill]] }
  0x17   : > { %v409_v2 = vld [vmem:[%s5331_s2 + $0x10] sm:$0xff]  ;;  %2796 = vset.pattern.permute.xlu0 %v5347_v3  ;;  %2795 = vset.pattern.permute.xlu2 %v5341_v4  ;;  %v412_v11 = vld [vmem:[%s5331_s2 + $0x28] sm:$0xff]  ;;  %v410_v12 = vld [vmem:[%s5331_s2 + $0x18] sm:$0xff]  ;;  %s5434_s1 = sld [smem:[#allocation64_spill]]  ;;  %vm501_vm0 = vcmask 130048   ;;  %v5343_v14 = vmov 6  }
  0x18   : > { %2794 = vset.pattern.permute.xlu1 %v5341_v4  ;;  %1287 = vperm.xlu0 %2796, %v3227_v0   ;;  %s381_s16 = scalar_select %p380_p10, %s3197_s21, 1  ;;  %v422_v15 = vld [vmem:[%s5332_s3 + $0x38] sm:$0xff]  ;;  %v408_v16 = vld [vmem:[%s5331_s2 + $0x8] sm:$0xff]  ;;  %v419_v17 = vld [vmem:[%s5332_s3 + $0x20] sm:$0xff]  ;;  %v5345_v18 = vmov 2   ;;  %v5348_v22 = vmov 7  }
  0x19   : > { %463 = vperm.xlu1 %2794, %v411_v1   ;;  %453 = vperm.xlu2 %2795, %v409_v2   ;;  %v3279_v20 = vld [vmem:[%s5332_s3 + $0x10] sm:$0xff]  ;;  %v414_v24 = vld [vmem:[%s5331_s2 + $0x38] sm:$0xff]  ;;  %v407_v25 = vld [vmem:[%s5331_s2] sm:$0xff]  ;;  %v5350_v26 = vmov 8   ;;  %s377_s12 = sand.u32 1, %s3091_s18   ;;  %s2739_s15 = sshll.u32 %s3197_s21, 5 }
  0x1a   : > { %s2729_s22 = sshll.u32 %s381_s16, 5  ;;  %v413_v21 = vld [vmem:[%s5331_s2 + $0x30] sm:$0xff]  ;;  %v3320_v28 = vld [vmem:[%s5332_s3 + $0x28] sm:$0xff]  ;;  %v3329_v29 = vld [vmem:[%s5332_s3] sm:$0xff]  ;;  %s3107_s16 = smov 1  }
  0x1b   : > { %v3348_v30 = vld [vmem:[%s5332_s3 + $0x18] sm:$0xff]  ;;  %s2629_s13 = sshll.u32 %s377_s12, 5  ;;  %s2559_s25 = scalar_lea.hbm %s5340_s11, %s2739_s15 }
  0x1c   : > { %s3244_s29 = scalar_lea.vmem %s5433_s0, %s2729_s22  ;;  %s3108_s22 = smov 127  }
  0x1d   : > { %v435_v5 = vld [vmem:[%s3244_s29] sm:$0xff]  ;;  %v437_v6 = vld [vmem:[%s3244_s29 + $0x10] sm:$0xff]  ;;  %v436_v7 = vld [vmem:[%s3244_s29 + $0x8] sm:$0xff]  ;;  %s379_s14 = scalar_lea.vmem [#allocation2], %s2629_s13  ;;  %s2562_s13 = sshll.u32 %s2559_s25, 4  ;;  %s2563_s13 = int_to_ptr.hbm [resolvable:$true] %s2562_s13 }
  0x1e   : > { %v439_v8 = vpack.c.bf16 %v437_v6, %v435_v5  ;;  %v438_v9 = vld [vmem:[%s3244_s29 + $0x18] sm:$0xff]  ;;  %v2730_v13 = vld [vmem:[%s5434_s1] sm:$0xff]  ;;  %v2731_v19 = vld [vmem:[%s5434_s1 + $0x8] sm:$0xff]  ;;  %s2560_s30 = sshll.u32 %s379_s14, 4  ;;  %s3051_s21 = sshra.s32 %s2563_s13, 4  ;;  %s2561_s30 = int_to_ptr.vmem [resolvable:$true] %s2560_s30  ;;  %s3052_s21 = int_to_ptr.hbm [resolvable:$true] %s3051_s21 }
  0x1f   : > { %v440_v10 = vpack.c.bf16 %v438_v9, %v436_v7  ;;  %v2732_v23 = vld [vmem:[%s5434_s1 + $0x10] sm:$0xff]  ;;  %v2733_v27 = vld [vmem:[%s5434_s1 + $0x18] sm:$0xff]  ;;  %s3053_s0 = scalar_lea.hbm %s3052_s21, 32  ;;  %s3057_s24 = scalar_lea.hbm %s5340_s11, 64 }
  0x20   : > { %521 = vmatpush.bf16.msra.mxu0 %v439_v8  ;;  %2800 = vset.pattern.permute.xlu0 %v5343_v14  ;;  %p3054_p11 = scmp.ne.s32.totalorder %s3052_s21, %s3053_s0  ;;  %p3058_p0 = scmp.lt.s32.totalorder %s3052_s21, %s5340_s11 }
  0x21   : > { %550 = vmatpush.bf16.msra.mxu1 %v440_v10  ;;  %468 = vperm.xlu1 %2794, %v412_v11   ;;  %p3059_p1 = scmp.lt.s32.totalorder %s3057_s24, %s3053_s0 }
  0x22   : > { %458 = vperm.xlu2 %2795, %v410_v12   ;;  %1500 = vperm.xlu0 %2800, %v3227_v0   ;;  %p3055_p12 = pnand %p3054_p11, %p3214_p5 }
  0x23   : > { %2648 = vmatmul.msk.bf16.vlgmr.msra.gmra.mxu0 %vm501_vm0, %v2730_v13  ;;  %p3060_p2 = por %p3059_p1, %p3058_p0 }
  0x24   : > { %2652 = vmatmul.msk.bf16.vlgmr.msra.gmra.mxu1 %vm501_vm0, %v2730_v13  ;;  %p3056_p13 = pneg %p3055_p12 }
  0x26   : > { %p3061_p3 = pnand %p3060_p2, %p3056_p13 }
  0x29   : > { %448 = vperm.xlu1 %2794, %v408_v16  }
  0x2a   : > { %1243 = vperm.xlu2 %2795, %v422_v15   ;;  %2808 = vset.pattern.permute.xlu0 %v5345_v18 }
  0x2b   : > { %1343 = vperm.xlu0 %2808, %v419_v17  }
  0x31   : > { %1239 = vperm.xlu1 %2794, %v3227_v0  }
  0x32   : > { %2799 = vset.pattern.permute.xlu2 %v5345_v18 }
  0x33   : > { %1355 = vperm.xlu2 %2799, %v422_v15   ;;  %2649 = vmatmul.msk.bf16.gmra.mxu0 %vm501_vm0, %v2731_v19 }
  0x34   : > { %1335 = vperm.xlu0 %2808, %v3279_v20   ;;  %2653 = vmatmul.msk.bf16.gmra.mxu1 %vm501_vm0, %v2731_v19 }
  0x39   : > { %2797 = vset.pattern.permute.xlu1 %v5347_v3 }
  0x3a   : > { %1291 = vperm.xlu1 %2797, %v422_v15  }
  0x3b   : > { %2802 = vset.pattern.permute.xlu2 %v5348_v22 }
  0x3c   : > { %2817 = vset.pattern.permute.xlu0 %v5341_v4  ;;  %1548 = vperm.xlu2 %2802, %v3227_v0  }
  0x3d   : > { %473 = vperm.xlu0 %2817, %v413_v21  }
  0x42   : > { %2798 = vset.pattern.permute.xlu1 %v5345_v18 }
  0x43   : > { %2650 = vmatmul.msk.bf16.gmra.mxu0 %vm501_vm0, %v2732_v23  ;;  %1351 = vperm.xlu1 %2798, %v3227_v0  }
  0x44   : > { %2805 = vset.pattern.permute.xlu2 %v5347_v3  ;;  %2654 = vmatmul.msk.bf16.gmra.mxu1 %vm501_vm0, %v2732_v23 }
  0x45   : > { %478 = vperm.xlu0 %2817, %v414_v24   ;;  %1279 = vperm.xlu2 %2805, %v419_v17  }
  0x4b   : > { %2801 = vset.pattern.permute.xlu1 %v5343_v14 }
  0x4c   : > { %1504 = vperm.xlu1 %2801, %v422_v15  }
  0x4d   : > { %443 = vperm.xlu0 %2817, %v407_v25   ;;  %2807 = vset.pattern.permute.xlu2 %v5350_v26 }
  0x4e   : > { %1612 = vperm.xlu2 %2807, %v3227_v0  }
  0x53   : > { %2651 = vmatmul.msk.bf16.gmra.mxu0 %vm501_vm0, %v2733_v27 }
  0x54   : > { %2655 = vmatmul.msk.bf16.gmra.mxu1 %vm501_vm0, %v2733_v27  ;;  %2803 = vset.pattern.permute.xlu1 %v5348_v22 }
  0x55   : > { %1231 = vperm.xlu0 %2817, %v419_v17   ;;  %1552 = vperm.xlu1 %2803, %v422_v15  }
  0x56   : > { %2810 = vset.pattern.permute.xlu2 %v5343_v14 }
  0x57   : > { %1492 = vperm.xlu2 %2810, %v419_v17  }
  0x5d   : > { %1223 = vperm.xlu0 %2817, %v3279_v20   ;;  %2804 = vset.pattern.permute.xlu1 %v5341_v4 }
  0x5e   : > { %1235 = vperm.xlu1 %2804, %v3320_v28  }
  0x5f   : > { %2812 = vset.pattern.permute.xlu2 %v5348_v22 }
  0x60   : > { %1540 = vperm.xlu2 %2812, %v419_v17  }
  0x65   : > { %1215 = vperm.xlu0 %2817, %v3329_v29  }
  0x66   : > { %2806 = vset.pattern.permute.xlu1 %v5347_v3 }
  0x67   : > { %1283 = vperm.xlu1 %2806, %v3320_v28  }
  0x68   : > { %2814 = vset.pattern.permute.xlu2 %v5347_v3 }
  0x69   : > { %1271 = vperm.xlu2 %2814, %v3279_v20  }
  0x6d   : > { %2822 = vset.pattern.permute.xlu0 %v5350_v26 }
  0x6e   : > { %1616 = vperm.xlu0 %2822, %v422_v15  }
  0x6f   : > { %2809 = vset.pattern.permute.xlu1 %v5345_v18 }
  0x70   : > { %1347 = vperm.xlu1 %2809, %v3320_v28  }
  0x71   : > { %2816 = vset.pattern.permute.xlu2 %v5350_v26 }
  0x72   : > { %1604 = vperm.xlu2 %2816, %v419_v17  }
  0x73   : > { %v3371_v38 = vpop.permute.xlu2 %453 }
  0x76   : > { %1608 = vperm.xlu0 %2822, %v3320_v28  }
  0x78   : > { %2811 = vset.pattern.permute.xlu1 %v5343_v14 }
  0x79   : > { %1496 = vperm.xlu1 %2811, %v3320_v28  }
  0x7a   : > { %2819 = vset.pattern.permute.xlu2 %v5343_v14 }
  0x7b   : > { %1484 = vperm.xlu2 %2819, %v3279_v20  }
  0x7c   : > { %v459_v47 = vpop.permute.xlu2 %458 }
  0x81   : > { %2813 = vset.pattern.permute.xlu1 %v5341_v4 }
  0x82   : > { %1227 = vperm.xlu1 %2813, %v3348_v30  }
  0x83   : > { %2821 = vset.pattern.permute.xlu2 %v5348_v22 }
  0x84   : > { %1532 = vperm.xlu2 %2821, %v3279_v20   ;;  %v3383_v55 = vpop.permute.xlu2 %1243 }
  0x85   : > { %5436 = vst [vmem:[#allocation6_spill] sm:$0xff] %v3383_v55 }
  0x8a   : > { %2815 = vset.pattern.permute.xlu1 %v5347_v3  ;;  %v3355_v31 = vpop.permute.xlu0 %1287 }
  0x8b   : > { %1275 = vperm.xlu1 %2815, %v3348_v30   ;;  %v3359_v32 = vpop.permute.xlu1 %463 }
  0x8c   : > { %2824 = vset.pattern.permute.xlu2 %v5347_v3 }
  0x8d   : > { %v3396_v11 = vpop.permute.xlu2 %1355 }
  0x8e   : > { %5437 = vst [vmem:[#allocation7_spill] sm:$0xff] %v3396_v11 }
  0x93   : > { %2818 = vset.pattern.permute.xlu1 %v5345_v18  ;;  %v3368_v35 = vpop.permute.xlu1 %468 }
  0x94   : > { %v3362_v33 = vpop.permute.xlu0 %1500  ;;  %1339 = vperm.xlu1 %2818, %v3348_v30  }
  0x9b   : > { %v449_v40 = vpop.permute.xlu1 %448 }
  0x9c   : > { %2820 = vset.pattern.permute.xlu1 %v5343_v14 }
  0x9d   : > { %v3366_v34 = vpop.permute.xlu0 %1343  ;;  %1488 = vperm.xlu1 %2820, %v3348_v30  }
  0xa0   : > { %v523_v36 = vpop.f32.mrf.mxu0 }
  0xa1   : > { %v552_v37 = vpop.f32.mrf.mxu1 }
  0xa5   : > { %2823 = vset.pattern.permute.xlu1 %v5341_v4 }
  0xa6   : > { %v3373_v39 = vpop.permute.xlu0 %1335 }
  0xa7   : > { %5435 = vst [vmem:[#allocation5_spill] sm:$0xff] %v3373_v39 }
  0xa8   : > { %v525_v41 = vpop.f32.mrf.mxu0 }
  0xa9   : > { %v526_v42 = vadd.f32 %v525_v41, %v449_v40  ;;  %v554_v43 = vpop.f32.mrf.mxu1 }
  0xaa   : > { %v3376_v44 = vadd.f32 %v554_v43, %v449_v40 }
  0xab   : > { %v2658_v45 = vmul.f32 -1.442695, %v526_v42 }
  0xac   : > { %v2659_v46 = vmul.f32 -1.442695, %v3376_v44 }
  0xad   : > { %2860 = vpow2.f32 %v2658_v45 }
  0xae   : > { %2862 = vpow2.f32 %v2659_v46 }
  0xaf   : > { %v3379_v48 = vpop.permute.xlu0 %473 }
  0xb0   : > { %v528_v49 = vpop.f32.mrf.mxu0 }
  0xb1   : > { %v3381_v51 = vpop.f32.mrf.mxu1  ;;  %v3401_v17 = vadd.f32 %v528_v49, %v3371_v38 }
  0xb3   : > { %v2861_v50 = vpop.eup %2860  ;;  %v2660_v45 = vmul.f32 -1.442695, %v3401_v17 }
  0xb4   : > { %v2863_v52 = vpop.eup %2862  ;;  %v622_v53 = vadd.f32 1.0, %v2861_v50  ;;  %v3412_v50 = vpop.permute.xlu2 %1548 }
  0xb5   : > { %v623_v54 = vadd.f32 1.0, %v2863_v52 }
  0xb6   : > { %2864 = vrcp.f32 %v622_v53  ;;  %v675_v2 = vand.u32 2147483647, %v622_v53  ;;  %v677_v6 = vand.u32 2147483648, %v622_v53  ;;  %vm671_vm1 = vweird.f32 %v622_v53 }
  0xb7   : > { %2866 = vrcp.f32 %v623_v54  ;;  %v3385_v56 = vpop.permute.xlu0 %478  ;;  %vm686_vm3 = vweird.f32 %v623_v54  ;;  %v690_v40 = vand.u32 2147483647, %v623_v54 }
  0xb8   : > { %v530_v57 = vpop.f32.mrf.mxu0  ;;  %vm676_vm5 = vcmp.eq.f32.partialorder %v675_v2, 8.507059e+37  ;;  %v678_v20 = vor.u32 1.1754944e-38, %v677_v6 }
  0xb9   : > { %v3387_v58 = vadd.f32 %v530_v57, %v459_v47  ;;  %v559_v62 = vpop.f32.mrf.mxu1  ;;  %vm691_vm8 = vcmp.eq.f32.partialorder %v690_v40, 8.507059e+37 }
  0xba   : > { %v3390_v8 = vadd.f32 %v559_v62, %v459_v47 }
  0xbb   : > { %v2662_v0 = vmul.f32 -1.442695, %v3387_v58 }
  0xbc   : > { %v2865_v59 = vpop.eup %2864  ;;  %v2663_v21 = vmul.f32 -1.442695, %v3390_v8 }
  0xbd   : > { %v2867_v60 = vpop.eup %2866  ;;  %v667_v61 = vmul.f32 %v2865_v59, %v622_v53  ;;  %vm672_vm2 = vweird.f32 %v2865_v59  ;;  %2868 = vpow2.f32 %v2662_v0 }
  0xbe   : > { %v682_v63 = vmul.f32 %v2867_v60, %v623_v54  ;;  %vm673_vm4 = vmor %vm671_vm1, %vm672_vm2  ;;  %vm687_vm6 = vweird.f32 %v2867_v60 }
  0xbf   : > { %v668_v1 = vsub.f32 1.0, %v667_v61  ;;  %v444_v5 = vpop.permute.xlu0 %443  ;;  %vm688_vm7 = vmor %vm686_vm3, %vm687_vm6  ;;  %v3423_v61 = vadd.f32 %v3381_v51, %v3371_v38  ;;  %v3438_v51 = vpop.permute.xlu2 %1279 }
  0xc0   : > { %v683_v7 = vsub.f32 1.0, %v682_v63  ;;  %v3392_v9 = vadd.f32 %v523_v36, %v444_v5  ;;  %v3394_v10 = vpop.f32.mrf.mxu0  ;;  %v3398_v13 = vadd.f32 %v552_v37, %v444_v5  ;;  %v692_v36 = vand.u32 2147483648, %v623_v54 }
  0xc1   : > { %v669_v12 = vmul.f32 %v2865_v59, %v668_v1  ;;  %v3416_v54 = vpop.f32.mrf.mxu1  ;;  %v3432_v1 = vpop.permute.xlu1 %1239  ;;  %v2661_v2 = vmul.f32 -1.442695, %v3423_v61 }
  0xc2   : > { %v684_v15 = vmul.f32 %v2867_v60, %v683_v7  ;;  %v2656_v19 = vmul.f32 -1.442695, %v3392_v9  ;;  %v2657_v25 = vmul.f32 -1.442695, %v3398_v13  ;;  %v693_v46 = vor.u32 1.1754944e-38, %v692_v36 }
  0xc3   : > { %v670_v16 = vadd.f32 %v2865_v59, %v669_v12  ;;  %v2869_v41 = vpop.eup %2868 }
  0xc4   : > { %v685_v24 = vadd.f32 %v2867_v60, %v684_v15  ;;  %2870 = vpow2.f32 %v2656_v19 }
  0xc5   : > { %v674_v23 = vsel %vm673_vm4, %v2865_v59, %v670_v16  ;;  %2872 = vpow2.f32 %v2663_v21  ;;  %v3445_v16 = vadd.f32 %v3394_v10, %v3359_v32 }
  0xc6   : > { %v679_v27 = vsel %vm676_vm5, %v678_v20, %v674_v23  ;;  %v689_v43 = vsel %vm688_vm7, %v2867_v60, %v685_v24  ;;  %2874 = vpow2.f32 %v2657_v25 }
  0xc7   : > { %v3406_v37 = vmul.f32 %v679_v27, %v526_v42  ;;  %v3414_v42 = vadd.f32 1.0, %v2869_v41  ;;  %v694_v52 = vsel %vm691_vm8, %v693_v46, %v689_v43  ;;  %2876 = vpow2.f32 %v2660_v45 }
  0xc8   : > { %v535_v47 = vpop.f32.mrf.mxu0  ;;  %v3419_v60 = vmul.f32 %v694_v52, %v3376_v44  ;;  %v2664_v46 = vmul.f32 -1.442695, %v3445_v16 }
  0xc9   : > { %5438 = vst [vmem:[#allocation8_spill] sm:$0xff] %v3406_v37  ;;  %894 = vrot.lane.b32.xlu2 %v3406_v37, %s3107_s16  ;;  %v564_v7 = vpop.f32.mrf.mxu1  ;;  %v3450_v23 = vadd.f32 %v535_v47, %v3368_v35  ;;  %v3467_v52 = vpop.permute.xlu1 %1291  ;;  %vm731_vm15 = vweird.f32 %v3414_v42 }
  0xca   : > { %v2871_v49 = vpop.eup %2870  ;;  %5439 = vst [vmem:[#allocation9_spill] sm:$0xff] %v3419_v60  ;;  %v3453_v27 = vadd.f32 %v564_v7, %v3368_v35  ;;  %v3471_v7 = vpop.permute.xlu2 %1612 }
  0xcb   : > { %v620_v53 = vadd.f32 1.0, %v2871_v49  ;;  %v2873_v57 = vpop.eup %2872  ;;  %v2666_v41 = vmul.f32 -1.442695, %v3450_v23  ;;  %5440 = vst [vmem:[#allocation10_spill] sm:$0xff] %v3467_v52 }
  0xcc   : > { %v2875_v59 = vpop.eup %2874  ;;  %v3430_v63 = vadd.f32 1.0, %v2873_v57  ;;  %v2667_v47 = vmul.f32 -1.442695, %v3453_v27 }
  0xcd   : > { %2878 = vrcp.f32 %v620_v53  ;;  %v3426_v62 = vadd.f32 1.0, %v2875_v59  ;;  %v2877_v0 = vpop.eup %2876  ;;  %v645_v20 = vand.u32 2147483647, %v620_v53  ;;  %v647_v21 = vand.u32 2147483648, %v620_v53 }
  0xce   : > { %2880 = vrcp.f32 %v3414_v42  ;;  %v3441_v12 = vadd.f32 1.0, %v2877_v0  ;;  %vm641_vm10 = vweird.f32 %v620_v53  ;;  %vm746_vm5 = vweird.f32 %v3430_v63 }
  0xcf   : > { %2882 = vrcp.f32 %v3426_v62  ;;  %v648_v35 = vor.u32 1.1754944e-38, %v647_v21  ;;  %vm646_vm12 = vcmp.eq.f32.partialorder %v645_v20, 8.507059e+37  ;;  %v660_v21 = vand.u32 2147483647, %v3426_v62 }
  0xd0   : > { %v538_v5 = vpop.f32.mrf.mxu0  ;;  %2884 = vrcp.f32 %v3430_v63  ;;  %vm656_vm14 = vweird.f32 %v3426_v62  ;;  %vm701_vm8 = vweird.f32 %v3441_v12 }
  0xd1   : > { %910 = vrot.lane.b32.xlu2 %v3419_v60, %s3107_s16  ;;  %2886 = vpow2.f32 %v2661_v2  ;;  %v3456_v36 = vadd.f32 %v538_v5, %v3379_v48  ;;  %v662_v5 = vand.u32 2147483648, %v3426_v62  ;;  %vm661_vm2 = vcmp.eq.f32.partialorder %v660_v21, 8.507059e+37  ;;  %v3524_v21 = vpop.permute.xlu1 %1351 }
  0xd2   : > { %2888 = vrcp.f32 %v3441_v12 }
  0xd3   : > { %v2879_v44 = vpop.eup %2878  ;;  %v2668_v0 = vmul.f32 -1.442695, %v3456_v36  ;;  %2890 = vpow2.f32 %v2666_v41 }
  0xd4   : > { %v3436_v38 = vpop.eup %2880  ;;  %v637_v6 = vmul.f32 %v2879_v44, %v620_v53  ;;  %vm642_vm9 = vweird.f32 %v2879_v44  ;;  %2892 = vpow2.f32 %v2667_v47 }
  0xd5   : > { %v727_v19 = vmul.f32 %v3436_v38, %v3414_v42  ;;  %v2883_v24 = vpop.eup %2882  ;;  %vm643_vm11 = vmor %vm641_vm10, %vm642_vm9  ;;  %2894 = vpow2.f32 %v2668_v0  ;;  %vm732_vm1 = vweird.f32 %v3436_v38 }
  0xd6   : > { %v638_v15 = vsub.f32 1.0, %v637_v6  ;;  %v652_v10 = vmul.f32 %v2883_v24, %v3426_v62  ;;  %v3463_v43 = vpop.eup %2884  ;;  %vm657_vm13 = vweird.f32 %v2883_v24  ;;  %2896 = vpow2.f32 %v2664_v46  ;;  %vm3516_vm3 = vmor %vm731_vm15, %vm732_vm1 }
  0xd7   : > { %v2887_v49 = vpop.eup %2886  ;;  %v728_v57 = vsub.f32 1.0, %v727_v19  ;;  %vm3487_vm0 = vmor %vm656_vm14, %vm657_vm13  ;;  %vm747_vm6 = vweird.f32 %v3463_v43 }
  0xd8   : > { %v639_v25 = vmul.f32 %v2879_v44, %v638_v15  ;;  %v653_v45 = vsub.f32 1.0, %v652_v10  ;;  %v540_v6 = vpop.f32.mrf.mxu0  ;;  %v742_v15 = vmul.f32 %v3463_v43, %v3430_v63  ;;  %v3482_v20 = vpop.eup %2888  ;;  %vm3556_vm7 = vmor %vm746_vm5, %vm747_vm6 }
  0xd9   : > { %963 = vrot.lane.b32.xlu2 %v3406_v37, %s3108_s22  ;;  %v729_v10 = vmul.f32 %v3436_v38, %v728_v57  ;;  %v3494_v41 = vadd.f32 %v540_v6, %v3385_v56  ;;  %v735_v57 = vand.u32 2147483647, %v3414_v42  ;;  %vm702_vm10 = vweird.f32 %v3482_v20 }
  0xda   : > { %v640_v40 = vadd.f32 %v2879_v44, %v639_v25  ;;  %v654_v2 = vmul.f32 %v2883_v24, %v653_v45  ;;  %v3504_v45 = vadd.f32 %v3416_v54, %v3359_v32  ;;  %v743_v47 = vsub.f32 1.0, %v742_v15 }
  0xdb   : > { %v730_v46 = vadd.f32 %v3436_v38, %v729_v10  ;;  %v697_v32 = vmul.f32 %v3482_v20, %v3441_v12  ;;  %vm3531_vm4 = vcmp.eq.f32.partialorder %v735_v57, 8.507059e+37  ;;  %v752_v57 = vand.u32 2147483648, %v3430_v63 }
  0xdc   : > { %v644_v59 = vsel %vm643_vm11, %v2879_v44, %v640_v40  ;;  %v3479_v44 = vadd.f32 1.0, %v2887_v49  ;;  %v655_v19 = vadd.f32 %v2883_v24, %v654_v2  ;;  %v2670_v49 = vmul.f32 -1.442695, %v3494_v41  ;;  %vm3608_vm11 = vmor %vm701_vm8, %vm702_vm10 }
  0xdd   : > { %v649_v53 = vsel %vm646_vm12, %v648_v35, %v644_v59  ;;  %v663_v35 = vor.u32 1.1754944e-38, %v662_v5  ;;  %v737_v59 = vand.u32 2147483648, %v3414_v42  ;;  %v2665_v2 = vmul.f32 -1.442695, %v3504_v45 }
  0xde   : > { %v3477_v25 = vmul.f32 %v649_v53, %v3392_v9  ;;  %v3491_v9 = vpop.f32.mrf.mxu1  ;;  %v659_v62 = vsel %vm3487_vm0, %v2883_v24, %v655_v19  ;;  %2898 = vrcp.f32 %v3479_v44  ;;  %v2891_v24 = vpop.eup %2890  ;;  %v744_v15 = vmul.f32 %v3463_v43, %v743_v47 }
  0xdf   : > { %v664_v0 = vsel %vm661_vm2, %v663_v35, %v659_v62  ;;  %v2893_v53 = vpop.eup %2892  ;;  %v3521_v5 = vadd.f32 1.0, %v2891_v24  ;;  %2900 = vpow2.f32 %v2670_v49  ;;  %v738_v62 = vor.u32 1.1754944e-38, %v737_v59  ;;  %v3536_v35 = vpop.permute.xlu2 %1492 }
  0xe0   : > { %5441 = vst [vmem:[#allocation11_spill] sm:$0xff] %v3477_v25  ;;  %892 = vrot.lane.b32.xlu1 %v3477_v25, %s3107_s16  ;;  %v2895_v6 = vpop.eup %2894  ;;  %v3527_v19 = vmul.f32 %v664_v0, %v3398_v13  ;;  %v3529_v10 = vadd.f32 1.0, %v2893_v53  ;;  %v734_v47 = vsel %vm3516_vm3, %v3436_v38, %v730_v46  ;;  %v698_v49 = vsub.f32 1.0, %v697_v32 }
  0xe1   : > { %979 = vrot.lane.b32.xlu2 %v3419_v60, %s3108_s22  ;;  %v2897_v42 = vpop.eup %2896  ;;  %2902 = vrcp.f32 %v3521_v5  ;;  %v3550_v59 = vadd.f32 1.0, %v2895_v6  ;;  %v745_v38 = vadd.f32 %v3463_v43, %v744_v15  ;;  %v750_v0 = vand.u32 2147483647, %v3430_v63 }
  0xe2   : > { %5446 = vst [vmem:[#allocation12_spill] sm:$0xff] %v3527_v19  ;;  %2904 = vrcp.f32 %v3529_v10  ;;  %v739_v46 = vsel %vm3531_vm4, %v738_v62, %v734_v47  ;;  %v3560_v54 = vadd.f32 1.0, %v2897_v42  ;;  %v699_v63 = vmul.f32 %v3482_v20, %v698_v49 }
  0xe3   : > { %2906 = vpow2.f32 %v2665_v2  ;;  %v753_v15 = vor.u32 1.1754944e-38, %v752_v57  ;;  %v3573_v42 = vmul.f32 %v739_v46, %v3387_v58  ;;  %v749_v47 = vsel %vm3556_vm7, %v3463_v43, %v745_v38  ;;  %v3589_v43 = vpop.permute.xlu1 %1504 }
  0xe4   : > { %v3547_v13 = vpop.eup %2898  ;;  %2908 = vrcp.f32 %v3550_v59  ;;  %vm3578_vm9 = vcmp.eq.f32.partialorder %v750_v0, 8.507059e+37  ;;  %v707_v57 = vand.u32 2147483648, %v3441_v12  ;;  %v700_v53 = vadd.f32 %v3482_v20, %v699_v63 }
  0xe5   : > { %v2901_v32 = vpop.eup %2900  ;;  %v712_v2 = vmul.f32 %v3547_v13, %v3479_v44  ;;  %2910 = vrcp.f32 %v3560_v54  ;;  %v754_v18 = vsel %vm3578_vm9, %v753_v15, %v749_v47  ;;  %v810_v4 = vand.u32 2147483647, %v3529_v10 }
  0xe6   : > { %v569_v24 = vpop.f32.mrf.mxu1  ;;  %v3591_v0 = vadd.f32 1.0, %v2901_v32  ;;  %v812_v63 = vand.u32 2147483648, %v3529_v10  ;;  %vm716_vm14 = vweird.f32 %v3479_v44  ;;  %vm806_vm15 = vweird.f32 %v3529_v10 }
  0xe7   : > { %v3565_v6 = vpop.eup %2902  ;;  %v3570_v40 = vadd.f32 %v569_v24, %v3385_v56  ;;  %v705_v56 = vand.u32 2147483647, %v3441_v12  ;;  %v713_v24 = vsub.f32 1.0, %v712_v2  ;;  %vm811_vm1 = vcmp.eq.f32.partialorder %v810_v4, 8.507059e+37 }
  0xe8   : > { %908 = vrot.lane.b32.xlu1 %v3527_v19, %s3107_s16  ;;  %v2905_v62 = vpop.eup %2904  ;;  %v787_v49 = vmul.f32 %v3565_v6, %v3521_v5  ;;  %2912 = vrcp.f32 %v3591_v0  ;;  %vm792_vm2 = vweird.f32 %v3565_v6  ;;  %vm717_vm3 = vweird.f32 %v3547_v13 }
  0xe9   : > { %1263 = vperm.xlu2 %2824, %v3329_v29   ;;  %v2907_v14 = vpop.eup %2906  ;;  %v802_v58 = vmul.f32 %v2905_v62, %v3529_v10  ;;  %v2671_v2 = vmul.f32 -1.442695, %v3570_v40  ;;  %vm807_vm12 = vweird.f32 %v2905_v62  ;;  %vm3622_vm13 = vcmp.eq.f32.partialorder %v705_v56, 8.507059e+37  ;;  %vm3682_vm6 = vmor %vm716_vm14, %vm717_vm3 }
  0xea   : > { %v788_v38 = vsub.f32 1.0, %v787_v49  ;;  %v3597_v46 = vpop.eup %2908  ;;  %v3612_v49 = vpop.permute.xlu2 %1540  ;;  %v3614_v22 = vadd.f32 1.0, %v2907_v14  ;;  %v714_v14 = vmul.f32 %v3547_v13, %v713_v24  ;;  %v3635_v56 = vmul.f32 %v754_v18, %v3390_v8  ;;  %vm808_vm0 = vmor %vm806_vm15, %vm807_vm12 }
  0xeb   : > { %v803_v3 = vsub.f32 1.0, %v802_v58  ;;  %v817_v12 = vmul.f32 %v3597_v46, %v3550_v59  ;;  %v3628_v39 = vpop.eup %2910  ;;  %2914 = vpow2.f32 %v2671_v2  ;;  %v797_v18 = vand.u32 2147483648, %v3521_v5 }
  0xec   : > { %v789_v15 = vmul.f32 %v3565_v6, %v788_v38  ;;  %v704_v38 = vsel %vm3608_vm11, %v3482_v20, %v700_v53  ;;  %5457 = vst [vmem:[#allocation13_spill] sm:$0xff] %v3635_v56  ;;  %2916 = vrcp.f32 %v3614_v22  ;;  %v720_v20 = vand.u32 2147483647, %v3479_v44 }
  0xed   : > { %v804_v47 = vmul.f32 %v2905_v62, %v803_v3  ;;  %v818_v11 = vsub.f32 1.0, %v817_v12  ;;  %v757_v10 = vmul.f32 %v3628_v39, %v3560_v54  ;;  %vm791_vm4 = vweird.f32 %v3521_v5 }
  0xee   : > { %v790_v24 = vadd.f32 %v3565_v6, %v789_v15  ;;  %v3640_v32 = vpop.eup %2912  ;;  %vm3661_vm5 = vmor %vm791_vm4, %vm792_vm2  ;;  %vm3688_vm7 = vcmp.eq.f32.partialorder %v720_v20, 8.507059e+37  ;;  %vm822_vm9 = vweird.f32 %v3597_v46  ;;  %vm821_vm10 = vweird.f32 %v3550_v59 }
  0xef   : > { %v805_v3 = vadd.f32 %v2905_v62, %v804_v47  ;;  %v715_v47 = vadd.f32 %v3547_v13, %v714_v14  ;;  %v758_v14 = vsub.f32 1.0, %v757_v10  ;;  %vm3717_vm11 = vmor %vm821_vm10, %vm822_vm9  ;;  %vm762_vm12 = vweird.f32 %v3628_v39 }
  0xf0   : > { %961 = vrot.lane.b32.xlu1 %v3477_v25, %s3108_s22  ;;  %vm761_vm14 = vweird.f32 %v3560_v54 }
  0xf1   : > { %898 = vrot.lane.b32.xlu2 %v3573_v42, %s3107_s16  ;;  %v809_v60 = vsel %vm808_vm0, %v2905_v62, %v805_v3  ;;  %v795_v62 = vand.u32 2147483647, %v3521_v5  ;;  %v2915_v15 = vpop.eup %2914  ;;  %v819_v5 = vmul.f32 %v3597_v46, %v818_v11  ;;  %v798_v11 = vor.u32 1.1754944e-38, %v797_v18  ;;  %vm3745_vm15 = vmor %vm761_vm14, %vm762_vm12 }
  0xf2   : > { %2826 = vset.pattern.permute.xlu2 %v5350_v26  ;;  %v708_v26 = vor.u32 1.1754944e-38, %v707_v57  ;;  %v813_v57 = vor.u32 1.1754944e-38, %v812_v63  ;;  %v3665_v63 = vpop.permute.xlu1 %1552  ;;  %v3676_v12 = vpop.eup %2916  ;;  %v759_v18 = vmul.f32 %v3628_v39, %v758_v14  ;;  %vm852_vm0 = vweird.f32 %v3640_v32 }
  0xf3   : > { %vm796_vm8 = vcmp.eq.f32.partialorder %v795_v62, 8.507059e+37  ;;  %v820_v10 = vadd.f32 %v3597_v46, %v819_v5  ;;  %v772_v62 = vmul.f32 %v3676_v12, %v3614_v22  ;;  %vm777_vm4 = vweird.f32 %v3676_v12 }
  0xf4   : > { %v814_v8 = vsel %vm811_vm1, %v813_v57, %v809_v60  ;;  %v709_v2 = vsel %vm3622_vm13, %v708_v26, %v704_v38  ;;  %v722_v60 = vand.u32 2147483648, %v3479_v44  ;;  %v847_v26 = vmul.f32 %v3640_v32, %v3591_v0 }
  0xf5   : > { %v3654_v53 = vmul.f32 %v814_v8, %v3453_v27  ;;  %v794_v27 = vsel %vm3661_vm5, %v3565_v6, %v790_v24  ;;  %v3686_v6 = vpop.permute.xlu2 %1271  ;;  %v3693_v3 = vmul.f32 %v709_v2, %v3401_v17  ;;  %v3695_v8 = vadd.f32 1.0, %v2915_v15 }
  0xf6   : > { %5463 = vst [vmem:[#allocation15_spill] sm:$0xff] %v3686_v6  ;;  %v723_v57 = vor.u32 1.1754944e-38, %v722_v60  ;;  %v799_v24 = vsel %vm796_vm8, %v798_v11, %v794_v27  ;;  %v719_v44 = vsel %vm3682_vm6, %v3547_v13, %v715_v47  ;;  %v848_v20 = vsub.f32 1.0, %v847_v26 }
  0xf7   : > { %5458 = vst [vmem:[#allocation14_spill] sm:$0xff] %v3654_v53  ;;  %918 = vrot.lane.b32.xlu0 %v3654_v53, %s3107_s16  ;;  %v827_v17 = vand.u32 2147483648, %v3550_v59  ;;  %v3711_v13 = vmul.f32 %v799_v24, %v3450_v23  ;;  %v825_v2 = vand.u32 2147483647, %v3550_v59  ;;  %v3723_v15 = vadd.f32 %v3491_v9, %v3379_v48 }
  0xf8   : > { %977 = vrot.lane.b32.xlu1 %v3527_v19, %s3108_s22  ;;  %5466 = vst [vmem:[#allocation16_spill] sm:$0xff] %v3693_v3  ;;  %v724_v60 = vsel %vm3688_vm7, %v723_v57, %v719_v44  ;;  %2918 = vrcp.f32 %v3695_v8  ;;  %v824_v23 = vsel %vm3717_vm11, %v3597_v46, %v820_v10  ;;  %v849_v47 = vmul.f32 %v3640_v32, %v848_v20 }
  0xf9   : > { %914 = vrot.lane.b32.xlu2 %v3635_v56, %s3107_s16  ;;  %v760_v59 = vadd.f32 %v3628_v39, %v759_v18  ;;  %v773_v27 = vsub.f32 1.0, %v772_v62  ;;  %v828_v5 = vor.u32 1.1754944e-38, %v827_v17  ;;  %v3737_v48 = vmul.f32 %v724_v60, %v3423_v61 }
  0xfa   : > { %v3734_v26 = vpop.permute.xlu1 %1235  ;;  %v767_v9 = vand.u32 2147483648, %v3560_v54  ;;  %vm826_vm13 = vcmp.eq.f32.partialorder %v825_v2, 8.507059e+37  ;;  %v765_v46 = vand.u32 2147483647, %v3560_v54  ;;  %v2669_v11 = vmul.f32 -1.442695, %v3723_v15 }
  0xfb   : > { %5469 = vst [vmem:[#allocation17_spill] sm:$0xff] %v3737_v48  ;;  %v829_v14 = vsel %vm826_vm13, %v828_v5, %v824_v23  ;;  %v850_v57 = vadd.f32 %v3640_v32, %v849_v47  ;;  %v764_v24 = vsel %vm3745_vm15, %v3628_v39, %v760_v59  ;;  %v774_v54 = vmul.f32 %v3676_v12, %v773_v27 }
  0xfc   : > { %v857_v44 = vand.u32 2147483648, %v3591_v0  ;;  %v768_v10 = vor.u32 1.1754944e-38, %v767_v9  ;;  %v3761_v20 = vmul.f32 %v829_v14, %v3456_v36  ;;  %vm851_vm1 = vweird.f32 %v3591_v0 }
  0xfd   : > { %v3742_v58 = vpop.permute.xlu2 %1604  ;;  %v855_v18 = vand.u32 2147483647, %v3591_v0  ;;  %vm766_vm2 = vcmp.eq.f32.partialorder %v765_v46, 8.507059e+37  ;;  %2920 = vpow2.f32 %v2669_v11  ;;  %vm853_vm3 = vmor %vm851_vm1, %vm852_vm0  ;;  %v775_v2 = vadd.f32 %v3676_v12, %v774_v54 }
  0xfe   : > { %v2919_v61 = vpop.eup %2918  ;;  %v769_v39 = vsel %vm766_vm2, %v768_v10, %v764_v24  ;;  %v854_v62 = vsel %vm853_vm3, %v3640_v32, %v850_v57  ;;  %v858_v36 = vor.u32 1.1754944e-38, %v857_v44  ;;  %v782_v60 = vand.u32 2147483648, %v3614_v22  ;;  %v3809_v10 = vld [vmem:[%s5332_s3 + $0x8] sm:$0xff] }
  0xff   : > { %971 = vrot.lane.b32.xlu0 %v3711_v13, %s3108_s22  ;;  %v862_v17 = vmul.f32 %v2919_v61, %v3695_v8  ;;  %vm856_vm5 = vcmp.eq.f32.partialorder %v855_v18, 8.507059e+37  ;;  %v3773_v0 = vmul.f32 %v769_v39, %v3445_v16  ;;  %vm776_vm6 = vweird.f32 %v3614_v22  ;;  %5477 = vst [vmem:[#allocation23_spill] sm:$0xff] %v3809_v10 }
 0x100   : > { %896 = vrot.lane.b32.xlu1 %v3693_v3, %s3107_s16  ;;  %v780_v32 = vand.u32 2147483647, %v3614_v22  ;;  %v859_v4 = vsel %vm856_vm5, %v858_v36, %v854_v62  ;;  %vm778_vm7 = vmor %vm776_vm6, %vm777_vm4  ;;  %v783_v16 = vor.u32 1.1754944e-38, %v782_v60  ;;  %vm867_vm9 = vweird.f32 %v2919_v61 }
 0x101   : > { %967 = vrot.lane.b32.xlu2 %v3573_v42, %s3108_s22  ;;  %5472 = vst [vmem:[#allocation18_spill] sm:$0xff] %v3773_v0  ;;  %v863_v47 = vsub.f32 1.0, %v862_v17  ;;  %v779_v27 = vsel %vm778_vm7, %v3676_v12, %v775_v2  ;;  %v3787_v9 = vmul.f32 %v859_v4, %v3494_v41  ;;  %v872_v38 = vand.u32 2147483648, %v3695_v8 }
 0x102   : > { %v3777_v23 = vpop.permute.xlu1 %1283  ;;  %vm781_vm8 = vcmp.eq.f32.partialorder %v780_v32, 8.507059e+37  ;;  %vm866_vm10 = vweird.f32 %v3695_v8  ;;  %v870_v41 = vand.u32 2147483647, %v3695_v8  ;;  %v5479_v2 = vmov 7  }
 0x103   : > { %v2921_v59 = vpop.eup %2920  ;;  %5474 = vst [vmem:[#allocation20_spill] sm:$0xff] %v3787_v9  ;;  %v784_v22 = vsel %vm781_vm8, %v783_v16, %v779_v27  ;;  %v864_v14 = vmul.f32 %v2919_v61, %v863_v47  ;;  %vm868_vm11 = vmor %vm866_vm10, %vm867_vm9  ;;  %v873_v54 = vor.u32 1.1754944e-38, %v872_v38  ;;  %v5480_v60 = vmov 1  }
 0x104   : > { %v633_v46 = vadd.f32 1.0, %v2921_v59  ;;  %v3792_v12 = vmul.f32 %v784_v22, %v3504_v45  ;;  %vm871_vm12 = vcmp.eq.f32.partialorder %v870_v41, 8.507059e+37  ;;  %v386_v22 = vlaneseq }
 0x105   : > { %v3780_v5 = vpop.permute.xlu2 %1484  ;;  %v865_v11 = vadd.f32 %v2919_v61, %v864_v14 }
 0x106   : > { %5473 = vst [vmem:[#allocation19_spill] sm:$0xff] %v3780_v5  ;;  %2922 = vrcp.f32 %v633_v46  ;;  %v842_v47 = vand.u32 2147483648, %v633_v46  ;;  %vm836_vm14 = vweird.f32 %v633_v46  ;;  %v840_v59 = vand.u32 2147483647, %v633_v46 }
 0x107   : > { %973 = vrot.lane.b32.xlu0 %v3761_v20, %s3108_s22  ;;  %5475 = vst [vmem:[#allocation21_spill] sm:$0xff] %v3792_v12  ;;  %v869_v24 = vsel %vm868_vm11, %v2919_v61, %v865_v11  ;;  %v5492_v5 = vmov 6  }
 0x108   : > { %912 = vrot.lane.b32.xlu1 %v3737_v48, %s3107_s16  ;;  %v874_v18 = vsel %vm871_vm12, %v873_v54, %v869_v24  ;;  %v843_v16 = vor.u32 1.1754944e-38, %v842_v47  ;;  %vm841_vm0 = vcmp.eq.f32.partialorder %v840_v59, 8.507059e+37  ;;  %v3860_v54 = vpop.permute.xlu0 %1231  ;;  %v5489_v47 = vmov 2  }
 0x109   : > { %983 = vrot.lane.b32.xlu2 %v3635_v56, %s3108_s22  ;;  %v3815_v8 = vmul.f32 %v874_v18, %v3570_v40  ;;  %v5502_v56 = vmov 8  }
 0x10a   : > { %v3795_v57 = vpop.permute.xlu1 %1347 }
 0x10c   : > { %v2923_v44 = vpop.eup %2922 }
 0x10d   : > { %v3803_v45 = vpop.permute.xlu2 %1532  ;;  %v832_v39 = vmul.f32 %v2923_v44, %v633_v46  ;;  %vm837_vm13 = vweird.f32 %v2923_v44  ;;  %v3844_v46 = vand.u32 127, %v386_v22 }
 0x10e   : > { %5476 = vst [vmem:[#allocation22_spill] sm:$0xff] %v3803_v45  ;;  %vm838_vm15 = vmor %vm836_vm14, %vm837_vm13 }
 0x10f   : > { %906 = vrot.lane.b32.xlu0 %v3787_v9, %s3107_s16  ;;  %v833_v17 = vsub.f32 1.0, %v832_v39  ;;  %vm993_vm1 = vcmp.lt.s32.totalorder %v3844_v46, 127  ;;  %v5356_v39 = vmov 4   ;;  %vm924_vm2 = vcmp.lt.s32.totalorder %v3844_v46, 1 }
 0x110   : > { %965 = vrot.lane.b32.xlu1 %v3693_v3, %s3108_s22  ;;  %v3939_v3 = vld [vmem:[%s5332_s3 + $0x20] sm:$0xff]  ;;  %v5517_v52 = vand.u32 15, %v3844_v46  ;;  %vm1422_vm7 = vcmp.lt.s32.totalorder %v3844_v46, 16  ;;  %vm395_vm8 = vcmp.ge.s32.totalorder %v3844_v46, 16  ;;  %vm1683_vm9 = vcmp.lt.s32.totalorder %v3844_v46, 112 }
 0x111   : > { %900 = vrot.lane.b32.xlu2 %v3773_v0, %s3107_s16  ;;  %v834_v36 = vmul.f32 %v2923_v44, %v833_v17  ;;  %v3870_v17 = vpop.permute.xlu0 %1223  ;;  %5499 = vst [vmem:[#allocation37_spill] sm:$0xff] %v3939_v3 }
 0x112   : > { %v3817_v61 = vpop.permute.xlu1 %1496  ;;  %5486 = vst [vmem:[#allocation30_spill] sm:$0xff] %v3870_v17  ;;  %vm4046_vm5 = vcmp.le.s32.totalorder %v5517_v52, 14 }
 0x113   : > { %5478 = vst [vmem:[#allocation24_spill] sm:$0xff] %v3817_v61  ;;  %v835_v32 = vadd.f32 %v2923_v44, %v834_v36 }
 0x115   : > { %v839_v27 = vsel %vm838_vm15, %v2923_v44, %v835_v32 }
 0x116   : > { %v844_v11 = vsel %vm841_vm0, %v843_v16, %v839_v27  ;;  %v3888_v16 = vadd.s32 128, %v3844_v46 }
 0x117   : > { %1600 = vperm.xlu0 %2822, %v3348_v30   ;;  %v3840_v38 = vmul.f32 %v844_v11, %v3723_v15  ;;  %v5360_v11 = vmov 3  }
 0x118   : > { %981 = vrot.lane.b32.xlu1 %v3737_v48, %s3108_s22  ;;  %5490 = vst [vmem:[#allocation33_spill] sm:$0xff] %v3888_v16 }
 0x119   : > { %916 = vrot.lane.b32.xlu2 %v3792_v12, %s3107_s16 }
 0x11a   : > { %v3832_v4 = vpop.permute.xlu1 %1227 }
 0x11b   : > { %5481 = vst [vmem:[#allocation25_spill] sm:$0xff] %v3832_v4 }
 0x11f   : > { %991 = vrot.lane.b32.xlu0 %v3815_v8, %s3108_s22 }
 0x120   : > { %1219 = vperm.xlu1 %2823, %v3809_v10   ;;  %2827 = vset.pattern.permute.xlu0 %v5479_v2 }
 0x121   : > { %969 = vrot.lane.b32.xlu2 %v3773_v0, %s3108_s22 }
 0x122   : > { %v3842_v41 = vpop.permute.xlu1 %1275 }
 0x123   : > { %v3819_v62 = vpop.permute.xlu2 %894  ;;  %5482 = vst [vmem:[#allocation26_spill] sm:$0xff] %v3842_v41 }
 0x127   : > { %1544 = vperm.xlu0 %2827, %v3320_v28  }
 0x128   : > { %985 = vrot.lane.b32.xlu1 %v3792_v12, %s3108_s22 }
 0x129   : > { %987 = vrot.lane.b32.xlu2 %v3654_v53, %s3108_s22  ;;  %2825 = vset.pattern.permute.xlu1 %v5480_v60  ;;  %v3878_v60 = vld [vmem:[%s5332_s3 + $0x10] sm:$0xff] }
 0x12a   : > { %v3862_v44 = vpop.permute.xlu1 %1339  ;;  %5488 = vst [vmem:[#allocation32_spill] sm:$0xff] %v3878_v60 }
 0x12b   : > { %v3829_v40 = vpop.permute.xlu2 %910  ;;  %5485 = vst [vmem:[#allocation29_spill] sm:$0xff] %v3862_v44  ;;  %v5509_v44 = vmov 4  }
 0x12f   : > { %1536 = vperm.xlu0 %2827, %v3348_v30  }
 0x130   : > { %902 = vrot.lane.b32.xlu1 %v3711_v13, %s3107_s16 }
 0x131   : > { %904 = vrot.lane.b32.xlu2 %v3761_v20, %s3107_s16 }
 0x132   : > { %v3873_v36 = vpop.permute.xlu1 %1488 }
 0x133   : > { %v964_v14 = vpop.permute.xlu2 %963  ;;  %5487 = vst [vmem:[#allocation31_spill] sm:$0xff] %v3873_v36 }
 0x137   : > { %1524 = vperm.xlu0 %2827, %v3329_v29  }
 0x138   : > { %920 = vrot.lane.b32.xlu1 %v3840_v38, %s3107_s16 }
 0x139   : > { %989 = vrot.lane.b32.xlu2 %v3840_v38, %s3108_s22 }
 0x13b   : > { %v980_v24 = vpop.permute.xlu2 %979 }
 0x13c   : > { %v3854_v30 = vsel %vm993_vm1, %v964_v14, %v980_v24  ;;  %v3858_v15 = vsel %vm993_vm1, %v980_v24, %v964_v14  ;;  %v3027_v24 = vld [vmem:[%s5332_s3 + $0x38] sm:$0xff] }
 0x13d   : > { %5483 = vst [vmem:[#allocation27_spill] sm:$0xff] %v3854_v30 }
 0x13e   : > { %5484 = vst [vmem:[#allocation28_spill] sm:$0xff] %v3858_v15 }
 0x13f   : > { %2842 = vset.pattern.permute.xlu0 %v5356_v39  ;;  %v5366_v39 = vand.u32 15, %v3888_v16 }
 0x140   : > { %975 = vrot.lane.b32.xlu1 %v3787_v9, %s3108_s22  ;;  %1107 = vperm.xlu0 %2842, %v3320_v28   ;;  %v1216_v28 = vpop.permute.xlu0 %1215  ;;  %s3113_s22 = smov 112   ;;  %v5577_v9 = vld [vmem:[#allocation16_spill] sm:$0xff] }
 0x141   : > { %922 = vrot.lane.b32.xlu2 %v3815_v8, %s3107_s16  ;;  %vm3918_vm4 = vcmp.ge.s32.totalorder %v5366_v39, 1  ;;  %s5428_s16 = smov 16  }
 0x143   : > { %v1264_v18 = vpop.permute.xlu2 %1263 }
 0x144   : > { %v1294_v6 = vmul.f32 %v1264_v18, %v3477_v25  ;;  %v1295_v39 = vmul.f32 %v1264_v18, %v3527_v19 }
 0x148   : > { %1267 = vperm.xlu1 %2825, %v3809_v10   ;;  %1095 = vperm.xlu0 %2842, %v3878_v60   ;;  %v3904_v45 = vpop.permute.xlu0 %1616 }
 0x149   : > { %1596 = vperm.xlu2 %2826, %v3878_v60  }
 0x14b   : > { %v899_v32 = vpop.permute.xlu2 %898 }
 0x150   : > { %2828 = vset.pattern.permute.xlu1 %v5489_v47  ;;  %2846 = vset.pattern.permute.xlu0 %v5360_v11  ;;  %v3950_v19 = vpop.permute.xlu0 %1608  ;;  %v5574_v11 = vmov 4  }
 0x151   : > { %2829 = vset.pattern.permute.xlu2 %v5489_v47  ;;  %1327 = vperm.xlu1 %2828, %v3329_v29   ;;  %v5364_v47 = vand.u32 15, %v3844_v46  ;;  %5503 = vst [vmem:[#allocation40_spill] sm:$0xff] %v3950_v19 }
 0x152   : > { %1331 = vperm.xlu2 %2829, %v3809_v10   ;;  %v893_v59 = vpop.permute.xlu1 %892  ;;  %1067 = vperm.xlu0 %2846, %v3027_v24  }
 0x153   : > { %v915_v27 = vpop.permute.xlu2 %914  ;;  %vm3912_vm3 = vcmp.ge.s32.totalorder %v5364_v47, 1 }
 0x154   : > { %v3892_v22 = vsel %vm924_vm2, %v899_v32, %v915_v27  ;;  %v3896_v14 = vsel %vm924_vm2, %v915_v27, %v899_v32 }
 0x155   : > { %5491 = vst [vmem:[#allocation34_spill] sm:$0xff] %v3892_v22 }
 0x159   : > { %2830 = vset.pattern.permute.xlu1 %v5492_v5 }
 0x15a   : > { %2831 = vset.pattern.permute.xlu2 %v5492_v5  ;;  %1476 = vperm.xlu1 %2830, %v3329_v29   ;;  %v909_v32 = vpop.permute.xlu1 %908 }
 0x15b   : > { %1480 = vperm.xlu2 %2831, %v3809_v10   ;;  %v968_v27 = vpop.permute.xlu2 %967  ;;  %v925_v5 = vsel %vm924_vm2, %v893_v59, %v909_v32  ;;  %v933_v29 = vsel %vm924_vm2, %v909_v32, %v893_v59  ;;  %1052 = vperm.xlu0 %2846, %v3939_v3  }
 0x15c   : > { %v3928_v48 = vsel %vm3912_vm3, %v933_v29, 0.0  ;;  %v3932_v47 = vsel %vm3918_vm4, %v925_v5, 0.0 }
 0x15d   : > { %5497 = vst [vmem:[#allocation35_spill] sm:$0xff] %v3928_v48  ;;  %v1246_v59 = vmul.f32 %v1216_v28, %v3928_v48  ;;  %v1247_v32 = vmul.f32 %v1216_v28, %v3932_v47 }
 0x15e   : > { %5498 = vst [vmem:[#allocation36_spill] sm:$0xff] %v3932_v47 }
 0x15f   : > { %v3944_v29 = vadd.f32 %v1295_v39, %v1247_v32  ;;  %v3946_v17 = vadd.f32 %v1294_v6, %v1246_v59  ;;  %v3964_v6 = vld [vmem:[%s5332_s3] sm:$0xff] }
 0x160   : > { %5505 = vst [vmem:[#allocation42_spill] sm:$0xff] %v3964_v6 }
 0x161   : > { %5500 = vst [vmem:[#allocation38_spill] sm:$0xff] %v3944_v29 }
 0x162   : > { %5501 = vst [vmem:[#allocation39_spill] sm:$0xff] %v3946_v17  ;;  %2832 = vset.pattern.permute.xlu1 %v5479_v2  ;;  %v962_v5 = vpop.permute.xlu1 %961 }
 0x163   : > { %2833 = vset.pattern.permute.xlu2 %v5502_v56  ;;  %v984_v18 = vpop.permute.xlu2 %983  ;;  %1528 = vperm.xlu1 %2832, %v3809_v10  }
 0x164   : > { %v3955_v22 = vsel %vm993_vm1, %v968_v27, %v984_v18  ;;  %v3959_v39 = vsel %vm993_vm1, %v984_v18, %v968_v27  ;;  %1588 = vperm.xlu2 %2833, %v3964_v6   ;;  %v5508_v27 = vmov 3   ;;  %v3030_v18 = vld [vmem:[%s5332_s3 + $0x30] sm:$0xff] }
 0x165   : > { %5504 = vst [vmem:[#allocation41_spill] sm:$0xff] %v3959_v39 }
 0x169   : > { %v3981_v47 = vpop.permute.xlu0 %918 }
 0x16a   : > { %v978_v2 = vpop.permute.xlu1 %977 }
 0x16b   : > { %v901_v28 = vpop.permute.xlu2 %900  ;;  %v3969_v59 = vsel %vm993_vm1, %v962_v5, %v978_v2  ;;  %v3973_v32 = vsel %vm993_vm1, %v978_v2, %v962_v5  ;;  %2834 = vset.pattern.permute.xlu1 %v5502_v56 }
 0x16c   : > { %5506 = vst [vmem:[#allocation43_spill] sm:$0xff] %v3969_v59  ;;  %2835 = vset.pattern.permute.xlu2 %v5508_v27  ;;  %1592 = vperm.xlu1 %2834, %v3809_v10   ;;  %v5387_v59 = vmov 5  }
 0x16d   : > { %5507 = vst [vmem:[#allocation44_spill] sm:$0xff] %v3973_v32  ;;  %1062 = vperm.xlu2 %2835, %v3030_v18  }
 0x171   : > { %v972_v5 = vpop.permute.xlu0 %971 }
 0x172   : > { %v897_v17 = vpop.permute.xlu1 %896 }
 0x173   : > { %v917_v39 = vpop.permute.xlu2 %916 }
 0x174   : > { %2836 = vset.pattern.permute.xlu1 %v5509_v44 }
 0x175   : > { %2837 = vset.pattern.permute.xlu2 %v5509_v44  ;;  %1111 = vperm.xlu1 %2836, %v3030_v18  }
 0x176   : > { %1115 = vperm.xlu2 %2837, %v3027_v24  }
 0x179   : > { %v3993_v4 = vpop.permute.xlu0 %973 }
 0x17a   : > { %v913_v56 = vpop.permute.xlu1 %912 }
 0x17b   : > { %v970_v2 = vpop.permute.xlu2 %969  ;;  %v3987_v10 = vsel %vm924_vm2, %v897_v17, %v913_v56  ;;  %v3991_v41 = vsel %vm924_vm2, %v913_v56, %v897_v17  ;;  %v3031_v17 = vld [vmem:[%s5332_s3 + $0x28] sm:$0xff] }
 0x17c   : > { %5510 = vst [vmem:[#allocation45_spill] sm:$0xff] %v3987_v10 }
 0x17d   : > { %5511 = vst [vmem:[#allocation46_spill] sm:$0xff] %v3991_v41  ;;  %2838 = vset.pattern.permute.xlu1 %v5387_v59  ;;  %v5514_v41 = vmov 5  }
 0x17e   : > { %1175 = vperm.xlu1 %2838, %v3030_v18   ;;  %2839 = vset.pattern.permute.xlu2 %v5387_v59 }
 0x17f   : > { %1179 = vperm.xlu2 %2839, %v3027_v24  }
 0x181   : > { %v3997_v6 = vpop.permute.xlu0 %906 }
 0x182   : > { %v966_v48 = vpop.permute.xlu1 %965 }
 0x183   : > { %v988_v25 = vpop.permute.xlu2 %987 }
 0x186   : > { %2840 = vset.pattern.permute.xlu1 %v5508_v27 }
 0x187   : > { %1057 = vperm.xlu1 %2840, %v3031_v17   ;;  %2841 = vset.pattern.permute.xlu2 %v5509_v44 }
 0x188   : > { %1103 = vperm.xlu2 %2841, %v3939_v3   ;;  %v4022_v3 = vld [vmem:[%s5332_s3 + $0x18] sm:$0xff] }
 0x189   : > { %v4015_v10 = vpop.permute.xlu0 %1600 }
 0x18a   : > { %v982_v56 = vpop.permute.xlu1 %981 }
 0x18b   : > { %v4005_v18 = vpop.permute.xlu2 %904  ;;  %v4009_v24 = vsel %vm993_vm1, %v966_v48, %v982_v56  ;;  %v4013_v59 = vsel %vm993_vm1, %v982_v56, %v966_v48  ;;  %v937_v48 = vsel %vm924_vm2, %v917_v39, %v901_v28 }
 0x18c   : > { %5512 = vst [vmem:[#allocation47_spill] sm:$0xff] %v4009_v24 }
 0x18d   : > { %5513 = vst [vmem:[#allocation48_spill] sm:$0xff] %v4013_v59 }
 0x18f   : > { %2843 = vset.pattern.permute.xlu1 %v5514_v41 }
 0x190   : > { %1171 = vperm.xlu1 %2843, %v3031_v17   ;;  %2845 = vset.pattern.permute.xlu2 %v5508_v27  ;;  %v4035_v17 = vsel %vm3912_vm3, %v937_v48, 0.0  ;;  %v929_v48 = vsel %vm924_vm2, %v901_v28, %v917_v39  ;;  %v5523_v28 = vand.u32 15, %v3888_v16 }
 0x191   : > { %1047 = vperm.xlu2 %2845, %v4022_v3   ;;  %v4031_v56 = vpop.permute.xlu0 %991  ;;  %5516 = vst [vmem:[#allocation50_spill] sm:$0xff] %v4035_v17  ;;  %v1254_v59 = vmul.f32 %v3860_v54, %v4035_v17  ;;  %v4068_v39 = vsel %vm3918_vm4, %v929_v48, 0.0 }
 0x192   : > { %v4025_v29 = vpop.permute.xlu1 %1219  ;;  %5522 = vst [vmem:[#allocation53_spill] sm:$0xff] %v4068_v39  ;;  %vm4072_vm6 = vcmp.le.s32.totalorder %v5523_v28, 14  ;;  %v1305_v28 = vmul.f32 %v3777_v23, %v3654_v53 }
 0x193   : > { %5515 = vst [vmem:[#allocation49_spill] sm:$0xff] %v4025_v29  ;;  %v4027_v24 = vpop.permute.xlu2 %989 }
 0x198   : > { %2844 = vset.pattern.permute.xlu1 %v5508_v27 }
 0x199   : > { %1042 = vperm.xlu1 %2844, %v3878_v60   ;;  %2849 = vset.pattern.permute.xlu2 %v5514_v41  ;;  %v1302_v60 = vmul.f32 %v3438_v51, %v3773_v0  ;;  %v4060_v37 = vpop.permute.xlu0 %1544 }
 0x19a   : > { %v986_v32 = vpop.permute.xlu1 %985  ;;  %5521 = vst [vmem:[#allocation52_spill] sm:$0xff] %v4060_v37  ;;  %v999_v37 = vsel %vm993_vm1, %v972_v5, %v988_v25 }
 0x19b   : > { %v4042_v19 = vpop.permute.xlu2 %922  ;;  %v998_v27 = vsel %vm993_vm1, %v970_v2, %v986_v32  ;;  %v1006_v52 = vsel %vm993_vm1, %v986_v32, %v970_v2  ;;  %v1318_v29 = vadd.f32 %v1302_v60, %v1254_v59  ;;  %v1255_v60 = vmul.f32 %v3860_v54, %v4068_v39 }
 0x19c   : > { %v4058_v30 = vsel %vm4046_vm5, %v998_v27, 0.0  ;;  %v4080_v32 = vsel %vm4072_vm6, %v1006_v52, 0.0  ;;  %v1007_v59 = vsel %vm993_vm1, %v988_v25, %v972_v5  ;;  %v1303_v54 = vmul.f32 %v3438_v51, %v3792_v12 }
 0x19d   : > { %5520 = vst [vmem:[#allocation51_spill] sm:$0xff] %v4058_v30  ;;  %v1366_v55 = vmul.f32 %v3366_v34, %v4058_v30  ;;  %v4100_v25 = vsel %vm4046_vm5, %v999_v37, 0.0  ;;  %v1367_v5 = vmul.f32 %v3366_v34, %v4080_v32  ;;  %v1304_v52 = vmul.f32 %v3777_v23, %v3711_v13 }
 0x19e   : > { %5526 = vst [vmem:[#allocation54_spill] sm:$0xff] %v4080_v32  ;;  %v4114_v51 = vsel %vm4072_vm6, %v1007_v59, 0.0  ;;  %v1368_v23 = vmul.f32 %v3795_v57, %v4100_v25 }
 0x19f   : > { %v1382_v27 = vadd.f32 %v1366_v55, %v1318_v29  ;;  %v4091_v55 = vsel %vm3912_vm3, %v3896_v14, 0.0 }
 0x1a1   : > { %2847 = vset.pattern.permute.xlu1 %v5509_v44  ;;  %1398 = vrot.lane.b32.xlu2 %v1382_v27, %s5428_s16  ;;  %v4126_v27 = vpop.permute.xlu0 %1536 }
 0x1a2   : > { %1099 = vperm.xlu1 %2847, %v4022_v3   ;;  %v903_v29 = vpop.permute.xlu1 %902  ;;  %5529 = vst [vmem:[#allocation57_spill] sm:$0xff] %v4126_v27  ;;  %v1561_v16 = vmul.f32 %v4126_v27, %v3573_v42  ;;  %v1515_v27 = vmul.f32 %v3536_v35, %v4035_v17 }
 0x1a3   : > { %v4094_v2 = vpop.permute.xlu2 %1596  ;;  %v930_v14 = vsel %vm924_vm2, %v903_v29, %v3981_v47  ;;  %v938_v48 = vsel %vm924_vm2, %v3981_v47, %v903_v29  ;;  %v1319_v29 = vadd.f32 %v1303_v54, %v1255_v60 }
 0x1a4   : > { %5527 = vst [vmem:[#allocation55_spill] sm:$0xff] %v4094_v2  ;;  %v4118_v37 = vsel %vm3912_vm3, %v938_v48, 0.0  ;;  %v4122_v34 = vsel %vm3918_vm4, %v930_v14, 0.0  ;;  %v1513_v48 = vmul.f32 %v3873_v36, %v4091_v55  ;;  %v4137_v14 = vsel %vm4046_vm5, %v3955_v22, 0.0 }
 0x1a5   : > { %5528 = vst [vmem:[#allocation56_spill] sm:$0xff] %v4122_v34  ;;  %v1256_v47 = vmul.f32 %v3734_v26, %v4118_v37  ;;  %v1257_v59 = vmul.f32 %v3734_v26, %v4122_v34  ;;  %v1369_v2 = vmul.f32 %v3795_v57, %v4114_v51  ;;  %v1383_v44 = vadd.f32 %v1367_v5, %v1319_v29 }
 0x1a6   : > { %5530 = vst [vmem:[#allocation58_spill] sm:$0xff] %v4137_v14  ;;  %v1625_v54 = vmul.f32 %v4015_v10, %v4137_v14  ;;  %v1577_v36 = vadd.f32 %v1561_v16, %v1513_v48  ;;  %v1000_v22 = vsel %vm993_vm1, %v3993_v4, %v4027_v24 }
 0x1a7   : > { %v1320_v26 = vadd.f32 %v1304_v52, %v1256_v47  ;;  %v1321_v60 = vadd.f32 %v1305_v28, %v1257_v59  ;;  %v932_v59 = vsel %vm924_vm2, %v3997_v6, %v4042_v19 }
 0x1a8   : > { %v4154_v57 = vadd.f32 %v1625_v54, %v1577_v36  ;;  %v1563_v36 = vmul.f32 %v3612_v49, %v3773_v0 }
 0x1a9   : > { %1414 = vrot.lane.b32.xlu2 %v1383_v44, %s5428_s16  ;;  %v1384_v12 = vadd.f32 %v1368_v23, %v1320_v26  ;;  %v1385_v32 = vadd.f32 %v1369_v2, %v1321_v60  ;;  %v4171_v2 = vsel %vm4046_vm5, %v1000_v22, 0.0  ;;  %v4183_v47 = vpop.permute.xlu0 %1524 }
 0x1aa   : > { %5531 = vst [vmem:[#allocation59_spill] sm:$0xff] %v4154_v57  ;;  %v921_v5 = vpop.permute.xlu1 %920  ;;  %2848 = vset.pattern.permute.xlu1 %v5514_v41  ;;  %v1579_v26 = vadd.f32 %v1563_v36, %v1515_v27  ;;  %v1370_v60 = vmul.f32 %v3524_v21, %v4171_v2  ;;  %v1631_v54 = vmul.f32 %v3471_v7, %v4171_v2 }
 0x1ab   : > { %v931_v16 = vsel %vm924_vm2, %v4005_v18, %v921_v5  ;;  %v939_v52 = vsel %vm924_vm2, %v921_v5, %v4005_v18  ;;  %1400 = vrot.lane.b32.xlu1 %v1384_v12, %s5428_s16  ;;  %1416 = vrot.lane.b32.xlu0 %v1385_v32, %s5428_s16  ;;  %v1567_v18 = vmul.f32 %v3412_v50, %v3761_v20 }
 0x1ac   : > { %v4165_v44 = vpop.permute.xlu2 %1331  ;;  %v4175_v28 = vsel %vm3912_vm3, %v939_v52, 0.0  ;;  %v1306_v12 = vmul.f32 %v3355_v31, %v3761_v20  ;;  %v1627_v32 = vmul.f32 %v3742_v58, %v4058_v30  ;;  %v4195_v23 = vsel %vm3918_vm4, %v931_v16, 0.0 }
 0x1ad   : > { %5532 = vst [vmem:[#allocation60_spill] sm:$0xff] %v4165_v44  ;;  %v1258_v29 = vmul.f32 %v3432_v1, %v4175_v28  ;;  %v1519_v48 = vmul.f32 %v3362_v33, %v4175_v28  ;;  %v1008_v52 = vsel %vm993_vm1, %v4027_v24, %v3993_v4  ;;  %v4207_v30 = vsel %vm3918_vm4, %v932_v59, 0.0 }
 0x1ae   : > { %v1520_v27 = vmul.f32 %v3362_v33, %v4195_v23  ;;  %v1643_v16 = vadd.f32 %v1627_v32, %v1579_v26  ;;  %v1259_v0 = vmul.f32 %v3432_v1, %v4195_v23  ;;  %v1568_v33 = vmul.f32 %v3412_v50, %v3840_v38 }
 0x1af   : > { %v1583_v22 = vadd.f32 %v1567_v18, %v1519_v48  ;;  %v1322_v5 = vadd.f32 %v1306_v12, %v1258_v29  ;;  %v1522_v12 = vmul.f32 %v3589_v43, %v4207_v30  ;;  %v4224_v24 = vsel %vm4072_vm6, %v1008_v52, 0.0 }
 0x1b0   : > { %v1307_v59 = vmul.f32 %v3355_v31, %v3840_v38  ;;  %v940_v50 = vsel %vm924_vm2, %v4042_v19, %v3997_v6  ;;  %v1584_v48 = vadd.f32 %v1568_v33, %v1520_v27  ;;  %v1570_v26 = vmul.f32 %v3665_v63, %v3815_v8 }
 0x1b1   : > { %v1647_v36 = vadd.f32 %v1631_v54, %v1583_v22  ;;  %v1386_v17 = vadd.f32 %v1370_v60, %v1322_v5  ;;  %v1632_v54 = vmul.f32 %v3471_v7, %v4224_v24  ;;  %v1371_v22 = vmul.f32 %v3524_v21, %v4224_v24 }
 0x1b2   : > { %v976_v18 = vpop.permute.xlu1 %975  ;;  %v4247_v60 = vpop.permute.xlu0 %1107  ;;  %v1323_v31 = vadd.f32 %v1307_v59, %v1259_v0  ;;  %v1586_v6 = vadd.f32 %v1570_v26, %v1522_v12  ;;  %v959_v5 = vsel %vm3912_vm3, %v940_v50, 0.0  ;;  %v5535_v0 = vld [vmem:[#allocation24_spill] sm:$0xff]  ;;  %v5539_v59 = vld [vmem:[#allocation6_spill] sm:$0xff] }
 0x1b3   : > { %v1009_v4 = vsel %vm993_vm1, %v4031_v56, %v976_v18  ;;  %1659 = vrot.lane.b32.xlu0 %v1643_v16, %s3113_s22  ;;  %1663 = vrot.lane.b32.xlu2 %v1647_v36, %s3113_s22  ;;  %5533 = vst [vmem:[#allocation61_spill] sm:$0xff] %v4247_v60  ;;  %v1001_v19 = vsel %vm993_vm1, %v976_v18, %v4031_v56  ;;  %v5536_v36 = vld [vmem:[#allocation49_spill] sm:$0xff]  ;;  %v5538_v12 = vld [vmem:[#allocation52_spill] sm:$0xff] }
 0x1b4   : > { %v4228_v1 = vsel %vm4072_vm6, %v1009_v4, 0.0  ;;  %1402 = vrot.lane.b32.xlu1 %v1386_v17, %s5428_s16  ;;  %v934_v17 = vsel %vm924_vm2, %v3829_v40, %v3819_v62  ;;  %v1518_v27 = vmul.f32 %v5535_v0, %v4122_v34  ;;  %v1648_v16 = vadd.f32 %v1632_v54, %v1584_v48  ;;  %v5540_v26 = vld [vmem:[#allocation8_spill] sm:$0xff] }
 0x1b5   : > { %v4231_v32 = vpop.permute.xlu2 %1480  ;;  %v1634_v29 = vmul.f32 %v3904_v45, %v4228_v1  ;;  %v4260_v52 = vsel %vm3912_vm3, %v934_v17, 0.0  ;;  %v4268_v56 = vsel %vm4046_vm5, %v1001_v19, 0.0  ;;  %v1387_v18 = vadd.f32 %v1371_v22, %v1323_v31  ;;  %v5543_v31 = vld [vmem:[#allocation20_spill] sm:$0xff]  ;;  %v5544_v19 = vld [vmem:[#allocation10_spill] sm:$0xff] }
 0x1b6   : > { %5534 = vst [vmem:[#allocation62_spill] sm:$0xff] %v4260_v52  ;;  %v1248_v4 = vmul.f32 %v5536_v36, %v4260_v52  ;;  %v1566_v33 = vmul.f32 %v5538_v12, %v3654_v53  ;;  %v1260_v50 = vmul.f32 %v5539_v59, %v959_v5  ;;  %v1521_v54 = vmul.f32 %v3589_v43, %v959_v5  ;;  %v5545_v52 = vld [vmem:[#allocation7_spill] sm:$0xff] }
 0x1b7   : > { %v1650_v7 = vadd.f32 %v1634_v29, %v1586_v6  ;;  %v5541_v29 = vld [vmem:[#allocation27_spill] sm:$0xff]  ;;  %v1308_v6 = vmul.f32 %v5544_v19, %v5543_v31  ;;  %v1633_v43 = vmul.f32 %v3904_v45, %v4268_v56  ;;  %v1261_v45 = vmul.f32 %v5539_v59, %v4207_v30 }
 0x1b8   : > { %v4282_v48 = vsel %vm4046_vm5, %v5541_v29, 0.0  ;;  %v1582_v57 = vadd.f32 %v1566_v33, %v1518_v27  ;;  %v5546_v29 = vld [vmem:[#allocation40_spill] sm:$0xff] }
 0x1b9   : > { %5542 = vst [vmem:[#allocation52_spill] sm:$0xff] %v4282_v48  ;;  %v1360_v22 = vmul.f32 %v4165_v44, %v4282_v48  ;;  %v1630_v53 = vmul.f32 %v5546_v29, %v4114_v51  ;;  %v1324_v48 = vadd.f32 %v1308_v6, %v1260_v50 }
 0x1ba   : > { %v4270_v21 = vpop.permute.xlu1 %1267  ;;  %v4294_v34 = vpop.permute.xlu0 %1095 }
 0x1bb   : > { %5537 = vst [vmem:[#allocation24_spill] sm:$0xff] %v4270_v21  ;;  %v1296_v17 = vmul.f32 %v4270_v21, %v5540_v26  ;;  %1679 = vrot.lane.b32.xlu2 %v1648_v16, %s3113_s22  ;;  %1681 = vrot.lane.b32.xlu0 %v1650_v7, %s3113_s22  ;;  %v1372_v16 = vmul.f32 %v5545_v52, %v4268_v56  ;;  %v5547_v21 = vld [vmem:[#allocation44_spill] sm:$0xff] }
 0x1bc   : > { %1418 = vrot.lane.b32.xlu1 %v1387_v18, %s5428_s16  ;;  %v1569_v18 = vmul.f32 %v3665_v63, %v5543_v31  ;;  %v1646_v36 = vadd.f32 %v1630_v53, %v1582_v57  ;;  %v4307_v27 = vsel %vm4072_vm6, %v5547_v21, 0.0  ;;  %v1373_v57 = vmul.f32 %v5545_v52, %v4228_v1  ;;  %v5548_v21 = vld [vmem:[#allocation38_spill] sm:$0xff] }
 0x1bd   : > { %v1312_v26 = vadd.f32 %v1296_v17, %v1248_v4  ;;  %v1388_v4 = vadd.f32 %v1372_v16, %v1324_v48  ;;  %v1517_v52 = vmul.f32 %v5535_v0, %v4118_v37  ;;  %v1565_v16 = vmul.f32 %v5538_v12, %v3711_v13 }
 0x1be   : > { %v4292_v7 = vpop.permute.xlu2 %1588  ;;  %v1585_v44 = vadd.f32 %v1569_v18, %v1521_v54  ;;  %v5552_v18 = vld [vmem:[#allocation35_spill] sm:$0xff] }
 0x1bf   : > { %v4302_v60 = vadd.f32 %v1360_v22, %v1312_v26 }
 0x1c0   : > { %v1649_v17 = vadd.f32 %v1633_v43, %v1585_v44  ;;  %v1309_v44 = vmul.f32 %v5544_v19, %v3815_v8  ;;  %v5549_v19 = vld [vmem:[#allocation42_spill] sm:$0xff] }
 0x1c2   : > { %v1325_v48 = vadd.f32 %v1309_v44, %v1261_v45 }
 0x1c3   : > { %1677 = vrot.lane.b32.xlu0 %v1646_v36, %s3113_s22  ;;  %1404 = vrot.lane.b32.xlu2 %v1388_v4, %s5428_s16  ;;  %v4313_v63 = vpop.permute.xlu1 %1327  ;;  %v5553_v4 = vld [vmem:[#allocation43_spill] sm:$0xff] }
 0x1c4   : > { %1665 = vrot.lane.b32.xlu1 %v1649_v17, %s3113_s22  ;;  %v1359_v53 = vmul.f32 %v4313_v63, %v4307_v27  ;;  %v1068_v36 = vpop.permute.xlu0 %1067  ;;  %v1389_v22 = vadd.f32 %v1373_v57, %v1325_v48  ;;  %v4348_v0 = vsel %vm4046_vm5, %v5553_v4, 0.0  ;;  %v1581_v17 = vadd.f32 %v1565_v16, %v1517_v52  ;;  %v5561_v4 = vld [vmem:[#allocation29_spill] sm:$0xff] }
 0x1c5   : > { %v1084_v54 = vmul.f32 %v1068_v36, %v959_v5  ;;  %v1085_v6 = vmul.f32 %v1068_v36, %v4207_v30  ;;  %5554 = vst [vmem:[#allocation6_spill] sm:$0xff] %v4348_v0  ;;  %v1619_v45 = vmul.f32 %v4292_v7, %v4348_v0  ;;  %v926_v36 = vsel %vm924_vm2, %v3819_v62, %v3829_v40  ;;  %v5557_v40 = vld [vmem:[#allocation54_spill] sm:$0xff] }
 0x1c6   : > { %v4323_v33 = vadd.f32 %v1359_v53, %v5548_v21  ;;  %v1629_v53 = vmul.f32 %v5546_v29, %v4100_v25  ;;  %v5555_v29 = vld [vmem:[#allocation25_spill] sm:$0xff]  ;;  %v4372_v62 = vsel %vm3918_vm4, %v926_v36, 0.0 }
 0x1c7   : > { %v1063_v59 = vpop.permute.xlu2 %1062 }
 0x1c8   : > { %v4326_v50 = vmul.f32 %v1063_v59, %v4175_v28  ;;  %v4329_v26 = vmul.f32 %v1063_v59, %v4195_v23  ;;  %v5550_v28 = vld [vmem:[#allocation32_spill] sm:$0xff]  ;;  %v5551_v23 = vld [vmem:[#allocation11_spill] sm:$0xff]  ;;  %v1645_v48 = vadd.f32 %v1629_v53, %v1581_v17  ;;  %v1364_v17 = vmul.f32 %v5561_v4, %v4137_v14 }
 0x1c9   : > { %v1555_v5 = vmul.f32 %v4183_v47, %v5551_v23 }
 0x1cb   : > { %1032 = vperm.xlu0 %2846, %v5549_v19   ;;  %1420 = vrot.lane.b32.xlu2 %v1389_v22, %s5428_s16  ;;  %v1516_v22 = vmul.f32 %v3536_v35, %v4068_v39  ;;  %v1628_v35 = vmul.f32 %v3742_v58, %v5557_v40 }
 0x1cc   : > { %1159 = vperm.xlu1 %2848, %v5550_v28   ;;  %v4339_v43 = vpop.permute.xlu1 %1476  ;;  %v5559_v28 = vld [vmem:[#allocation21_spill] sm:$0xff] }
 0x1cd   : > { %v1507_v30 = vmul.f32 %v4339_v43, %v5552_v18 }
 0x1cf   : > { %v1571_v12 = vadd.f32 %v1555_v5, %v1507_v30  ;;  %v5560_v5 = vld [vmem:[#allocation26_spill] sm:$0xff] }
 0x1d0   : > { %v1116_v57 = vpop.permute.xlu2 %1115  ;;  %v1300_v30 = vmul.f32 %v5560_v5, %v3573_v42 }
 0x1d1   : > { %v4354_v44 = vadd.f32 %v1619_v45, %v1571_v12  ;;  %v1132_v21 = vmul.f32 %v1116_v57, %v5543_v31  ;;  %v1133_v59 = vmul.f32 %v1116_v57, %v3815_v8  ;;  %v1252_v31 = vmul.f32 %v5555_v29, %v4091_v55  ;;  %v5556_v8 = vld [vmem:[#allocation37_spill] sm:$0xff] }
 0x1d2   : > { %v1510_v45 = vmul.f32 %v4231_v32, %v4372_v62  ;;  %v5562_v12 = vld [vmem:[#allocation9_spill] sm:$0xff] }
 0x1d3   : > { %v1148_v52 = vadd.f32 %v1132_v21, %v1084_v54  ;;  %v1149_v16 = vadd.f32 %v1133_v59, %v1085_v6  ;;  %2852 = vset.pattern.permute.xlu0 %v5514_v41  ;;  %1163 = vperm.xlu2 %2849, %v4022_v3   ;;  %v5558_v6 = vmov 0   ;;  %v1564_v3 = vmul.f32 %v3612_v49, %v5559_v28  ;;  %v429_v49 = vld [vmem:[%s5333_s4 + $0x30] sm:$0xff] }
 0x1d4   : > { %1661 = vrot.lane.b32.xlu1 %v1645_v48, %s3113_s22  ;;  %1167 = vperm.xlu0 %2852, %v5556_v8   ;;  %v1316_v21 = vadd.f32 %v1300_v30, %v1252_v31  ;;  %v5563_v31 = vld [vmem:[#allocation34_spill] sm:$0xff]  ;;  %v5567_v30 = vmov 3   ;;  %v5582_v28 = vld [vmem:[#allocation39_spill] sm:$0xff] }
 0x1d5   : > { %v4376_v54 = vpop.permute.xlu1 %1528  ;;  %2850 = vset.pattern.permute.xlu1 %v5558_v6  ;;  %v1580_v58 = vadd.f32 %v1564_v3, %v1516_v22  ;;  %v5566_v3 = vld [vmem:[#allocation31_spill] sm:$0xff] }
 0x1d6   : > { %v1558_v53 = vmul.f32 %v4376_v54, %v5562_v12  ;;  %v1380_v23 = vadd.f32 %v1364_v17, %v1316_v21  ;;  %v5568_v17 = vld [vmem:[#allocation23_spill] sm:$0xff] }
 0x1d7   : > { %v1644_v36 = vadd.f32 %v1628_v35, %v1580_v58  ;;  %v5565_v35 = vld [vmem:[#allocation57_spill] sm:$0xff] }
 0x1d8   : > { %v4389_v57 = vadd.f32 %v1558_v53, %v1510_v45  ;;  %v5569_v53 = vld [vmem:[#allocation41_spill] sm:$0xff] }
 0x1d9   : > { %v1180_v59 = vpop.permute.xlu2 %1179  ;;  %v4423_v58 = vsel %vm4072_vm6, %v5569_v53, 0.0 }
 0x1da   : > { %v1196_v48 = vmul.f32 %v1180_v59, %v4268_v56  ;;  %v1197_v8 = vmul.f32 %v1180_v59, %v4228_v1  ;;  %v430_v56 = vld [vmem:[%s5333_s4 + $0x38] sm:$0xff]  ;;  %v4411_v1 = vsel %vm3918_vm4, %v5563_v31, 0.0  ;;  %v1626_v59 = vmul.f32 %v4015_v10, %v4423_v58 }
 0x1db   : > { %1675 = vrot.lane.b32.xlu2 %v1644_v36, %s3113_s22 }
 0x1dc   : > { %v4397_v18 = vadd.f32 %v1196_v48, %v1148_v52  ;;  %v4399_v40 = vadd.f32 %v1197_v8, %v1149_v16  ;;  %1768 = vperm.xlu1 %2850, %v429_v49   ;;  %1396 = vrot.lane.b32.xlu0 %v1380_v23, %s5428_s16  ;;  %v5564_v52 = vld [vmem:[#allocation13_spill] sm:$0xff]  ;;  %v1514_v23 = vmul.f32 %v5566_v3, %v4411_v1  ;;  %v5570_v48 = vld [vmem:[#allocation46_spill] sm:$0xff] }
 0x1dd   : > { %2851 = vset.pattern.permute.xlu2 %v5558_v6  ;;  %v1562_v16 = vmul.f32 %v5565_v35, %v5564_v52  ;;  %v4432_v8 = vsel %vm3912_vm3, %v5570_v48, 0.0  ;;  %v5572_v3 = vld [vmem:[#allocation45_spill] sm:$0xff] }
 0x1de   : > { %v4403_v22 = vpop.permute.xlu1 %1592  ;;  %v4441_v10 = vsel %vm3918_vm4, %v5572_v3, 0.0 }
 0x1df   : > { %v1578_v45 = vadd.f32 %v1562_v16, %v1514_v23  ;;  %v5575_v23 = vld [vmem:[#allocation30_spill] sm:$0xff] }
 0x1e0   : > { %v1251_v53 = vmul.f32 %v5575_v23, %v4441_v10 }
 0x1e1   : > { %v1642_v16 = vadd.f32 %v1626_v59, %v1578_v45 }
 0x1e3   : > { %1773 = vperm.xlu2 %2851, %v430_v56   ;;  %v4434_v56 = vpop.permute.xlu2 %1103 }
 0x1e4   : > { %2853 = vset.pattern.permute.xlu1 %v5567_v30  ;;  %1151 = vperm.xlu0 %2852, %v5549_v19   ;;  %5571 = vst [vmem:[#allocation27_spill] sm:$0xff] %v4434_v56  ;;  %v1250_v30 = vmul.f32 %v5575_v23, %v4432_v8  ;;  %v1253_v56 = vmul.f32 %v5555_v29, %v4411_v1 }
 0x1e5   : > { %1037 = vperm.xlu1 %2853, %v5568_v17   ;;  %v1365_v29 = vmul.f32 %v5561_v4, %v4423_v58 }
 0x1e7   : > { %v1112_v21 = vpop.permute.xlu1 %1111 }
 0x1e8   : > { %v1130_v49 = vmul.f32 %v1112_v21, %v3761_v20  ;;  %v1131_v36 = vmul.f32 %v1112_v21, %v3840_v38  ;;  %v5573_v20 = vld [vmem:[#allocation47_spill] sm:$0xff]  ;;  %v5579_v21 = vld [vmem:[#allocation5_spill] sm:$0xff] }
 0x1e9   : > { %v4446_v38 = vsel %vm4046_vm5, %v5573_v20, 0.0 }
 0x1ea   : > { %v1146_v31 = vadd.f32 %v1130_v49, %v4326_v50  ;;  %v1147_v35 = vadd.f32 %v1131_v36, %v4329_v26  ;;  %v5576_v50 = vld [vmem:[#allocation48_spill] sm:$0xff]  ;;  %v5578_v26 = vld [vmem:[#allocation15_spill] sm:$0xff]  ;;  %v1362_v59 = vmul.f32 %v5579_v21, %v4446_v38  ;;  %v5580_v49 = vld [vmem:[#allocation17_spill] sm:$0xff] }
 0x1eb   : > { %2854 = vset.pattern.permute.xlu2 %v5574_v11  ;;  %v4456_v15 = vsel %vm4072_vm6, %v5576_v50, 0.0  ;;  %v1298_v45 = vmul.f32 %v5578_v26, %v5577_v9  ;;  %v1299_v36 = vmul.f32 %v5578_v26, %v5580_v49  ;;  %v5581_v50 = vld [vmem:[#allocation24_spill] sm:$0xff]  ;;  %v4480_v26 = vpop.permute.xlu2 %1047 }
 0x1ec   : > { %1673 = vrot.lane.b32.xlu0 %v1642_v16, %s3113_s22  ;;  %1087 = vperm.xlu2 %2854, %v5549_v19   ;;  %v1358_v19 = vmul.f32 %v4313_v63, %v4348_v0  ;;  %v1363_v48 = vmul.f32 %v5579_v21, %v4456_v15  ;;  %v1297_v39 = vmul.f32 %v5581_v50, %v5562_v12 }
 0x1ed   : > { %2855 = vset.pattern.permute.xlu1 %v5574_v11  ;;  %2859 = vset.pattern.permute.xlu0 %v5558_v6  ;;  %v1314_v3 = vadd.f32 %v1298_v45, %v1250_v30  ;;  %v1315_v23 = vadd.f32 %v1299_v36, %v1251_v53  ;;  %v5587_v36 = vld [vmem:[#allocation14_spill] sm:$0xff] }
 0x1ee   : > { %1091 = vperm.xlu1 %2855, %v5568_v17   ;;  %v1374_v63 = vadd.f32 %v1358_v19, %v5582_v28  ;;  %v1301_v28 = vmul.f32 %v5560_v5, %v5564_v52  ;;  %v5586_v19 = vld [vmem:[#allocation61_spill] sm:$0xff] }
 0x1ef   : > { %v1378_v0 = vadd.f32 %v1362_v59, %v1314_v3  ;;  %v1379_v30 = vadd.f32 %v1363_v48, %v1315_v23  ;;  %v1128_v4 = vmul.f32 %v5586_v19, %v3711_v13 }
 0x1f0   : > { %v1176_v16 = vpop.permute.xlu1 %1175  ;;  %v1317_v53 = vadd.f32 %v1301_v28, %v1253_v56 }
 0x1f1   : > { %v1194_v20 = vmul.f32 %v1176_v16, %v4171_v2  ;;  %v1195_v11 = vmul.f32 %v1176_v16, %v4224_v24  ;;  %v5583_v2 = vld [vmem:[#allocation49_spill] sm:$0xff]  ;;  %v5588_v16 = vld [vmem:[#allocation36_spill] sm:$0xff] }
 0x1f2   : > { %v1249_v24 = vmul.f32 %v5583_v2, %v4372_v62  ;;  %v1381_v5 = vadd.f32 %v1365_v29, %v1317_v53  ;;  %v1508_v3 = vmul.f32 %v4339_v43, %v5588_v16  ;;  %v5592_v43 = vld [vmem:[#allocation22_spill] sm:$0xff] }
 0x1f3   : > { %v4482_v14 = vadd.f32 %v1194_v20, %v1146_v31  ;;  %v4484_v21 = vadd.f32 %v1195_v11, %v1147_v35  ;;  %v5584_v35 = vld [vmem:[#allocation28_spill] sm:$0xff] }
 0x1f4   : > { %1394 = vrot.lane.b32.xlu2 %v1378_v0, %s5428_s16  ;;  %1390 = vrot.lane.b32.xlu0 %v1374_v63, %s5428_s16  ;;  %v1313_v31 = vadd.f32 %v1297_v39, %v1249_v24  ;;  %v4499_v45 = vsel %vm4072_vm6, %v5584_v35, 0.0  ;;  %v5585_v0 = vld [vmem:[#allocation60_spill] sm:$0xff]  ;;  %v1129_v39 = vmul.f32 %v5586_v19, %v5587_v36  ;;  %v1559_v24 = vmul.f32 %v5592_v43, %v5577_v9 }
 0x1f5   : > { %2858 = vset.pattern.permute.xlu2 %v5558_v6  ;;  %v1361_v59 = vmul.f32 %v5585_v0, %v4499_v45  ;;  %v5589_v20 = vld [vmem:[#allocation56_spill] sm:$0xff]  ;;  %v1620_v35 = vmul.f32 %v4292_v7, %v4307_v27 }
 0x1f6   : > { %1410 = vrot.lane.b32.xlu1 %v1379_v30, %s5428_s16  ;;  %v5591_v63 = vld [vmem:[#allocation12_spill] sm:$0xff] }
 0x1f7   : > { %2856 = vset.pattern.permute.xlu1 %v5514_v41  ;;  %v1377_v11 = vadd.f32 %v1361_v59, %v1313_v31  ;;  %v5590_v41 = vld [vmem:[#allocation19_spill] sm:$0xff]  ;;  %v1556_v30 = vmul.f32 %v4183_v47, %v5591_v63 }
 0x1f8   : > { %v1511_v23 = vmul.f32 %v5590_v41, %v4432_v8 }
 0x1f9   : > { %v1058_v48 = vpop.permute.xlu1 %1057  ;;  %v1572_v29 = vadd.f32 %v1556_v30, %v1508_v3 }
 0x1fa   : > { %v1080_v61 = vmul.f32 %v1058_v48, %v4118_v37  ;;  %v1081_v56 = vmul.f32 %v1058_v48, %v5589_v20  ;;  %v5593_v37 = vld [vmem:[#allocation55_spill] sm:$0xff]  ;;  %v1575_v31 = vadd.f32 %v1559_v24, %v1511_v23  ;;  %v1123_v23 = vmul.f32 %v4294_v34, %v5580_v49 }
 0x1fb   : > { %v1399_v50 = vpop.permute.xlu2 %1398  ;;  %v1623_v28 = vmul.f32 %v5593_v37, %v4446_v38  ;;  %v1636_v0 = vadd.f32 %v1620_v35, %v1572_v29  ;;  %v5594_v48 = vld [vmem:[#allocation59_spill] sm:$0xff] }
 0x1fc   : > { %v1144_v13 = vadd.f32 %v1128_v4, %v1080_v61  ;;  %v1145_v2 = vadd.f32 %v1129_v39, %v1081_v56  ;;  %1412 = vrot.lane.b32.xlu2 %v1381_v5, %s5428_s16  ;;  %1408 = vrot.lane.b32.xlu0 %v1377_v11, %s5428_s16  ;;  %v1512_v4 = vmul.f32 %v5590_v41, %v4441_v10  ;;  %v426_v61 = vld [vmem:[%s5333_s4 + $0x18] sm:$0xff]  ;;  %v427_v41 = vld [vmem:[%s5333_s4 + $0x20] sm:$0xff] }
 0x1fd   : > { %v1639_v47 = vadd.f32 %v1623_v28, %v1575_v31  ;;  %v1624_v39 = vmul.f32 %v5593_v37, %v4456_v15  ;;  %v1122_v56 = vmul.f32 %v4294_v34, %v5577_v9  ;;  %v5595_v31 = vld [vmem:[#allocation8_spill] sm:$0xff] }
 0x1fe   : > { %1155 = vperm.xlu1 %2856, %v5568_v17   ;;  %v1557_v35 = vmul.f32 %v4376_v54, %v5595_v31 }
 0x202   : > { %v1172_v53 = vpop.permute.xlu1 %1171 }
 0x203   : > { %v1192_v59 = vmul.f32 %v1172_v53, %v4100_v25  ;;  %v1193_v5 = vmul.f32 %v1172_v53, %v4114_v51  ;;  %v1415_v19 = vpop.permute.xlu2 %1414  ;;  %v1560_v51 = vmul.f32 %v5592_v43, %v5580_v49  ;;  %v4569_v49 = vpop.permute.xlu0 %1052 }
 0x204   : > { %v4532_v17 = vsel %vm1422_vm7, %v1399_v50, %v1415_v19  ;;  %v4536_v7 = vsel %vm1422_vm7, %v1415_v19, %v1399_v50  ;;  %1655 = vrot.lane.b32.xlu2 %v1639_v47, %s3113_s22  ;;  %1667 = vrot.lane.b32.xlu0 %v1636_v0, %s3113_s22  ;;  %v1622_v0 = vmul.f32 %v4403_v22, %v4499_v45 }
 0x205   : > { %v1208_v36 = vadd.f32 %v1192_v59, %v1144_v13  ;;  %v1209_v25 = vadd.f32 %v1193_v5, %v1145_v2  ;;  %v1576_v3 = vadd.f32 %v1560_v51, %v1512_v4  ;;  %v428_v2 = vld [vmem:[%s5333_s4 + $0x28] sm:$0xff] }
 0x206   : > { %1657 = vrot.lane.b32.xlu1 %v5594_v48, %s3113_s22  ;;  %v1638_v19 = vadd.f32 %v1622_v0, %v4389_v57  ;;  %v5600_v0 = vld [vmem:[#allocation18_spill] sm:$0xff] }
 0x207   : > { %2857 = vset.pattern.permute.xlu1 %v5558_v6  ;;  %v1640_v20 = vadd.f32 %v1624_v39, %v1576_v3  ;;  %v425_v3 = vld [vmem:[%s5333_s4 + $0x10] sm:$0xff] }
 0x20b   : > { %v1043_v11 = vpop.permute.xlu1 %1042 }
 0x20c   : > { %v1074_v50 = vmul.f32 %v1043_v11, %v4432_v8  ;;  %v1075_v6 = vmul.f32 %v1043_v11, %v4441_v10  ;;  %1671 = vrot.lane.b32.xlu2 %v1640_v20, %s3113_s22  ;;  %1753 = vperm.xlu0 %2859, %v426_v61   ;;  %v1076_v8 = vmul.f32 %v4480_v26, %v4091_v55  ;;  %v423_v61 = vld [vmem:[%s5333_s4] sm:$0xff]  ;;  %v5598_v11 = vld [vmem:[#allocation58_spill] sm:$0xff] }
 0x20d   : > { %v4560_v30 = vpop.permute.xlu2 %1663  ;;  %v1077_v10 = vmul.f32 %v4480_v26, %v4411_v1  ;;  %v5596_v1 = vld [vmem:[#allocation62_spill] sm:$0xff]  ;;  %v5597_v26 = vld [vmem:[#allocation52_spill] sm:$0xff] }
 0x20e   : > { %v4562_v13 = vadd.f32 %v1122_v56, %v1074_v50  ;;  %v4564_v9 = vadd.f32 %v1123_v23, %v1075_v6  ;;  %1758 = vperm.xlu1 %2857, %v427_v41   ;;  %v424_v6 = vld [vmem:[%s5333_s4 + $0x8] sm:$0xff] }
 0x214   : > { %1763 = vperm.xlu2 %2858, %v428_v2   ;;  %v1100_v34 = vpop.permute.xlu1 %1099 }
 0x215   : > { %v1124_v43 = vmul.f32 %v1100_v34, %v3573_v42  ;;  %v1125_v24 = vmul.f32 %v1100_v34, %v5564_v52  ;;  %v4577_v37 = vpop.permute.xlu2 %1679  ;;  %v1509_v42 = vmul.f32 %v4231_v32, %v5596_v1  ;;  %v1621_v52 = vmul.f32 %v4403_v22, %v5597_v26 }
 0x216   : > { %1392 = vrot.lane.b32.xlu1 %v4302_v60, %s5428_s16 }
 0x217   : > { %v1140_v28 = vadd.f32 %v1124_v43, %v1076_v8  ;;  %v1141_v29 = vadd.f32 %v1125_v24, %v1077_v10  ;;  %v1573_v54 = vadd.f32 %v1557_v35, %v1509_v42  ;;  %v5599_v43 = vld [vmem:[#allocation33_spill] sm:$0xff] }
 0x218   : > { %vm398_vm10 = vcmp.lt.s32.totalorder %v5599_v43, 240 }
 0x21c   : > { %1406 = vrot.lane.b32.xlu2 %v4323_v33, %s5428_s16  ;;  %s2548_s16 = scalar_lea.sflag [#allocation3], %s377_s12 }
 0x21d   : > { %v1417_v55 = vpop.permute.xlu0 %1416  ;;  %v1405_v47 = vpop.permute.xlu2 %1404 }
 0x21e   : > { %v1401_v53 = vpop.permute.xlu1 %1400  ;;  %1651 = vrot.lane.b32.xlu1 %v4354_v44, %s3113_s22  ;;  %v1637_v44 = vadd.f32 %v1621_v52, %v1573_v54 }
 0x21f   : > { %v1428_v60 = vsel %vm1422_vm7, %v1401_v53, %v1417_v55  ;;  %v1436_v33 = vsel %vm1422_vm7, %v1417_v55, %v1401_v53 }
 0x220   : > { %v1453_v32 = vsel %vm395_vm8, %v1436_v33, 0.0  ;;  %v4600_v59 = vadd.f32 %v1428_v60, %v1209_v25 }
 0x221   : > { %v4602_v5 = vadd.f32 %v1453_v32, %v1208_v36  ;;  %v5601_v32 = vld [vmem:[#allocation27_spill] sm:$0xff] }
 0x224   : > { %1653 = vrot.lane.b32.xlu2 %v1637_v44, %s3113_s22  ;;  %v1126_v44 = vmul.f32 %v5601_v32, %v5600_v0 }
 0x225   : > { %v1660_v4 = vpop.permute.xlu0 %1659  ;;  %v1421_v51 = vpop.permute.xlu2 %1420 }
 0x226   : > { %v1430_v39 = vsel %vm1422_vm7, %v1405_v47, %v1421_v51  ;;  %v1438_v22 = vsel %vm1422_vm7, %v1421_v51, %v1405_v47  ;;  %v1403_v48 = vpop.permute.xlu1 %1402  ;;  %1669 = vrot.lane.b32.xlu1 %v1638_v19, %s3113_s22  ;;  %v5602_v19 = vld [vmem:[#allocation21_spill] sm:$0xff] }
 0x227   : > { %v1457_v36 = vsel %vm395_vm8, %v1438_v22, 0.0  ;;  %v1474_v25 = vadd.f32 %v1430_v39, %v4399_v40  ;;  %v5603_v39 = vld [vmem:[#allocation50_spill] sm:$0xff]  ;;  %v5604_v22 = vld [vmem:[#allocation53_spill] sm:$0xff] }
 0x228   : > { %v1473_v57 = vadd.f32 %v1457_v36, %v4397_v18 }
 0x22c   : > { %1748 = vperm.xlu2 %2858, %v425_v3  }
 0x22d   : > { %v1682_v20 = vpop.permute.xlu0 %1681  ;;  %v1164_v56 = vpop.permute.xlu2 %1163 }
 0x22e   : > { %v1188_v41 = vmul.f32 %v1164_v56, %v5598_v11  ;;  %v1189_v23 = vmul.f32 %v1164_v56, %v4423_v58  ;;  %v1419_v50 = vpop.permute.xlu1 %1418  ;;  %1738 = vperm.xlu1 %2857, %v423_v61   ;;  %v5605_v56 = vld [vmem:[#allocation51_spill] sm:$0xff]  ;;  %v5606_v11 = vld [vmem:[#allocation54_spill] sm:$0xff] }
 0x22f   : > { %v1437_v51 = vsel %vm1422_vm7, %v1419_v50, %v1403_v48 }
 0x230   : > { %v4623_v40 = vadd.f32 %v1188_v41, %v1140_v28  ;;  %v4625_v18 = vadd.f32 %v1189_v23, %v1141_v29  ;;  %v1455_v36 = vsel %vm395_vm8, %v1437_v51, 0.0 }
 0x234   : > { %1743 = vperm.xlu2 %2858, %v424_v6  }
 0x235   : > { %v4631_v2 = vpop.permute.xlu0 %1677  ;;  %v1676_v34 = vpop.permute.xlu2 %1675 }
 0x236   : > { %v1688_v8 = vsel %vm1683_vm9, %v1660_v4, %v1676_v34  ;;  %v1696_v58 = vsel %vm1683_vm9, %v1676_v34, %v1660_v4  ;;  %v1666_v10 = vpop.permute.xlu1 %1665  ;;  %v1127_v4 = vmul.f32 %v5601_v32, %v5602_v19  ;;  %v5608_v34 = vld [vmem:[#allocation11_spill] sm:$0xff] }
 0x237   : > { %v1691_v24 = vsel %vm1683_vm9, %v1666_v10, %v1682_v20  ;;  %v1699_v28 = vsel %vm1683_vm9, %v1682_v20, %v1666_v10  ;;  %v1698_v20 = vsel %vm1683_vm9, %v4577_v37, %v4560_v30 }
 0x238   : > { %v1719_v29 = vsel %vm398_vm10, %v1699_v28, 0.0  ;;  %v1734_v35 = vadd.f32 %v1691_v24, %v1473_v57  ;;  %v1471_v28 = vadd.f32 %v1455_v36, %v4482_v14  ;;  %v1717_v14 = vsel %vm398_vm10, %v1698_v20, 0.0 }
 0x239   : > { %v1735_v55 = vadd.f32 %v1719_v29, %v1474_v25 }
 0x23d   : > { %v1033_v47 = vpop.permute.xlu0 %1032  ;;  %v1774_v42 = vpop.permute.xlu2 %1773 }
 0x23e   : > { %v1160_v52 = vpop.permute.xlu1 %1159  ;;  %v4666_v25 = vadd.f32 %v1774_v42, %v1734_v35  ;;  %v1071_v6 = vmul.f32 %v1033_v47, %v5588_v16  ;;  %v1451_v16 = vsel %vm395_vm8, %v4536_v7, 0.0 }
 0x23f   : > { %v1186_v53 = vmul.f32 %v1160_v52, %v4446_v38  ;;  %v1187_v60 = vmul.f32 %v1160_v52, %v4456_v15  ;;  %v1078_v38 = vmul.f32 %v4569_v49, %v5603_v39  ;;  %v1079_v15 = vmul.f32 %v4569_v49, %v5604_v22 }
 0x241   : > { %v4647_v33 = vadd.f32 %v1186_v53, %v4562_v13  ;;  %v4650_v54 = vadd.f32 %v1187_v60, %v4564_v9  ;;  %v1142_v13 = vadd.f32 %v1126_v44, %v1078_v38  ;;  %v1429_v9 = vsel %vm1422_vm7, %v1403_v48, %v1419_v50  ;;  %v5607_v48 = vld [vmem:[#allocation35_spill] sm:$0xff] }
 0x242   : > { %v1143_v61 = vadd.f32 %v1127_v4, %v1079_v15  ;;  %v1070_v50 = vmul.f32 %v1033_v47, %v5607_v48  ;;  %v1472_v29 = vadd.f32 %v1429_v9, %v4484_v21  ;;  %v4682_v53 = vadd.f32 %v1774_v42, %v1735_v55  ;;  %v5609_v9 = vld [vmem:[#allocation6_spill] sm:$0xff] }
 0x243   : > { %v2686_v60 = vmul.f32 -1.442695, %v4666_v25  ;;  %v1713_v44 = vsel %vm398_vm10, %v1696_v58, 0.0 }
 0x244   : > { %v1733_v47 = vadd.f32 %v1717_v14, %v1472_v29  ;;  %v2687_v19 = vmul.f32 -1.442695, %v4682_v53 }
 0x245   : > { %2924 = vpow2.f32 %v2686_v60 }
 0x246   : > { %v4668_v57 = vpop.permute.xlu1 %1661  ;;  %v1168_v3 = vpop.permute.xlu0 %1167  ;;  %2926 = vpow2.f32 %v2687_v19 }
 0x247   : > { %v1190_v49 = vmul.f32 %v1168_v3, %v5605_v56  ;;  %v1191_v41 = vmul.f32 %v1168_v3, %v5606_v11  ;;  %v1088_v23 = vpop.permute.xlu2 %1087 }
 0x248   : > { %v1118_v10 = vmul.f32 %v1088_v23, %v5608_v34  ;;  %v1119_v24 = vmul.f32 %v1088_v23, %v5591_v63  ;;  %v1690_v63 = vsel %vm1683_vm9, %v4560_v30, %v4577_v37 }
 0x249   : > { %v1206_v35 = vadd.f32 %v1190_v49, %v1142_v13  ;;  %v1207_v52 = vadd.f32 %v1191_v41, %v1143_v61  ;;  %v1732_v21 = vadd.f32 %v1690_v63, %v1471_v28 }
 0x24a   : > { %v1134_v0 = vadd.f32 %v1118_v10, %v1070_v50  ;;  %v1135_v32 = vadd.f32 %v1119_v24, %v1071_v6 }
 0x24b   : > { %v1467_v55 = vadd.f32 %v1451_v16, %v1206_v35  ;;  %v1468_v42 = vadd.f32 %v4532_v17, %v1207_v52  ;;  %v2925_v22 = vpop.eup %2924 }
 0x24c   : > { %v4712_v13 = vadd.f32 1.0, %v2925_v22  ;;  %v2927_v20 = vpop.eup %2926 }
 0x24d   : > { %v4706_v39 = vadd.f32 %v1688_v8, %v1467_v55  ;;  %v4708_v38 = vadd.f32 %v1713_v44, %v1468_v42  ;;  %v4724_v48 = vadd.f32 1.0, %v2927_v20 }
 0x24e   : > { %v1769_v7 = vpop.permute.xlu1 %1768  ;;  %v4698_v4 = vpop.permute.xlu0 %1396  ;;  %vm2071_vm4 = vweird.f32 %v4712_v13 }
 0x24f   : > { %v4700_v51 = vadd.f32 %v1769_v7, %v1732_v21  ;;  %v4702_v30 = vadd.f32 %v1769_v7, %v1733_v47  ;;  %v4704_v37 = vpop.permute.xlu2 %1394 }
 0x251   : > { %v2684_v17 = vmul.f32 -1.442695, %v4700_v51  ;;  %v2685_v58 = vmul.f32 -1.442695, %v4702_v30 }
 0x253   : > { %2928 = vpow2.f32 %v2684_v17 }
 0x254   : > { %2930 = vpow2.f32 %v2685_v58  ;;  %v1689_v58 = vsel %vm1683_vm9, %v4668_v57, %v4631_v2 }
 0x255   : > { %2932 = vrcp.f32 %v4712_v13 }
 0x256   : > { %v1152_v15 = vpop.permute.xlu0 %1151 }
 0x257   : > { %v1182_v36 = vmul.f32 %v1152_v15, %v5609_v9  ;;  %v1183_v3 = vmul.f32 %v1152_v15, %v4307_v27  ;;  %v4716_v61 = vpop.permute.xlu2 %1412  ;;  %v4718_v8 = vpop.permute.xlu1 %1037 }
 0x259   : > { %v2929_v56 = vpop.eup %2928  ;;  %v4720_v49 = vadd.f32 %v1182_v36, %v1134_v0  ;;  %v4722_v11 = vadd.f32 %v1183_v3, %v1135_v32  ;;  %v1697_v32 = vsel %vm1683_vm9, %v4631_v2, %v4668_v57 }
 0x25a   : > { %v2931_v41 = vpop.eup %2930  ;;  %v1852_v23 = vadd.f32 1.0, %v2929_v56  ;;  %v1715_v3 = vsel %vm398_vm10, %v1697_v32, 0.0 }
 0x25b   : > { %v1853_v50 = vadd.f32 1.0, %v2931_v41  ;;  %v4734_v10 = vpop.eup %2932 }
 0x25c   : > { %2934 = vrcp.f32 %v1852_v23  ;;  %v2067_v0 = vmul.f32 %v4734_v10, %v4712_v13  ;;  %v2047_v16 = vand.u32 2147483648, %v1852_v23  ;;  %v2045_v47 = vand.u32 2147483647, %v1852_v23 }
 0x25d   : > { %2936 = vrcp.f32 %v1853_v50  ;;  %v2062_v55 = vand.u32 2147483648, %v1853_v50  ;;  %v2060_v7 = vand.u32 2147483647, %v1853_v50  ;;  %vm2041_vm13 = vweird.f32 %v1852_v23 }
 0x25e   : > { %v4727_v27 = vpop.permute.xlu0 %1673  ;;  %2938 = vrcp.f32 %v4724_v48  ;;  %v2068_v15 = vsub.f32 1.0, %v2067_v0  ;;  %v2048_v9 = vor.u32 1.1754944e-38, %v2047_v16  ;;  %vm2056_vm15 = vweird.f32 %v1853_v50 }
 0x25f   : > { %v4730_v6 = vpop.permute.xlu2 %1655  ;;  %vm2046_vm0 = vcmp.eq.f32.partialorder %v2045_v47, 8.507059e+37  ;;  %v2063_v56 = vor.u32 1.1754944e-38, %v2062_v55  ;;  %vm2061_vm2 = vcmp.eq.f32.partialorder %v2060_v7, 8.507059e+37  ;;  %vm2072_vm3 = vweird.f32 %v4734_v10 }
 0x260   : > { %v4732_v34 = vpop.permute.xlu1 %1091  ;;  %v2069_v57 = vmul.f32 %v4734_v10, %v2068_v15  ;;  %v2077_v47 = vand.u32 2147483648, %v4712_v13  ;;  %v2075_v55 = vand.u32 2147483647, %v4712_v13  ;;  %vm4787_vm6 = vmor %vm2071_vm4, %vm2072_vm3  ;;  %v2092_v7 = vand.u32 2147483648, %v4724_v48 }
 0x262   : > { %v2935_v24 = vpop.eup %2934 }
 0x263   : > { %v2937_v28 = vpop.eup %2936  ;;  %v2037_v29 = vmul.f32 %v2935_v24, %v1852_v23  ;;  %vm2042_vm11 = vweird.f32 %v2935_v24  ;;  %v1730_v23 = vadd.f32 %v1689_v58, %v4602_v5  ;;  %v2070_v5 = vadd.f32 %v4734_v10, %v2069_v57 }
 0x264   : > { %v2052_v35 = vmul.f32 %v2937_v28, %v1853_v50  ;;  %v4736_v52 = vpop.eup %2938  ;;  %vm2057_vm12 = vweird.f32 %v2937_v28  ;;  %vm2043_vm14 = vmor %vm2041_vm13, %vm2042_vm11  ;;  %v1434_v58 = vsel %vm1422_vm7, %v4716_v61, %v4698_v4  ;;  %vm2086_vm11 = vweird.f32 %v4724_v48 }
 0x265   : > { %v2038_v60 = vsub.f32 1.0, %v2037_v29  ;;  %v2082_v44 = vmul.f32 %v4736_v52, %v4724_v48  ;;  %vm2058_vm1 = vmor %vm2056_vm15, %vm2057_vm12  ;;  %vm2087_vm5 = vweird.f32 %v4736_v52  ;;  %v2074_v13 = vsel %vm4787_vm6, %v4734_v10, %v2070_v5 }
 0x266   : > { %v2053_v63 = vsub.f32 1.0, %v2052_v35  ;;  %v4744_v14 = vpop.permute.xlu0 %1390  ;;  %vm4803_vm12 = vmor %vm2086_vm11, %vm2087_vm5  ;;  %vm2076_vm13 = vcmp.eq.f32.partialorder %v2075_v55, 8.507059e+37  ;;  %v1426_v10 = vsel %vm1422_vm7, %v4698_v4, %v4716_v61 }
 0x267   : > { %v2039_v21 = vmul.f32 %v2935_v24, %v2038_v60  ;;  %v4746_v42 = vpop.permute.xlu2 %1671  ;;  %v2083_v41 = vsub.f32 1.0, %v2082_v44 }
 0x268   : > { %v2054_v19 = vmul.f32 %v2937_v28, %v2053_v63  ;;  %v4750_v17 = vpop.permute.xlu1 %1410 }
 0x269   : > { %v2040_v22 = vadd.f32 %v2935_v24, %v2039_v21  ;;  %v2084_v16 = vmul.f32 %v4736_v52, %v2083_v41  ;;  %v1425_v5 = vsel %vm1422_vm7, %v4704_v37, %v4750_v17 }
 0x26a   : > { %v2055_v36 = vadd.f32 %v2937_v28, %v2054_v19  ;;  %v1464_v55 = vadd.f32 %v1425_v5, %v4650_v54 }
 0x26b   : > { %v2044_v20 = vsel %vm2043_vm14, %v2935_v24, %v2040_v22  ;;  %v1731_v24 = vadd.f32 %v1715_v3, %v4600_v59  ;;  %v2085_v44 = vadd.f32 %v4736_v52, %v2084_v16  ;;  %v2090_v22 = vand.u32 2147483647, %v4724_v48 }
 0x26c   : > { %v2049_v29 = vsel %vm2046_vm0, %v2048_v9, %v2044_v20  ;;  %v2059_v35 = vsel %vm2058_vm1, %v2937_v28, %v2055_v36  ;;  %v2078_v9 = vor.u32 1.1754944e-38, %v2077_v47  ;;  %v1449_v48 = vsel %vm395_vm8, %v1434_v58, 0.0 }
 0x26d   : > { %v2064_v60 = vsel %vm2061_vm2, %v2063_v56, %v2059_v35  ;;  %v4759_v2 = vmul.f32 %v2049_v29, %v4700_v51  ;;  %v2089_v20 = vsel %vm4803_vm12, %v4736_v52, %v2085_v44  ;;  %v2093_v29 = vor.u32 1.1754944e-38, %v2092_v7 }
 0x26e   : > { %v4764_v50 = vmul.f32 %v2064_v60, %v4702_v30  ;;  %v4767_v0 = vpop.permute.xlu0 %1408  ;;  %v2079_v41 = vsel %vm2076_vm13, %v2078_v9, %v2074_v13  ;;  %vm2091_vm14 = vcmp.eq.f32.partialorder %v2090_v22, 8.507059e+37  ;;  %v1433_v52 = vsel %vm1422_vm7, %v4750_v17, %v4704_v37 }
 0x26f   : > { %v1764_v32 = vpop.permute.xlu2 %1763  ;;  %v1121_v47 = vmul.f32 %v4732_v34, %v5562_v12  ;;  %v1694_v17 = vsel %vm1683_vm9, %v4746_v42, %v4730_v6  ;;  %v1073_v12 = vmul.f32 %v4718_v8, %v4372_v62 }
 0x270   : > { %v4770_v28 = vadd.f32 %v1764_v32, %v1730_v23  ;;  %v4772_v63 = vadd.f32 %v1764_v32, %v1731_v24  ;;  %v4774_v51 = vpop.permute.xlu1 %1155  ;;  %v2130_v21 = vadd.f32 %v4764_v50, %v4759_v2  ;;  %v2094_v23 = vsel %vm2091_vm14, %v2093_v29, %v2089_v20 }
 0x271   : > { %v1465_v24 = vadd.f32 %v1449_v48, %v4623_v40  ;;  %v1466_v32 = vadd.f32 %v1426_v10, %v4625_v18  ;;  %v4847_v18 = vmul.f32 %v2094_v23, %v4682_v53  ;;  %v1185_v29 = vmul.f32 %v4774_v51, %v4499_v45 }
 0x272   : > { %v2682_v59 = vmul.f32 -1.442695, %v4770_v28  ;;  %v2683_v30 = vmul.f32 -1.442695, %v4772_v63  ;;  %2131 = vadd.xlane.f32.xlu1 %v2130_v21  ;;  %v4835_v21 = vmul.f32 %v2079_v41, %v4666_v25  ;;  %v1120_v25 = vmul.f32 %v4732_v34, %v5595_v31 }
 0x273   : > { %v1072_v31 = vmul.f32 %v4718_v8, %v5596_v1  ;;  %v1709_v1 = vsel %vm398_vm10, %v1694_v17, 0.0  ;;  %v1137_v8 = vadd.f32 %v1121_v47, %v1073_v12  ;;  %v1184_v41 = vmul.f32 %v4774_v51, %v5597_v26 }
 0x274   : > { %2940 = vpow2.f32 %v2682_v59  ;;  %v1447_v59 = vsel %vm395_vm8, %v1433_v52, 0.0  ;;  %v4884_v62 = vadd.f32 %v4847_v18, %v4835_v21  ;;  %v1725_v36 = vadd.f32 %v1709_v1, %v1464_v55 }
 0x275   : > { %2942 = vpow2.f32 %v2683_v30  ;;  %v1463_v34 = vadd.f32 %v1447_v59, %v4647_v33  ;;  %v4878_v9 = vadd.f32 %v1120_v25, %v1072_v31 }
 0x276   : > { %v4801_v15 = vpop.permute.xlu0 %1667 }
 0x277   : > { %v4807_v3 = vpop.permute.xlu2 %1406 }
 0x278   : > { %v1658_v56 = vpop.permute.xlu1 %1657 }
 0x279   : > { %v1695_v35 = vsel %vm1683_vm9, %v4727_v27, %v1658_v56  ;;  %v1687_v4 = vsel %vm1683_vm9, %v1658_v56, %v4727_v27 }
 0x27a   : > { %v2941_v60 = vpop.eup %2940  ;;  %v1711_v61 = vsel %vm398_vm10, %v1695_v35, 0.0  ;;  %v1726_v40 = vadd.f32 %v1687_v4, %v1465_v24 }
 0x27b   : > { %v2943_v57 = vpop.eup %2942  ;;  %v4832_v16 = vadd.f32 1.0, %v2941_v60  ;;  %v1727_v30 = vadd.f32 %v1711_v61, %v1466_v32  ;;  %v1431_v60 = vsel %vm1422_vm7, %v4807_v3, %v4744_v14 }
 0x27c   : > { %v4841_v27 = vadd.f32 1.0, %v2943_v57  ;;  %v1443_v1 = vsel %vm395_vm8, %v1431_v60, 0.0 }
 0x27d   : > { %2944 = vrcp.f32 %v4832_v16  ;;  %vm2011_vm15 = vweird.f32 %v4832_v16  ;;  %v2017_v52 = vand.u32 2147483648, %v4832_v16 }
 0x27e   : > { %2946 = vrcp.f32 %v4841_v27  ;;  %v1754_v37 = vpop.permute.xlu0 %1753  ;;  %v2030_v26 = vand.u32 2147483647, %v4841_v27  ;;  %v2032_v61 = vand.u32 2147483648, %v4841_v27  ;;  %vm2026_vm3 = vweird.f32 %v4841_v27 }
 0x27f   : > { %v4859_v44 = vpop.permute.xlu2 %1653  ;;  %v4861_v53 = vadd.f32 %v1754_v37, %v1726_v40  ;;  %v4863_v19 = vadd.f32 %v1754_v37, %v1727_v30  ;;  %v2018_v25 = vor.u32 1.1754944e-38, %v2017_v52 }
 0x280   : > { %v1759_v7 = vpop.permute.xlu1 %1758  ;;  %vm2031_vm5 = vcmp.eq.f32.partialorder %v2030_v26, 8.507059e+37  ;;  %v2033_v55 = vor.u32 1.1754944e-38, %v2032_v61 }
 0x281   : > { %v2678_v58 = vmul.f32 -1.442695, %v4861_v53  ;;  %v2679_v13 = vmul.f32 -1.442695, %v4863_v19  ;;  %v4873_v54 = vadd.f32 %v1759_v7, %v4706_v39  ;;  %v4876_v22 = vadd.f32 %v1759_v7, %v4708_v38 }
 0x282   : > { %v1686_v39 = vsel %vm1683_vm9, %v4730_v6, %v4746_v42  ;;  %v2015_v42 = vand.u32 2147483647, %v4832_v16 }
 0x283   : > { %v2945_v33 = vpop.eup %2944  ;;  %2948 = vpow2.f32 %v2678_v58  ;;  %v2680_v10 = vmul.f32 -1.442695, %v4873_v54  ;;  %v1724_v48 = vadd.f32 %v1686_v39, %v1463_v34  ;;  %v2681_v35 = vmul.f32 -1.442695, %v4876_v22 }
 0x284   : > { %v2947_v38 = vpop.eup %2946  ;;  %v2007_v20 = vmul.f32 %v2945_v33, %v4832_v16  ;;  %2950 = vpow2.f32 %v2679_v13  ;;  %vm2012_vm0 = vweird.f32 %v2945_v33  ;;  %vm2016_vm2 = vcmp.eq.f32.partialorder %v2015_v42, 8.507059e+37 }
 0x285   : > { %v2022_v56 = vmul.f32 %v2947_v38, %v4841_v27  ;;  %2952 = vpow2.f32 %v2680_v10  ;;  %vm2027_vm1 = vweird.f32 %v2947_v38  ;;  %vm2013_vm4 = vmor %vm2011_vm15, %vm2012_vm0  ;;  %v1423_v13 = vsel %vm1422_vm7, %v4744_v14, %v4807_v3 }
 0x286   : > { %v2008_v6 = vsub.f32 1.0, %v2007_v20  ;;  %2954 = vpow2.f32 %v2681_v35  ;;  %vm2028_vm6 = vmor %vm2026_vm3, %vm2027_vm1  ;;  %v1200_v20 = vadd.f32 %v1184_v41, %v4878_v9  ;;  %v1201_v14 = vadd.f32 %v1185_v29, %v1137_v8 }
 0x287   : > { %v2023_v4 = vsub.f32 1.0, %v2022_v56  ;;  %v1749_v45 = vpop.permute.xlu2 %1748 }
 0x288   : > { %v2009_v51 = vmul.f32 %v2945_v33, %v2008_v6  ;;  %v4907_v57 = vadd.f32 %v1749_v45, %v1724_v48  ;;  %v1393_v23 = vpop.permute.xlu1 %1392  ;;  %v4909_v5 = vadd.f32 %v1749_v45, %v1725_v36  ;;  %v1460_v48 = vadd.f32 %v1423_v13, %v4722_v11 }
 0x289   : > { %v2949_v24 = vpop.eup %2948  ;;  %v2024_v32 = vmul.f32 %v2947_v38, %v2023_v4 }
 0x28a   : > { %v2951_v59 = vpop.eup %2950  ;;  %v2010_v40 = vadd.f32 %v2945_v33, %v2009_v51  ;;  %v4912_v30 = vadd.f32 1.0, %v2949_v24  ;;  %v2676_v31 = vmul.f32 -1.442695, %v4907_v57  ;;  %v2677_v27 = vmul.f32 -1.442695, %v4909_v5 }
 0x28b   : > { %v2025_v47 = vadd.f32 %v2947_v38, %v2024_v32  ;;  %v4916_v37 = vadd.f32 1.0, %v2951_v59  ;;  %v2953_v16 = vpop.eup %2952 }
 0x28c   : > { %v2014_v17 = vsel %vm2013_vm4, %v2945_v33, %v2010_v40  ;;  %2956 = vrcp.f32 %v4912_v30  ;;  %v2955_v33 = vpop.eup %2954  ;;  %v1955_v36 = vand.u32 2147483647, %v4912_v30  ;;  %v1957_v3 = vand.u32 2147483648, %v4912_v30 }
 0x28d   : > { %v2019_v12 = vsel %vm2016_vm2, %v2018_v25, %v2014_v17  ;;  %v2029_v34 = vsel %vm2028_vm6, %v2947_v38, %v2025_v47  ;;  %2958 = vrcp.f32 %v4916_v37  ;;  %v1424_v38 = vsel %vm1422_vm7, %v1393_v23, %v4767_v0 }
 0x28e   : > { %v2034_v7 = vsel %vm2031_vm5, %v2033_v55, %v2029_v34  ;;  %v4923_v58 = vmul.f32 %v2019_v12, %v4770_v28  ;;  %v1432_v28 = vsel %vm1422_vm7, %v4767_v0, %v1393_v23  ;;  %2960 = vpow2.f32 %v2676_v31 }
 0x28f   : > { %v4932_v39 = vmul.f32 %v2034_v7, %v4772_v63  ;;  %v1459_v63 = vadd.f32 %v1443_v1, %v4720_v49  ;;  %v4945_v56 = vadd.f32 1.0, %v2953_v16  ;;  %2962 = vpow2.f32 %v2677_v27  ;;  %v1744_v49 = vpop.permute.xlu2 %1743 }
 0x290   : > { %v1652_v10 = vpop.permute.xlu1 %1651  ;;  %v4947_v6 = vadd.f32 1.0, %v2955_v33  ;;  %v1445_v0 = vsel %vm395_vm8, %v1432_v28, 0.0  ;;  %v4951_v42 = vadd.f32 %v1424_v38, %v1201_v14  ;;  %vm1951_vm7 = vweird.f32 %v4912_v30 }
 0x291   : > { %v2127_v9 = vadd.f32 %v4932_v39, %v4923_v58  ;;  %vm4957_vm11 = vcmp.eq.f32.partialorder %v1955_v36, 8.507059e+37  ;;  %vm1966_vm12 = vweird.f32 %v4916_v37  ;;  %v1958_v11 = vor.u32 1.1754944e-38, %v1957_v3 }
 0x292   : > { %v2957_v35 = vpop.eup %2956  ;;  %v1970_v60 = vand.u32 2147483647, %v4916_v37  ;;  %v1692_v52 = vsel %vm1683_vm9, %v4801_v15, %v1652_v10  ;;  %v1972_v26 = vand.u32 2147483648, %v4916_v37  ;;  %2964 = vrcp.f32 %v4945_v56 }
 0x293   : > { %v2959_v8 = vpop.eup %2958  ;;  %v1947_v41 = vmul.f32 %v2957_v35, %v4912_v30  ;;  %2128 = vadd.xlane.f32.xlu2 %v2127_v9  ;;  %v1461_v61 = vadd.f32 %v1445_v0, %v1200_v20  ;;  %vm1952_vm8 = vweird.f32 %v2957_v35  ;;  %2966 = vrcp.f32 %v4947_v6 }
 0x294   : > { %v1962_v29 = vmul.f32 %v2959_v8, %v4916_v37  ;;  %v2961_v45 = vpop.eup %2960  ;;  %v1684_v23 = vsel %vm1683_vm9, %v1652_v10, %v4801_v15  ;;  %v1705_v40 = vsel %vm398_vm10, %v1692_v52, 0.0  ;;  %v1987_v25 = vand.u32 2147483648, %v4945_v56  ;;  %vm1953_vm15 = vmor %vm1951_vm7, %vm1952_vm8 }
 0x295   : > { %v1948_v4 = vsub.f32 1.0, %v1947_v41  ;;  %v2963_v24 = vpop.eup %2962  ;;  %v4973_v59 = vadd.f32 1.0, %v2961_v45  ;;  %vm1967_vm13 = vweird.f32 %v2959_v8  ;;  %v2002_v31 = vand.u32 2147483648, %v4947_v6 }
 0x296   : > { %v1963_v51 = vsub.f32 1.0, %v1962_v29  ;;  %v4978_v17 = vadd.f32 1.0, %v2963_v24  ;;  %vm4981_vm14 = vcmp.eq.f32.partialorder %v1970_v60, 8.507059e+37  ;;  %v1973_v15 = vor.u32 1.1754944e-38, %v1972_v26  ;;  %vm1968_vm0 = vmor %vm1966_vm12, %vm1967_vm13 }
 0x297   : > { %v1949_v32 = vmul.f32 %v2957_v35, %v1948_v4  ;;  %2968 = vrcp.f32 %v4973_v59  ;;  %v1720_v16 = vadd.f32 %v1684_v23, %v1459_v63  ;;  %v1721_v7 = vadd.f32 %v1705_v40, %v1460_v48 }
 0x298   : > { %v1964_v47 = vmul.f32 %v2959_v8, %v1963_v51  ;;  %v1670_v55 = vpop.permute.xlu1 %1669  ;;  %2970 = vrcp.f32 %v4978_v17  ;;  %v4990_v13 = vpop.eup %2964  ;;  %v1985_v33 = vand.u32 2147483647, %v4945_v56  ;;  %v4996_v36 = vor.u32 1.1754944e-38, %v1987_v25 }
 0x299   : > { %v1950_v12 = vadd.f32 %v2957_v35, %v1949_v32  ;;  %v2000_v38 = vand.u32 2147483647, %v4947_v6  ;;  %v4999_v30 = vpop.eup %2966  ;;  %v1685_v14 = vsel %vm1683_vm9, %v4859_v44, %v1670_v55  ;;  %v5007_v37 = vor.u32 1.1754944e-38, %v2002_v31 }
 0x29a   : > { %v1965_v27 = vadd.f32 %v2959_v8, %v1964_v47  ;;  %v1925_v10 = vand.u32 2147483647, %v4973_v59  ;;  %v1927_v63 = vand.u32 2147483648, %v4973_v59  ;;  %v1940_v48 = vand.u32 2147483647, %v4978_v17 }
 0x29b   : > { %v1954_v1 = vsel %vm1953_vm15, %v2957_v35, %v1950_v12  ;;  %2134 = vadd.xlane.f32.xlu2 %v4884_v62  ;;  %vm1981_vm1 = vweird.f32 %v4945_v56  ;;  %vm1921_vm2 = vweird.f32 %v4973_v59  ;;  %v1693_v62 = vsel %vm1683_vm9, %v1670_v55, %v4859_v44 }
 0x29c   : > { %v1959_v28 = vsel %vm4957_vm11, %v1958_v11, %v1954_v1  ;;  %v1969_v20 = vsel %vm1968_vm0, %v2959_v8, %v1965_v27  ;;  %v1722_v9 = vadd.f32 %v1685_v14, %v1461_v61  ;;  %vm1936_vm3 = vweird.f32 %v4978_v17 }
 0x29d   : > { %v1974_v3 = vsel %vm4981_vm14, %v1973_v15, %v1969_v20  ;;  %v5016_v35 = vmul.f32 %v1959_v28, %v4861_v53  ;;  %v2969_v8 = vpop.eup %2968  ;;  %v1942_v41 = vand.u32 2147483648, %v4978_v17  ;;  %v1707_v53 = vsel %vm398_vm10, %v1693_v62, 0.0 }
 0x29e   : > { %v5019_v0 = vmul.f32 %v1974_v3, %v4863_v19  ;;  %v1977_v19 = vmul.f32 %v4990_v13, %v4945_v56  ;;  %vm1982_vm4 = vweird.f32 %v4990_v13  ;;  %v2971_v11 = vpop.eup %2970  ;;  %v1917_v29 = vmul.f32 %v2969_v8, %v4973_v59 }
 0x29f   : > { %v1723_v46 = vadd.f32 %v1707_v53, %v4951_v42  ;;  %v5034_v44 = vadd.f32 %v1744_v49, %v1722_v9  ;;  %v1992_v52 = vmul.f32 %v4999_v30, %v4947_v6  ;;  %vm1996_vm9 = vweird.f32 %v4947_v6  ;;  %vm5065_vm11 = vmor %vm1981_vm1, %vm1982_vm4 }
 0x2a0   : > { %v1739_v60 = vpop.permute.xlu1 %1738  ;;  %vm1922_vm5 = vweird.f32 %v2969_v8  ;;  %v1932_v43 = vmul.f32 %v2971_v11, %v4978_v17  ;;  %vm5044_vm10 = vcmp.eq.f32.partialorder %v1985_v33, 8.507059e+37  ;;  %v1918_v42 = vsub.f32 1.0, %v1917_v29 }
 0x2a1   : > { %v5040_v4 = vadd.f32 %v1739_v60, %v1720_v16  ;;  %v5042_v26 = vadd.f32 %v1739_v60, %v1721_v7  ;;  %v5048_v45 = vadd.f32 %v1744_v49, %v1723_v46  ;;  %v2674_v51 = vmul.f32 -1.442695, %v5034_v44  ;;  %vm1923_vm8 = vmor %vm1921_vm2, %vm1922_vm5 }
 0x2a2   : > { %v2121_v23 = vadd.f32 %v5019_v0, %v5016_v35  ;;  %vm5053_vm6 = vcmp.eq.f32.partialorder %v2000_v38, 8.507059e+37  ;;  %v1933_v32 = vsub.f32 1.0, %v1932_v43  ;;  %v1978_v47 = vsub.f32 1.0, %v1977_v19 }
 0x2a3   : > { %v2672_v40 = vmul.f32 -1.442695, %v5040_v4  ;;  %v2673_v25 = vmul.f32 -1.442695, %v5042_v26  ;;  %v1919_v55 = vmul.f32 %v2969_v8, %v1918_v42  ;;  %2972 = vpow2.f32 %v2674_v51 }
 0x2a4   : > { %v2675_v31 = vmul.f32 -1.442695, %v5048_v45  ;;  %2122 = vadd.xlane.f32.xlu2 %v2121_v23  ;;  %v1993_v12 = vsub.f32 1.0, %v1992_v52  ;;  %v1934_v34 = vmul.f32 %v2971_v11, %v1933_v32  ;;  %vm1937_vm7 = vweird.f32 %v2971_v11 }
 0x2a5   : > { %2974 = vpow2.f32 %v2672_v40  ;;  %v1979_v15 = vmul.f32 %v4990_v13, %v1978_v47  ;;  %v1920_v27 = vadd.f32 %v2969_v8, %v1919_v55  ;;  %vm1997_vm12 = vweird.f32 %v4999_v30  ;;  %vm1938_vm14 = vmor %vm1936_vm3, %vm1937_vm7 }
 0x2a6   : > { %2976 = vpow2.f32 %v2675_v31  ;;  %v1994_v7 = vmul.f32 %v4999_v30, %v1993_v12  ;;  %v1928_v1 = vor.u32 1.1754944e-38, %v1927_v63  ;;  %v1935_v33 = vadd.f32 %v2971_v11, %v1934_v34  ;;  %vm1998_vm0 = vmor %vm1996_vm9, %vm1997_vm12 }
 0x2a7   : > { %2978 = vpow2.f32 %v2673_v25  ;;  %v1980_v38 = vadd.f32 %v4990_v13, %v1979_v15  ;;  %v1924_v28 = vsel %vm1923_vm8, %v2969_v8, %v1920_v27  ;;  %vm1926_vm13 = vcmp.eq.f32.partialorder %v1925_v10, 8.507059e+37 }
 0x2a8   : > { %v1943_v56 = vor.u32 1.1754944e-38, %v1942_v41  ;;  %v1995_v20 = vadd.f32 %v4999_v30, %v1994_v7  ;;  %v1929_v14 = vsel %vm1926_vm13, %v1928_v1, %v1924_v28  ;;  %v1939_v3 = vsel %vm1938_vm14, %v2971_v11, %v1935_v33 }
 0x2a9   : > { %vm1941_vm15 = vcmp.eq.f32.partialorder %v1940_v48, 8.507059e+37  ;;  %v1984_v59 = vsel %vm5065_vm11, %v4990_v13, %v1980_v38  ;;  %v2973_v10 = vpop.eup %2972  ;;  %v5087_v17 = vmul.f32 %v1929_v14, %v4907_v57 }
 0x2aa   : > { %v1944_v63 = vsel %vm1941_vm15, %v1943_v56, %v1939_v3  ;;  %v1989_v62 = vsel %vm5044_vm10, %v4996_v36, %v1984_v59  ;;  %v1999_v48 = vsel %vm1998_vm0, %v4999_v30, %v1995_v20  ;;  %v1842_v13 = vadd.f32 1.0, %v2973_v10 }
 0x2ab   : > { %v2975_v9 = vpop.eup %2974  ;;  %v5094_v8 = vmul.f32 %v1944_v63, %v4909_v5  ;;  %v2004_v6 = vsel %vm5053_vm6, %v5007_v37, %v1999_v48  ;;  %v5100_v41 = vmul.f32 %v1989_v62, %v4873_v54 }
 0x2ac   : > { %v2977_v57 = vpop.eup %2976  ;;  %v1840_v49 = vadd.f32 1.0, %v2975_v9  ;;  %v5103_v53 = vmul.f32 %v2004_v6, %v4876_v22  ;;  %2980 = vrcp.f32 %v1842_v13  ;;  %v1895_v54 = vand.u32 2147483647, %v1842_v13 }
 0x2ad   : > { %v2979_v36 = vpop.eup %2978  ;;  %v1843_v19 = vadd.f32 1.0, %v2977_v57  ;;  %v2118_v5 = vadd.f32 %v5094_v8, %v5087_v17  ;;  %v1897_v22 = vand.u32 2147483648, %v1842_v13  ;;  %vm1891_vm1 = vweird.f32 %v1842_v13 }
 0x2ae   : > { %v5107_v30 = vadd.f32 1.0, %v2979_v36  ;;  %2982 = vrcp.f32 %v1840_v49  ;;  %v2124_v37 = vadd.f32 %v5103_v53, %v5100_v41  ;;  %vm5112_vm2 = vcmp.eq.f32.partialorder %v1895_v54, 8.507059e+37 }
 0x2af   : > { %2984 = vrcp.f32 %v1843_v19  ;;  %2119 = vadd.xlane.f32.xlu1 %v2118_v5  ;;  %v1910_v29 = vand.u32 2147483647, %v1843_v19  ;;  %vm1906_vm3 = vweird.f32 %v1843_v19  ;;  %v1912_v61 = vand.u32 2147483648, %v1843_v19 }
 0x2b0   : > { %2986 = vrcp.f32 %v5107_v30  ;;  %2125 = vadd.xlane.f32.xlu0 %v2124_v37  ;;  %v1898_v24 = vor.u32 1.1754944e-38, %v1897_v22  ;;  %vm1861_vm4 = vweird.f32 %v1840_v49  ;;  %v1865_v47 = vand.u32 2147483647, %v1840_v49 }
 0x2b1   : > { %vm5116_vm9 = vcmp.eq.f32.partialorder %v1910_v29, 8.507059e+37  ;;  %v1867_v34 = vand.u32 2147483648, %v1840_v49  ;;  %v1913_v15 = vor.u32 1.1754944e-38, %v1912_v61  ;;  %v1882_v33 = vand.u32 2147483648, %v5107_v30 }
 0x2b2   : > { %v2981_v11 = vpop.eup %2980  ;;  %v1880_v56 = vand.u32 2147483647, %v5107_v30  ;;  %vm1876_vm8 = vweird.f32 %v5107_v30  ;;  %vm1866_vm14 = vcmp.eq.f32.partialorder %v1865_v47, 8.507059e+37  ;;  %v3114_v37 = vmov 256.0  }
 0x2b3   : > { %v1887_v60 = vmul.f32 %v2981_v11, %v1842_v13  ;;  %vm1892_vm5 = vweird.f32 %v2981_v11  ;;  %v1868_v3 = vor.u32 1.1754944e-38, %v1867_v34  ;;  %v1883_v13 = vor.u32 1.1754944e-38, %v1882_v33 }
 0x2b4   : > { %v2983_v46 = vpop.eup %2982  ;;  %vm1893_vm7 = vmor %vm1891_vm1, %vm1892_vm5  ;;  %vm1881_vm0 = vcmp.eq.f32.partialorder %v1880_v56, 8.507059e+37  ;;  %2988 = vrcp.f32 %v3114_v37  ;;  %v2735_v37 = vld [vmem:[%s5336_s7] sm:$0xff] }
 0x2b5   : > { %v2985_v52 = vpop.eup %2984  ;;  %v1857_v42 = vmul.f32 %v2983_v46, %v1840_v49  ;;  %v1888_v23 = vsub.f32 1.0, %v1887_v60  ;;  %vm1862_vm10 = vweird.f32 %v2983_v46 }
 0x2b6   : > { %v2987_v51 = vpop.eup %2986  ;;  %v1902_v32 = vmul.f32 %v2985_v52, %v1843_v19  ;;  %vm1907_vm6 = vweird.f32 %v2985_v52  ;;  %vm1863_vm12 = vmor %vm1861_vm4, %vm1862_vm10  ;;  %vm2244_vm10 = vcmask 1043456  }
 0x2b7   : > { %v1858_v25 = vsub.f32 1.0, %v1857_v42  ;;  %v1872_v55 = vmul.f32 %v2987_v51, %v5107_v30  ;;  %v1889_v31 = vmul.f32 %v2981_v11, %v1888_v23  ;;  %vm1877_vm11 = vweird.f32 %v2987_v51  ;;  %vm1908_vm13 = vmor %vm1906_vm3, %vm1907_vm6 }
 0x2b8   : > { %v1903_v12 = vsub.f32 1.0, %v1902_v32  ;;  %vm1878_vm15 = vmor %vm1876_vm8, %vm1877_vm11  ;;  %vm2231_vm6 = vcmask 64512  }
 0x2b9   : > { %v1859_v27 = vmul.f32 %v2983_v46, %v1858_v25  ;;  %v1873_v16 = vsub.f32 1.0, %v1872_v55  ;;  %v1890_v7 = vadd.f32 %v2981_v11, %v1889_v31 }
 0x2ba   : > { %v1904_v1 = vmul.f32 %v2985_v52, %v1903_v12  ;;  %v2989_v54 = vpop.eup %2988 }
 0x2bb   : > { %v1860_v38 = vadd.f32 %v2983_v46, %v1859_v27  ;;  %v1874_v28 = vmul.f32 %v2987_v51, %v1873_v16  ;;  %v1894_v20 = vsel %vm1893_vm7, %v2981_v11, %v1890_v7  ;;  %vm2141_vm1 = vweird.f32 %v2989_v54  ;;  %v2151_v16 = vld [vmem:[%s5334_s5] sm:$0xf] }
 0x2bc   : > { %v1905_v14 = vadd.f32 %v2985_v52, %v1904_v1  ;;  %v1899_v59 = vsel %vm5112_vm2, %v1898_v24, %v1894_v20  ;;  %vm2157_vm2 = vcmask 523264   ;;  %v2156_v7 = vld [vmem:[%s5335_s6] sm:$0xff] }
 0x2bd   : > { %v1864_v10 = vsel %vm1863_vm12, %v2983_v46, %v1860_v38  ;;  %v1875_v63 = vadd.f32 %v2987_v51, %v1874_v28  ;;  %v5130_v48 = vmul.f32 %v1899_v59, %v5034_v44 }
 0x2be   : > { %v1909_v62 = vsel %vm1908_vm13, %v2985_v52, %v1905_v14  ;;  %v1869_v9 = vsel %vm1866_vm14, %v1868_v3, %v1864_v10 }
 0x2bf   : > { %v1914_v6 = vsel %vm5116_vm9, %v1913_v15, %v1909_v62  ;;  %v1879_v57 = vsel %vm1878_vm15, %v2987_v51, %v1875_v63  ;;  %v5136_v49 = vmul.f32 %v1869_v9, %v5040_v4  ;;  %v2137_v4 = vmul.f32 256.0, %v2989_v54 }
 0x2c0   : > { %v5139_v36 = vmul.f32 %v1914_v6, %v5048_v45  ;;  %v1884_v19 = vsel %vm1881_vm0, %v1883_v13, %v1879_v57 }
 0x2c1   : > { %v5142_v5 = vmul.f32 %v1884_v19, %v5042_v26  ;;  %v2138_v22 = vsub.f32 1.0, %v2137_v4  ;;  %v2737_v4 = vld [vmem:[%s5336_s7 + $0x10] sm:$0xff] }
 0x2c2   : > { %v2115_v44 = vadd.f32 %v5139_v36, %v5130_v48 }
 0x2c3   : > { %v2112_v30 = vadd.f32 %v5142_v5, %v5136_v49  ;;  %v2139_v11 = vmul.f32 %v2989_v54, %v2138_v22  ;;  %v2738_v22 = vld [vmem:[%s5336_s7 + $0x18] sm:$0xff] }
 0x2c4   : > { %2116 = vadd.xlane.f32.xlu1 %v2115_v44 }
 0x2c5   : > { %2113 = vadd.xlane.f32.xlu0 %v2112_v30  ;;  %v2140_v29 = vadd.f32 %v2989_v54, %v2139_v11 }
 0x2c7   : > { %v2142_v46 = vsel %vm2141_vm1, %v2989_v54, %v2140_v29  ;;  %v2736_v54 = vld [vmem:[%s5336_s7 + $0x8] sm:$0xff] }
 0x2e5   : > { %v2132_v26 = vpop.xlane.xlu1 %2131 }
 0x2e6   : > { %v2149_v52 = vmul.f32 %v2142_v46, %v2132_v26 }
 0x306   : > { %v2129_v45 = vpop.xlane.xlu2 %2128 }
 0x307   : > { %v2148_v24 = vmul.f32 %v2142_v46, %v2129_v45 }
 0x30e   : > { %v2135_v60 = vpop.xlane.xlu2 %2134 }
 0x30f   : > { %v2150_v43 = vmul.f32 %v2142_v46, %v2135_v60 }
 0x311   : > { %v2155_v61 = vpack.c.bf16 %v2150_v43, %v2149_v52  ;;  %v2207_v43 = vld [vmem:[%s5337_s8 + $0x20] sm:$0xff] }
 0x313   : > { %2165 = vmatpush.bf16.msra.mxu2 %v2155_v61 }
 0x317   : > { %v2123_v51 = vpop.xlane.xlu2 %2122 }
 0x318   : > { %v2146_v25 = vmul.f32 %v2142_v46, %v2123_v51  ;;  %v2205_v51 = vld [vmem:[%s5337_s8 + $0x10] sm:$0xff] }
 0x322   : > { %v2120_v42 = vpop.xlane.xlu1 %2119 }
 0x323   : > { %v2126_v23 = vpop.xlane.xlu0 %2125  ;;  %v2145_v40 = vmul.f32 %v2142_v46, %v2120_v42 }
 0x324   : > { %v2147_v32 = vmul.f32 %v2142_v46, %v2126_v23 }
 0x325   : > { %v2153_v55 = vpack.c.bf16 %v2146_v25, %v2145_v40  ;;  %v2204_v25 = vld [vmem:[%s5337_s8 + $0x8] sm:$0xff] }
 0x326   : > { %v2154_v47 = vpack.c.bf16 %v2148_v24, %v2147_v32 }
 0x328   : > { %2166 = vmatpush.bf16.msra.mxu2 %v2154_v47 }
 0x32c   : > { %2167 = vmatpush.bf16.msra.mxu2 %v2153_v55 }
 0x337   : > { %v2117_v31 = vpop.xlane.xlu1 %2116 }
 0x338   : > { %v2114_v12 = vpop.xlane.xlu0 %2113  ;;  %v2144_v34 = vmul.f32 %v2142_v46, %v2117_v31  ;;  %v2208_v31 = vld [vmem:[%s5337_s8 + $0x28] sm:$0xff] }
 0x339   : > { %v2143_v15 = vmul.f32 %v2142_v46, %v2114_v12  ;;  %v2206_v46 = vld [vmem:[%s5337_s8 + $0x18] sm:$0xff] }
 0x33b   : > { %v2152_v27 = vpack.c.bf16 %v2144_v34, %v2143_v15 }
 0x33d   : > { %2168 = vmatpush.bf16.msra.mxu2 %v2152_v27 }
 0x340   : > { %2688 = vmatmul.msk.bf16.vlgmr.msra.gmra.mxu2 %vm2157_vm2, %v2151_v16  ;;  %v2209_v16 = vld [vmem:[%s5337_s8 + $0x30] sm:$0xff] }
 0x3c3   : > { %v2170_v1 = vpop.f32.mrf.mxu2 }
 0x3c4   : > { %v2171_v33 = vadd.f32 %v2170_v1, %v2156_v7 }
 0x3c6   : > { %v2689_v38 = vmul.f32 -1.442695, %v2171_v33 }
 0x3c8   : > { %2990 = vpow2.f32 %v2689_v38 }
 0x3cb   : > { %v2172_v28 = vpop.f32.mrf.mxu2 }
 0x3cc   : > { %v2203_v28 = vld [vmem:[%s5337_s8] sm:$0xff] }
 0x3ce   : > { %v2991_v56 = vpop.eup %2990 }
 0x3cf   : > { %v2177_v20 = vadd.f32 1.0, %v2991_v56 }
 0x3d1   : > { %2992 = vrcp.f32 %v2177_v20  ;;  %v2189_v10 = vand.u32 2147483648, %v2177_v20  ;;  %v2187_v62 = vand.u32 2147483647, %v2177_v20  ;;  %vm2183_vm4 = vweird.f32 %v2177_v20 }
 0x3d3   : > { %v2190_v13 = vor.u32 1.1754944e-38, %v2189_v10  ;;  %vm2188_vm5 = vcmp.eq.f32.partialorder %v2187_v62, 8.507059e+37 }
 0x3d7   : > { %v2993_v14 = vpop.eup %2992 }
 0x3d8   : > { %v2179_v3 = vmul.f32 %v2993_v14, %v2177_v20  ;;  %vm2184_vm3 = vweird.f32 %v2993_v14 }
 0x3d9   : > { %vm2185_vm9 = vmor %vm2183_vm4, %vm2184_vm3 }
 0x3da   : > { %v2180_v59 = vsub.f32 1.0, %v2179_v3 }
 0x3dc   : > { %v2181_v63 = vmul.f32 %v2993_v14, %v2180_v59 }
 0x3de   : > { %v2182_v9 = vadd.f32 %v2993_v14, %v2181_v63 }
 0x3e0   : > { %v2186_v6 = vsel %vm2185_vm9, %v2993_v14, %v2182_v9  ;;  %v2210_v9 = vld [vmem:[%s5337_s8 + $0x38] sm:$0xff] }
 0x3e1   : > { %v2191_v57 = vsel %vm2188_vm5, %v2190_v13, %v2186_v6 }
 0x3e2   : > { %v2193_v19 = vmul.f32 %v2191_v57, %v2171_v33 }
 0x3e4   : > { %v2202_v44 = vpack.c.bf16 %v2193_v19, %v2193_v19 }
 0x3e6   : > { %v2246_v30 = vsel %vm2244_vm10, %v2202_v44, 0 }
 0x3e7   : > { %2255 = vmatpush.bf16.msra.mxu3 %v2246_v30 }
 0x3ea   : > { %2706 = vmatmul.msk.bf16.vlgmr.msra.gmra.mxu3 %vm2231_vm6, %v2735_v37 }
 0x3fa   : > { %2707 = vmatmul.msk.bf16.gmra.mxu3 %vm2231_vm6, %v2736_v54 }
 0x40a   : > { %2708 = vmatmul.msk.bf16.gmra.mxu3 %vm2231_vm6, %v2737_v4 }
 0x41a   : > { %2709 = vmatmul.msk.bf16.gmra.mxu3 %vm2231_vm6, %v2738_v22 }
 0x46d   : > { %v2257_v11 = vpop.f32.mrf.mxu3 }
 0x46e   : > { %v2258_v10 = vadd.f32 %v2257_v11, %v2203_v28 }
 0x470   : > { %v2710_v57 = vmul.f32 -1.442695, %v2258_v10 }
 0x475   : > { %v2259_v45 = vpop.f32.mrf.mxu3 }
 0x476   : > { %v2260_v34 = vadd.f32 %v2259_v45, %v2204_v25 }
 0x478   : > { %v2711_v7 = vmul.f32 -1.442695, %v2260_v34 }
 0x47d   : > { %v2262_v29 = vpop.f32.mrf.mxu3 }
 0x47e   : > { %v2263_v32 = vadd.f32 %v2262_v29, %v2205_v51 }
 0x480   : > { %v2712_v55 = vmul.f32 -1.442695, %v2263_v32 }
 0x485   : > { %v2264_v26 = vpop.f32.mrf.mxu3 }
 0x486   : > { %v2265_v60 = vadd.f32 %v2264_v26, %v2206_v46 }
 0x488   : > { %v2713_v52 = vmul.f32 -1.442695, %v2265_v60 }
 0x48a   : > { %2994 = vpow2.f32 %v2713_v52 }
 0x48d   : > { %v2267_v61 = vpop.f32.mrf.mxu3 }
 0x48e   : > { %v2268_v42 = vadd.f32 %v2267_v61, %v2207_v43 }
 0x490   : > { %v2995_v23 = vpop.eup %2994  ;;  %v2714_v24 = vmul.f32 -1.442695, %v2268_v42 }
 0x491   : > { %v5176_v40 = vadd.f32 1.0, %v2995_v23 }
 0x492   : > { %2996 = vpow2.f32 %v2714_v24 }
 0x493   : > { %2998 = vrcp.f32 %v5176_v40  ;;  %v2365_v24 = vand.u32 2147483648, %v5176_v40  ;;  %vm2359_vm14 = vweird.f32 %v5176_v40  ;;  %v2363_v32 = vand.u32 2147483647, %v5176_v40 }
 0x494   : > { %3000 = vpow2.f32 %v2712_v55 }
 0x495   : > { %v2269_v47 = vpop.f32.mrf.mxu3  ;;  %vm2364_vm0 = vcmp.eq.f32.partialorder %v2363_v32, 8.507059e+37 }
 0x496   : > { %v2270_v27 = vadd.f32 %v2269_v47, %v2208_v31 }
 0x498   : > { %v2997_v12 = vpop.eup %2996  ;;  %v2715_v33 = vmul.f32 -1.442695, %v2270_v27 }
 0x499   : > { %v2305_v15 = vadd.f32 1.0, %v2997_v12  ;;  %v5188_v1 = vpop.eup %2998 }
 0x49a   : > { %v3001_v20 = vpop.eup %3000  ;;  %v2355_v3 = vmul.f32 %v5188_v1, %v5176_v40  ;;  %vm2360_vm13 = vweird.f32 %v5188_v1 }
 0x49b   : > { %3002 = vrcp.f32 %v2305_v15  ;;  %v5195_v62 = vadd.f32 1.0, %v3001_v20  ;;  %v2380_v44 = vand.u32 2147483648, %v2305_v15  ;;  %v2378_v4 = vand.u32 2147483647, %v2305_v15  ;;  %vm2361_vm15 = vmor %vm2359_vm14, %vm2360_vm13 }
 0x49c   : > { %3004 = vpow2.f32 %v2711_v7  ;;  %v2356_v6 = vsub.f32 1.0, %v2355_v3  ;;  %vm2374_vm11 = vweird.f32 %v2305_v15 }
 0x49d   : > { %v2272_v38 = vpop.f32.mrf.mxu3  ;;  %3006 = vpow2.f32 %v2715_v33  ;;  %v2381_v60 = vor.u32 1.1754944e-38, %v2380_v44  ;;  %vm2379_vm8 = vcmp.eq.f32.partialorder %v2378_v4, 8.507059e+37  ;;  %vm2344_vm10 = vweird.f32 %v5195_v62 }
 0x49e   : > { %v2273_v56 = vadd.f32 %v2272_v38, %v2209_v16  ;;  %v2357_v46 = vmul.f32 %v5188_v1, %v2356_v6 }
 0x4a0   : > { %v2716_v14 = vmul.f32 -1.442695, %v2273_v56  ;;  %v2358_v51 = vadd.f32 %v5188_v1, %v2357_v46  ;;  %v2348_v46 = vand.u32 2147483647, %v5195_v62 }
 0x4a1   : > { %v3003_v59 = vpop.eup %3002 }
 0x4a2   : > { %3008 = vpow2.f32 %v2716_v14  ;;  %v2370_v63 = vmul.f32 %v3003_v59, %v2305_v15  ;;  %v3005_v30 = vpop.eup %3004  ;;  %vm2375_vm7 = vweird.f32 %v3003_v59  ;;  %v2362_v55 = vsel %vm2361_vm15, %v5188_v1, %v2358_v51 }
 0x4a3   : > { %v3007_v22 = vpop.eup %3006  ;;  %3010 = vrcp.f32 %v5195_v62  ;;  %vm2376_vm12 = vmor %vm2374_vm11, %vm2375_vm7  ;;  %v5202_v52 = vadd.f32 1.0, %v3005_v30  ;;  %v2366_v15 = vor.u32 1.1754944e-38, %v2365_v24  ;;  %vm2349_vm13 = vcmp.eq.f32.partialorder %v2348_v46, 8.507059e+37 }
 0x4a4   : > { %v2371_v13 = vsub.f32 1.0, %v2370_v63  ;;  %3012 = vpow2.f32 %v2710_v57  ;;  %v5204_v61 = vadd.f32 1.0, %v3007_v22 }
 0x4a5   : > { %v2274_v19 = vpop.f32.mrf.mxu3  ;;  %v2367_v7 = vsel %vm2364_vm0, %v2366_v15, %v2362_v55  ;;  %vm2329_vm0 = vweird.f32 %v5202_v52 }
 0x4a6   : > { %v2275_v37 = vadd.f32 %v2274_v19, %v2210_v9  ;;  %v2372_v54 = vmul.f32 %v3003_v59, %v2371_v13  ;;  %v433_v13 = vld [vmem:[%s5339_s10] sm:$0xff]  ;;  %v2393_v15 = vand.u32 2147483647, %v5204_v61 }
 0x4a8   : > { %v3009_v11 = vpop.eup %3008  ;;  %v2717_v45 = vmul.f32 -1.442695, %v2275_v37  ;;  %v2373_v29 = vadd.f32 %v3003_v59, %v2372_v54 }
 0x4a9   : > { %v2307_v26 = vadd.f32 1.0, %v3009_v11  ;;  %v5208_v23 = vpop.eup %3010  ;;  %v2350_v11 = vand.u32 2147483648, %v5195_v62 }
 0x4aa   : > { %3014 = vpow2.f32 %v2717_v45  ;;  %v2377_v43 = vsel %vm2376_vm12, %v3003_v59, %v2373_v29  ;;  %v3013_v25 = vpop.eup %3012  ;;  %v2340_v31 = vmul.f32 %v5208_v23, %v5195_v62  ;;  %vm2345_vm5 = vweird.f32 %v5208_v23 }
 0x4ab   : > { %3016 = vrcp.f32 %v2307_v26  ;;  %v2382_v42 = vsel %vm2379_vm8, %v2381_v60, %v2377_v43  ;;  %v5218_v27 = vadd.f32 1.0, %v3013_v25  ;;  %v2410_v1 = vand.u32 2147483648, %v2307_v26  ;;  %vm2346_vm7 = vmor %vm2344_vm10, %vm2345_vm5 }
 0x4ac   : > { %2451 = vperm.xlu1 %2857, %v2382_v42   ;;  %3018 = vrcp.f32 %v5202_v52  ;;  %v2341_v38 = vsub.f32 1.0, %v2340_v31  ;;  %v2408_v20 = vand.u32 2147483647, %v2307_v26  ;;  %vm2404_vm3 = vweird.f32 %v2307_v26 }
 0x4ad   : > { %3020 = vrcp.f32 %v5204_v61  ;;  %v2411_v9 = vor.u32 1.1754944e-38, %v2410_v1  ;;  %v2351_v32 = vor.u32 1.1754944e-38, %v2350_v11 }
 0x4ae   : > { %v2342_v59 = vmul.f32 %v5208_v23, %v2341_v38  ;;  %vm2409_vm9 = vcmp.eq.f32.partialorder %v2408_v20, 8.507059e+37 }
 0x4b0   : > { %v3015_v47 = vpop.eup %3014  ;;  %v2343_v54 = vadd.f32 %v5208_v23, %v2342_v59 }
 0x4b1   : > { %v3017_v12 = vpop.eup %3016  ;;  %v2308_v34 = vadd.f32 1.0, %v3015_v47 }
 0x4b2   : > { %v2400_v16 = vmul.f32 %v3017_v12, %v2307_v26  ;;  %v5220_v40 = vpop.eup %3018  ;;  %vm2405_vm1 = vweird.f32 %v3017_v12  ;;  %v2347_v42 = vsel %vm2346_vm7, %v5208_v23, %v2343_v54 }
 0x4b3   : > { %3022 = vrcp.f32 %v2308_v34  ;;  %v5222_v28 = vpop.eup %3020  ;;  %v2325_v14 = vmul.f32 %v5220_v40, %v5202_v52  ;;  %vm2406_vm4 = vmor %vm2404_vm3, %vm2405_vm1  ;;  %v2425_v22 = vand.u32 2147483648, %v2308_v34  ;;  %v2423_v29 = vand.u32 2147483647, %v2308_v34 }
 0x4b4   : > { %2446 = vperm.xlu1 %2857, %v2367_v7   ;;  %v2401_v33 = vsub.f32 1.0, %v2400_v16  ;;  %3024 = vrcp.f32 %v5218_v27  ;;  %v2385_v10 = vmul.f32 %v5222_v28, %v5204_v61  ;;  %vm2419_vm11 = vweird.f32 %v2308_v34 }
 0x4b5   : > { %v2326_v44 = vsub.f32 1.0, %v2325_v14  ;;  %v2426_v24 = vor.u32 1.1754944e-38, %v2425_v22  ;;  %vm2424_vm8 = vcmp.eq.f32.partialorder %v2423_v29, 8.507059e+37  ;;  %v2352_v62 = vsel %vm2349_vm13, %v2351_v32, %v2347_v42 }
 0x4b6   : > { %v2402_v56 = vmul.f32 %v3017_v12, %v2401_v33  ;;  %v2386_v4 = vsub.f32 1.0, %v2385_v10  ;;  %vm2330_vm14 = vweird.f32 %v5220_v40  ;;  %vm2390_vm15 = vweird.f32 %v5222_v28  ;;  %v434_v10 = vld [vmem:[%s5339_s10 + $0x8] sm:$0xff] }
 0x4b7   : > { %v2327_v26 = vmul.f32 %v5220_v40, %v2326_v44  ;;  %vm2389_vm1 = vweird.f32 %v5204_v61  ;;  %vm2331_vm3 = vmor %vm2329_vm0, %vm2330_vm14  ;;  %v2333_v16 = vand.u32 2147483647, %v5202_v52 }
 0x4b8   : > { %v2403_v3 = vadd.f32 %v3017_v12, %v2402_v56  ;;  %v2387_v51 = vmul.f32 %v5222_v28, %v2386_v4 }
 0x4b9   : > { %v3023_v63 = vpop.eup %3022  ;;  %v2328_v23 = vadd.f32 %v5220_v40, %v2327_v26  ;;  %vm2334_vm5 = vcmp.eq.f32.partialorder %v2333_v16, 8.507059e+37  ;;  %v3036_v16 = vld [vmem:[%s3244_s29 + $0x18] sm:$0xff] }
 0x4ba   : > { %v2407_v6 = vsel %vm2406_vm4, %v3017_v12, %v2403_v3  ;;  %v2415_v57 = vmul.f32 %v3023_v63, %v2308_v34  ;;  %v5233_v30 = vpop.eup %3024  ;;  %vm2420_vm6 = vweird.f32 %v3023_v63  ;;  %v2388_v55 = vadd.f32 %v5222_v28, %v2387_v51  ;;  %vm2391_vm4 = vmor %vm2389_vm1, %vm2390_vm15 }
 0x4bb   : > { %v2412_v19 = vsel %vm2409_vm9, %v2411_v9, %v2407_v6  ;;  %v2310_v60 = vmul.f32 %v5233_v30, %v5218_v27  ;;  %vm2421_vm12 = vmor %vm2419_vm11, %vm2420_vm6  ;;  %v2395_v12 = vand.u32 2147483648, %v5204_v61  ;;  %v2335_v34 = vand.u32 2147483648, %v5202_v52 }
 0x4bc   : > { %2461 = vperm.xlu2 %2858, %v2412_v19   ;;  %2495 = vperm.xlu1 %2857, %v433_v13   ;;  %v2416_v37 = vsub.f32 1.0, %v2415_v57  ;;  %v2392_v7 = vsel %vm2391_vm4, %v5222_v28, %v2388_v55  ;;  %v2332_v33 = vsel %vm2331_vm3, %v5220_v40, %v2328_v23  ;;  %vm2394_vm9 = vcmp.eq.f32.partialorder %v2393_v15, 8.507059e+37 }
 0x4bd   : > { %v2311_v31 = vsub.f32 1.0, %v2310_v60  ;;  %v2396_v1 = vor.u32 1.1754944e-38, %v2395_v12  ;;  %v2336_v56 = vor.u32 1.1754944e-38, %v2335_v34  ;;  %vm2315_vm10 = vweird.f32 %v5233_v30 }
 0x4be   : > { %v2417_v45 = vmul.f32 %v3023_v63, %v2416_v37  ;;  %v2320_v52 = vand.u32 2147483648, %v5218_v27  ;;  %vm2314_vm6 = vweird.f32 %v5218_v27  ;;  %v2318_v40 = vand.u32 2147483647, %v5218_v27 }
 0x4bf   : > { %v2312_v38 = vmul.f32 %v5233_v30, %v2311_v31  ;;  %v2397_v20 = vsel %vm2394_vm9, %v2396_v1, %v2392_v7  ;;  %v2337_v14 = vsel %vm2334_vm5, %v2336_v56, %v2332_v33  ;;  %vm2316_vm7 = vmor %vm2314_vm6, %vm2315_vm10  ;;  %v3035_v31 = vld [vmem:[%s3244_s29 + $0x8] sm:$0xff] }
 0x4c0   : > { %v2418_v43 = vadd.f32 %v3023_v63, %v2417_v45  ;;  %v2321_v3 = vor.u32 1.1754944e-38, %v2320_v52  ;;  %vm2319_vm11 = vcmp.eq.f32.partialorder %v2318_v40, 8.507059e+37 }
 0x4c1   : > { %v2313_v61 = vadd.f32 %v5233_v30, %v2312_v38 }
 0x4c2   : > { %v2422_v25 = vsel %vm2421_vm12, %v3023_v63, %v2418_v43 }
 0x4c3   : > { %v2427_v47 = vsel %vm2424_vm8, %v2426_v24, %v2422_v25  ;;  %v2317_v28 = vsel %vm2316_vm7, %v5233_v30, %v2313_v61  ;;  %v3033_v24 = vld [vmem:[%s3244_s29] sm:$0xff] }
 0x4c4   : > { %2466 = vperm.xlu0 %2859, %v2427_v47   ;;  %2441 = vperm.xlu2 %2858, %v2352_v62   ;;  %v2322_v59 = vsel %vm2319_vm11, %v2321_v3, %v2317_v28  ;;  %v3034_v47 = vld [vmem:[%s3244_s29 + $0x10] sm:$0xff] }
 0x4cc   : > { %2456 = vperm.xlu0 %2859, %v2397_v20   ;;  %2436 = vperm.xlu2 %2858, %v2337_v14  }
 0x4d4   : > { %2431 = vperm.xlu0 %2859, %v2322_v59  }
 0x4dc   : > { %2500 = vperm.xlu0 %2859, %v434_v10  }
 0x516   : > { %v2462_v63 = vpop.permute.xlu2 %2461 }
 0x517   : > { %v2481_v6 = vmul.f32 %v2462_v63, %v4759_v2 }
 0x51e   : > { %v2452_v9 = vpop.permute.xlu1 %2451  ;;  %v2442_v19 = vpop.permute.xlu2 %2441 }
 0x51f   : > { %v2477_v37 = vmul.f32 %v2452_v9, %v5100_v41  ;;  %v2473_v11 = vmul.f32 %v2442_v19, %v5087_v17  ;;  %v2482_v41 = vmul.f32 %v2462_v63, %v4764_v50  ;;  %v2734_v17 = vld [vmem:[%s5338_s9] sm:$0xff]  ;;  %v2474_v50 = vmul.f32 %v2442_v19, %v5094_v8 }
 0x526   : > { %v2447_v44 = vpop.permute.xlu1 %2446  ;;  %v2437_v45 = vpop.permute.xlu2 %2436 }
 0x527   : > { %v2475_v4 = vmul.f32 %v2447_v44, %v5016_v35  ;;  %v2471_v46 = vmul.f32 %v2437_v45, %v5130_v48  ;;  %v2476_v48 = vmul.f32 %v2447_v44, %v5019_v0  ;;  %v2472_v42 = vmul.f32 %v2437_v45, %v5139_v36 }
 0x529   : > { %v2487_v29 = vpack.c.bf16 %v2475_v4, %v2473_v11 }
 0x52e   : > { %v2496_v0 = vpop.permute.xlu1 %2495 }
 0x536   : > { %v2467_v13 = vpop.permute.xlu0 %2466 }
 0x537   : > { %v2483_v57 = vmul.f32 %v2467_v13, %v4835_v21  ;;  %v2484_v2 = vmul.f32 %v2467_v13, %v4847_v18  ;;  %v2478_v18 = vmul.f32 %v2452_v9, %v5103_v53 }
 0x539   : > { %v2491_v27 = vpack.c.bf16 %v2483_v57, %v2481_v6 }
 0x53b   : > { %2515 = vmatpush.bf16.msrb.mxu2 %v2491_v27 }
 0x53e   : > { %v2457_v30 = vpop.permute.xlu0 %2456 }
 0x53f   : > { %v2479_v54 = vmul.f32 %v2457_v30, %v4923_v58  ;;  %v2492_v58 = vpack.c.bf16 %v2484_v2, %v2482_v41  ;;  %v2480_v35 = vmul.f32 %v2457_v30, %v4932_v39  ;;  %v2488_v39 = vpack.c.bf16 %v2476_v48, %v2474_v50 }
 0x541   : > { %v2489_v22 = vpack.c.bf16 %v2479_v54, %v2477_v37 }
 0x543   : > { %2516 = vmatpush.bf16.msrb.mxu2 %v2489_v22 }
 0x546   : > { %v2432_v21 = vpop.permute.xlu0 %2431 }
 0x547   : > { %v2469_v26 = vmul.f32 %v2432_v21, %v5136_v49  ;;  %2517 = vmatpush.bf16.msrb.mxu2 %v2487_v29  ;;  %v2490_v49 = vpack.c.bf16 %v2480_v35, %v2478_v18  ;;  %v2470_v43 = vmul.f32 %v2432_v21, %v5142_v5 }
 0x549   : > { %v2485_v60 = vpack.c.bf16 %v2471_v46, %v2469_v26  ;;  %v2486_v51 = vpack.c.bf16 %v2472_v42, %v2470_v43 }
 0x54b   : > { %2518 = vmatpush.bf16.msrb.mxu2 %v2485_v60 }
 0x54e   : > { %2722 = vmatmul.msk.bf16.vlgmr.msrb.gmra.mxu2 %vm2157_vm2, %v2734_v17  ;;  %v2501_v5 = vpop.permute.xlu0 %2500 }
 0x54f   : > { %2529 = vmatpush.bf16.msra.mxu2 %v2492_v58 }
 0x553   : > { %2530 = vmatpush.bf16.msra.mxu2 %v2490_v49 }
 0x557   : > { %2531 = vmatpush.bf16.msra.mxu2 %v2488_v39 }
 0x55b   : > { %2532 = vmatpush.bf16.msra.mxu2 %v2486_v51 }
 0x55e   : > { %2723 = vmatmul.msk.bf16.vlgmr.msra.gmra.mxu2 %vm2157_vm2, %v2734_v17 }
 0x5d1   : > { %v2520_v53 = vpop.f32.mrf.mxu2 }
 0x5d2   : > { %v2521_v8 = vadd.f32 %v2520_v53, %v2496_v0 }
 0x5d4   : > { %v2539_v32 = vadd.f32 %v3033_v24, %v2521_v8 }
 0x5d6   : > { %2543 = vst [vmem:[%s379_s14] sm:$0xff] %v2539_v32 }
 0x5d9   : > { %v2522_v36 = vpop.f32.mrf.mxu2 }
 0x5da   : > { %v2523_v25 = vadd.f32 %v2522_v36, %v2501_v5 }
 0x5dc   : > { %v2541_v62 = vadd.f32 %v3034_v47, %v2523_v25 }
 0x5de   : > { %2545 = vst [vmem:[%s379_s14 + $0x10] sm:$0xff] %v2541_v62 }
 0x5e1   : > { %v2534_v55 = vpop.f32.mrf.mxu2 }
 0x5e2   : > { %v2535_v23 = vadd.f32 %v2534_v55, %v2496_v0 }
 0x5e4   : > { %v2540_v12 = vadd.f32 %v3035_v31, %v2535_v23 }
 0x5e6   : > { %2544 = vst [vmem:[%s379_s14 + $0x8] sm:$0xff] %v2540_v12 }
 0x5e9   : > { %v2536_v34 = vpop.f32.mrf.mxu2 }
 0x5ea   : > { %v2537_v15 = vadd.f32 %v2536_v34, %v2501_v5 }
 0x5ec   : > { %v2542_v7 = vadd.f32 %v3036_v16, %v2537_v15 }
 0x5ee   : > { %2546 = vst [vmem:[%s379_s14 + $0x18] sm:$0xff] %v2542_v7 }
 0x5ef   : > { %3064 = shalt.err (!%p3061_p3)
}
 0x5f0   : > { %s3115_s29 = smov 256   ;;  %s5628_s12 = smov 16  }
 0x5f1   : > { %2740 = dma.vmem_to_hbm [thread:$0]  (%p3214_p5), %s2561_s30, 512, %s2563_s13, %s2548_s16, %s3115_s29, %s3115_s29, %s5628_s12  }
 0x5f2 PF: > { %p2746_p4 = scmp.ge.s32.totalorder %s3099_s20, 2  ;;  %s2577_s14 = sand.u32 1, %s3087_s17  }
 0x5f3   : > { %s2578_s1 = scalar_lea.sflag [#allocation3], %s2577_s14 }
 0x5f4   : > { %p2743_p7 = pnand %p2746_p4, %p3218_p6 }
 0x5f6   : > { %p2744_p8 = pneg %p2743_p7 }
 0x5f8   : > { %3082 = dma.done.wait (%p2744_p8), %s2578_s1, 512  }
 0x5f9   : > { %3084 = vsyncadd (%p2744_p8), %s2578_s1, 4294966784  ;;  %p21_p9 = scmp.ge.s32.totalorder %s3201_s23, 4   ;;  %s5629_s17 = smov %s3091_s18 }
 0x5fa   : > { %s5630_s18 = smov %s3095_s19  ;;  %s5631_s19 = smov %s3212_s26 }
 0x5fb   : > { %s5632_s20 = smov %s3201_s23  ;;  %23 = sbr.rel (!%p21_p9) target bundleno = 6 (0x6), region = 99 }
 0x600   :  { %2584 = vsyncpa [#allocation3], 1 }
 0x601   :  { %2586 = vsyncpa [#allocation3 + $0x1], 1 }

</bundles_post_ra>
